<compile_context>
chip_gen: v7x
topology: tpu7x:2x2x1
jax: 0.10.0
libtpu: 0.0.40
codegen_flags: <defaults>
</compile_context>

<pallas_src>
import numpy as np
import jax
import jax.numpy as jnp
from jax import lax
from jax.experimental import pallas as pl
from jax.experimental.pallas import tpu as pltpu

# ---- problem sizes (input 224x224 is forced by fc in_features = 64*111*111) --------------
H_IN = 224
C_IN = 3
C_OUT = 64
H_POOL = 111                      # (224 - 3 + 1) // 2
NUM_CLASSES = 10
N_POS = H_POOL * H_POOL           # 12321 pooled positions per image
K_PACK = 48                       # 4 (p,q) window taps * 12 packed input channels
N_TAP = 4 * C_OUT                 # 256 = 4 (dh,dw) pooling taps * 64 output channels

# ---- conv kernel tiling -------------------------------------------------------------------
M_BAND = 8 * H_POOL               # 888 pooled positions (8 pooled rows) per grid step
NUM_BANDS = 14                    # ceil(12321 / 888)
M_PAD = M_BAND * NUM_BANDS        # 12432 (111 zero-padded rows; their FC weights are zero)

# ---- fc tiling ----------------------------------------------------------------------------
K_FC = M_PAD * C_OUT              # 795648 = lane-dense flatten of the conv-kernel output
K_SPLITS = 2                      # parallel K halves (uses both TCs on v7x; harmless elsewhere)
K_TILE = 56832                    # 444 * 128; 14 tiles cover K_FC exactly
K_STEPS = K_FC // K_TILE          # 14
K_HALF = K_STEPS // K_SPLITS      # 7
assert K_TILE % 128 == 0
assert K_SPLITS * K_HALF * K_TILE == K_FC


# ===========================================================================================
# Kernel 1: fused conv(3x3, valid) + bias + ReLU + maxpool(2x2, stride 2)
# ===========================================================================================
def conv_relu_pool_kernel(x_ref, w_ref, b_ref, o_ref):
    # x_ref: (1, 888, 48)   w_ref: (48, 256)   b_ref: (1, 256)   o_ref: (1, 888, 64)
    act = jnp.dot(x_ref[0], w_ref[...], preferred_element_type=jnp.float32)   # (888, 256)
    act = jnp.maximum(act + b_ref[...], 0.0)                                  # bias + ReLU
    # 2x2 max-pool = max over the 4 (dh,dw) tap groups packed along the lane axis
    pooled = jnp.maximum(
        jnp.maximum(act[:, 0:C_OUT], act[:, C_OUT:2 * C_OUT]),
        jnp.maximum(act[:, 2 * C_OUT:3 * C_OUT], act[:, 3 * C_OUT:4 * C_OUT]))
    o_ref[0] = pooled


def conv_relu_pool(x48, wp, b256):
    n = x48.shape[0]
    return pl.pallas_call(
        conv_relu_pool_kernel,
        out_shape=jax.ShapeDtypeStruct((n, M_PAD, C_OUT), jnp.float32),
        grid_spec=pltpu.PrefetchScalarGridSpec(
            num_scalar_prefetch=0,
            grid=(n, NUM_BANDS),
            in_specs=[
                pl.BlockSpec((1, M_BAND, K_PACK), lambda b, t: (b, t, 0)),
                pl.BlockSpec((K_PACK, N_TAP), lambda b, t: (0, 0)),
                pl.BlockSpec((1, N_TAP), lambda b, t: (0, 0)),
            ],
            out_specs=pl.BlockSpec((1, M_BAND, C_OUT), lambda b, t: (b, t, 0)),
        ),
        compiler_params=pltpu.CompilerParams(
            dimension_semantics=("parallel", "parallel"),
            vmem_limit_bytes=32 * 1024 * 1024,
        ),
    )(x48, wp, b256)


# ===========================================================================================
# Kernel 2: Linear — lane-dense (10, K) weight, K-tiled reduction, 2-way parallel K split
# ===========================================================================================
def fc_kernel(x_ref, w_ref, o_ref, acc_ref):
    # x_ref: (N, K_TILE)  w_ref: (10, K_TILE)  o_ref: (1, N, 10)  acc_ref: (N, 10)
    @pl.when(pl.program_id(1) == 0)
    def _():
        acc_ref[...] = jnp.zeros_like(acc_ref)

    acc_ref[...] += lax.dot_general(
        x_ref[...], w_ref[...],
        dimension_numbers=(((1,), (1,)), ((), ())),     # contract the lane (K) axis of both
        preferred_element_type=jnp.float32)

    @pl.when(pl.program_id(1) == pl.num_programs(1) - 1)
    def _():
        o_ref[0] = acc_ref[...]


def fc(act, w_fc):
    n = act.shape[0]
    return pl.pallas_call(
        fc_kernel,
        out_shape=jax.ShapeDtypeStruct((K_SPLITS, n, NUM_CLASSES), jnp.float32),
        grid_spec=pltpu.PrefetchScalarGridSpec(
            num_scalar_prefetch=0,
            grid=(K_SPLITS, K_HALF),
            in_specs=[
                pl.BlockSpec((n, K_TILE), lambda p, s: (0, p * K_HALF + s)),
                pl.BlockSpec((NUM_CLASSES, K_TILE), lambda p, s: (0, p * K_HALF + s)),
            ],
            out_specs=pl.BlockSpec((1, n, NUM_CLASSES), lambda p, s: (p, 0, 0)),
            scratch_shapes=[pltpu.VMEM((n, NUM_CLASSES), jnp.float32)],
        ),
        compiler_params=pltpu.CompilerParams(
            dimension_semantics=("parallel", "arbitrary"),
            vmem_limit_bytes=48 * 1024 * 1024,
        ),
    )(act, w_fc)


# ===========================================================================================
# Host-side packing (pure jnp on values; numpy only for static index constants → jit-safe)
# ===========================================================================================
def pack_conv_weight(conv_w):
    """(64,3,3,3) PyTorch (co,ci,kh,kw) -> (48, 256) fused conv/pool-tap weight.

    row  k48 = p*24 + q*12 + s*6 + r*3 + ci
    col  n   = (dh*2 + dw)*64 + co
    val  W[co, ci, kh, kw] with kh = 2p+s-dh, kw = 2q+r-dw when both in [0,3), else 0.
    """
    kh_i = np.zeros((K_PACK, 4), np.int32)
    kw_i = np.zeros((K_PACK, 4), np.int32)
    ci_i = np.zeros((K_PACK, 4), np.int32)
    ok = np.zeros((K_PACK, 4), bool)
    for p in range(2):
        for q in range(2):
            for s in range(2):
                for r in range(2):
                    for ci in range(3):
                        k48 = p * 24 + q * 12 + s * 6 + r * 3 + ci
                        for dh in range(2):
                            for dw in range(2):
                                tap = dh * 2 + dw
                                kh = 2 * p + s - dh
                                kw = 2 * q + r - dw
                                valid = (0 <= kh <= 2) and (0 <= kw <= 2)
                                ok[k48, tap] = valid
                                kh_i[k48, tap] = kh if valid else 0
                                kw_i[k48, tap] = kw if valid else 0
                                ci_i[k48, tap] = ci
    w_khkwci_co = jnp.transpose(conv_w, (2, 3, 1, 0))            # (3, 3, 3, 64)
    gathered = w_khkwci_co[kh_i, kw_i, ci_i]                     # (48, 4, 64)
    wp = jnp.where(jnp.asarray(ok)[:, :, None], gathered, 0.0)
    return wp.reshape(K_PACK, N_TAP).astype(jnp.float32)


def pack_input(x_nchw):
    """(N,3,224,224) -> (N, 12432, 48): xr[.., s*6+r*3+ci] 2x2 pack, then (p,q) im2col."""
    n = x_nchw.shape[0]
    x = jnp.transpose(x_nchw, (0, 2, 3, 1))                      # (N,224,224,3)
    xr = (x.reshape(n, 112, 2, 112, 2, C_IN)
           .transpose(0, 1, 3, 2, 4, 5)
           .reshape(n, 112, 112, 4 * C_IN))                      # (N,112,112,12)
    parts = [xr[:, p:p + H_POOL, q:q + H_POOL, :] for p in (0, 1) for q in (0, 1)]
    x48 = jnp.concatenate(parts, axis=-1)                        # (N,111,111,48)
    x48 = x48.reshape(n, N_POS, K_PACK)
    return jnp.pad(x48, ((0, 0), (0, M_PAD - N_POS), (0, 0)))


def pack_fc_weight(fc_w):
    """(10, 64*111*111) in PyTorch (c,h,w)-flatten order -> (10, K_FC) in kernel (hw,c) order."""
    w = fc_w.reshape(NUM_CLASSES, C_OUT, N_POS)
    w = jnp.transpose(w, (0, 2, 1))                              # (10, 12321, 64)
    w = jnp.pad(w, ((0, 0), (0, M_PAD - N_POS), (0, 0)))         # zero rows for padded positions
    return w.reshape(NUM_CLASSES, K_FC)


@jax.jit
def example_model_forward(x_nchw, conv_w, conv_b, fc_w, fc_b):
    n = x_nchw.shape[0]
    x48 = pack_input(x_nchw)                                     # (N, 12432, 48)
    wp = pack_conv_weight(conv_w)                                # (48, 256)
    b256 = jnp.tile(conv_b, 4).reshape(1, N_TAP)                 # bias per (tap, co) column
    pooled = conv_relu_pool(x48, wp, b256)                       # (N, 12432, 64)
    act = pooled.reshape(n, K_FC)                                # free reshape: FC flatten order
    w_fc = pack_fc_weight(fc_w)                                  # (10, K_FC), same order
    parts = fc(act, w_fc)                                        # (2, N, 10) K-split partials
    return parts[0] + parts[1] + fc_b[None, :]


# ---- pure-JAX reference (matches the PyTorch module) --------------------------------------
@jax.jit
def reference_forward(x, conv_w, conv_b, fc_w, fc_b):
    conv = lax.conv_general_dilated(
        x, conv_w, window_strides=(1, 1), padding="VALID",
        dimension_numbers=("NCHW", "OIHW", "NCHW"),
        precision=lax.Precision.HIGHEST)
    a = jnp.maximum(conv + conv_b[None, :, None, None], 0.0)
    pooled = lax.reduce_window(a, -jnp.inf, lax.max,
                               window_dimensions=(1, 1, 2, 2),
                               window_strides=(1, 1, 2, 2), padding="VALID")
    flat = pooled.reshape(x.shape[0], -1)
    return jnp.matmul(flat, fc_w.T, precision=lax.Precision.HIGHEST) + fc_b[None, :]


# ===========================================================================================
if __name__ == "__main__":
    key = jax.random.PRNGKey(0)
    k_x, k_cw, k_cb, k_fw, k_fb = jax.random.split(key, 5)

    # batch=2; spatial 224 is forced by fc in_features = 64*111*111
    x = jax.random.normal(k_x, (2, C_IN, H_IN, H_IN), jnp.float32)
    conv_w = jax.random.normal(k_cw, (C_OUT, C_IN, 3, 3), jnp.float32) * 0.1
    conv_b = jax.random.normal(k_cb, (C_OUT,), jnp.float32) * 0.1
    fc_w = jax.random.normal(k_fw, (NUM_CLASSES, C_OUT * N_POS), jnp.float32) * 1e-3
    fc_b = jax.random.normal(k_fb, (NUM_CLASSES,), jnp.float32) * 0.1

    out = example_model_forward(x, conv_w, conv_b, fc_w, fc_b)
    out = jax.block_until_ready(out)

    assert out.shape == (2, NUM_CLASSES), out.shape
    assert bool(jnp.all(jnp.isfinite(out)))

    ref = jax.block_until_ready(reference_forward(x, conv_w, conv_b, fc_w, fc_b))
    max_err = float(jnp.max(jnp.abs(out - ref)))
    assert max_err < 5e-2, f"max abs error vs reference: {max_err}"

    print("KERNEL_OK")
</pallas_src>

<mosaic_0001>
module attributes {stable_mosaic.version = 11 : i64} {
  func.func @conv_relu_pool_kernel(%arg0: i32, %arg1: i32, %arg2: memref<1x888x48xf32, #tpu.memory_space<vmem>>, %arg3: memref<48x256xf32, #tpu.memory_space<vmem>>, %arg4: memref<1x256xf32, #tpu.memory_space<vmem>>, %arg5: memref<1x888x64xf32, #tpu.memory_space<vmem>>) attributes {dimension_semantics = [#tpu.dimension_semantics<parallel>, #tpu.dimension_semantics<parallel>], iteration_bounds = array<i64: 2, 14>, scalar_prefetch = 0 : i64, scratch_operands = 0 : i64, tpu.core_type = #tpu.core_type<tc>, window_params = [{transform_indices = @transform_0, window_bounds = array<i64: 1, 888, 48>}, {pipeline_mode = #tpu.pipeline_mode<synchronous>, transform_indices = @transform_1, window_bounds = array<i64: 48, 256>}, {pipeline_mode = #tpu.pipeline_mode<synchronous>, transform_indices = @transform_2, window_bounds = array<i64: 1, 256>}, {transform_indices = @transform_3, window_bounds = array<i64: 1, 888, 64>}]} {
    %c0 = arith.constant 0 : index
    %c0_0 = arith.constant 0 : index
    %c0_1 = arith.constant 0 : index
    %0 = vector.load %arg2[%c0, %c0_0, %c0_1] : memref<1x888x48xf32, #tpu.memory_space<vmem>>, vector<1x888x48xf32>
    %1 = vector.shape_cast %0 : vector<1x888x48xf32> to vector<888x48xf32>
    %c0_2 = arith.constant 0 : index
    %c0_3 = arith.constant 0 : index
    %2 = vector.load %arg3[%c0_2, %c0_3] : memref<48x256xf32, #tpu.memory_space<vmem>>, vector<48x256xf32>
    %cst = arith.constant dense<0.000000e+00> : vector<888x256xf32>
    %3 = tpu.matmul %1, %2, %cst {dimension_numbers = #tpu.dot_dimension_numbers<[1], [0], [0], [1], [0, 0, 1, 1], [], []>} : vector<888x48xf32>, vector<48x256xf32>, vector<888x256xf32> -> vector<888x256xf32>
    %c0_4 = arith.constant 0 : index
    %c0_5 = arith.constant 0 : index
    %4 = vector.load %arg4[%c0_4, %c0_5] : memref<1x256xf32, #tpu.memory_space<vmem>>, vector<1x256xf32>
    %5 = vector.broadcast %4 : vector<1x256xf32> to vector<888x256xf32>
    %6 = arith.addf %3, %5 : vector<888x256xf32>
    %cst_6 = arith.constant 0.000000e+00 : f32
    %7 = vector.broadcast %cst_6 : f32 to vector<888x256xf32>
    %8 = arith.maximumf %6, %7 : vector<888x256xf32>
    %9 = vector.extract_strided_slice %8 {offsets = [0, 0], sizes = [888, 64], strides = [1, 1]} : vector<888x256xf32> to vector<888x64xf32>
    %10 = vector.extract_strided_slice %8 {offsets = [0, 64], sizes = [888, 64], strides = [1, 1]} : vector<888x256xf32> to vector<888x64xf32>
    %11 = arith.maximumf %9, %10 : vector<888x64xf32>
    %12 = vector.extract_strided_slice %8 {offsets = [0, 128], sizes = [888, 64], strides = [1, 1]} : vector<888x256xf32> to vector<888x64xf32>
    %13 = vector.extract_strided_slice %8 {offsets = [0, 192], sizes = [888, 64], strides = [1, 1]} : vector<888x256xf32> to vector<888x64xf32>
    %14 = arith.maximumf %12, %13 : vector<888x64xf32>
    %15 = arith.maximumf %11, %14 : vector<888x64xf32>
    %c0_7 = arith.constant 0 : index
    %c0_8 = arith.constant 0 : index
    %c0_9 = arith.constant 0 : index
    %16 = vector.load %arg5[%c0_7, %c0_8, %c0_9] : memref<1x888x64xf32, #tpu.memory_space<vmem>>, vector<1x888x64xf32>
    %17 = vector.shape_cast %16 : vector<1x888x64xf32> to vector<888x64xf32>
    %18 = vector.shape_cast %15 : vector<888x64xf32> to vector<1x888x64xf32>
    tpu.vector_store %arg5[%c0_7, %c0_8, %c0_9], %18 {strides = array<i32>} : memref<1x888x64xf32, #tpu.memory_space<vmem>>, vector<1x888x64xf32>,
    return
  }
  func.func @transform_0(%arg0: i32, %arg1: i32) -> (i32, i32, i32) {
    %c0_i32 = arith.constant 0 : i32
    %c0_i32_0 = arith.constant 0 : i32
    return %arg0, %arg1, %c0_i32 : i32, i32, i32
  }
  func.func @transform_1(%arg0: i32, %arg1: i32) -> (i32, i32) {
    %c0_i32 = arith.constant 0 : i32
    %c0_i32_0 = arith.constant 0 : i32
    %c0_i32_1 = arith.constant 0 : i32
    return %c0_i32, %c0_i32_0 : i32, i32
  }
  func.func @transform_2(%arg0: i32, %arg1: i32) -> (i32, i32) {
    %c0_i32 = arith.constant 0 : i32
    %c0_i32_0 = arith.constant 0 : i32
    %c0_i32_1 = arith.constant 0 : i32
    return %c0_i32, %c0_i32_0 : i32, i32
  }
  func.func @transform_3(%arg0: i32, %arg1: i32) -> (i32, i32, i32) {
    %c0_i32 = arith.constant 0 : i32
    %c0_i32_0 = arith.constant 0 : i32
    return %arg0, %arg1, %c0_i32 : i32, i32, i32
  }
}

module attributes {stable_mosaic.version = 11 : i64} {
  func.func @fc_kernel(%arg0: i32, %arg1: i32, %arg2: memref<2x56832xf32, #tpu.memory_space<vmem>>, %arg3: memref<10x56832xf32, #tpu.memory_space<vmem>>, %arg4: memref<1x2x10xf32, #tpu.memory_space<vmem>>, %arg5: memref<2x10xf32, #tpu.memory_space<vmem>>) attributes {dimension_semantics = [#tpu.dimension_semantics<parallel>, #tpu.dimension_semantics<arbitrary>], iteration_bounds = array<i64: 2, 7>, scalar_prefetch = 0 : i64, scratch_operands = 1 : i64, tpu.core_type = #tpu.core_type<tc>, window_params = [{transform_indices = @transform_0, window_bounds = array<i64: 2, 56832>}, {transform_indices = @transform_1, window_bounds = array<i64: 10, 56832>}, {transform_indices = @transform_2, window_bounds = array<i64: 1, 2, 10>}]} {
    %c0_i32 = arith.constant 0 : i32
    %0 = arith.cmpi eq, %arg1, %c0_i32 : i32
    %1 = arith.extui %0 : i1 to i32
    %c0_i32_0 = arith.constant 0 : i32
    %2 = arith.cmpi ne, %1, %c0_i32_0 : i32
    scf.if %2 {
      %cst_9 = arith.constant 0.000000e+00 : f32
      %12 = vector.broadcast %cst_9 : f32 to vector<2x10xf32>
      %c0_10 = arith.constant 0 : index
      %c0_11 = arith.constant 0 : index
      %13 = vector.load %arg5[%c0_10, %c0_11] : memref<2x10xf32, #tpu.memory_space<vmem>>, vector<2x10xf32>
      tpu.vector_store %arg5[%c0_10, %c0_11], %12 {strides = array<i32>} : memref<2x10xf32, #tpu.memory_space<vmem>>, vector<2x10xf32>,
    } else {
    }
    %c0 = arith.constant 0 : index
    %c0_1 = arith.constant 0 : index
    %3 = vector.load %arg5[%c0, %c0_1] : memref<2x10xf32, #tpu.memory_space<vmem>>, vector<2x10xf32>
    %c0_2 = arith.constant 0 : index
    %c0_3 = arith.constant 0 : index
    %4 = vector.load %arg2[%c0_2, %c0_3] : memref<2x56832xf32, #tpu.memory_space<vmem>>, vector<2x56832xf32>
    %c0_4 = arith.constant 0 : index
    %c0_5 = arith.constant 0 : index
    %5 = vector.load %arg3[%c0_4, %c0_5] : memref<10x56832xf32, #tpu.memory_space<vmem>>, vector<10x56832xf32>
    %cst = arith.constant dense<0.000000e+00> : vector<2x10xf32>
    %6 = tpu.matmul %4, %5, %cst {dimension_numbers = #tpu.dot_dimension_numbers<[1], [1], [0], [0], [0, 0, 1, 0], [], []>} : vector<2x56832xf32>, vector<10x56832xf32>, vector<2x10xf32> -> vector<2x10xf32>
    %7 = arith.addf %3, %6 : vector<2x10xf32>
    %c0_6 = arith.constant 0 : index
    %c0_7 = arith.constant 0 : index
    %8 = vector.load %arg5[%c0_6, %c0_7] : memref<2x10xf32, #tpu.memory_space<vmem>>, vector<2x10xf32>
    tpu.vector_store %arg5[%c0_6, %c0_7], %7 {strides = array<i32>} : memref<2x10xf32, #tpu.memory_space<vmem>>, vector<2x10xf32>,
    %c6_i32 = arith.constant 6 : i32
    %9 = arith.cmpi eq, %arg1, %c6_i32 : i32
    %10 = arith.extui %9 : i1 to i32
    %c0_i32_8 = arith.constant 0 : i32
    %11 = arith.cmpi ne, %10, %c0_i32_8 : i32
    scf.if %11 {
      %c0_9 = arith.constant 0 : index
      %c0_10 = arith.constant 0 : index
      %12 = vector.load %arg5[%c0_9, %c0_10] : memref<2x10xf32, #tpu.memory_space<vmem>>, vector<2x10xf32>
      %c0_11 = arith.constant 0 : index
      %c0_12 = arith.constant 0 : index
      %c0_13 = arith.constant 0 : index
      %13 = vector.load %arg4[%c0_11, %c0_12, %c0_13] : memref<1x2x10xf32, #tpu.memory_space<vmem>>, vector<1x2x10xf32>
      %14 = vector.shape_cast %13 : vector<1x2x10xf32> to vector<2x10xf32>
      %15 = vector.shape_cast %12 : vector<2x10xf32> to vector<1x2x10xf32>
      tpu.vector_store %arg4[%c0_11, %c0_12, %c0_13], %15 {strides = array<i32>} : memref<1x2x10xf32, #tpu.memory_space<vmem>>, vector<1x2x10xf32>,
    } else {
    }
    return
  }
  func.func @transform_0(%arg0: i32, %arg1: i32) -> (i32, i32) {
    %c7_i32 = arith.constant 7 : i32
    %0 = arith.muli %arg0, %c7_i32 : i32
    %1 = arith.addi %0, %arg1 : i32
    %c0_i32 = arith.constant 0 : i32
    %c0_i32_0 = arith.constant 0 : i32
    return %c0_i32, %1 : i32, i32
  }
  func.func @transform_1(%arg0: i32, %arg1: i32) -> (i32, i32) {
    %c7_i32 = arith.constant 7 : i32
    %0 = arith.muli %arg0, %c7_i32 : i32
    %1 = arith.addi %0, %arg1 : i32
    %c0_i32 = arith.constant 0 : i32
    %c0_i32_0 = arith.constant 0 : i32
    return %c0_i32, %1 : i32, i32
  }
  func.func @transform_2(%arg0: i32, %arg1: i32) -> (i32, i32, i32) {
    %c0_i32 = arith.constant 0 : i32
    %c0_i32_0 = arith.constant 0 : i32
    %c0_i32_1 = arith.constant 0 : i32
    return %arg0, %c0_i32, %c0_i32_0 : i32, i32, i32
  }
}

</mosaic_0001>

<bundles_post_ra>
// kernel: tile.8
= control target key start
LH: loop header
LB: loop body
LE: loop exit
PB: predicated region body
PF: predicated region fallthrough
CT: control target
= control target key end

     0   :  { %2 = vsyncpa [#allocation1], 0  ;;  %s44_s6 = smov [#allocation0]   ;;  %s70_s0 = inlined_call_operand.hbm [shape: f32[64], index: 0, kind: input, shape index: {}]   ;;  %s71_s1 = inlined_call_operand.vmem [shape: f32[4,64], index: 1, kind: output, shape index: {}]  }
   0x1   :  { %s9_s7 = sshll.u32 %s44_s6, 4  ;;  %s20_s10 = scalar_lea.hbm %s70_s0, 16  ;;  %s10_s7 = int_to_ptr.vmem [resolvable:$true] %s9_s7 }
   0x2   :  { %p21_p0 = scmp.ne.s32.totalorder %s70_s0, %s20_s10  ;;  %p24_p1 = scmp.lt.u32.totalorder %s20_s10, %s70_s0 }
   0x4   :  { %p26_p2 = pnand %p24_p1, %p21_p0 }
   0x6   :  { %29 = shalt.err (!%p26_p2)
}
   0x7   :  { %s30_s15 = scalar_lea.vmem %s10_s7, 16  ;;  %s34_s16 = scalar_lea.vmem %s10_s7, 32 }
   0x8   :  { %p31_p3 = scmp.ne.s32.totalorder %s10_s7, %s30_s15  ;;  %p35_p4 = scmp.lt.s32.totalorder %s10_s7, %s10_s7 }
   0x9   :  { %p36_p5 = scmp.lt.s32.totalorder %s34_s16, %s30_s15 }
   0xb   :  { %p37_p6 = por %p36_p5, %p35_p4 }
   0xd   :  { %p38_p7 = pnand %p37_p6, %p31_p3 }
   0xf   :  { %41 = shalt.err (!%p38_p7)
}
  0x10   :  { %12 = dma.hbm_to_vmem [thread:$0]  %s70_s0, 16, %s10_s7, [#allocation1]  }
  0x11   :  { %42 = dma.done.wait [#allocation1], 16  }
  0x12   :  { %43 = vsyncadd [#allocation1], 4294967280  ;;  %v16_v0 = vld [vmem:[#allocation0] ss:$0 sm:$0xff] }
  0x13   :  { %17 = vst [vmem:[%s71_s1] sm:$0xf] %v16_v0 }
  0x14   :  { %18 = vsyncpa [#allocation1], 1 }

// kernel: tile.9
= control target key start
LH: loop header
LB: loop body
LE: loop exit
PB: predicated region body
PF: predicated region fallthrough
CT: control target
= control target key end

     0   :  { %s92_s0 = inlined_call_operand.vmem [shape: f32[4,64], index: 0, kind: input, shape index: {}]   ;;  %s93_s1 = inlined_call_operand.hbm [shape: f32[1,256], index: 1, kind: output, shape index: {}]  }
   0x1   :  { %v5_v0 = vld [vmem:[%s92_s0] sm:$0xf] }
   0x2   :  { %6 = vst [vmem:[#allocation3] sm:$0xf] %v5_v0 }
   0x3   :  { %2 = vsyncpa [#allocation1], 0  ;;  %s12_s0 = smov 3  ;;  %s7_s8 = smov 3  ;;  %vm9_vm0 = vcmask 523264   ;;  %vm16_vm1 = vcmask 1048064  }
   0x4   :  { %s65_s9 = smov 64   ;;  %s66_s10 = smov [#allocation0]  }
   0x5   :  { %s33_s11 = sshll.u32 %s66_s10, 4  ;;  %s34_s11 = int_to_ptr.vmem [resolvable:$true] %s33_s11 }
   0x6   :  { %s41_s12 = scalar_lea.vmem %s34_s11, 32  ;;  %p46_p1 = scmp.lt.s32.totalorder %s34_s11, %s34_s11 }
   0x7   :  { %p42_p0 = scmp.ne.s32.totalorder %s34_s11, %s41_s12  ;;  %p47_p2 = scmp.lt.s32.totalorder %s41_s12, %s41_s12 }
   0x9   :  { %v13_v1 = vld [vmem:[#allocation3 + $0x1] ss:$2 sm:%s12_s0]   ;;  %v8_v2 = vld [vmem:[#allocation3] ss:$2 sm:%s7_s8]   ;;  %p48_p3 = por %p47_p2, %p46_p1 }
   0xa   :  { %14 = vrot.lane.b32.xlu0 %v13_v1, %s65_s9  ;;  %10 = vst.msk [vmem:[#allocation2] ss:$8 sm:$0x3] %vm9_vm0, %v8_v2  }
   0xb   :  { %p49_p4 = pnand %p48_p3, %p42_p0 }
  0x7c   :  { %v15_v3 = vpop.permute.xlu0 %14  }
  0x7d   :  { %17 = vst.msk [vmem:[#allocation2] ss:$8 sm:$0x3] %vm16_vm1, %v15_v3  }
  0x84   :  { %v21_v4 = vld [vmem:[#allocation2] sm:$0x1]  ;;  %v25_v5 = vld [vmem:[#allocation2 + $0x8] sm:$0x1] }
  0x85   :  { %23 = vst [vmem:[#allocation0] sm:$0x1] %v21_v4  ;;  %28 = vst [vmem:[#allocation0 + $0x1] sm:$0x1] %v25_v5 }
  0x86   :  { %52 = shalt.err (!%p49_p4)
}
  0x87   :  { %s53_s15 = scalar_lea.hbm %s93_s1, 32 }
  0x88   :  { %p54_p5 = scmp.ne.s32.totalorder %s93_s1, %s53_s15  ;;  %p57_p6 = scmp.lt.u32.totalorder %s53_s15, %s93_s1 }
  0x8a   :  { %p59_p7 = pnand %p57_p6, %p54_p5 }
  0x8c   :  { %62 = shalt.err (!%p59_p7)
}
  0x8d   :  { %36 = dma.vmem_to_hbm [thread:$0]  %s34_s11, 32, %s93_s1, [#allocation1]  }
  0x8e   :  { %63 = dma.done.wait [#allocation1], 32  }
  0x8f   :  { %64 = vsyncadd [#allocation1], 4294967264 }
  0x90   :  { %38 = vsyncpa [#allocation1], 1 }

// kernel: example_model_forward.2
= control target key start
LH: loop header
LB: loop body
LE: loop exit
PB: predicated region body
PF: predicated region fallthrough
CT: control target
= control target key end

     0   :  { %s3298_s12 = smov 0   ;;  %s3300_s13 = smov 0   ;;  %s6566_s0 = inlined_call_operand.vmem [shape: f32[2,12432,48], index: 0, kind: input, shape index: {}]   ;;  %s6567_s1 = inlined_call_operand.vmem [shape: f32[48,256], index: 1, kind: input, shape index: {}]   ;;  %s6568_s2 = inlined_call_operand.vmem [shape: f32[1,256], index: 2, kind: input, shape index: {}]   ;;  %s6569_s3 = inlined_call_operand.vmem [shape: f32[2,12432,64], index: 3, kind: output, shape index: {}]  }
   0x1   :  { %s3302_s14 = smov 0   ;;  %s3304_s15 = smov 0  }
   0x2   :  { %s3306_s16 = smov 0  }
   0x3 LB: > { %s22_s17 = sadd.s32 1, %s3266_s14  ;;  %s25_s18 = sadd.s32 1, %s3270_s15  ;;  %s3274_s16 = sphi %s3306_s16, %s13_s16   ;;  %s3270_s15 = sphi %s3304_s15, %s7517_s15   ;;  %s3266_s14 = sphi %s3302_s14, %s7516_s14   ;;  %s3262_s13 = sphi %s3300_s13, %s7515_s13   ;;  %s3258_s12 = sphi %s3298_s12, %s7514_s12  }
   0x4   : > { %p23_p0 = scmp.ge.s32.totalorder %s22_s17, 14  ;;  %p3059_p1 = scmp.ge.s32.totalorder %s3274_s16, 1 }
   0x5   : > { %p158_p2 = scmp.lt.s32.totalorder %s3274_s16, 29 }
   0x6   : > { %s7519_s17 = smov (%p23_p0, %s22_s17), 0  ;;  %s7521_s18 = smov (!%p23_p0, %s25_s18), %s3270_s15 }
   0x7   : > { %p159_p3 = pnand %p3059_p1, %p158_p2  ;;  %p27_p4 = scmp.ge.s32.totalorder %s7521_s18, 2 }
   0x9   : > { %s7523_s18 = smov (%p27_p4, %s7521_s18), 0  ;;  %162 = sbr.rel (%p159_p3) target bundleno = 810 (0x32a), region = 32 }
  0x10   : > { %v322_v0 = vld [vmem:[%s6567_s1 + $0x8] sm:$0xff]  ;;  %v324_v1 = vld [vmem:[%s6567_s1 + $0x18] sm:$0xff]  ;;  %v321_v2 = vld [vmem:[%s6567_s1] sm:$0xff]  ;;  %s190_s25 = smul.u32 111, %s3258_s12  ;;  %p191_p5 = scmp.lt.s32.totalorder %s3262_s13, 1  ;;  %v6596_v7 = vmov 0.0  }
  0x11   : > { %v3175_v3 = vpack.c.bf16 %v324_v1, %v322_v0  ;;  %v323_v4 = vld [vmem:[%s6567_s1 + $0x10] sm:$0xff]  ;;  %v326_v5 = vld [vmem:[%s6567_s1 + $0x28] sm:$0xff]  ;;  %v328_v6 = vld [vmem:[%s6567_s1 + $0x38] sm:$0xff]  ;;  %743 = vmatprep.mubr.f32.mxu0 %v6596_v7  ;;  %1079 = vmatprep.mubr.f32.mxu1 %v6596_v7  ;;  %vm345_vm0 = vcmask 392192   ;;  %s3277_s30 = smov 64   ;;  %vm2853_vm1 = vcmask 523264  }
  0x12   : > { %v3177_v8 = vpack.c.bf16 %v323_v4, %v321_v2  ;;  %v3179_v9 = vpack.c.bf16 %v328_v6, %v326_v5  ;;  %v325_v10 = vld [vmem:[%s6567_s1 + $0x20] sm:$0xff]  ;;  %v327_v11 = vld [vmem:[%s6567_s1 + $0x30] sm:$0xff]  ;;  %v330_v12 = vld [vmem:[%s6567_s1 + $0x48] sm:$0xff]  ;;  %s7525_s13 = smov (!%p191_p5, %s3262_s13), 1  ;;  %p193_p6 = scmp.lt.s32.totalorder %s190_s25, 1553 }
  0x13   : > { %3176 = vmatprep.subr.bf16.mxu0 %v3175_v3  ;;  %3187 = vmatprep.subr.bf16.mxu1 %v3175_v3  ;;  %v332_v13 = vld [vmem:[%s6567_s1 + $0x58] sm:$0xff]  ;;  %v3181_v14 = vpack.c.bf16 %v327_v11, %v325_v10  ;;  %s3193_s19 = smul.u32 1554, %s7525_s13  ;;  %v329_v16 = vld [vmem:[%s6567_s1 + $0x40] sm:$0xff]  ;;  %v331_v17 = vld [vmem:[%s6567_s1 + $0x50] sm:$0xff] }
  0x14   : > { %3178 = vmatpush1.bf16.msra.mxu0 %v3177_v8  ;;  %3190 = vmatpush1.bf16.msra.mxu1 %v3177_v8  ;;  %v3183_v15 = vpack.c.bf16 %v332_v13, %v330_v12  ;;  %s7527_s25 = smov (!%p193_p6, %s190_s25), 1553  ;;  %v3185_v18 = vpack.c.bf16 %v331_v17, %v329_v16 }
  0x15   : > { %3180 = vmatprep.subr.bf16.mxu0 %v3179_v9  ;;  %3188 = vmatprep.subr.bf16.mxu1 %v3179_v9  ;;  %s3373_s24 = sadd.s32 %s3193_s19, %s7527_s25 }
  0x16   : > { %s3060_s13 = sshll.u32 %s3373_s24, 3 }
  0x17   : > { %s3381_s28 = scalar_lea.vmem %s6566_s0, %s3060_s13  ;;  %s4403_s6 = scalar_lea.vmem %s6569_s3, %s3060_s13 }
  0x18   : > { %3182 = vmatpush1.bf16.msra.mxu0 %v3181_v14  ;;  %3191 = vmatpush1.bf16.msra.mxu1 %v3181_v14  ;;  %v210_v19 = vld [vmem:[%s3381_s28] sm:$0xff]  ;;  %v211_v21 = vld [vmem:[%s3381_s28 + $0x8] sm:$0xff]  ;;  %v212_v23 = vld [vmem:[%s3381_s28 + $0x10] sm:$0xff] }
  0x19   : > { %3184 = vmatprep.subr.bf16.mxu0 %v3183_v15  ;;  %3189 = vmatprep.subr.bf16.mxu1 %v3183_v15  ;;  %v266_v20 = vld [vmem:[%s3381_s28 + $0x1c0] sm:$0xff]  ;;  %v267_v22 = vld [vmem:[%s3381_s28 + $0x1c8] sm:$0xff]  ;;  %v268_v24 = vld [vmem:[%s3381_s28 + $0x1d0] sm:$0xff] }
  0x1a   : > { %v213_v25 = vld [vmem:[%s3381_s28 + $0x18] sm:$0xff]  ;;  %v214_v27 = vld [vmem:[%s3381_s28 + $0x20] sm:$0xff]  ;;  %v215_v29 = vld [vmem:[%s3381_s28 + $0x28] sm:$0xff] }
  0x1b   : > { %v269_v26 = vld [vmem:[%s3381_s28 + $0x1d8] sm:$0xff]  ;;  %v270_v28 = vld [vmem:[%s3381_s28 + $0x1e0] sm:$0xff]  ;;  %v271_v30 = vld [vmem:[%s3381_s28 + $0x1e8] sm:$0xff] }
  0x1c   : > { %3186 = vmatpush1.bf16.msra.mxu0 %v3185_v18  ;;  %3192 = vmatpush1.bf16.msra.mxu1 %v3185_v18  ;;  %v216_v31 = vld [vmem:[%s3381_s28 + $0x30] sm:$0xff]  ;;  %v217_v33 = vld [vmem:[%s3381_s28 + $0x38] sm:$0xff]  ;;  %v218_v35 = vld [vmem:[%s3381_s28 + $0x40] sm:$0xff] }
  0x1d   : > { %v272_v32 = vld [vmem:[%s3381_s28 + $0x1f0] sm:$0xff]  ;;  %v273_v34 = vld [vmem:[%s3381_s28 + $0x1f8] sm:$0xff]  ;;  %v274_v36 = vld [vmem:[%s3381_s28 + $0x200] sm:$0xff] }
  0x1e   : > { %v219_v37 = vld [vmem:[%s3381_s28 + $0x48] sm:$0xff]  ;;  %v220_v39 = vld [vmem:[%s3381_s28 + $0x50] sm:$0xff]  ;;  %v221_v41 = vld [vmem:[%s3381_s28 + $0x58] sm:$0xff] }
  0x1f   : > { %3062 = vmatmul.mubr.msk.f32.vlgmr.msra.gmra.mrb[0].mxu0 %vm345_vm0, %v210_v19  ;;  %3118 = vmatmul.mubr.msk.f32.vlgmr.msra.gmra.mrb[0].mxu1 %vm345_vm0, %v266_v20  ;;  %v275_v38 = vld [vmem:[%s3381_s28 + $0x208] sm:$0xff]  ;;  %v276_v40 = vld [vmem:[%s3381_s28 + $0x210] sm:$0xff]  ;;  %v277_v42 = vld [vmem:[%s3381_s28 + $0x218] sm:$0xff] }
  0x20   : > { %749 = vmatprep.mubr.f32.mxu0 %v6596_v7  ;;  %1085 = vmatprep.mubr.f32.mxu1 %v6596_v7  ;;  %v222_v43 = vld [vmem:[%s3381_s28 + $0x60] sm:$0xff]  ;;  %v223_v45 = vld [vmem:[%s3381_s28 + $0x68] sm:$0xff]  ;;  %v224_v47 = vld [vmem:[%s3381_s28 + $0x70] sm:$0xff] }
  0x21   : > { %v278_v44 = vld [vmem:[%s3381_s28 + $0x220] sm:$0xff]  ;;  %v279_v46 = vld [vmem:[%s3381_s28 + $0x228] sm:$0xff]  ;;  %v280_v48 = vld [vmem:[%s3381_s28 + $0x230] sm:$0xff] }
  0x22   : > { %v225_v49 = vld [vmem:[%s3381_s28 + $0x78] sm:$0xff]  ;;  %v226_v51 = vld [vmem:[%s3381_s28 + $0x80] sm:$0xff]  ;;  %v227_v53 = vld [vmem:[%s3381_s28 + $0x88] sm:$0xff] }
  0x23   : > { %3063 = vmatmul.mubr.msk.f32.gmra.mrb[2].mxu0 %vm345_vm0, %v211_v21  ;;  %3119 = vmatmul.mubr.msk.f32.gmra.mrb[2].mxu1 %vm345_vm0, %v267_v22  ;;  %v281_v50 = vld [vmem:[%s3381_s28 + $0x238] sm:$0xff]  ;;  %v282_v52 = vld [vmem:[%s3381_s28 + $0x240] sm:$0xff]  ;;  %v283_v54 = vld [vmem:[%s3381_s28 + $0x248] sm:$0xff] }
  0x24   : > { %755 = vmatprep.mubr.f32.mxu0 %v6596_v7  ;;  %1091 = vmatprep.mubr.f32.mxu1 %v6596_v7  ;;  %v228_v55 = vld [vmem:[%s3381_s28 + $0x90] sm:$0xff]  ;;  %v229_v57 = vld [vmem:[%s3381_s28 + $0x98] sm:$0xff]  ;;  %v230_v59 = vld [vmem:[%s3381_s28 + $0xa0] sm:$0xff] }
  0x25   : > { %v284_v56 = vld [vmem:[%s3381_s28 + $0x250] sm:$0xff]  ;;  %v285_v58 = vld [vmem:[%s3381_s28 + $0x258] sm:$0xff]  ;;  %v286_v60 = vld [vmem:[%s3381_s28 + $0x260] sm:$0xff] }
  0x26   : > { %v231_v61 = vld [vmem:[%s3381_s28 + $0xa8] sm:$0xff]  ;;  %v232_v63 = vld [vmem:[%s3381_s28 + $0xb0] sm:$0xff]  ;;  %v233_v1 = vld [vmem:[%s3381_s28 + $0xb8] sm:$0xff] }
  0x27   : > { %3064 = vmatmul.mubr.msk.f32.gmra.mrb[4].mxu0 %vm345_vm0, %v212_v23  ;;  %3120 = vmatmul.mubr.msk.f32.gmra.mrb[4].mxu1 %vm345_vm0, %v268_v24  ;;  %v287_v62 = vld [vmem:[%s3381_s28 + $0x268] sm:$0xff]  ;;  %v288_v0 = vld [vmem:[%s3381_s28 + $0x270] sm:$0xff]  ;;  %v289_v2 = vld [vmem:[%s3381_s28 + $0x278] sm:$0xff] }
  0x28   : > { %761 = vmatprep.mubr.f32.mxu0 %v6596_v7  ;;  %1097 = vmatprep.mubr.f32.mxu1 %v6596_v7  ;;  %v234_v3 = vld [vmem:[%s3381_s28 + $0xc0] sm:$0xff]  ;;  %v235_v5 = vld [vmem:[%s3381_s28 + $0xc8] sm:$0xff]  ;;  %v236_v8 = vld [vmem:[%s3381_s28 + $0xd0] sm:$0xff] }
  0x29   : > { %v290_v4 = vld [vmem:[%s3381_s28 + $0x280] sm:$0xff]  ;;  %v291_v6 = vld [vmem:[%s3381_s28 + $0x288] sm:$0xff]  ;;  %v292_v9 = vld [vmem:[%s3381_s28 + $0x290] sm:$0xff] }
  0x2a   : > { %v237_v10 = vld [vmem:[%s3381_s28 + $0xd8] sm:$0xff]  ;;  %v238_v12 = vld [vmem:[%s3381_s28 + $0xe0] sm:$0xff]  ;;  %v239_v14 = vld [vmem:[%s3381_s28 + $0xe8] sm:$0xff] }
  0x2b   : > { %3065 = vmatmul.mubr.msk.f32.gmra.mrb[6].mxu0 %vm345_vm0, %v213_v25  ;;  %3121 = vmatmul.mubr.msk.f32.gmra.mrb[6].mxu1 %vm345_vm0, %v269_v26  ;;  %v293_v11 = vld [vmem:[%s3381_s28 + $0x298] sm:$0xff]  ;;  %v294_v13 = vld [vmem:[%s3381_s28 + $0x2a0] sm:$0xff]  ;;  %v295_v15 = vld [vmem:[%s3381_s28 + $0x2a8] sm:$0xff] }
  0x2c   : > { %767 = vmatprep.mubr.f32.mxu0 %v6596_v7  ;;  %1103 = vmatprep.mubr.f32.mxu1 %v6596_v7  ;;  %v240_v16 = vld [vmem:[%s3381_s28 + $0xf0] sm:$0xff]  ;;  %v241_v18 = vld [vmem:[%s3381_s28 + $0xf8] sm:$0xff]  ;;  %v242_v20 = vld [vmem:[%s3381_s28 + $0x100] sm:$0xff] }
  0x2d   : > { %v296_v17 = vld [vmem:[%s3381_s28 + $0x2b0] sm:$0xff]  ;;  %v297_v19 = vld [vmem:[%s3381_s28 + $0x2b8] sm:$0xff]  ;;  %v298_v21 = vld [vmem:[%s3381_s28 + $0x2c0] sm:$0xff] }
  0x2e   : > { %v243_v22 = vld [vmem:[%s3381_s28 + $0x108] sm:$0xff]  ;;  %v244_v24 = vld [vmem:[%s3381_s28 + $0x110] sm:$0xff]  ;;  %v245_v26 = vld [vmem:[%s3381_s28 + $0x118] sm:$0xff] }
  0x2f   : > { %3066 = vmatmul.mubr.msk.f32.gmra.mrb[8].mxu0 %vm345_vm0, %v214_v27  ;;  %3122 = vmatmul.mubr.msk.f32.gmra.mrb[8].mxu1 %vm345_vm0, %v270_v28  ;;  %v299_v23 = vld [vmem:[%s3381_s28 + $0x2c8] sm:$0xff]  ;;  %v300_v25 = vld [vmem:[%s3381_s28 + $0x2d0] sm:$0xff]  ;;  %v301_v27 = vld [vmem:[%s3381_s28 + $0x2d8] sm:$0xff] }
  0x30   : > { %773 = vmatprep.mubr.f32.mxu0 %v6596_v7  ;;  %1109 = vmatprep.mubr.f32.mxu1 %v6596_v7  ;;  %v246_v28 = vld [vmem:[%s3381_s28 + $0x120] sm:$0xff] }
  0x33   : > { %3067 = vmatmul.mubr.msk.f32.gmra.mrb[10].mxu0 %vm345_vm0, %v215_v29  ;;  %3123 = vmatmul.mubr.msk.f32.gmra.mrb[10].mxu1 %vm345_vm0, %v271_v30  ;;  %v302_v29 = vld [vmem:[%s3381_s28 + $0x2e0] sm:$0xff]  ;;  %v247_v30 = vld [vmem:[%s3381_s28 + $0x128] sm:$0xff] }
  0x34   : > { %779 = vmatprep.mubr.f32.mxu0 %v6596_v7  ;;  %1115 = vmatprep.mubr.f32.mxu1 %v6596_v7 }
  0x37   : > { %3068 = vmatmul.mubr.msk.f32.gmra.mrb[12].mxu0 %vm345_vm0, %v216_v31  ;;  %3124 = vmatmul.mubr.msk.f32.gmra.mrb[12].mxu1 %vm345_vm0, %v272_v32  ;;  %v303_v31 = vld [vmem:[%s3381_s28 + $0x2e8] sm:$0xff]  ;;  %v248_v32 = vld [vmem:[%s3381_s28 + $0x130] sm:$0xff] }
  0x38   : > { %785 = vmatprep.mubr.f32.mxu0 %v6596_v7  ;;  %1121 = vmatprep.mubr.f32.mxu1 %v6596_v7 }
  0x3b   : > { %3069 = vmatmul.mubr.msk.f32.gmra.mrb[14].mxu0 %vm345_vm0, %v217_v33  ;;  %3125 = vmatmul.mubr.msk.f32.gmra.mrb[14].mxu1 %vm345_vm0, %v273_v34  ;;  %v304_v33 = vld [vmem:[%s3381_s28 + $0x2f0] sm:$0xff]  ;;  %v249_v34 = vld [vmem:[%s3381_s28 + $0x138] sm:$0xff] }
  0x3c   : > { %791 = vmatprep.mubr.f32.mxu0 %v6596_v7  ;;  %1127 = vmatprep.mubr.f32.mxu1 %v6596_v7 }
  0x3f   : > { %3070 = vmatmul.mubr.msk.f32.gmra.mrb[16].mxu0 %vm345_vm0, %v218_v35  ;;  %3126 = vmatmul.mubr.msk.f32.gmra.mrb[16].mxu1 %vm345_vm0, %v274_v36  ;;  %v305_v35 = vld [vmem:[%s3381_s28 + $0x2f8] sm:$0xff]  ;;  %v250_v36 = vld [vmem:[%s3381_s28 + $0x140] sm:$0xff] }
  0x40   : > { %797 = vmatprep.mubr.f32.mxu0 %v6596_v7  ;;  %1133 = vmatprep.mubr.f32.mxu1 %v6596_v7 }
  0x43   : > { %3071 = vmatmul.mubr.msk.f32.gmra.mrb[18].mxu0 %vm345_vm0, %v219_v37  ;;  %3127 = vmatmul.mubr.msk.f32.gmra.mrb[18].mxu1 %vm345_vm0, %v275_v38  ;;  %v306_v37 = vld [vmem:[%s3381_s28 + $0x300] sm:$0xff]  ;;  %v335_v38 = vlaneseq }
  0x44   : > { %803 = vmatprep.mubr.f32.mxu0 %v6596_v7  ;;  %1139 = vmatprep.mubr.f32.mxu1 %v6596_v7 }
  0x47   : > { %3072 = vmatmul.mubr.msk.f32.gmra.mrb[20].mxu0 %vm345_vm0, %v220_v39  ;;  %3128 = vmatmul.mubr.msk.f32.gmra.mrb[20].mxu1 %vm345_vm0, %v276_v40  ;;  %v251_v39 = vld [vmem:[%s3381_s28 + $0x148] sm:$0xff]  ;;  %v336_v40 = vshrl.u32 %v335_v38, 7 }
  0x48   : > { %809 = vmatprep.mubr.f32.mxu0 %v6596_v7  ;;  %1145 = vmatprep.mubr.f32.mxu1 %v6596_v7 }
  0x4b   : > { %3073 = vmatmul.mubr.msk.f32.gmra.mrb[22].mxu0 %vm345_vm0, %v221_v41  ;;  %3129 = vmatmul.mubr.msk.f32.gmra.mrb[22].mxu1 %vm345_vm0, %v277_v42  ;;  %v307_v41 = vld [vmem:[%s3381_s28 + $0x308] sm:$0xff]  ;;  %v337_v42 = vsub.s32 0, %v336_v40 }
  0x4c   : > { %815 = vmatprep.mubr.f32.mxu0 %v6596_v7  ;;  %1151 = vmatprep.mubr.f32.mxu1 %v6596_v7 }
  0x4f   : > { %3074 = vmatmul.mubr.msk.f32.gmra.mrb[24].mxu0 %vm345_vm0, %v222_v43  ;;  %3130 = vmatmul.mubr.msk.f32.gmra.mrb[24].mxu1 %vm345_vm0, %v278_v44  ;;  %v333_v43 = vld [vmem:[%s6568_s2] sm:$0x3]  ;;  %v341_v44 = vsub.s32 1, %v336_v40 }
  0x50   : > { %821 = vmatprep.mubr.f32.mxu0 %v6596_v7  ;;  %1157 = vmatprep.mubr.f32.mxu1 %v6596_v7 }
  0x53   : > { %3075 = vmatmul.mubr.msk.f32.gmra.mrb[26].mxu0 %vm345_vm0, %v223_v45  ;;  %3131 = vmatmul.mubr.msk.f32.gmra.mrb[26].mxu1 %vm345_vm0, %v279_v46  ;;  %v252_v45 = vld [vmem:[%s3381_s28 + $0x150] sm:$0xff]  ;;  %v3640_v46 = vrot.slane %v333_v43, %v337_v42 }
  0x54   : > { %827 = vmatprep.mubr.f32.mxu0 %v6596_v7  ;;  %1163 = vmatprep.mubr.f32.mxu1 %v6596_v7 }
  0x57   : > { %3076 = vmatmul.mubr.msk.f32.gmra.mrb[28].mxu0 %vm345_vm0, %v224_v47  ;;  %3132 = vmatmul.mubr.msk.f32.gmra.mrb[28].mxu1 %vm345_vm0, %v280_v48  ;;  %v3643_v47 = vrot.slane %v333_v43, %v341_v44  ;;  %v308_v48 = vld [vmem:[%s3381_s28 + $0x310] sm:$0xff] }
  0x58   : > { %833 = vmatprep.mubr.f32.mxu0 %v6596_v7  ;;  %1169 = vmatprep.mubr.f32.mxu1 %v6596_v7 }
  0x5b   : > { %3077 = vmatmul.mubr.msk.f32.gmra.mrb[30].mxu0 %vm345_vm0, %v225_v49  ;;  %3133 = vmatmul.mubr.msk.f32.gmra.mrb[30].mxu1 %vm345_vm0, %v281_v50 }
  0x5c   : > { %839 = vmatprep.mubr.f32.mxu0 %v6596_v7  ;;  %1175 = vmatprep.mubr.f32.mxu1 %v6596_v7 }
  0x5f   : > { %3078 = vmatmul.mubr.msk.f32.gmra.mrb[32].mxu0 %vm345_vm0, %v226_v51  ;;  %3134 = vmatmul.mubr.msk.f32.gmra.mrb[32].mxu1 %vm345_vm0, %v282_v52 }
  0x60   : > { %845 = vmatprep.mubr.f32.mxu0 %v6596_v7  ;;  %1181 = vmatprep.mubr.f32.mxu1 %v6596_v7 }
  0x63   : > { %3079 = vmatmul.mubr.msk.f32.gmra.mrb[34].mxu0 %vm345_vm0, %v227_v53  ;;  %3135 = vmatmul.mubr.msk.f32.gmra.mrb[34].mxu1 %vm345_vm0, %v283_v54 }
  0x64   : > { %851 = vmatprep.mubr.f32.mxu0 %v6596_v7  ;;  %1187 = vmatprep.mubr.f32.mxu1 %v6596_v7 }
  0x67   : > { %3080 = vmatmul.mubr.msk.f32.gmra.mrb[36].mxu0 %vm345_vm0, %v228_v55  ;;  %3136 = vmatmul.mubr.msk.f32.gmra.mrb[36].mxu1 %vm345_vm0, %v284_v56 }
  0x68   : > { %857 = vmatprep.mubr.f32.mxu0 %v6596_v7  ;;  %1193 = vmatprep.mubr.f32.mxu1 %v6596_v7 }
  0x6b   : > { %3081 = vmatmul.mubr.msk.f32.gmra.mrb[38].mxu0 %vm345_vm0, %v229_v57  ;;  %3137 = vmatmul.mubr.msk.f32.gmra.mrb[38].mxu1 %vm345_vm0, %v285_v58  ;;  %v253_v58 = vld [vmem:[%s3381_s28 + $0x158] sm:$0xff] }
  0x6c   : > { %863 = vmatprep.mubr.f32.mxu0 %v6596_v7  ;;  %1199 = vmatprep.mubr.f32.mxu1 %v6596_v7 }
  0x6f   : > { %3082 = vmatmul.mubr.msk.f32.gmra.mrb[40].mxu0 %vm345_vm0, %v230_v59  ;;  %3138 = vmatmul.mubr.msk.f32.gmra.mrb[40].mxu1 %vm345_vm0, %v286_v60 }
  0x70   : > { %869 = vmatprep.mubr.f32.mxu0 %v6596_v7  ;;  %1205 = vmatprep.mubr.f32.mxu1 %v6596_v7 }
  0x73   : > { %3083 = vmatmul.mubr.msk.f32.gmra.mrb[42].mxu0 %vm345_vm0, %v231_v61  ;;  %3139 = vmatmul.mubr.msk.f32.gmra.mrb[42].mxu1 %vm345_vm0, %v287_v62 }
  0x74   : > { %875 = vmatprep.mubr.f32.mxu0 %v6596_v7  ;;  %1211 = vmatprep.mubr.f32.mxu1 %v6596_v7 }
  0x77   : > { %3084 = vmatmul.mubr.msk.f32.gmra.mrb[44].mxu0 %vm345_vm0, %v232_v63  ;;  %3140 = vmatmul.mubr.msk.f32.gmra.mrb[44].mxu1 %vm345_vm0, %v288_v0 }
  0x78   : > { %881 = vmatprep.mubr.f32.mxu0 %v6596_v7  ;;  %1217 = vmatprep.mubr.f32.mxu1 %v6596_v7 }
  0x7b   : > { %3085 = vmatmul.mubr.msk.f32.gmra.mrb[46].mxu0 %vm345_vm0, %v233_v1  ;;  %3141 = vmatmul.mubr.msk.f32.gmra.mrb[46].mxu1 %vm345_vm0, %v289_v2 }
  0x7c   : > { %887 = vmatprep.mubr.f32.mxu0 %v6596_v7  ;;  %1223 = vmatprep.mubr.f32.mxu1 %v6596_v7 }
  0x7f   : > { %3086 = vmatmul.mubr.msk.f32.gmra.mrb[48].mxu0 %vm345_vm0, %v234_v3  ;;  %3142 = vmatmul.mubr.msk.f32.gmra.mrb[48].mxu1 %vm345_vm0, %v290_v4  ;;  %v309_v4 = vld [vmem:[%s3381_s28 + $0x318] sm:$0xff] }
  0x80   : > { %893 = vmatprep.mubr.f32.mxu0 %v6596_v7  ;;  %1229 = vmatprep.mubr.f32.mxu1 %v6596_v7 }
  0x83   : > { %3087 = vmatmul.mubr.msk.f32.gmra.mrb[50].mxu0 %vm345_vm0, %v235_v5  ;;  %3143 = vmatmul.mubr.msk.f32.gmra.mrb[50].mxu1 %vm345_vm0, %v291_v6 }
  0x84   : > { %899 = vmatprep.mubr.f32.mxu0 %v6596_v7  ;;  %1235 = vmatprep.mubr.f32.mxu1 %v6596_v7 }
  0x87   : > { %3088 = vmatmul.mubr.msk.f32.gmra.mrb[52].mxu0 %vm345_vm0, %v236_v8  ;;  %3144 = vmatmul.mubr.msk.f32.gmra.mrb[52].mxu1 %vm345_vm0, %v292_v9 }
  0x88   : > { %905 = vmatprep.mubr.f32.mxu0 %v6596_v7  ;;  %1241 = vmatprep.mubr.f32.mxu1 %v6596_v7 }
  0x8b   : > { %3089 = vmatmul.mubr.msk.f32.gmra.mrb[54].mxu0 %vm345_vm0, %v237_v10  ;;  %3145 = vmatmul.mubr.msk.f32.gmra.mrb[54].mxu1 %vm345_vm0, %v293_v11 }
  0x8c   : > { %911 = vmatprep.mubr.f32.mxu0 %v6596_v7  ;;  %1247 = vmatprep.mubr.f32.mxu1 %v6596_v7 }
  0x8f   : > { %3090 = vmatmul.mubr.msk.f32.gmra.mrb[56].mxu0 %vm345_vm0, %v238_v12  ;;  %3146 = vmatmul.mubr.msk.f32.gmra.mrb[56].mxu1 %vm345_vm0, %v294_v13 }
  0x90   : > { %917 = vmatprep.mubr.f32.mxu0 %v6596_v7  ;;  %1253 = vmatprep.mubr.f32.mxu1 %v6596_v7 }
  0x93   : > { %3091 = vmatmul.mubr.msk.f32.gmra.mrb[58].mxu0 %vm345_vm0, %v239_v14  ;;  %3147 = vmatmul.mubr.msk.f32.gmra.mrb[58].mxu1 %vm345_vm0, %v295_v15  ;;  %v254_v14 = vld [vmem:[%s3381_s28 + $0x160] sm:$0xff] }
  0x94   : > { %923 = vmatprep.mubr.f32.mxu0 %v6596_v7  ;;  %1259 = vmatprep.mubr.f32.mxu1 %v6596_v7 }
  0x97   : > { %3092 = vmatmul.mubr.msk.f32.gmra.mrb[60].mxu0 %vm345_vm0, %v240_v16  ;;  %3148 = vmatmul.mubr.msk.f32.gmra.mrb[60].mxu1 %vm345_vm0, %v296_v17 }
  0x98   : > { %929 = vmatprep.mubr.f32.mxu0 %v6596_v7  ;;  %1265 = vmatprep.mubr.f32.mxu1 %v6596_v7 }
  0x9b   : > { %3093 = vmatmul.mubr.msk.f32.gmra.mrb[62].mxu0 %vm345_vm0, %v241_v18  ;;  %3149 = vmatmul.mubr.msk.f32.gmra.mrb[62].mxu1 %vm345_vm0, %v297_v19 }
  0x9c   : > { %935 = vmatprep.mubr.f32.mxu0 %v6596_v7  ;;  %1271 = vmatprep.mubr.f32.mxu1 %v6596_v7 }
  0x9f   : > { %3094 = vmatmul.mubr.msk.f32.gmra.mrb[64].mxu0 %vm345_vm0, %v242_v20  ;;  %3150 = vmatmul.mubr.msk.f32.gmra.mrb[64].mxu1 %vm345_vm0, %v298_v21 }
  0xa0   : > { %941 = vmatprep.mubr.f32.mxu0 %v6596_v7  ;;  %1277 = vmatprep.mubr.f32.mxu1 %v6596_v7 }
  0xa3   : > { %3095 = vmatmul.mubr.msk.f32.gmra.mrb[66].mxu0 %vm345_vm0, %v243_v22  ;;  %3151 = vmatmul.mubr.msk.f32.gmra.mrb[66].mxu1 %vm345_vm0, %v299_v23  ;;  %v310_v22 = vld [vmem:[%s3381_s28 + $0x320] sm:$0xff] }
  0xa4   : > { %947 = vmatprep.mubr.f32.mxu0 %v6596_v7  ;;  %1283 = vmatprep.mubr.f32.mxu1 %v6596_v7 }
  0xa7   : > { %3096 = vmatmul.mubr.msk.f32.gmra.mrb[68].mxu0 %vm345_vm0, %v244_v24  ;;  %3152 = vmatmul.mubr.msk.f32.gmra.mrb[68].mxu1 %vm345_vm0, %v300_v25 }
  0xa8   : > { %953 = vmatprep.mubr.f32.mxu0 %v6596_v7  ;;  %1289 = vmatprep.mubr.f32.mxu1 %v6596_v7 }
  0xab   : > { %3097 = vmatmul.mubr.msk.f32.gmra.mrb[70].mxu0 %vm345_vm0, %v245_v26  ;;  %3153 = vmatmul.mubr.msk.f32.gmra.mrb[70].mxu1 %vm345_vm0, %v301_v27 }
  0xac   : > { %959 = vmatprep.mubr.f32.mxu0 %v6596_v7  ;;  %1295 = vmatprep.mubr.f32.mxu1 %v6596_v7 }
  0xaf   : > { %3098 = vmatmul.mubr.msk.f32.gmra.mrb[72].mxu0 %vm345_vm0, %v246_v28  ;;  %3154 = vmatmul.mubr.msk.f32.gmra.mrb[72].mxu1 %vm345_vm0, %v302_v29 }
  0xb0   : > { %965 = vmatprep.mubr.f32.mxu0 %v6596_v7  ;;  %1301 = vmatprep.mubr.f32.mxu1 %v6596_v7 }
  0xb3   : > { %3099 = vmatmul.mubr.msk.f32.gmra.mrb[74].mxu0 %vm345_vm0, %v247_v30  ;;  %3155 = vmatmul.mubr.msk.f32.gmra.mrb[74].mxu1 %vm345_vm0, %v303_v31  ;;  %v255_v31 = vld [vmem:[%s3381_s28 + $0x168] sm:$0xff] }
  0xb4   : > { %971 = vmatprep.mubr.f32.mxu0 %v6596_v7  ;;  %1307 = vmatprep.mubr.f32.mxu1 %v6596_v7 }
  0xb7   : > { %3100 = vmatmul.mubr.msk.f32.gmra.mrb[76].mxu0 %vm345_vm0, %v248_v32  ;;  %3156 = vmatmul.mubr.msk.f32.gmra.mrb[76].mxu1 %vm345_vm0, %v304_v33 }
  0xb8   : > { %977 = vmatprep.mubr.f32.mxu0 %v6596_v7  ;;  %1313 = vmatprep.mubr.f32.mxu1 %v6596_v7 }
  0xbb   : > { %3101 = vmatmul.mubr.msk.f32.gmra.mrb[78].mxu0 %vm345_vm0, %v249_v34  ;;  %3157 = vmatmul.mubr.msk.f32.gmra.mrb[78].mxu1 %vm345_vm0, %v305_v35 }
  0xbc   : > { %983 = vmatprep.mubr.f32.mxu0 %v6596_v7  ;;  %1319 = vmatprep.mubr.f32.mxu1 %v6596_v7 }
  0xbf   : > { %3102 = vmatmul.mubr.msk.f32.gmra.mrb[80].mxu0 %vm345_vm0, %v250_v36  ;;  %3158 = vmatmul.mubr.msk.f32.gmra.mrb[80].mxu1 %vm345_vm0, %v306_v37 }
  0xc0   : > { %989 = vmatprep.mubr.f32.mxu0 %v6596_v7  ;;  %1325 = vmatprep.mubr.f32.mxu1 %v6596_v7 }
  0xc3   : > { %3103 = vmatmul.mubr.msk.f32.gmra.mrb[82].mxu0 %vm345_vm0, %v251_v39  ;;  %3159 = vmatmul.mubr.msk.f32.gmra.mrb[82].mxu1 %vm345_vm0, %v307_v41  ;;  %v311_v41 = vld [vmem:[%s3381_s28 + $0x328] sm:$0xff] }
  0xc4   : > { %995 = vmatprep.mubr.f32.mxu0 %v6596_v7  ;;  %1331 = vmatprep.mubr.f32.mxu1 %v6596_v7 }
  0xc7   : > { %3104 = vmatmul.mubr.msk.f32.gmra.mrb[84].mxu0 %vm345_vm0, %v252_v45  ;;  %3160 = vmatmul.mubr.msk.f32.gmra.mrb[84].mxu1 %vm345_vm0, %v308_v48 }
  0xc8   : > { %1001 = vmatprep.mubr.f32.mxu0 %v6596_v7  ;;  %1337 = vmatprep.mubr.f32.mxu1 %v6596_v7 }
  0xcb   : > { %3105 = vmatmul.mubr.msk.f32.gmra.mrb[86].mxu0 %vm345_vm0, %v253_v58  ;;  %3161 = vmatmul.mubr.msk.f32.gmra.mrb[86].mxu1 %vm345_vm0, %v309_v4 }
  0xcc   : > { %1007 = vmatprep.mubr.f32.mxu0 %v6596_v7  ;;  %1343 = vmatprep.mubr.f32.mxu1 %v6596_v7 }
  0xcf   : > { %3106 = vmatmul.mubr.msk.f32.gmra.mrb[88].mxu0 %vm345_vm0, %v254_v14  ;;  %3162 = vmatmul.mubr.msk.f32.gmra.mrb[88].mxu1 %vm345_vm0, %v310_v22 }
  0xd0   : > { %1013 = vmatprep.mubr.f32.mxu0 %v6596_v7  ;;  %1349 = vmatprep.mubr.f32.mxu1 %v6596_v7 }
  0xd3   : > { %3107 = vmatmul.mubr.msk.f32.gmra.mrb[90].mxu0 %vm345_vm0, %v255_v31  ;;  %3163 = vmatmul.mubr.msk.f32.gmra.mrb[90].mxu1 %vm345_vm0, %v311_v41 }
  0xd4   : > { %1019 = vmatprep.mubr.f32.mxu0 %v6596_v7  ;;  %1355 = vmatprep.mubr.f32.mxu1 %v6596_v7 }
  0xf2   : > { %v745_v49 = vpop.f32.mrb[0].mxu0  ;;  %v1081_v50 = vpop.f32.mrb[0].mxu1 }
  0xf3   : > { %v3648_v51 = vadd.f32 %v745_v49, %v3640_v46  ;;  %v747_v52 = vpop.f32.mrb[1].mxu0  ;;  %v3651_v53 = vadd.f32 %v1081_v50, %v3640_v46  ;;  %v1083_v54 = vpop.f32.mrb[1].mxu1 }
  0xf4   : > { %v3655_v55 = vadd.f32 %v747_v52, %v3643_v47  ;;  %v3658_v56 = vadd.f32 %v1083_v54, %v3643_v47  ;;  %v256_v54 = vld [vmem:[%s3381_s28 + $0x170] sm:$0xff] }
  0xf5   : > { %v6593_v57 = vmax.f32 %v3648_v51, 0.0  ;;  %v6590_v62 = vmax.f32 %v3651_v53, 0.0  ;;  %3108 = vmatmul.mubr.msk.f32.gmra.mrb[92].mxu0 %vm345_vm0, %v256_v54 }
  0xf6   : > { %v6591_v59 = vmax.f32 %v3655_v55, 0.0  ;;  %v751_v60 = vpop.f32.mrb[2].mxu0  ;;  %v1087_v61 = vpop.f32.mrb[2].mxu1  ;;  %v6588_v2 = vmax.f32 %v3658_v56, 0.0  ;;  %1025 = vmatprep.mubr.f32.mxu0 %v6596_v7 }
  0xf7   : > { %1743 = vrot.lane.b32.xlu0 %v6593_v57, %s3277_s30  ;;  %v3669_v63 = vadd.f32 %v751_v60, %v3640_v46  ;;  %v753_v0 = vpop.f32.mrb[3].mxu0  ;;  %v1089_v1 = vpop.f32.mrb[3].mxu1  ;;  %v3677_v3 = vadd.f32 %v1087_v61, %v3640_v46 }
  0xf8   : > { %2298 = vrot.lane.b32.xlu1 %v6591_v59, %s3277_s30  ;;  %v3694_v13 = vadd.f32 %v753_v0, %v3643_v47  ;;  %v3708_v21 = vadd.f32 %v1089_v1, %v3643_v47  ;;  %v315_v59 = vld [vmem:[%s3381_s28 + $0x348] sm:$0xff] }
  0xf9   : > { %v6587_v8 = vmax.f32 %v3669_v63, 0.0  ;;  %v6584_v11 = vmax.f32 %v3677_v3, 0.0 }
  0xfa   : > { %v757_v5 = vpop.f32.mrb[4].mxu0  ;;  %v1093_v6 = vpop.f32.mrb[4].mxu1  ;;  %v6585_v20 = vmax.f32 %v3694_v13, 0.0  ;;  %v6582_v30 = vmax.f32 %v3708_v21, 0.0 }
  0xfb   : > { %1855 = vrot.lane.b32.xlu0 %v6590_v62, %s3277_s30  ;;  %v759_v9 = vpop.f32.mrb[5].mxu0  ;;  %v1095_v10 = vpop.f32.mrb[5].mxu1  ;;  %v3691_v12 = vadd.f32 %v757_v5, %v3640_v46  ;;  %v3719_v26 = vadd.f32 %v1093_v6, %v3640_v46 }
  0xfc   : > { %2410 = vrot.lane.b32.xlu1 %v6588_v2, %s3277_s30  ;;  %v3712_v23 = vadd.f32 %v759_v9, %v3643_v47  ;;  %v3726_v29 = vadd.f32 %v1095_v10, %v3643_v47  ;;  %v312_v9 = vld [vmem:[%s3381_s28 + $0x330] sm:$0xff] }
  0xfd   : > { %v6581_v19 = vmax.f32 %v3691_v12, 0.0  ;;  %v6578_v35 = vmax.f32 %v3719_v26, 0.0  ;;  %3164 = vmatmul.mubr.msk.f32.gmra.mrb[92].mxu1 %vm345_vm0, %v312_v9 }
  0xfe   : > { %v763_v15 = vpop.f32.mrb[6].mxu0  ;;  %v1099_v16 = vpop.f32.mrb[6].mxu1  ;;  %v6579_v32 = vmax.f32 %v3712_v23, 0.0  ;;  %v6576_v39 = vmax.f32 %v3726_v29, 0.0  ;;  %1361 = vmatprep.mubr.f32.mxu1 %v6596_v7 }
  0xff   : > { %1745 = vrot.lane.b32.xlu0 %v6587_v8, %s3277_s30  ;;  %v765_v17 = vpop.f32.mrb[7].mxu0  ;;  %v1101_v18 = vpop.f32.mrb[7].mxu1  ;;  %v3751_v40 = vadd.f32 %v763_v15, %v3640_v46  ;;  %v3776_v52 = vadd.f32 %v1099_v16, %v3640_v46 }
 0x100   : > { %1857 = vrot.lane.b32.xlu1 %v6584_v11, %s3277_s30  ;;  %v3741_v36 = vadd.f32 %v765_v17, %v3643_v47  ;;  %v3764_v45 = vadd.f32 %v1101_v18, %v3643_v47 }
 0x101   : > { %v6573_v50 = vmax.f32 %v3751_v40, 0.0  ;;  %6713 = vst [vmem:[#allocation3_spill] sm:$0xff] %v3776_v52  ;;  %v6570_v5 = vmax.f32 %v3776_v52, 0.0  ;;  %v262_v52 = vld [vmem:[%s3381_s28 + $0x1a0] sm:$0xff] }
 0x102   : > { %v769_v24 = vpop.f32.mrb[8].mxu0  ;;  %v1105_v25 = vpop.f32.mrb[8].mxu1  ;;  %v6575_v44 = vmax.f32 %v3741_v36, 0.0  ;;  %6712 = vst [vmem:[#allocation2_spill] sm:$0xff] %v3764_v45  ;;  %v6572_v61 = vmax.f32 %v3764_v45, 0.0 }
 0x103   : > { %2300 = vrot.lane.b32.xlu0 %v6585_v20, %s3277_s30  ;;  %v771_v27 = vpop.f32.mrb[9].mxu0  ;;  %v1107_v28 = vpop.f32.mrb[9].mxu1  ;;  %v3789_v0 = vadd.f32 %v769_v24, %v3640_v46  ;;  %v3814_v16 = vadd.f32 %v1105_v25, %v3640_v46 }
 0x104   : > { %1747 = vrot.lane.b32.xlu1 %v6581_v19, %s3277_s30  ;;  %v3801_v6 = vadd.f32 %v771_v27, %v3643_v47  ;;  %v3826_v24 = vadd.f32 %v1107_v28, %v3643_v47  ;;  %v257_v27 = vld [vmem:[%s3381_s28 + $0x178] sm:$0xff] }
 0x105   : > { %6714 = vst [vmem:[#allocation4_spill] sm:$0xff] %v3789_v0  ;;  %v6571_v15 = vmax.f32 %v3789_v0, 0.0  ;;  %6716 = vst [vmem:[#allocation6_spill] sm:$0xff] %v3814_v16  ;;  %3109 = vmatmul.mubr.msk.f32.gmra.mrb[94].mxu0 %vm345_vm0, %v257_v27  ;;  %v6577_v41 = vmax.f32 %v3814_v16, 0.0 }
 0x106   : > { %v3731_v33 = vpop.f32.mrb[10].mxu0  ;;  %v3733_v34 = vpop.f32.mrb[10].mxu1  ;;  %6715 = vst [vmem:[#allocation5_spill] sm:$0xff] %v3801_v6  ;;  %v6574_v22 = vmax.f32 %v3801_v6, 0.0  ;;  %6717 = vst [vmem:[#allocation7_spill] sm:$0xff] %v3826_v24  ;;  %1031 = vmatprep.mubr.f32.mxu0 %v6596_v7  ;;  %v317_v6 = vld [vmem:[%s3381_s28 + $0x358] sm:$0xff] }
 0x107   : > { %2412 = vrot.lane.b32.xlu0 %v6582_v30, %s3277_s30  ;;  %v777_v37 = vpop.f32.mrb[11].mxu0  ;;  %v3743_v38 = vpop.f32.mrb[11].mxu1  ;;  %v3852_v27 = vadd.f32 %v3731_v33, %v3640_v46 }
 0x108   : > { %2302 = vrot.lane.b32.xlu1 %v6579_v32, %s3277_s30  ;;  %v3839_v54 = vadd.f32 %v777_v37, %v3643_v47 }
 0x109   : > { %6719 = vst [vmem:[#allocation9_spill] sm:$0xff] %v3852_v27 }
 0x10a   : > { %v3754_v42 = vpop.f32.mrb[12].mxu0  ;;  %v3756_v43 = vpop.f32.mrb[12].mxu1  ;;  %6718 = vst [vmem:[#allocation8_spill] sm:$0xff] %v3839_v54 }
 0x10b   : > { %1859 = vrot.lane.b32.xlu0 %v6578_v35, %s3277_s30  ;;  %v3766_v48 = vpop.f32.mrb[13].mxu0  ;;  %v3768_v49 = vpop.f32.mrb[13].mxu1 }
 0x10c   : > { %2414 = vrot.lane.b32.xlu1 %v6576_v39, %s3277_s30  ;;  %v6586_v39 = vmax.f32 %v3852_v27, 0.0  ;;  %v316_v27 = vld [vmem:[%s3381_s28 + $0x350] sm:$0xff] }
 0x10e   : > { %v3779_v58 = vpop.f32.mrb[14].mxu0  ;;  %v3781_v60 = vpop.f32.mrb[14].mxu1 }
 0x10f   : > { %2304 = vrot.lane.b32.xlu0 %v6575_v44, %s3277_s30  ;;  %v3791_v1 = vpop.f32.mrb[15].mxu0  ;;  %v3793_v4 = vpop.f32.mrb[15].mxu1 }
 0x110   : > { %1749 = vrot.lane.b32.xlu1 %v6573_v50, %s3277_s30  ;;  %v6583_v50 = vmax.f32 %v3839_v54, 0.0 }
 0x112   : > { %v3804_v10 = vpop.f32.mrb[16].mxu0  ;;  %v3806_v14 = vpop.f32.mrb[16].mxu1 }
 0x113   : > { %2416 = vrot.lane.b32.xlu0 %v6572_v61, %s3277_s30  ;;  %v3816_v17 = vpop.f32.mrb[17].mxu0  ;;  %v3818_v18 = vpop.f32.mrb[17].mxu1 }
 0x114   : > { %1861 = vrot.lane.b32.xlu1 %v6570_v5, %s3277_s30  ;;  %v6580_v5 = vmax.f32 %v3826_v24, 0.0  ;;  %v261_v24 = vld [vmem:[%s3381_s28 + $0x198] sm:$0xff] }
 0x116   : > { %v3829_v31 = vpop.f32.mrb[18].mxu0  ;;  %v3831_v25 = vpop.f32.mrb[18].mxu1 }
 0x117   : > { %1751 = vrot.lane.b32.xlu0 %v6571_v15, %s3277_s30  ;;  %v3841_v9 = vpop.f32.mrb[19].mxu0  ;;  %v3843_v28 = vpop.f32.mrb[19].mxu1  ;;  %v313_v15 = vld [vmem:[%s3381_s28 + $0x338] sm:$0xff] }
 0x118   : > { %2306 = vrot.lane.b32.xlu1 %v6574_v22, %s3277_s30  ;;  %3165 = vmatmul.mubr.msk.f32.gmra.mrb[94].mxu1 %vm345_vm0, %v313_v15  ;;  %v3866_v22 = vadd.f32 %v3743_v38, %v3643_v47  ;;  %v3879_v15 = vadd.f32 %v3733_v34, %v3640_v46 }
 0x119   : > { %1367 = vmatprep.mubr.f32.mxu1 %v6596_v7 }
 0x11a   : > { %v3855_v37 = vpop.f32.mrb[20].mxu0  ;;  %v3857_v61 = vpop.f32.mrb[20].mxu1  ;;  %6720 = vst [vmem:[#allocation10_spill] sm:$0xff] %v3866_v22  ;;  %6721 = vst [vmem:[#allocation11_spill] sm:$0xff] %v3879_v15  ;;  %v6589_v32 = vmax.f32 %v3866_v22, 0.0  ;;  %v6592_v30 = vmax.f32 %v3879_v15, 0.0 }
 0x11b   : > { %1863 = vrot.lane.b32.xlu0 %v6577_v41, %s3277_s30  ;;  %v3868_v44 = vpop.f32.mrb[21].mxu0  ;;  %v3870_v33 = vpop.f32.mrb[21].mxu1  ;;  %v258_v41 = vld [vmem:[%s3381_s28 + $0x180] sm:$0xff]  ;;  %v6731_v15 = vmov 0.0  }
 0x11c   : > { %2418 = vrot.lane.b32.xlu1 %v6580_v5, %s3277_s30  ;;  %3110 = vmatmul.mubr.msk.f32.gmra.mrb[96].mxu0 %vm345_vm0, %v258_v41  ;;  %v3893_v5 = vadd.f32 %v3754_v42, %v3640_v46  ;;  %v3906_v41 = vadd.f32 %v3766_v48, %v3643_v47 }
 0x11d   : > { %1037 = vmatprep.mubr.f32.mxu0 %v6596_v7 }
 0x11e   : > { %v3882_v38 = vpop.f32.mrb[22].mxu0  ;;  %v3884_v35 = vpop.f32.mrb[22].mxu1  ;;  %6722 = vst [vmem:[#allocation12_spill] sm:$0xff] %v3893_v5  ;;  %6723 = vst [vmem:[#allocation13_spill] sm:$0xff] %v3906_v41  ;;  %v6594_v20 = vmax.f32 %v3893_v5, 0.0 }
 0x11f   : > { %2308 = vrot.lane.b32.xlu0 %v6583_v50, %s3277_s30  ;;  %v3895_v19 = vpop.f32.mrb[23].mxu0  ;;  %v3897_v34 = vpop.f32.mrb[23].mxu1  ;;  %v314_v50 = vld [vmem:[%s3381_s28 + $0x340] sm:$0xff] }
 0x120   : > { %1753 = vrot.lane.b32.xlu1 %v6586_v39, %s3277_s30  ;;  %3166 = vmatmul.mubr.msk.f32.gmra.mrb[96].mxu1 %vm345_vm0, %v314_v50  ;;  %v3920_v39 = vadd.f32 %v3756_v43, %v3640_v46  ;;  %v3933_v50 = vadd.f32 %v3768_v49, %v3643_v47 }
 0x121   : > { %1373 = vmatprep.mubr.f32.mxu1 %v6596_v7 }
 0x122   : > { %v3909_v42 = vpop.f32.mrb[24].mxu0  ;;  %v3911_v11 = vpop.f32.mrb[24].mxu1  ;;  %6724 = vst [vmem:[#allocation14_spill] sm:$0xff] %v3920_v39  ;;  %6725 = vst [vmem:[#allocation15_spill] sm:$0xff] %v3933_v50  ;;  %v6729_v2 = vmax.f32 %v3920_v39, 0.0 }
 0x123   : > { %2420 = vrot.lane.b32.xlu0 %v6589_v32, %s3277_s30  ;;  %v3922_v8 = vpop.f32.mrb[25].mxu0  ;;  %v3924_v48 = vpop.f32.mrb[25].mxu1  ;;  %v259_v32 = vld [vmem:[%s3381_s28 + $0x188] sm:$0xff] }
 0x124   : > { %1865 = vrot.lane.b32.xlu1 %v6592_v30, %s3277_s30  ;;  %3111 = vmatmul.mubr.msk.f32.gmra.mrb[98].mxu0 %vm345_vm0, %v259_v32  ;;  %v3947_v30 = vadd.f32 %v3791_v1, %v3643_v47  ;;  %v6727_v32 = vmax.f32 %v3906_v41, 0.0 }
 0x125   : > { %1043 = vmatprep.mubr.f32.mxu0 %v6596_v7  ;;  %3167 = vmatmul.mubr.msk.f32.gmra.mrb[98].mxu1 %vm345_vm0, %v315_v59  ;;  %v6732_v59 = vmax.f32 %v3933_v50, 0.0  ;;  %v260_v7 = vld [vmem:[%s3381_s28 + $0x190] sm:$0xff] }
 0x126   : > { %v3936_v43 = vpop.f32.mrb[26].mxu0  ;;  %v3938_v62 = vpop.f32.mrb[26].mxu1  ;;  %6726 = vst [vmem:[#allocation16_spill] sm:$0xff] %v3947_v30  ;;  %1379 = vmatprep.mubr.f32.mxu1 %v6731_v15  ;;  %v6734_v22 = vmax.f32 %v3947_v30, 0.0 }
 0x127   : > { %1755 = vrot.lane.b32.xlu0 %v6594_v20, %s3277_s30  ;;  %v3949_v57 = vpop.f32.mrb[27].mxu0  ;;  %v3951_v49 = vpop.f32.mrb[27].mxu1  ;;  %v3960_v20 = vadd.f32 %v3779_v58, %v3640_v46 }
 0x128   : > { %2310 = vrot.lane.b32.xlu1 %v6727_v32, %s3277_s30  ;;  %v3974_v32 = vadd.f32 %v3793_v4, %v3643_v47  ;;  %3112 = vmatmul.mubr.msk.f32.gmra.mrb[100].mxu0 %vm345_vm0, %v260_v7 }
 0x129   : > { %6728 = vst [vmem:[#allocation17_spill] sm:$0xff] %v3960_v20  ;;  %1049 = vmatprep.mubr.f32.mxu0 %v6731_v15  ;;  %v6736_v7 = vmax.f32 %v3960_v20, 0.0  ;;  %3168 = vmatmul.mubr.msk.f32.gmra.mrb[100].mxu1 %vm345_vm0, %v316_v27 }
 0x12a   : > { %v3963_v1 = vpop.f32.mrb[28].mxu0  ;;  %v3965_v5 = vpop.f32.mrb[28].mxu1  ;;  %6730 = vst [vmem:[#allocation18_spill] sm:$0xff] %v3974_v32  ;;  %v6738_v54 = vmax.f32 %v3974_v32, 0.0  ;;  %1385 = vmatprep.mubr.f32.mxu1 %v6731_v15 }
 0x12b   : > { %1867 = vrot.lane.b32.xlu0 %v6729_v2, %s3277_s30  ;;  %v3976_v41 = vpop.f32.mrb[29].mxu0  ;;  %v3978_v58 = vpop.f32.mrb[29].mxu1  ;;  %v3987_v2 = vadd.f32 %v3781_v60, %v3640_v46 }
 0x12c   : > { %2422 = vrot.lane.b32.xlu1 %v6732_v59, %s3277_s30  ;;  %v4001_v59 = vadd.f32 %v3804_v10, %v3640_v46  ;;  %3113 = vmatmul.mubr.msk.f32.gmra.mrb[102].mxu0 %vm345_vm0, %v261_v24 }
 0x12d   : > { %6733 = vst [vmem:[#allocation19_spill] sm:$0xff] %v3987_v2  ;;  %v6740_v27 = vmax.f32 %v3987_v2, 0.0  ;;  %1055 = vmatprep.mubr.f32.mxu0 %v6731_v15  ;;  %3169 = vmatmul.mubr.msk.f32.gmra.mrb[102].mxu1 %vm345_vm0, %v317_v6 }
 0x12e   : > { %v3990_v4 = vpop.f32.mrb[30].mxu0  ;;  %v3992_v39 = vpop.f32.mrb[30].mxu1  ;;  %6735 = vst [vmem:[#allocation20_spill] sm:$0xff] %v4001_v59  ;;  %v6742_v16 = vmax.f32 %v4001_v59, 0.0  ;;  %1391 = vmatprep.mubr.f32.mxu1 %v6731_v15 }
 0x12f   : > { %2312 = vrot.lane.b32.xlu0 %v6734_v22, %s3277_s30  ;;  %v4003_v50 = vpop.f32.mrb[31].mxu0  ;;  %v4005_v60 = vpop.f32.mrb[31].mxu1  ;;  %v4014_v22 = vadd.f32 %v3816_v17, %v3643_v47 }
 0x130   : > { %1757 = vrot.lane.b32.xlu1 %v6736_v7, %s3277_s30  ;;  %v4028_v7 = vadd.f32 %v3806_v14, %v3640_v46  ;;  %3114 = vmatmul.mubr.msk.f32.gmra.mrb[104].mxu0 %vm345_vm0, %v262_v52 }
 0x131   : > { %6737 = vst [vmem:[#allocation21_spill] sm:$0xff] %v4014_v22  ;;  %v6744_v24 = vmax.f32 %v4014_v22, 0.0  ;;  %1061 = vmatprep.mubr.f32.mxu0 %v6731_v15 }
 0x132   : > { %v4017_v10 = vpop.f32.mrb[32].mxu0  ;;  %v4019_v30 = vpop.f32.mrb[32].mxu1  ;;  %6739 = vst [vmem:[#allocation22_spill] sm:$0xff] %v4028_v7  ;;  %v6746_v0 = vmax.f32 %v4028_v7, 0.0 }
 0x133   : > { %2424 = vrot.lane.b32.xlu0 %v6738_v54, %s3277_s30  ;;  %v4030_v20 = vpop.f32.mrb[33].mxu0  ;;  %v4032_v17 = vpop.f32.mrb[33].mxu1  ;;  %v4041_v54 = vadd.f32 %v3818_v18, %v3643_v47 }
 0x134   : > { %1869 = vrot.lane.b32.xlu1 %v6740_v27, %s3277_s30  ;;  %v4055_v27 = vadd.f32 %v3841_v9, %v3643_v47 }
 0x135   : > { %6741 = vst [vmem:[#allocation23_spill] sm:$0xff] %v4041_v54  ;;  %v6749_v6 = vmax.f32 %v4041_v54, 0.0 }
 0x136   : > { %v4044_v14 = vpop.f32.mrb[34].mxu0  ;;  %v4046_v32 = vpop.f32.mrb[34].mxu1  ;;  %6743 = vst [vmem:[#allocation24_spill] sm:$0xff] %v4055_v27  ;;  %v6752_v45 = vmax.f32 %v4055_v27, 0.0 }
 0x137   : > { %1759 = vrot.lane.b32.xlu0 %v6742_v16, %s3277_s30  ;;  %v4057_v2 = vpop.f32.mrb[35].mxu0  ;;  %v4059_v18 = vpop.f32.mrb[35].mxu1  ;;  %v4068_v16 = vadd.f32 %v3829_v31, %v3640_v46 }
 0x138   : > { %2314 = vrot.lane.b32.xlu1 %v6744_v24, %s3277_s30  ;;  %v4082_v24 = vadd.f32 %v3843_v28, %v3643_v47 }
 0x139   : > { %6745 = vst [vmem:[#allocation25_spill] sm:$0xff] %v4068_v16  ;;  %v6755_v52 = vmax.f32 %v4068_v16, 0.0 }
 0x13a   : > { %v4071_v9 = vpop.f32.mrb[36].mxu0  ;;  %v4073_v59 = vpop.f32.mrb[36].mxu1  ;;  %6747 = vst [vmem:[#allocation26_spill] sm:$0xff] %v4082_v24 }
 0x13b   : > { %1871 = vrot.lane.b32.xlu0 %v6746_v0, %s3277_s30  ;;  %v4084_v22 = vpop.f32.mrb[37].mxu0  ;;  %v4086_v31 = vpop.f32.mrb[37].mxu1  ;;  %v4095_v0 = vadd.f32 %v3831_v25, %v3640_v46 }
 0x13c   : > { %6748 = vst [vmem:[#allocation27_spill] sm:$0xff] %v4086_v31  ;;  %2426 = vrot.lane.b32.xlu1 %v6749_v6, %s3277_s30  ;;  %v4109_v6 = vadd.f32 %v3855_v37, %v3640_v46  ;;  %v318_v31 = vld [vmem:[%s3381_s28 + $0x360] sm:$0xff] }
 0x13d   : > { %6750 = vst [vmem:[#allocation28_spill] sm:$0xff] %v4095_v0  ;;  %3170 = vmatmul.mubr.msk.f32.gmra.mrb[104].mxu1 %vm345_vm0, %v318_v31  ;;  %v6761_v31 = vmax.f32 %v4095_v0, 0.0 }
 0x13e   : > { %v4098_v28 = vpop.f32.mrb[38].mxu0  ;;  %v4100_v7 = vpop.f32.mrb[38].mxu1  ;;  %6753 = vst [vmem:[#allocation30_spill] sm:$0xff] %v4109_v6  ;;  %1397 = vmatprep.mubr.f32.mxu1 %v6731_v15 }
 0x13f   : > { %6751 = vst [vmem:[#allocation29_spill] sm:$0xff] %v4100_v7  ;;  %2316 = vrot.lane.b32.xlu0 %v6752_v45, %s3277_s30  ;;  %v4111_v54 = vpop.f32.mrb[39].mxu0  ;;  %v4113_v25 = vpop.f32.mrb[39].mxu1  ;;  %v4122_v45 = vadd.f32 %v3868_v44, %v3643_v47  ;;  %v6758_v7 = vmax.f32 %v4082_v24, 0.0 }
 0x140   : > { %6754 = vst [vmem:[#allocation31_spill] sm:$0xff] %v4113_v25  ;;  %1761 = vrot.lane.b32.xlu1 %v6755_v52, %s3277_s30  ;;  %v4136_v52 = vadd.f32 %v3857_v61, %v3640_v46  ;;  %v4149_v25 = vadd.f32 %v3870_v33, %v3643_v47 }
 0x141   : > { %6756 = vst [vmem:[#allocation32_spill] sm:$0xff] %v4122_v45 }
 0x142   : > { %v4125_v37 = vpop.f32.mrb[40].mxu0  ;;  %v4127_v27 = vpop.f32.mrb[40].mxu1  ;;  %6759 = vst [vmem:[#allocation34_spill] sm:$0xff] %v4136_v52  ;;  %6762 = vst [vmem:[#allocation36_spill] sm:$0xff] %v4149_v25 }
 0x143   : > { %6757 = vst [vmem:[#allocation33_spill] sm:$0xff] %v4127_v27  ;;  %2428 = vrot.lane.b32.xlu0 %v6758_v7, %s3277_s30  ;;  %v4138_v16 = vpop.f32.mrb[41].mxu0  ;;  %v4140_v44 = vpop.f32.mrb[41].mxu1  ;;  %v263_v7 = vld [vmem:[%s3381_s28 + $0x1a8] sm:$0xff]  ;;  %v6765_v27 = vmax.f32 %v4109_v6, 0.0  ;;  %v264_v6 = vld [vmem:[%s3381_s28 + $0x1b0] sm:$0xff] }
 0x144   : > { %6760 = vst [vmem:[#allocation35_spill] sm:$0xff] %v4140_v44  ;;  %1873 = vrot.lane.b32.xlu1 %v6761_v31, %s3277_s30  ;;  %3115 = vmatmul.mubr.msk.f32.gmra.mrb[106].mxu0 %vm345_vm0, %v263_v7  ;;  %v4163_v31 = vadd.f32 %v3895_v19, %v3643_v47  ;;  %v6768_v7 = vmax.f32 %v4122_v45, 0.0  ;;  %v4176_v44 = vadd.f32 %v3882_v38, %v3640_v46 }
 0x145   : > { %1067 = vmatprep.mubr.f32.mxu0 %v6731_v15 }
 0x146   : > { %v4152_v61 = vpop.f32.mrb[42].mxu0  ;;  %v4154_v24 = vpop.f32.mrb[42].mxu1  ;;  %6766 = vst [vmem:[#allocation39_spill] sm:$0xff] %v4163_v31  ;;  %6769 = vst [vmem:[#allocation41_spill] sm:$0xff] %v4176_v44 }
 0x147   : > { %6763 = vst [vmem:[#allocation37_spill] sm:$0xff] %v4152_v61  ;;  %6764 = vst [vmem:[#allocation38_spill] sm:$0xff] %v4154_v24  ;;  %1763 = vrot.lane.b32.xlu0 %v6765_v27, %s3277_s30  ;;  %v4165_v33 = vpop.f32.mrb[43].mxu0  ;;  %v4167_v0 = vpop.f32.mrb[43].mxu1  ;;  %v319_v61 = vld [vmem:[%s3381_s28 + $0x368] sm:$0xff]  ;;  %v6772_v24 = vmax.f32 %v4136_v52, 0.0 }
 0x148   : > { %6767 = vst [vmem:[#allocation40_spill] sm:$0xff] %v4167_v0  ;;  %2318 = vrot.lane.b32.xlu1 %v6768_v7, %s3277_s30  ;;  %v4190_v7 = vadd.f32 %v3897_v34, %v3643_v47  ;;  %3116 = vmatmul.mubr.msk.f32.gmra.mrb[108].mxu0 %vm345_vm0, %v264_v6  ;;  %v4203_v0 = vadd.f32 %v3884_v35, %v3640_v46  ;;  %v320_v6 = vld [vmem:[%s3381_s28 + $0x370] sm:$0xff]  ;;  %v6779_v52 = vmax.f32 %v4176_v44, 0.0 }
 0x149   : > { %3171 = vmatmul.mubr.msk.f32.gmra.mrb[106].mxu1 %vm345_vm0, %v319_v61  ;;  %1073 = vmatprep.mubr.f32.mxu0 %v6731_v15  ;;  %v4219_v35 = vadd.f32 %v3909_v42, %v3640_v46  ;;  %v4270_v44 = vadd.f32 %v3949_v57, %v3643_v47  ;;  %v4306_v57 = vadd.f32 %v3938_v62, %v3640_v46 }
 0x14a   : > { %v4178_v27 = vpop.f32.mrb[44].mxu0  ;;  %v4180_v19 = vpop.f32.mrb[44].mxu1  ;;  %6773 = vst [vmem:[#allocation44_spill] sm:$0xff] %v4190_v7  ;;  %6775 = vst [vmem:[#allocation45_spill] sm:$0xff] %v4203_v0  ;;  %1403 = vmatprep.mubr.f32.mxu1 %v6731_v15  ;;  %v6782_v15 = vmax.f32 %v4190_v7, 0.0  ;;  %v4342_v62 = vadd.f32 %v3965_v5, %v3640_v46  ;;  %v4378_v5 = vadd.f32 %v3990_v4, %v3640_v46 }
 0x14b   : > { %6770 = vst [vmem:[#allocation42_spill] sm:$0xff] %v4178_v27  ;;  %6771 = vst [vmem:[#allocation43_spill] sm:$0xff] %v4180_v19  ;;  %1875 = vrot.lane.b32.xlu0 %v6772_v24, %s3277_s30  ;;  %v4192_v45 = vpop.f32.mrb[45].mxu0  ;;  %v4194_v38 = vpop.f32.mrb[45].mxu1  ;;  %v6774_v27 = vmax.f32 %v4149_v25, 0.0  ;;  %v4231_v19 = vadd.f32 %v3922_v8, %v3643_v47  ;;  %v6788_v7 = vmax.f32 %v4219_v35, 0.0  ;;  %v4392_v4 = vadd.f32 %v4005_v60, %v3643_v47 }
 0x14c   : > { %6778 = vst [vmem:[#allocation47_spill] sm:$0xff] %v4219_v35  ;;  %6789 = vst [vmem:[#allocation54_spill] sm:$0xff] %v4270_v44  ;;  %v4411_v60 = vadd.f32 %v3992_v39, %v3640_v46 }
 0x14d   : > { %2430 = vrot.lane.b32.xlu1 %v6774_v27, %s3277_s30  ;;  %v6777_v27 = vmax.f32 %v4163_v31, 0.0  ;;  %6780 = vst [vmem:[#allocation48_spill] sm:$0xff] %v4231_v19  ;;  %3172 = vmatmul.mubr.msk.f32.gmra.mrb[108].mxu1 %vm345_vm0, %v320_v6  ;;  %6797 = vst [vmem:[#allocation59_spill] sm:$0xff] %v4306_v57 }
 0x14e   : > { %v4208_v34 = vpop.f32.mrb[46].mxu0  ;;  %v4210_v24 = vpop.f32.mrb[46].mxu1 }
 0x14f   : > { %6776 = vst [vmem:[#allocation46_spill] sm:$0xff] %v4210_v24  ;;  %2320 = vrot.lane.b32.xlu0 %v6777_v27, %s3277_s30  ;;  %v4221_v61 = vpop.f32.mrb[47].mxu0  ;;  %v4223_v25 = vpop.f32.mrb[47].mxu1  ;;  %v265_v27 = vld [vmem:[%s3381_s28 + $0x1b8] sm:$0xff] }
 0x150   : > { %3117 = vmatmul.mubr.msk.f32.gmra.mrb[110].mxu0 %vm345_vm0, %v265_v27  ;;  %v4258_v27 = vadd.f32 %v3924_v48, %v3643_v47  ;;  %v4294_v48 = vadd.f32 %v3951_v49, %v3643_v47  ;;  %v4330_v49 = vadd.f32 %v3976_v41, %v3643_v47  ;;  %v4366_v41 = vadd.f32 %v4003_v50, %v3643_v47 }
 0x151   : > { %1765 = vrot.lane.b32.xlu1 %v6779_v52, %s3277_s30  ;;  %v4246_v52 = vadd.f32 %v3911_v11, %v3640_v46  ;;  %v4282_v11 = vadd.f32 %v3936_v43, %v3640_v46  ;;  %v4318_v43 = vadd.f32 %v3963_v1, %v3640_v46  ;;  %v4354_v1 = vadd.f32 %v3978_v58, %v3643_v47 }
 0x152   : > { %v4235_v31 = vpop.f32.mrb[48].mxu0  ;;  %v4237_v42 = vpop.f32.mrb[48].mxu1  ;;  %6785 = vst [vmem:[#allocation51_spill] sm:$0xff] %v4258_v27  ;;  %6795 = vst [vmem:[#allocation58_spill] sm:$0xff] %v4294_v48  ;;  %v6825_v39 = vmax.f32 %v4366_v41, 0.0 }
 0x153   : > { %6781 = vst [vmem:[#allocation49_spill] sm:$0xff] %v4237_v42  ;;  %2432 = vrot.lane.b32.xlu0 %v6782_v15, %s3277_s30  ;;  %6783 = vst [vmem:[#allocation50_spill] sm:$0xff] %v4246_v52  ;;  %v4248_v8 = vpop.f32.mrb[49].mxu0  ;;  %v4250_v6 = vpop.f32.mrb[49].mxu1  ;;  %v6784_v42 = vmax.f32 %v4203_v0, 0.0 }
 0x154   : > { %6791 = vst [vmem:[#allocation55_spill] sm:$0xff] %v4282_v11  ;;  %6801 = vst [vmem:[#allocation62_spill] sm:$0xff] %v4318_v43 }
 0x155   : > { %1877 = vrot.lane.b32.xlu1 %v6784_v42, %s3277_s30  ;;  %6803 = vst [vmem:[#allocation63_spill] sm:$0xff] %v4330_v49 }
 0x156   : > { %v4260_v24 = vpop.f32.mrb[50].mxu0  ;;  %v4262_v15 = vpop.f32.mrb[50].mxu1 }
 0x157   : > { %6786 = vst [vmem:[#allocation52_spill] sm:$0xff] %v4260_v24  ;;  %6787 = vst [vmem:[#allocation53_spill] sm:$0xff] %v4262_v15  ;;  %1767 = vrot.lane.b32.xlu0 %v6788_v7, %s3277_s30  ;;  %v4272_v0 = vpop.f32.mrb[51].mxu0  ;;  %v4274_v42 = vpop.f32.mrb[51].mxu1  ;;  %v6790_v24 = vmax.f32 %v4231_v19, 0.0  ;;  %v6794_v15 = vmax.f32 %v4246_v52, 0.0 }
 0x159   : > { %2322 = vrot.lane.b32.xlu1 %v6790_v24, %s3277_s30 }
 0x15a   : > { %v4284_v35 = vpop.f32.mrb[52].mxu0  ;;  %v4286_v7 = vpop.f32.mrb[52].mxu1 }
 0x15b   : > { %6792 = vst [vmem:[#allocation56_spill] sm:$0xff] %v4284_v35  ;;  %6793 = vst [vmem:[#allocation57_spill] sm:$0xff] %v4286_v7  ;;  %1879 = vrot.lane.b32.xlu0 %v6794_v15, %s3277_s30  ;;  %v4296_v19 = vpop.f32.mrb[53].mxu0  ;;  %v4298_v24 = vpop.f32.mrb[53].mxu1  ;;  %v6796_v35 = vmax.f32 %v4258_v27, 0.0  ;;  %v6800_v7 = vmax.f32 %v4270_v44, 0.0 }
 0x15d   : > { %2434 = vrot.lane.b32.xlu1 %v6796_v35, %s3277_s30 }
 0x15e   : > { %v4308_v52 = vpop.f32.mrb[54].mxu0  ;;  %v4310_v15 = vpop.f32.mrb[54].mxu1 }
 0x15f   : > { %6798 = vst [vmem:[#allocation60_spill] sm:$0xff] %v4308_v52  ;;  %6799 = vst [vmem:[#allocation61_spill] sm:$0xff] %v4310_v15  ;;  %2324 = vrot.lane.b32.xlu0 %v6800_v7, %s3277_s30  ;;  %v4320_v27 = vpop.f32.mrb[55].mxu0  ;;  %v4322_v35 = vpop.f32.mrb[55].mxu1  ;;  %v6802_v52 = vmax.f32 %v4282_v11, 0.0  ;;  %v6806_v15 = vmax.f32 %v4294_v48, 0.0 }
 0x161   : > { %1769 = vrot.lane.b32.xlu1 %v6802_v52, %s3277_s30 }
 0x162   : > { %v4332_v44 = vpop.f32.mrb[56].mxu0  ;;  %v4334_v7 = vpop.f32.mrb[56].mxu1 }
 0x163   : > { %6804 = vst [vmem:[#allocation64_spill] sm:$0xff] %v4332_v44  ;;  %6805 = vst [vmem:[#allocation65_spill] sm:$0xff] %v4334_v7  ;;  %2436 = vrot.lane.b32.xlu0 %v6806_v15, %s3277_s30  ;;  %v4344_v11 = vpop.f32.mrb[57].mxu0  ;;  %v4346_v52 = vpop.f32.mrb[57].mxu1  ;;  %v6808_v44 = vmax.f32 %v4306_v57, 0.0  ;;  %v6811_v7 = vmax.f32 %v4318_v43, 0.0 }
 0x164   : > { %6807 = vst [vmem:[#allocation66_spill] sm:$0xff] %v4346_v52  ;;  %v6815_v43 = vmax.f32 %v3648_v51, 0.0 }
 0x165   : > { %1881 = vrot.lane.b32.xlu1 %v6808_v44, %s3277_s30 }
 0x166   : > { %v4356_v48 = vpop.f32.mrb[58].mxu0  ;;  %v4358_v15 = vpop.f32.mrb[58].mxu1 }
 0x167   : > { %6809 = vst [vmem:[#allocation67_spill] sm:$0xff] %v4356_v48  ;;  %6810 = vst [vmem:[#allocation68_spill] sm:$0xff] %v4358_v15  ;;  %1771 = vrot.lane.b32.xlu0 %v6811_v7, %s3277_s30  ;;  %v4368_v44 = vpop.f32.mrb[59].mxu0  ;;  %v4370_v57 = vpop.f32.mrb[59].mxu1  ;;  %v6814_v15 = vmax.f32 %v4330_v49, 0.0  ;;  %v6818_v49 = vmax.f32 %v4342_v62, 0.0 }
 0x168   : > { %6812 = vst [vmem:[#allocation69_spill] sm:$0xff] %v4368_v44  ;;  %6813 = vst [vmem:[#allocation70_spill] sm:$0xff] %v4370_v57  ;;  %v6817_v57 = vmax.f32 %v3655_v55, 0.0 }
 0x169   : > { %2326 = vrot.lane.b32.xlu1 %v6814_v15, %s3277_s30  ;;  %v1744_v7 = vpop.permute.xlu0 %1743 }
 0x16a   : > { %v2076_v50 = vmax.f32 %v6815_v43, %v1744_v7  ;;  %v2299_v48 = vpop.permute.xlu1 %2298  ;;  %v4382_v52 = vpop.f32.mrb[60].mxu0  ;;  %v6822_v7 = vmax.f32 %v3651_v53, 0.0 }
 0x16b   : > { %6816 = vst [vmem:[#allocation71_spill] sm:$0xff] %v4382_v52  ;;  %v2631_v58 = vmax.f32 %v6817_v57, %v2299_v48  ;;  %1883 = vrot.lane.b32.xlu0 %v6818_v49, %s3277_s30  ;;  %v4394_v15 = vpop.f32.mrb[61].mxu0  ;;  %v4396_v51 = vpop.f32.mrb[60].mxu1  ;;  %v6821_v48 = vmax.f32 %v4354_v1, 0.0 }
 0x16c   : > { %6819 = vst [vmem:[#allocation72_spill] sm:$0xff] %v4394_v15  ;;  %6820 = vst [vmem:[#allocation73_spill] sm:$0xff] %v4396_v51  ;;  %v4413_v57 = vpop.f32.mrb[61].mxu1 }
 0x16d   : > { %2438 = vrot.lane.b32.xlu1 %v6821_v48, %s3277_s30  ;;  %v2742_v43 = vmax.f32 %v2076_v50, %v2631_v58  ;;  %v1856_v49 = vpop.permute.xlu0 %1855  ;;  %v6824_v48 = vmax.f32 %v3658_v56, 0.0  ;;  %v4429_v58 = vadd.f32 %v4017_v10, %v3640_v46  ;;  %v4441_v56 = vadd.f32 %v4030_v20, %v3643_v47 }
 0x16e   : > { %v2132_v44 = vmax.f32 %v6822_v7, %v1856_v49  ;;  %v2411_v51 = vpop.permute.xlu1 %2410  ;;  %v4417_v15 = vpop.f32.mrb[62].mxu0  ;;  %v6830_v49 = vmax.f32 %v4392_v4, 0.0 }
 0x16f   : > { %6823 = vst [vmem:[#allocation74_spill] sm:$0xff] %v4417_v15  ;;  %2854 = vst.msk [vmem:[%s4403_s6] sm:$0xff] %vm2853_vm1, %v2742_v43  ;;  %v2687_v52 = vmax.f32 %v6824_v48, %v2411_v51  ;;  %2328 = vrot.lane.b32.xlu0 %v6825_v39, %s3277_s30  ;;  %v4431_v53 = vpop.f32.mrb[63].mxu0  ;;  %v4433_v50 = vpop.f32.mrb[62].mxu1  ;;  %v6827_v43 = vmax.f32 %v4378_v5, 0.0 }
 0x170   : > { %6826 = vst [vmem:[#allocation75_spill] sm:$0xff] %v4433_v50  ;;  %v4443_v51 = vpop.f32.mrb[63].mxu1  ;;  %v6835_v50 = vmax.f32 %v3694_v13, 0.0  ;;  %v6838_v13 = vmax.f32 %v4441_v56, 0.0 }
 0x171   : > { %1773 = vrot.lane.b32.xlu1 %v6827_v43, %s3277_s30  ;;  %6828 = vst [vmem:[#allocation76_spill] sm:$0xff] %v4443_v51  ;;  %v2798_v7 = vmax.f32 %v2132_v44, %v2687_v52  ;;  %v1746_v48 = vpop.permute.xlu0 %1745  ;;  %v4455_v43 = vadd.f32 %v4019_v30, %v3640_v46  ;;  %v6832_v44 = vmax.f32 %v4411_v60, 0.0 }
 0x172   : > { %v1858_v10 = vpop.permute.xlu1 %1857  ;;  %v4445_v39 = vpop.f32.mrb[64].mxu0 }
 0x173   : > { %6829 = vst [vmem:[#allocation77_spill] sm:$0xff] %v4445_v39  ;;  %2910 = vst.msk [vmem:[%s4403_s6 + $0x1c0] sm:$0xff] %vm2853_vm1, %v2798_v7  ;;  %2440 = vrot.lane.b32.xlu0 %v6830_v49, %s3277_s30  ;;  %v4457_v20 = vpop.f32.mrb[65].mxu0  ;;  %v4465_v7 = vadd.f32 %v4032_v17, %v3643_v47  ;;  %v4467_v39 = vpop.f32.mrb[64].mxu1  ;;  %v6834_v49 = vmax.f32 %v3669_v63, 0.0  ;;  %v4481_v17 = vadd.f32 %v4057_v2, %v3643_v47  ;;  %v6841_v2 = vmax.f32 %v3708_v21, 0.0 }
 0x174   : > { %6831 = vst [vmem:[#allocation78_spill] sm:$0xff] %v4457_v20  ;;  %6833 = vst [vmem:[#allocation79_spill] sm:$0xff] %v4467_v39  ;;  %v4473_v52 = vpop.f32.mrb[65].mxu1  ;;  %v4511_v21 = vadd.f32 %v4059_v18, %v3643_v47  ;;  %v6846_v18 = vmax.f32 %v3719_v26, 0.0 }
 0x175   : > { %1885 = vrot.lane.b32.xlu1 %v6832_v44, %s3277_s30  ;;  %v2301_v55 = vpop.permute.xlu0 %2300  ;;  %v2077_v30 = vmax.f32 %v6834_v49, %v1746_v48  ;;  %6836 = vst [vmem:[#allocation80_spill] sm:$0xff] %v4473_v52  ;;  %v6837_v44 = vmax.f32 %v4429_v58, 0.0  ;;  %v6840_v49 = vmax.f32 %v3677_v3, 0.0  ;;  %v6844_v3 = vmax.f32 %v4455_v43, 0.0 }
 0x176   : > { %v2632_v20 = vmax.f32 %v6835_v50, %v2301_v55  ;;  %v1748_v51 = vpop.permute.xlu1 %1747  ;;  %v4489_v55 = vadd.f32 %v4044_v14, %v3640_v46  ;;  %v4491_v48 = vpop.f32.mrb[66].mxu0  ;;  %v6644_v14 = vmax.f32 %v4481_v17, 0.0 }
 0x177   : > { %1775 = vrot.lane.b32.xlu0 %v6837_v44, %s3277_s30  ;;  %6839 = vst [vmem:[#allocation81_spill] sm:$0xff] %v4491_v48  ;;  %v2133_v44 = vmax.f32 %v6840_v49, %v1858_v10  ;;  %v4499_v63 = vpop.f32.mrb[67].mxu0  ;;  %v6843_v48 = vmax.f32 %v3712_v23, 0.0 }
 0x178   : > { %v2743_v39 = vmax.f32 %v2077_v30, %v2632_v20  ;;  %v6643_v10 = vmax.f32 %v4489_v55, 0.0 }
 0x179   : > { %2330 = vrot.lane.b32.xlu1 %v6838_v13, %s3277_s30  ;;  %v2413_v50 = vpop.permute.xlu0 %2412  ;;  %v6842_v13 = vmax.f32 %v3691_v12, 0.0  ;;  %v6845_v12 = vmax.f32 %v4465_v7, 0.0 }
 0x17a   : > { %2855 = vst.msk [vmem:[%s4403_s6 + $0x8] sm:$0xff] %vm2853_vm1, %v2743_v39  ;;  %v2688_v20 = vmax.f32 %v6841_v2, %v2413_v50  ;;  %v2303_v30 = vpop.permute.xlu1 %2302 }
 0x17b   : > { %v2078_v15 = vmax.f32 %v6842_v13, %v1748_v51  ;;  %v2633_v52 = vmax.f32 %v6843_v48, %v2303_v30  ;;  %1887 = vrot.lane.b32.xlu0 %v6844_v3, %s3277_s30  ;;  %v4519_v51 = vadd.f32 %v4046_v32, %v3640_v46  ;;  %v4521_v48 = vpop.f32.mrb[66].mxu1  ;;  %v6847_v32 = vmax.f32 %v3726_v29, 0.0  ;;  %v4549_v3 = vpop.f32.mrb[68].mxu0 }
 0x17c   : > { %v2799_v39 = vmax.f32 %v2133_v44, %v2688_v20  ;;  %v4527_v44 = vpop.f32.mrb[67].mxu1  ;;  %v6641_v20 = vmax.f32 %v4511_v21, 0.0 }
 0x17d   : > { %2442 = vrot.lane.b32.xlu1 %v6845_v12, %s3277_s30  ;;  %v2744_v23 = vmax.f32 %v2078_v15, %v2633_v52  ;;  %v1860_v50 = vpop.permute.xlu0 %1859  ;;  %v4539_v15 = vadd.f32 %v4071_v9, %v3640_v46  ;;  %v6642_v26 = vmax.f32 %v4519_v51, 0.0  ;;  %v4547_v52 = vadd.f32 %v4084_v22, %v3643_v47  ;;  %v4553_v9 = vpop.f32.mrb[69].mxu0 }
 0x17e   : > { %2911 = vst.msk [vmem:[%s4403_s6 + $0x1c8] sm:$0xff] %vm2853_vm1, %v2799_v39  ;;  %v2134_v49 = vmax.f32 %v6846_v18, %v1860_v50  ;;  %v2415_v2 = vpop.permute.xlu1 %2414  ;;  %v6848_v39 = vmax.f32 %v3741_v36, 0.0  ;;  %v6849_v18 = vmax.f32 %v3751_v40, 0.0  ;;  %v4565_v22 = vadd.f32 %v4073_v59, %v3640_v46 }
 0x17f   : > { %2856 = vst.msk [vmem:[%s4403_s6 + $0x10] sm:$0xff] %vm2853_vm1, %v2744_v23  ;;  %v2689_v30 = vmax.f32 %v6847_v32, %v2415_v2  ;;  %2332 = vrot.lane.b32.xlu0 %v6644_v14, %s3277_s30  ;;  %v6645_v50 = vmax.f32 %v4539_v15, 0.0  ;;  %v6646_v36 = vmax.f32 %v4547_v52, 0.0 }
 0x181   : > { %1777 = vrot.lane.b32.xlu1 %v6643_v10, %s3277_s30  ;;  %v2800_v29 = vmax.f32 %v2134_v49, %v2689_v30  ;;  %v2305_v13 = vpop.permute.xlu0 %2304  ;;  %v6850_v49 = vld [vmem:[#allocation27_spill] sm:$0xff] }
 0x182   : > { %v2634_v12 = vmax.f32 %v6848_v39, %v2305_v13  ;;  %v1750_v23 = vpop.permute.xlu1 %1749  ;;  %v4573_v32 = vadd.f32 %v6850_v49, %v3643_v47  ;;  %v6852_v13 = vld [vmem:[#allocation2_spill] sm:$0xff]  ;;  %v4599_v49 = vadd.f32 %v4098_v28, %v3640_v46  ;;  %v6863_v28 = vmax.f32 %v4565_v22, 0.0 }
 0x183   : > { %2912 = vst.msk [vmem:[%s4403_s6 + $0x1d0] sm:$0xff] %vm2853_vm1, %v2800_v29  ;;  %v2079_v2 = vmax.f32 %v6849_v18, %v1750_v23  ;;  %2444 = vrot.lane.b32.xlu0 %v6641_v20, %s3277_s30  ;;  %v4575_v29 = vpop.f32.mrb[68].mxu1  ;;  %v6853_v39 = vmax.f32 %v6852_v13, 0.0 }
 0x184   : > { %6851 = vst [vmem:[#allocation27_spill] sm:$0xff] %v4575_v29  ;;  %v4579_v59 = vpop.f32.mrb[69].mxu1 }
 0x185   : > { %1889 = vrot.lane.b32.xlu1 %v6642_v26, %s3277_s30  ;;  %v2745_v40 = vmax.f32 %v2079_v2, %v2634_v12  ;;  %v2417_v30 = vpop.permute.xlu0 %2416  ;;  %6854 = vst [vmem:[#allocation2_spill] sm:$0xff] %v4579_v59  ;;  %v6855_v26 = vld [vmem:[#allocation3_spill] sm:$0xff]  ;;  %v4591_v12 = vadd.f32 %v4111_v54, %v3643_v47 }
 0x186   : > { %v2690_v23 = vmax.f32 %v6853_v39, %v2417_v30  ;;  %v1862_v18 = vpop.permute.xlu1 %1861  ;;  %v6856_v10 = vmax.f32 %v6855_v26, 0.0  ;;  %v6858_v30 = vld [vmem:[#allocation4_spill] sm:$0xff] }
 0x187   : > { %2857 = vst.msk [vmem:[%s4403_s6 + $0x18] sm:$0xff] %vm2853_vm1, %v2745_v40  ;;  %1779 = vrot.lane.b32.xlu0 %v6645_v50, %s3277_s30  ;;  %v4601_v40 = vpop.f32.mrb[70].mxu0  ;;  %v6859_v13 = vmax.f32 %v6858_v30, 0.0  ;;  %v6866_v30 = vmax.f32 %v4573_v32, 0.0  ;;  %v6870_v50 = vld [vmem:[#allocation6_spill] sm:$0xff] }
 0x188   : > { %v2135_v14 = vmax.f32 %v6856_v10, %v1862_v18  ;;  %6857 = vst [vmem:[#allocation3_spill] sm:$0xff] %v4601_v40  ;;  %v4605_v54 = vpop.f32.mrb[71].mxu0 }
 0x189   : > { %2334 = vrot.lane.b32.xlu1 %v6646_v36, %s3277_s30  ;;  %v1752_v10 = vpop.permute.xlu0 %1751  ;;  %6860 = vst [vmem:[#allocation4_spill] sm:$0xff] %v4605_v54  ;;  %v6861_v36 = vld [vmem:[#allocation5_spill] sm:$0xff] }
 0x18a   : > { %v2801_v26 = vmax.f32 %v2135_v14, %v2690_v23  ;;  %v2080_v39 = vmax.f32 %v6859_v13, %v1752_v10  ;;  %v2307_v18 = vpop.permute.xlu1 %2306  ;;  %v6862_v2 = vmax.f32 %v6861_v36, 0.0  ;;  %v6864_v14 = vld [vmem:[#allocation31_spill] sm:$0xff] }
 0x18b   : > { %1891 = vrot.lane.b32.xlu0 %v6863_v28, %s3277_s30  ;;  %v4617_v23 = vadd.f32 %v6864_v14, %v3643_v47  ;;  %v6871_v28 = vmax.f32 %v6870_v50, 0.0  ;;  %v6891_v50 = vld [vmem:[#allocation10_spill] sm:$0xff] }
 0x18c   : > { %2913 = vst.msk [vmem:[%s4403_s6 + $0x1d8] sm:$0xff] %vm2853_vm1, %v2801_v26  ;;  %v2635_v20 = vmax.f32 %v6862_v2, %v2307_v18  ;;  %v6867_v26 = vld [vmem:[#allocation29_spill] sm:$0xff]  ;;  %v4627_v18 = vpop.f32.mrb[70].mxu1 }
 0x18d   : > { %6865 = vst [vmem:[#allocation5_spill] sm:$0xff] %v4617_v23  ;;  %2446 = vrot.lane.b32.xlu1 %v6866_v30, %s3277_s30  ;;  %v4625_v13 = vadd.f32 %v6867_v26, %v3640_v46  ;;  %v1864_v2 = vpop.permute.xlu0 %1863  ;;  %6869 = vst [vmem:[#allocation29_spill] sm:$0xff] %v4627_v18  ;;  %v4631_v14 = vpop.f32.mrb[71].mxu1  ;;  %v6873_v30 = vld [vmem:[#allocation7_spill] sm:$0xff]  ;;  %v6876_v26 = vmax.f32 %v4599_v49, 0.0 }
 0x18e   : > { %v2746_v36 = vmax.f32 %v2080_v39, %v2635_v20  ;;  %v2136_v40 = vmax.f32 %v6871_v28, %v1864_v2  ;;  %v2419_v54 = vpop.permute.xlu1 %2418  ;;  %6872 = vst [vmem:[#allocation6_spill] sm:$0xff] %v4631_v14  ;;  %v6874_v59 = vmax.f32 %v6873_v30, 0.0  ;;  %v6875_v20 = vmax.f32 %v4591_v12, 0.0  ;;  %v6879_v28 = vld [vmem:[#allocation8_spill] sm:$0xff] }
 0x18f   : > { %6868 = vst [vmem:[#allocation31_spill] sm:$0xff] %v4625_v13  ;;  %v4643_v39 = vadd.f32 %v4125_v37, %v3640_v46  ;;  %v6880_v30 = vmax.f32 %v6879_v28, 0.0  ;;  %v6887_v28 = vmax.f32 %v4625_v13, 0.0 }
 0x190   : > { %2858 = vst.msk [vmem:[%s4403_s6 + $0x20] sm:$0xff] %vm2853_vm1, %v2746_v36  ;;  %v2691_v29 = vmax.f32 %v6874_v59, %v2419_v54  ;;  %2336 = vrot.lane.b32.xlu0 %v6875_v20, %s3277_s30  ;;  %v4651_v36 = vadd.f32 %v4138_v16, %v3643_v47  ;;  %v4653_v54 = vpop.f32.mrb[72].mxu0  ;;  %v6884_v16 = vmax.f32 %v4617_v23, 0.0 }
 0x191   : > { %1781 = vrot.lane.b32.xlu1 %v6876_v26, %s3277_s30  ;;  %v2309_v59 = vpop.permute.xlu0 %2308  ;;  %6878 = vst [vmem:[#allocation82_spill] sm:$0xff] %v4653_v54  ;;  %v4657_v37 = vpop.f32.mrb[73].mxu0  ;;  %v6882_v26 = vld [vmem:[#allocation9_spill] sm:$0xff] }
 0x192   : > { %6877 = vst [vmem:[#allocation7_spill] sm:$0xff] %v4651_v36  ;;  %v2802_v2 = vmax.f32 %v2136_v40, %v2691_v29  ;;  %v2636_v20 = vmax.f32 %v6880_v30, %v2309_v59  ;;  %v1754_v10 = vpop.permute.xlu1 %1753  ;;  %6881 = vst [vmem:[#allocation8_spill] sm:$0xff] %v4657_v37  ;;  %v6883_v18 = vmax.f32 %v6882_v26, 0.0  ;;  %v6885_v29 = vld [vmem:[#allocation33_spill] sm:$0xff] }
 0x193   : > { %v4669_v40 = vadd.f32 %v6885_v29, %v3640_v46 }
 0x194   : > { %2914 = vst.msk [vmem:[%s4403_s6 + $0x1e0] sm:$0xff] %vm2853_vm1, %v2802_v2  ;;  %v2081_v14 = vmax.f32 %v6883_v18, %v1754_v10  ;;  %2448 = vrot.lane.b32.xlu0 %v6884_v16, %s3277_s30  ;;  %v6888_v2 = vld [vmem:[#allocation35_spill] sm:$0xff]  ;;  %v4679_v18 = vpop.f32.mrb[72].mxu1  ;;  %v6892_v16 = vmax.f32 %v6891_v50, 0.0  ;;  %v6912_v50 = vld [vmem:[#allocation14_spill] sm:$0xff] }
 0x195   : > { %6886 = vst [vmem:[#allocation9_spill] sm:$0xff] %v4669_v40  ;;  %1893 = vrot.lane.b32.xlu1 %v6887_v28, %s3277_s30  ;;  %v4677_v30 = vadd.f32 %v6888_v2, %v3643_v47  ;;  %v2421_v10 = vpop.permute.xlu0 %2420  ;;  %6890 = vst [vmem:[#allocation35_spill] sm:$0xff] %v4679_v18  ;;  %v4683_v29 = vpop.f32.mrb[73].mxu1  ;;  %v6894_v28 = vld [vmem:[#allocation11_spill] sm:$0xff]  ;;  %v6897_v2 = vmax.f32 %v4651_v36, 0.0 }
 0x196   : > { %v2747_v26 = vmax.f32 %v2081_v14, %v2636_v20  ;;  %v2692_v37 = vmax.f32 %v6892_v16, %v2421_v10  ;;  %v1866_v54 = vpop.permute.xlu1 %1865  ;;  %6893 = vst [vmem:[#allocation10_spill] sm:$0xff] %v4683_v29  ;;  %v6895_v13 = vmax.f32 %v6894_v28, 0.0  ;;  %v6896_v14 = vmax.f32 %v4643_v39, 0.0  ;;  %v6901_v28 = vld [vmem:[#allocation12_spill] sm:$0xff] }
 0x197   : > { %6889 = vst [vmem:[#allocation33_spill] sm:$0xff] %v4677_v30  ;;  %v4695_v20 = vadd.f32 %v4165_v33, %v3643_v47 }
 0x198   : > { %2859 = vst.msk [vmem:[%s4403_s6 + $0x28] sm:$0xff] %vm2853_vm1, %v2747_v26  ;;  %v2137_v23 = vmax.f32 %v6895_v13, %v1866_v54  ;;  %1783 = vrot.lane.b32.xlu0 %v6896_v14, %s3277_s30  ;;  %v6898_v26 = vld [vmem:[#allocation37_spill] sm:$0xff]  ;;  %v4705_v54 = vpop.f32.mrb[74].mxu0  ;;  %v6902_v14 = vmax.f32 %v6901_v28, 0.0  ;;  %v6908_v28 = vmax.f32 %v4677_v30, 0.0 }
 0x199   : > { %2338 = vrot.lane.b32.xlu1 %v6897_v2, %s3277_s30  ;;  %v4703_v10 = vadd.f32 %v6898_v26, %v3640_v46  ;;  %v1756_v13 = vpop.permute.xlu0 %1755  ;;  %6900 = vst [vmem:[#allocation37_spill] sm:$0xff] %v4705_v54  ;;  %v4709_v33 = vpop.f32.mrb[75].mxu0  ;;  %v6904_v2 = vld [vmem:[#allocation13_spill] sm:$0xff] }
 0x19a   : > { %v2803_v16 = vmax.f32 %v2137_v23, %v2692_v37  ;;  %v2082_v59 = vmax.f32 %v6902_v14, %v1756_v13  ;;  %v2311_v29 = vpop.permute.xlu1 %2310  ;;  %6903 = vst [vmem:[#allocation12_spill] sm:$0xff] %v4709_v33  ;;  %v6905_v18 = vmax.f32 %v6904_v2, 0.0  ;;  %v6906_v23 = vmax.f32 %v4669_v40, 0.0  ;;  %v6907_v37 = vld [vmem:[#allocation40_spill] sm:$0xff] }
 0x19b   : > { %6899 = vst [vmem:[#allocation11_spill] sm:$0xff] %v4703_v10  ;;  %v4721_v26 = vadd.f32 %v6907_v37, %v3643_v47 }
 0x19c   : > { %2915 = vst.msk [vmem:[%s4403_s6 + $0x1e8] sm:$0xff] %vm2853_vm1, %v2803_v16  ;;  %v2637_v36 = vmax.f32 %v6905_v18, %v2311_v29  ;;  %1895 = vrot.lane.b32.xlu0 %v6906_v23, %s3277_s30  ;;  %v6909_v16 = vld [vmem:[#allocation38_spill] sm:$0xff]  ;;  %v4731_v29 = vpop.f32.mrb[74].mxu1  ;;  %v6913_v23 = vmax.f32 %v6912_v50, 0.0 }
 0x19d   : > { %2450 = vrot.lane.b32.xlu1 %v6908_v28, %s3277_s30  ;;  %v4729_v14 = vadd.f32 %v6909_v16, %v3640_v46  ;;  %v1868_v18 = vpop.permute.xlu0 %1867  ;;  %6911 = vst [vmem:[#allocation40_spill] sm:$0xff] %v4731_v29  ;;  %v4735_v37 = vpop.f32.mrb[75].mxu1  ;;  %v6915_v28 = vld [vmem:[#allocation15_spill] sm:$0xff] }
 0x19e   : > { %v2748_v2 = vmax.f32 %v2082_v59, %v2637_v36  ;;  %v2138_v54 = vmax.f32 %v6913_v23, %v1868_v18  ;;  %v2423_v33 = vpop.permute.xlu1 %2422  ;;  %6914 = vst [vmem:[#allocation38_spill] sm:$0xff] %v4735_v37  ;;  %v6916_v30 = vmax.f32 %v6915_v28, 0.0  ;;  %v6917_v36 = vmax.f32 %v4695_v20, 0.0  ;;  %v6918_v59 = vld [vmem:[#allocation42_spill] sm:$0xff]  ;;  %v6921_v28 = vld [vmem:[#allocation16_spill] sm:$0xff] }
 0x19f   : > { %6910 = vst [vmem:[#allocation13_spill] sm:$0xff] %v4729_v14  ;;  %v4747_v16 = vadd.f32 %v6918_v59, %v3640_v46  ;;  %v6919_v18 = vmax.f32 %v4703_v10, 0.0 }
 0x1a0   : > { %2860 = vst.msk [vmem:[%s4403_s6 + $0x30] sm:$0xff] %vm2853_vm1, %v2748_v2  ;;  %v2693_v40 = vmax.f32 %v6916_v30, %v2423_v33  ;;  %2340 = vrot.lane.b32.xlu0 %v6917_v36, %s3277_s30  ;;  %v4755_v2 = vadd.f32 %v4192_v45, %v3643_v47  ;;  %v4757_v33 = vpop.f32.mrb[76].mxu0  ;;  %v6922_v36 = vmax.f32 %v6921_v28, 0.0  ;;  %v6926_v45 = vmax.f32 %v4721_v26, 0.0 }
 0x1a1   : > { %1785 = vrot.lane.b32.xlu1 %v6919_v18, %s3277_s30  ;;  %v2313_v30 = vpop.permute.xlu0 %2312  ;;  %6920 = vst [vmem:[#allocation14_spill] sm:$0xff] %v4757_v33  ;;  %v4761_v59 = vpop.f32.mrb[77].mxu0  ;;  %v6924_v18 = vld [vmem:[#allocation17_spill] sm:$0xff]  ;;  %v6928_v28 = vmax.f32 %v4729_v14, 0.0 }
 0x1a2   : > { %v2804_v23 = vmax.f32 %v2138_v54, %v2693_v40  ;;  %v2638_v13 = vmax.f32 %v6922_v36, %v2313_v30  ;;  %v1758_v29 = vpop.permute.xlu1 %1757  ;;  %6923 = vst [vmem:[#allocation15_spill] sm:$0xff] %v4761_v59  ;;  %v6925_v37 = vmax.f32 %v6924_v18, 0.0  ;;  %v6927_v40 = vld [vmem:[#allocation43_spill] sm:$0xff]  ;;  %v6931_v18 = vld [vmem:[#allocation18_spill] sm:$0xff] }
 0x1a3   : > { %v4773_v54 = vadd.f32 %v6927_v40, %v3640_v46 }
 0x1a4   : > { %2916 = vst.msk [vmem:[%s4403_s6 + $0x1f0] sm:$0xff] %vm2853_vm1, %v2804_v23  ;;  %v2083_v10 = vmax.f32 %v6925_v37, %v1758_v29  ;;  %2452 = vrot.lane.b32.xlu0 %v6926_v45, %s3277_s30  ;;  %v4781_v23 = vadd.f32 %v4194_v38, %v3643_v47  ;;  %v4783_v37 = vpop.f32.mrb[76].mxu1  ;;  %v6932_v45 = vmax.f32 %v6931_v18, 0.0  ;;  %v6936_v38 = vmax.f32 %v4747_v16, 0.0 }
 0x1a5   : > { %1897 = vrot.lane.b32.xlu1 %v6928_v28, %s3277_s30  ;;  %v2425_v29 = vpop.permute.xlu0 %2424  ;;  %6930 = vst [vmem:[#allocation16_spill] sm:$0xff] %v4783_v37  ;;  %v4787_v40 = vpop.f32.mrb[77].mxu1  ;;  %v6934_v28 = vld [vmem:[#allocation19_spill] sm:$0xff] }
 0x1a6   : > { %6929 = vst [vmem:[#allocation42_spill] sm:$0xff] %v4781_v23  ;;  %v2749_v36 = vmax.f32 %v2083_v10, %v2638_v13  ;;  %v2694_v50 = vmax.f32 %v6932_v45, %v2425_v29  ;;  %v1870_v59 = vpop.permute.xlu1 %1869  ;;  %6933 = vst [vmem:[#allocation17_spill] sm:$0xff] %v4787_v40  ;;  %v6935_v33 = vmax.f32 %v6934_v28, 0.0  ;;  %v4799_v10 = vadd.f32 %v4221_v61, %v3643_v47  ;;  %v6939_v45 = vld [vmem:[#allocation20_spill] sm:$0xff] }
 0x1a7   : > { %v6937_v29 = vmax.f32 %v4755_v2, 0.0  ;;  %v6940_v28 = vmax.f32 %v6939_v45, 0.0 }
 0x1a8   : > { %2861 = vst.msk [vmem:[%s4403_s6 + $0x38] sm:$0xff] %vm2853_vm1, %v2749_v36  ;;  %v2139_v14 = vmax.f32 %v6935_v33, %v1870_v59  ;;  %1787 = vrot.lane.b32.xlu0 %v6936_v38, %s3277_s30  ;;  %v4807_v36 = vadd.f32 %v4208_v34, %v3640_v46  ;;  %v4809_v59 = vpop.f32.mrb[78].mxu0  ;;  %v6944_v34 = vmax.f32 %v4773_v54, 0.0 }
 0x1a9   : > { %2342 = vrot.lane.b32.xlu1 %v6937_v29, %s3277_s30  ;;  %v1760_v33 = vpop.permute.xlu0 %1759  ;;  %6938 = vst [vmem:[#allocation43_spill] sm:$0xff] %v4809_v59  ;;  %v4813_v61 = vpop.f32.mrb[79].mxu0  ;;  %v6942_v29 = vld [vmem:[#allocation21_spill] sm:$0xff] }
 0x1aa   : > { %v2805_v18 = vmax.f32 %v2139_v14, %v2694_v50  ;;  %v2084_v38 = vmax.f32 %v6940_v28, %v1760_v33  ;;  %v2315_v30 = vpop.permute.xlu1 %2314  ;;  %6941 = vst [vmem:[#allocation18_spill] sm:$0xff] %v4813_v61  ;;  %v6943_v40 = vmax.f32 %v6942_v29, 0.0  ;;  %v4825_v14 = vadd.f32 %v4223_v25, %v3643_v47  ;;  %v6949_v29 = vld [vmem:[#allocation22_spill] sm:$0xff] }
 0x1ab   : > { %v6945_v33 = vmax.f32 %v4781_v23, 0.0 }
 0x1ac   : > { %2917 = vst.msk [vmem:[%s4403_s6 + $0x1f8] sm:$0xff] %vm2853_vm1, %v2805_v18  ;;  %v2639_v37 = vmax.f32 %v6943_v40, %v2315_v30  ;;  %1899 = vrot.lane.b32.xlu0 %v6944_v34, %s3277_s30  ;;  %v6946_v18 = vld [vmem:[#allocation46_spill] sm:$0xff]  ;;  %v4835_v40 = vpop.f32.mrb[78].mxu1  ;;  %v6950_v34 = vmax.f32 %v6949_v29, 0.0 }
 0x1ad   : > { %2454 = vrot.lane.b32.xlu1 %v6945_v33, %s3277_s30  ;;  %v4833_v45 = vadd.f32 %v6946_v18, %v3640_v46  ;;  %v1872_v30 = vpop.permute.xlu0 %1871  ;;  %6948 = vst [vmem:[#allocation20_spill] sm:$0xff] %v4835_v40  ;;  %v4839_v25 = vpop.f32.mrb[79].mxu1  ;;  %v6952_v33 = vld [vmem:[#allocation23_spill] sm:$0xff] }
 0x1ae   : > { %v2750_v28 = vmax.f32 %v2084_v38, %v2639_v37  ;;  %v2140_v13 = vmax.f32 %v6950_v34, %v1872_v30  ;;  %v2427_v59 = vpop.permute.xlu1 %2426  ;;  %6951 = vst [vmem:[#allocation21_spill] sm:$0xff] %v4839_v25  ;;  %v6953_v61 = vmax.f32 %v6952_v33, 0.0  ;;  %v6954_v37 = vmax.f32 %v4799_v10, 0.0  ;;  %v6958_v34 = vld [vmem:[#allocation24_spill] sm:$0xff] }
 0x1af   : > { %6947 = vst [vmem:[#allocation19_spill] sm:$0xff] %v4833_v45  ;;  %v4851_v38 = vadd.f32 %v4235_v31, %v3640_v46  ;;  %v6955_v30 = vmax.f32 %v4807_v36, 0.0  ;;  %v6959_v33 = vmax.f32 %v6958_v34, 0.0  ;;  %v6965_v34 = vmax.f32 %v4833_v45, 0.0 }
 0x1b0   : > { %2862 = vst.msk [vmem:[%s4403_s6 + $0x40] sm:$0xff] %vm2853_vm1, %v2750_v28  ;;  %v2695_v23 = vmax.f32 %v6953_v61, %v2427_v59  ;;  %2344 = vrot.lane.b32.xlu0 %v6954_v37, %s3277_s30  ;;  %v4859_v28 = vadd.f32 %v4248_v8, %v3643_v47  ;;  %v4861_v61 = vpop.f32.mrb[80].mxu0  ;;  %v6963_v8 = vmax.f32 %v4825_v14, 0.0 }
 0x1b1   : > { %1789 = vrot.lane.b32.xlu1 %v6955_v30, %s3277_s30  ;;  %v2317_v59 = vpop.permute.xlu0 %2316  ;;  %6957 = vst [vmem:[#allocation22_spill] sm:$0xff] %v4861_v61  ;;  %v4865_v31 = vpop.f32.mrb[81].mxu0  ;;  %v6961_v30 = vld [vmem:[#allocation25_spill] sm:$0xff] }
 0x1b2   : > { %6956 = vst [vmem:[#allocation46_spill] sm:$0xff] %v4859_v28  ;;  %v2806_v29 = vmax.f32 %v2140_v13, %v2695_v23  ;;  %v2640_v37 = vmax.f32 %v6959_v33, %v2317_v59  ;;  %v1762_v50 = vpop.permute.xlu1 %1761  ;;  %6960 = vst [vmem:[#allocation23_spill] sm:$0xff] %v4865_v31  ;;  %v6962_v40 = vmax.f32 %v6961_v30, 0.0  ;;  %v6964_v23 = vld [vmem:[#allocation49_spill] sm:$0xff]  ;;  %v6968_v30 = vld [vmem:[#allocation26_spill] sm:$0xff] }
 0x1b3   : > { %v4877_v13 = vadd.f32 %v6964_v23, %v3640_v46 }
 0x1b4   : > { %2918 = vst.msk [vmem:[%s4403_s6 + $0x200] sm:$0xff] %vm2853_vm1, %v2806_v29  ;;  %v2085_v25 = vmax.f32 %v6962_v40, %v1762_v50  ;;  %2456 = vrot.lane.b32.xlu0 %v6963_v8, %s3277_s30  ;;  %v4885_v29 = vadd.f32 %v4250_v6, %v3643_v47  ;;  %v4887_v40 = vpop.f32.mrb[80].mxu1  ;;  %v6969_v8 = vmax.f32 %v6968_v30, 0.0  ;;  %v6973_v6 = vmax.f32 %v4851_v38, 0.0 }
 0x1b5   : > { %1901 = vrot.lane.b32.xlu1 %v6965_v34, %s3277_s30  ;;  %v2429_v50 = vpop.permute.xlu0 %2428  ;;  %6967 = vst [vmem:[#allocation25_spill] sm:$0xff] %v4887_v40  ;;  %v4891_v23 = vpop.f32.mrb[81].mxu1  ;;  %v6971_v34 = vld [vmem:[#allocation28_spill] sm:$0xff] }
 0x1b6   : > { %6966 = vst [vmem:[#allocation24_spill] sm:$0xff] %v4885_v29  ;;  %v2751_v33 = vmax.f32 %v2085_v25, %v2640_v37  ;;  %v2696_v18 = vmax.f32 %v6969_v8, %v2429_v50  ;;  %v1874_v31 = vpop.permute.xlu1 %1873  ;;  %6970 = vst [vmem:[#allocation49_spill] sm:$0xff] %v4891_v23  ;;  %v6972_v61 = vmax.f32 %v6971_v34, 0.0  ;;  %v4903_v25 = vadd.f32 %v4272_v0, %v3643_v47  ;;  %v6978_v34 = vld [vmem:[#allocation30_spill] sm:$0xff] }
 0x1b7   : > { %v6974_v50 = vmax.f32 %v4859_v28, 0.0 }
 0x1b8   : > { %2863 = vst.msk [vmem:[%s4403_s6 + $0x48] sm:$0xff] %vm2853_vm1, %v2751_v33  ;;  %v2141_v45 = vmax.f32 %v6972_v61, %v1874_v31  ;;  %1791 = vrot.lane.b32.xlu0 %v6973_v6, %s3277_s30  ;;  %v6975_v33 = vld [vmem:[#allocation52_spill] sm:$0xff]  ;;  %v4913_v31 = vpop.f32.mrb[82].mxu0  ;;  %v6979_v6 = vmax.f32 %v6978_v34, 0.0 }
 0x1b9   : > { %2346 = vrot.lane.b32.xlu1 %v6974_v50, %s3277_s30  ;;  %v4911_v30 = vadd.f32 %v6975_v33, %v3640_v46  ;;  %v1764_v61 = vpop.permute.xlu0 %1763  ;;  %6977 = vst [vmem:[#allocation28_spill] sm:$0xff] %v4913_v31  ;;  %v4917_v0 = vpop.f32.mrb[83].mxu0  ;;  %v6981_v50 = vld [vmem:[#allocation32_spill] sm:$0xff] }
 0x1ba   : > { %v2807_v8 = vmax.f32 %v2141_v45, %v2696_v18  ;;  %v2086_v59 = vmax.f32 %v6979_v6, %v1764_v61  ;;  %v2319_v23 = vpop.permute.xlu1 %2318  ;;  %6980 = vst [vmem:[#allocation52_spill] sm:$0xff] %v4917_v0  ;;  %v6982_v40 = vmax.f32 %v6981_v50, 0.0  ;;  %v6983_v45 = vmax.f32 %v4877_v13, 0.0  ;;  %v6988_v50 = vld [vmem:[#allocation34_spill] sm:$0xff] }
 0x1bb   : > { %6976 = vst [vmem:[#allocation26_spill] sm:$0xff] %v4911_v30  ;;  %v4929_v18 = vadd.f32 %v4274_v42, %v3643_v47  ;;  %v6984_v61 = vmax.f32 %v4885_v29, 0.0 }
 0x1bc   : > { %2919 = vst.msk [vmem:[%s4403_s6 + $0x208] sm:$0xff] %vm2853_vm1, %v2807_v8  ;;  %v2641_v28 = vmax.f32 %v6982_v40, %v2319_v23  ;;  %1903 = vrot.lane.b32.xlu0 %v6983_v45, %s3277_s30  ;;  %v6985_v8 = vld [vmem:[#allocation53_spill] sm:$0xff]  ;;  %v4939_v23 = vpop.f32.mrb[82].mxu1  ;;  %v6989_v45 = vmax.f32 %v6988_v50, 0.0  ;;  %v6995_v50 = vmax.f32 %v4911_v30, 0.0 }
 0x1bd   : > { %2458 = vrot.lane.b32.xlu1 %v6984_v61, %s3277_s30  ;;  %v4937_v34 = vadd.f32 %v6985_v8, %v3640_v46  ;;  %v1876_v40 = vpop.permute.xlu0 %1875  ;;  %6987 = vst [vmem:[#allocation32_spill] sm:$0xff] %v4939_v23  ;;  %v4943_v42 = vpop.f32.mrb[83].mxu1  ;;  %v6991_v61 = vld [vmem:[#allocation36_spill] sm:$0xff] }
 0x1be   : > { %v2752_v6 = vmax.f32 %v2086_v59, %v2641_v28  ;;  %v2142_v37 = vmax.f32 %v6989_v45, %v1876_v40  ;;  %6990 = vst [vmem:[#allocation53_spill] sm:$0xff] %v4943_v42  ;;  %v6992_v0 = vmax.f32 %v6991_v61, 0.0  ;;  %v6993_v28 = vmax.f32 %v4903_v25, 0.0  ;;  %v6994_v59 = vld [vmem:[#allocation56_spill] sm:$0xff]  ;;  %v6998_v61 = vld [vmem:[#allocation39_spill] sm:$0xff] }
 0x1bf   : > { %6986 = vst [vmem:[#allocation30_spill] sm:$0xff] %v4937_v34  ;;  %v2431_v31 = vpop.permute.xlu1 %2430  ;;  %v4955_v8 = vadd.f32 %v6994_v59, %v3640_v46 }
 0x1c0   : > { %2864 = vst.msk [vmem:[%s4403_s6 + $0x50] sm:$0xff] %vm2853_vm1, %v2752_v6  ;;  %v2697_v29 = vmax.f32 %v6992_v0, %v2431_v31  ;;  %2348 = vrot.lane.b32.xlu0 %v6993_v28, %s3277_s30  ;;  %v4963_v6 = vadd.f32 %v4296_v19, %v3643_v47  ;;  %v4965_v0 = vpop.f32.mrb[84].mxu0  ;;  %v6999_v28 = vmax.f32 %v6998_v61, 0.0  ;;  %v7003_v19 = vmax.f32 %v4929_v18, 0.0 }
 0x1c1   : > { %1793 = vrot.lane.b32.xlu1 %v6995_v50, %s3277_s30  ;;  %v2321_v31 = vpop.permute.xlu0 %2320  ;;  %6997 = vst [vmem:[#allocation36_spill] sm:$0xff] %v4965_v0  ;;  %v4969_v59 = vpop.f32.mrb[85].mxu0  ;;  %v7001_v50 = vld [vmem:[#allocation41_spill] sm:$0xff]  ;;  %v7005_v61 = vmax.f32 %v4937_v34, 0.0 }
 0x1c2   : > { %6996 = vst [vmem:[#allocation34_spill] sm:$0xff] %v4963_v6  ;;  %v2808_v45 = vmax.f32 %v2142_v37, %v2697_v29  ;;  %v2642_v33 = vmax.f32 %v6999_v28, %v2321_v31  ;;  %7000 = vst [vmem:[#allocation56_spill] sm:$0xff] %v4969_v59  ;;  %v7002_v42 = vmax.f32 %v7001_v50, 0.0  ;;  %v7004_v29 = vld [vmem:[#allocation57_spill] sm:$0xff]  ;;  %v7008_v50 = vld [vmem:[#allocation44_spill] sm:$0xff] }
 0x1c3   : > { %v1766_v23 = vpop.permute.xlu1 %1765  ;;  %v4981_v37 = vadd.f32 %v7004_v29, %v3640_v46 }
 0x1c4   : > { %2920 = vst.msk [vmem:[%s4403_s6 + $0x210] sm:$0xff] %vm2853_vm1, %v2808_v45  ;;  %v2087_v30 = vmax.f32 %v7002_v42, %v1766_v23  ;;  %2460 = vrot.lane.b32.xlu0 %v7003_v19, %s3277_s30  ;;  %v4989_v45 = vadd.f32 %v4298_v24, %v3643_v47  ;;  %v4991_v42 = vpop.f32.mrb[84].mxu1  ;;  %v7009_v19 = vmax.f32 %v7008_v50, 0.0  ;;  %v7013_v24 = vmax.f32 %v4955_v8, 0.0 }
 0x1c5   : > { %1905 = vrot.lane.b32.xlu1 %v7005_v61, %s3277_s30  ;;  %v2433_v23 = vpop.permute.xlu0 %2432  ;;  %7007 = vst [vmem:[#allocation41_spill] sm:$0xff] %v4991_v42  ;;  %v4995_v29 = vpop.f32.mrb[85].mxu1  ;;  %v7011_v61 = vld [vmem:[#allocation45_spill] sm:$0xff] }
 0x1c6   : > { %7006 = vst [vmem:[#allocation39_spill] sm:$0xff] %v4989_v45  ;;  %v2753_v28 = vmax.f32 %v2087_v30, %v2642_v33  ;;  %v2698_v40 = vmax.f32 %v7009_v19, %v2433_v23  ;;  %7010 = vst [vmem:[#allocation57_spill] sm:$0xff] %v4995_v29  ;;  %v7012_v0 = vmax.f32 %v7011_v61, 0.0  ;;  %v5007_v30 = vadd.f32 %v4320_v27, %v3643_v47  ;;  %v7018_v61 = vld [vmem:[#allocation47_spill] sm:$0xff] }
 0x1c7   : > { %v1878_v59 = vpop.permute.xlu1 %1877  ;;  %v7014_v23 = vmax.f32 %v4963_v6, 0.0 }
 0x1c8   : > { %2865 = vst.msk [vmem:[%s4403_s6 + $0x58] sm:$0xff] %vm2853_vm1, %v2753_v28  ;;  %v2143_v34 = vmax.f32 %v7012_v0, %v1878_v59  ;;  %1795 = vrot.lane.b32.xlu0 %v7013_v24, %s3277_s30  ;;  %v7015_v28 = vld [vmem:[#allocation60_spill] sm:$0xff]  ;;  %v5017_v59 = vpop.f32.mrb[86].mxu0  ;;  %v7019_v24 = vmax.f32 %v7018_v61, 0.0 }
 0x1c9   : > { %2350 = vrot.lane.b32.xlu1 %v7014_v23, %s3277_s30  ;;  %v5015_v50 = vadd.f32 %v7015_v28, %v3640_v46  ;;  %v1768_v0 = vpop.permute.xlu0 %1767  ;;  %7017 = vst [vmem:[#allocation45_spill] sm:$0xff] %v5017_v59  ;;  %v5021_v27 = vpop.f32.mrb[87].mxu0  ;;  %v7021_v23 = vld [vmem:[#allocation48_spill] sm:$0xff] }
 0x1ca   : > { %v2809_v19 = vmax.f32 %v2143_v34, %v2698_v40  ;;  %v2088_v31 = vmax.f32 %v7019_v24, %v1768_v0  ;;  %7020 = vst [vmem:[#allocation60_spill] sm:$0xff] %v5021_v27  ;;  %v7022_v42 = vmax.f32 %v7021_v23, 0.0  ;;  %v7023_v34 = vmax.f32 %v4981_v37, 0.0  ;;  %v7029_v23 = vld [vmem:[#allocation50_spill] sm:$0xff] }
 0x1cb   : > { %7016 = vst [vmem:[#allocation44_spill] sm:$0xff] %v5015_v50  ;;  %v2323_v29 = vpop.permute.xlu1 %2322  ;;  %v5033_v40 = vadd.f32 %v4322_v35, %v3643_v47  ;;  %v7025_v0 = vmax.f32 %v4989_v45, 0.0 }
 0x1cc   : > { %2921 = vst.msk [vmem:[%s4403_s6 + $0x218] sm:$0xff] %vm2853_vm1, %v2809_v19  ;;  %v2643_v6 = vmax.f32 %v7022_v42, %v2323_v29  ;;  %1907 = vrot.lane.b32.xlu0 %v7023_v34, %s3277_s30  ;;  %v7026_v19 = vld [vmem:[#allocation61_spill] sm:$0xff]  ;;  %v5043_v29 = vpop.f32.mrb[86].mxu1  ;;  %v7030_v34 = vmax.f32 %v7029_v23, 0.0  ;;  %v7037_v23 = vmax.f32 %v5015_v50, 0.0 }
 0x1cd   : > { %7024 = vst [vmem:[#allocation47_spill] sm:$0xff] %v5033_v40  ;;  %2462 = vrot.lane.b32.xlu1 %v7025_v0, %s3277_s30  ;;  %v5041_v61 = vadd.f32 %v7026_v19, %v3640_v46  ;;  %v1880_v42 = vpop.permute.xlu0 %1879  ;;  %7028 = vst [vmem:[#allocation61_spill] sm:$0xff] %v5043_v29  ;;  %v5047_v35 = vpop.f32.mrb[87].mxu1  ;;  %v7032_v0 = vld [vmem:[#allocation51_spill] sm:$0xff] }
 0x1ce   : > { %v2754_v24 = vmax.f32 %v2088_v31, %v2643_v6  ;;  %v2144_v33 = vmax.f32 %v7030_v34, %v1880_v42  ;;  %7031 = vst [vmem:[#allocation50_spill] sm:$0xff] %v5047_v35  ;;  %v7033_v27 = vmax.f32 %v7032_v0, 0.0  ;;  %v7034_v6 = vmax.f32 %v5007_v30, 0.0  ;;  %v7035_v31 = vld [vmem:[#allocation64_spill] sm:$0xff]  ;;  %v7040_v0 = vld [vmem:[#allocation54_spill] sm:$0xff] }
 0x1cf   : > { %7027 = vst [vmem:[#allocation48_spill] sm:$0xff] %v5041_v61  ;;  %v2435_v59 = vpop.permute.xlu1 %2434  ;;  %v5059_v19 = vadd.f32 %v7035_v31, %v3640_v46  ;;  %v7050_v42 = vld [vmem:[#allocation58_spill] sm:$0xff] }
 0x1d0   : > { %2866 = vst.msk [vmem:[%s4403_s6 + $0x60] sm:$0xff] %vm2853_vm1, %v2754_v24  ;;  %v2699_v45 = vmax.f32 %v7033_v27, %v2435_v59  ;;  %2352 = vrot.lane.b32.xlu0 %v7034_v6, %s3277_s30  ;;  %v5067_v24 = vadd.f32 %v4344_v11, %v3643_v47  ;;  %v5069_v27 = vpop.f32.mrb[88].mxu0  ;;  %v7041_v6 = vmax.f32 %v7040_v0, 0.0  ;;  %v7045_v11 = vmax.f32 %v5033_v40, 0.0 }
 0x1d1   : > { %7036 = vst [vmem:[#allocation51_spill] sm:$0xff] %v5059_v19  ;;  %1797 = vrot.lane.b32.xlu1 %v7037_v23, %s3277_s30  ;;  %v2325_v59 = vpop.permute.xlu0 %2324  ;;  %7039 = vst [vmem:[#allocation83_spill] sm:$0xff] %v5069_v27  ;;  %v5073_v31 = vpop.f32.mrb[89].mxu0  ;;  %v7043_v23 = vld [vmem:[#allocation55_spill] sm:$0xff]  ;;  %v7047_v0 = vmax.f32 %v5041_v61, 0.0 }
 0x1d2   : > { %7038 = vst [vmem:[#allocation64_spill] sm:$0xff] %v5067_v24  ;;  %v2810_v34 = vmax.f32 %v2144_v33, %v2699_v45  ;;  %v2644_v28 = vmax.f32 %v7041_v6, %v2325_v59  ;;  %7042 = vst [vmem:[#allocation54_spill] sm:$0xff] %v5073_v31  ;;  %v7044_v35 = vmax.f32 %v7043_v23, 0.0  ;;  %v7046_v45 = vld [vmem:[#allocation65_spill] sm:$0xff]  ;;  %v7060_v59 = vld [vmem:[#allocation62_spill] sm:$0xff] }
 0x1d3   : > { %v1770_v29 = vpop.permute.xlu1 %1769  ;;  %v5085_v33 = vadd.f32 %v7046_v45, %v3640_v46 }
 0x1d4   : > { %2922 = vst.msk [vmem:[%s4403_s6 + $0x220] sm:$0xff] %vm2853_vm1, %v2810_v34  ;;  %v2089_v50 = vmax.f32 %v7044_v35, %v1770_v29  ;;  %2464 = vrot.lane.b32.xlu0 %v7045_v11, %s3277_s30  ;;  %v7048_v34 = vld [vmem:[#allocation66_spill] sm:$0xff]  ;;  %v5095_v35 = vpop.f32.mrb[88].mxu1  ;;  %v7051_v11 = vmax.f32 %v7050_v42, 0.0 }
 0x1d5   : > { %1909 = vrot.lane.b32.xlu1 %v7047_v0, %s3277_s30  ;;  %v5093_v6 = vadd.f32 %v7048_v34, %v3643_v47  ;;  %v2437_v29 = vpop.permute.xlu0 %2436  ;;  %7049 = vst [vmem:[#allocation55_spill] sm:$0xff] %v5095_v35  ;;  %v5099_v45 = vpop.f32.mrb[89].mxu1  ;;  %v7053_v0 = vld [vmem:[#allocation59_spill] sm:$0xff] }
 0x1d6   : > { %v2755_v23 = vmax.f32 %v2089_v50, %v2644_v28  ;;  %v2700_v31 = vmax.f32 %v7051_v11, %v2437_v29  ;;  %7052 = vst [vmem:[#allocation65_spill] sm:$0xff] %v5099_v45  ;;  %v7054_v61 = vmax.f32 %v7053_v0, 0.0  ;;  %v7055_v50 = vmax.f32 %v5059_v19, 0.0  ;;  %v7056_v28 = vld [vmem:[#allocation69_spill] sm:$0xff] }
 0x1d7   : > { %v1882_v27 = vpop.permute.xlu1 %1881  ;;  %v5111_v34 = vadd.f32 %v7056_v28, %v3643_v47  ;;  %v7057_v29 = vmax.f32 %v5067_v24, 0.0 }
 0x1d8   : > { %2867 = vst.msk [vmem:[%s4403_s6 + $0x68] sm:$0xff] %vm2853_vm1, %v2755_v23  ;;  %v2145_v40 = vmax.f32 %v7054_v61, %v1882_v27  ;;  %1799 = vrot.lane.b32.xlu0 %v7055_v50, %s3277_s30  ;;  %v7058_v23 = vld [vmem:[#allocation67_spill] sm:$0xff]  ;;  %v5121_v27 = vpop.f32.mrb[90].mxu0  ;;  %v7061_v50 = vmax.f32 %v7060_v59, 0.0 }
 0x1d9   : > { %2354 = vrot.lane.b32.xlu1 %v7057_v29, %s3277_s30  ;;  %v5119_v11 = vadd.f32 %v7058_v23, %v3640_v46  ;;  %v1772_v61 = vpop.permute.xlu0 %1771  ;;  %7059 = vst [vmem:[#allocation66_spill] sm:$0xff] %v5121_v27  ;;  %v5125_v28 = vpop.f32.mrb[91].mxu0  ;;  %v7063_v29 = vld [vmem:[#allocation63_spill] sm:$0xff] }
 0x1da   : > { %v2811_v0 = vmax.f32 %v2145_v40, %v2700_v31  ;;  %v2090_v45 = vmax.f32 %v7061_v50, %v1772_v61  ;;  %7062 = vst [vmem:[#allocation58_spill] sm:$0xff] %v5125_v28  ;;  %v7064_v24 = vmax.f32 %v7063_v29, 0.0  ;;  %v7065_v40 = vmax.f32 %v5085_v33, 0.0  ;;  %v7066_v31 = vld [vmem:[#allocation70_spill] sm:$0xff] }
 0x1db   : > { %v2327_v35 = vpop.permute.xlu1 %2326  ;;  %v5137_v23 = vadd.f32 %v7066_v31, %v3643_v47  ;;  %v7067_v61 = vmax.f32 %v5093_v6, 0.0 }
 0x1dc   : > { %2923 = vst.msk [vmem:[%s4403_s6 + $0x228] sm:$0xff] %vm2853_vm1, %v2811_v0  ;;  %v2645_v19 = vmax.f32 %v7064_v24, %v2327_v35  ;;  %1911 = vrot.lane.b32.xlu0 %v7065_v40, %s3277_s30  ;;  %v7068_v0 = vld [vmem:[#allocation68_spill] sm:$0xff]  ;;  %v5147_v35 = vpop.f32.mrb[90].mxu1  ;;  %v7070_v40 = vmax.f32 %v4342_v62, 0.0 }
 0x1dd   : > { %2466 = vrot.lane.b32.xlu1 %v7067_v61, %s3277_s30  ;;  %v5145_v50 = vadd.f32 %v7068_v0, %v3640_v46  ;;  %v1884_v24 = vpop.permute.xlu0 %1883  ;;  %7069 = vst [vmem:[#allocation59_spill] sm:$0xff] %v5147_v35  ;;  %v5151_v31 = vpop.f32.mrb[91].mxu1  ;;  %v7072_v61 = vmax.f32 %v4354_v1, 0.0 }
 0x1de   : > { %v2756_v29 = vmax.f32 %v2090_v45, %v2645_v19  ;;  %v2146_v42 = vmax.f32 %v7070_v40, %v1884_v24  ;;  %7071 = vst [vmem:[#allocation69_spill] sm:$0xff] %v5151_v31  ;;  %v7073_v19 = vmax.f32 %v5111_v34, 0.0  ;;  %v7074_v45 = vld [vmem:[#allocation71_spill] sm:$0xff]  ;;  %v7075_v24 = vmax.f32 %v5119_v11, 0.0 }
 0x1df   : > { %v2439_v27 = vpop.permute.xlu1 %2438  ;;  %v5163_v0 = vadd.f32 %v7074_v45, %v3640_v46 }
 0x1e0   : > { %2868 = vst.msk [vmem:[%s4403_s6 + $0x70] sm:$0xff] %vm2853_vm1, %v2756_v29  ;;  %v2701_v28 = vmax.f32 %v7072_v61, %v2439_v27  ;;  %2356 = vrot.lane.b32.xlu0 %v7073_v19, %s3277_s30  ;;  %v7076_v29 = vld [vmem:[#allocation72_spill] sm:$0xff]  ;;  %v5173_v61 = vpop.f32.mrb[92].mxu0  ;;  %v7077_v19 = vmax.f32 %v4366_v41, 0.0 }
 0x1e1   : > { %1801 = vrot.lane.b32.xlu1 %v7075_v24, %s3277_s30  ;;  %v5171_v40 = vadd.f32 %v7076_v29, %v3643_v47  ;;  %v2329_v27 = vpop.permute.xlu0 %2328  ;;  %v5177_v45 = vpop.f32.mrb[93].mxu0  ;;  %v7079_v24 = vmax.f32 %v4378_v5, 0.0 }
 0x1e2   : > { %v2812_v1 = vmax.f32 %v2146_v42, %v2701_v28  ;;  %v2646_v59 = vmax.f32 %v7077_v19, %v2329_v27  ;;  %7078 = vst [vmem:[#allocation67_spill] sm:$0xff] %v5177_v45  ;;  %v7080_v42 = vmax.f32 %v5137_v23, 0.0  ;;  %v7081_v28 = vld [vmem:[#allocation73_spill] sm:$0xff]  ;;  %v7082_v27 = vmax.f32 %v5145_v50, 0.0  ;;  %v5199_v19 = vpop.f32.mrb[92].mxu1 }
 0x1e3   : > { %v1774_v35 = vpop.permute.xlu1 %1773  ;;  %v5189_v29 = vadd.f32 %v7081_v28, %v3640_v46  ;;  %v5203_v28 = vpop.f32.mrb[93].mxu1 }
 0x1e4   : > { %2924 = vst.msk [vmem:[%s4403_s6 + $0x230] sm:$0xff] %vm2853_vm1, %v2812_v1  ;;  %v2091_v31 = vmax.f32 %v7079_v24, %v1774_v35  ;;  %2468 = vrot.lane.b32.xlu0 %v7080_v42, %s3277_s30  ;;  %v5197_v1 = vadd.f32 %v4413_v57, %v3643_v47  ;;  %v7083_v24 = vmax.f32 %v4392_v4, 0.0  ;;  %7084 = vst [vmem:[#allocation62_spill] sm:$0xff] %v5203_v28  ;;  %v7086_v57 = vmax.f32 %v5163_v0, 0.0 }
 0x1e5   : > { %1913 = vrot.lane.b32.xlu1 %v7082_v27, %s3277_s30  ;;  %v2441_v35 = vpop.permute.xlu0 %2440  ;;  %v7085_v27 = vmax.f32 %v4411_v60, 0.0 }
 0x1e6   : > { %v2757_v5 = vmax.f32 %v2091_v31, %v2646_v59  ;;  %v2702_v42 = vmax.f32 %v7083_v24, %v2441_v35  ;;  %v5215_v59 = vadd.f32 %v4431_v53, %v3643_v47  ;;  %v7087_v31 = vmax.f32 %v5171_v40, 0.0  ;;  %v5225_v24 = vpop.f32.mrb[94].mxu0 }
 0x1e7   : > { %v1886_v62 = vpop.permute.xlu1 %1885  ;;  %7089 = vst [vmem:[#allocation63_spill] sm:$0xff] %v5225_v24  ;;  %v5229_v53 = vpop.f32.mrb[95].mxu0 }
 0x1e8   : > { %2869 = vst.msk [vmem:[%s4403_s6 + $0x78] sm:$0xff] %vm2853_vm1, %v2757_v5  ;;  %v2147_v45 = vmax.f32 %v7085_v27, %v1886_v62  ;;  %1803 = vrot.lane.b32.xlu0 %v7086_v57, %s3277_s30  ;;  %v7088_v5 = vld [vmem:[#allocation74_spill] sm:$0xff]  ;;  %v7090_v27 = vmax.f32 %v4429_v58, 0.0  ;;  %7091 = vst [vmem:[#allocation70_spill] sm:$0xff] %v5229_v53 }
 0x1e9   : > { %2358 = vrot.lane.b32.xlu1 %v7087_v31, %s3277_s30  ;;  %v5223_v35 = vadd.f32 %v7088_v5, %v3640_v46  ;;  %v1776_v62 = vpop.permute.xlu0 %1775  ;;  %v7092_v31 = vmax.f32 %v4441_v56, 0.0 }
 0x1ea   : > { %v2813_v60 = vmax.f32 %v2147_v45, %v2702_v42  ;;  %v2092_v57 = vmax.f32 %v7090_v27, %v1776_v62  ;;  %v7093_v45 = vmax.f32 %v5189_v29, 0.0  ;;  %v7094_v42 = vld [vmem:[#allocation76_spill] sm:$0xff]  ;;  %v7095_v62 = vmax.f32 %v5197_v1, 0.0 }
 0x1eb   : > { %v2331_v41 = vpop.permute.xlu1 %2330  ;;  %v5241_v5 = vadd.f32 %v7094_v42, %v3643_v47 }
 0x1ec   : > { %2925 = vst.msk [vmem:[%s4403_s6 + $0x238] sm:$0xff] %vm2853_vm1, %v2813_v60  ;;  %v2647_v28 = vmax.f32 %v7092_v31, %v2331_v41  ;;  %1915 = vrot.lane.b32.xlu0 %v7093_v45, %s3277_s30  ;;  %v7096_v60 = vld [vmem:[#allocation75_spill] sm:$0xff]  ;;  %v5251_v31 = vpop.f32.mrb[94].mxu1  ;;  %v7098_v45 = vmax.f32 %v4455_v43, 0.0 }
 0x1ed   : > { %2470 = vrot.lane.b32.xlu1 %v7095_v62, %s3277_s30  ;;  %v5249_v27 = vadd.f32 %v7096_v60, %v3640_v46  ;;  %v1888_v41 = vpop.permute.xlu0 %1887  ;;  %7097 = vst [vmem:[#allocation68_spill] sm:$0xff] %v5251_v31  ;;  %v5255_v42 = vpop.f32.mrb[95].mxu1  ;;  %v7100_v62 = vmax.f32 %v4465_v7, 0.0 }
 0x1ee   : > { %v2758_v56 = vmax.f32 %v2092_v57, %v2647_v28  ;;  %v2148_v4 = vmax.f32 %v7098_v45, %v1888_v41  ;;  %7099 = vst [vmem:[#allocation71_spill] sm:$0xff] %v5255_v42  ;;  %v7101_v28 = vmax.f32 %v5215_v59, 0.0  ;;  %v7102_v57 = vld [vmem:[#allocation77_spill] sm:$0xff]  ;;  %v7103_v41 = vmax.f32 %v5223_v35, 0.0 }
 0x1ef   : > { %v2443_v24 = vpop.permute.xlu1 %2442  ;;  %v5267_v60 = vadd.f32 %v7102_v57, %v3640_v46 }
 0x1f0   : > { %2870 = vst.msk [vmem:[%s4403_s6 + $0x80] sm:$0xff] %vm2853_vm1, %v2758_v56  ;;  %v2703_v53 = vmax.f32 %v7100_v62, %v2443_v24  ;;  %2360 = vrot.lane.b32.xlu0 %v7101_v28, %s3277_s30  ;;  %v7104_v56 = vld [vmem:[#allocation78_spill] sm:$0xff]  ;;  %v5277_v62 = vpop.f32.mrb[96].mxu0  ;;  %v7106_v28 = vmax.f32 %v4481_v17, 0.0 }
 0x1f1   : > { %1805 = vrot.lane.b32.xlu1 %v7103_v41, %s3277_s30  ;;  %v5275_v45 = vadd.f32 %v7104_v56, %v3643_v47  ;;  %v2333_v24 = vpop.permute.xlu0 %2332  ;;  %7105 = vst [vmem:[#allocation72_spill] sm:$0xff] %v5277_v62  ;;  %v5281_v57 = vpop.f32.mrb[97].mxu0  ;;  %v7108_v41 = vmax.f32 %v4489_v55, 0.0 }
 0x1f2   : > { %v2814_v7 = vmax.f32 %v2148_v4, %v2703_v53  ;;  %v2648_v58 = vmax.f32 %v7106_v28, %v2333_v24  ;;  %7107 = vst [vmem:[#allocation73_spill] sm:$0xff] %v5281_v57  ;;  %v7109_v4 = vmax.f32 %v5241_v5, 0.0  ;;  %v7110_v53 = vld [vmem:[#allocation79_spill] sm:$0xff]  ;;  %v7111_v24 = vmax.f32 %v5249_v27, 0.0 }
 0x1f3   : > { %v1778_v31 = vpop.permute.xlu1 %1777  ;;  %v5293_v56 = vadd.f32 %v7110_v53, %v3640_v46 }
 0x1f4   : > { %2926 = vst.msk [vmem:[%s4403_s6 + $0x240] sm:$0xff] %vm2853_vm1, %v2814_v7  ;;  %v2093_v42 = vmax.f32 %v7108_v41, %v1778_v31  ;;  %2472 = vrot.lane.b32.xlu0 %v7109_v4, %s3277_s30  ;;  %v7112_v7 = vld [vmem:[#allocation80_spill] sm:$0xff]  ;;  %v5303_v41 = vpop.f32.mrb[96].mxu1  ;;  %v7113_v4 = vmax.f32 %v4511_v21, 0.0 }
 0x1f5   : > { %1917 = vrot.lane.b32.xlu1 %v7111_v24, %s3277_s30  ;;  %v5301_v28 = vadd.f32 %v7112_v7, %v3643_v47  ;;  %v2445_v31 = vpop.permute.xlu0 %2444  ;;  %v5307_v53 = vpop.f32.mrb[97].mxu1  ;;  %v7115_v24 = vmax.f32 %v4519_v51, 0.0  ;;  %v7117_v7 = vmax.f32 %v5275_v45, 0.0 }
 0x1f6   : > { %v2759_v55 = vmax.f32 %v2093_v42, %v2648_v58  ;;  %v2704_v43 = vmax.f32 %v7113_v4, %v2445_v31  ;;  %7114 = vst [vmem:[#allocation74_spill] sm:$0xff] %v5307_v53  ;;  %v7116_v58 = vmax.f32 %v5267_v60, 0.0  ;;  %v5319_v42 = vadd.f32 %v4499_v63, %v3643_v47 }
 0x1f7   : > { %v1890_v57 = vpop.permute.xlu1 %1889  ;;  %v5329_v4 = vpop.f32.mrb[98].mxu0 }
 0x1f8   : > { %2871 = vst.msk [vmem:[%s4403_s6 + $0x88] sm:$0xff] %vm2853_vm1, %v2759_v55  ;;  %v2149_v62 = vmax.f32 %v7115_v24, %v1890_v57  ;;  %1807 = vrot.lane.b32.xlu0 %v7116_v58, %s3277_s30  ;;  %v7118_v55 = vld [vmem:[#allocation81_spill] sm:$0xff]  ;;  %v7119_v24 = vmax.f32 %v4539_v15, 0.0  ;;  %v5333_v63 = vpop.f32.mrb[99].mxu0 }
 0x1f9   : > { %2362 = vrot.lane.b32.xlu1 %v7117_v7, %s3277_s30  ;;  %v5327_v31 = vadd.f32 %v7118_v55, %v3640_v46  ;;  %v1780_v57 = vpop.permute.xlu0 %1779  ;;  %v7120_v7 = vmax.f32 %v4547_v52, 0.0  ;;  %v7122_v55 = vmax.f32 %v5301_v28, 0.0 }
 0x1fa   : > { %v2815_v51 = vmax.f32 %v2149_v62, %v2704_v43  ;;  %v2094_v58 = vmax.f32 %v7119_v24, %v1780_v57  ;;  %v7121_v43 = vmax.f32 %v5293_v56, 0.0  ;;  %v5345_v62 = vadd.f32 %v4527_v44, %v3643_v47  ;;  %v5355_v57 = vpop.f32.mrb[98].mxu1 }
 0x1fb   : > { %v2335_v17 = vpop.permute.xlu1 %2334  ;;  %7123 = vst [vmem:[#allocation76_spill] sm:$0xff] %v5355_v57  ;;  %v7124_v24 = vmax.f32 %v4565_v22, 0.0  ;;  %v5359_v44 = vpop.f32.mrb[99].mxu1  ;;  %v7141_v22 = vld [vmem:[#allocation5_spill] sm:$0xff] }
 0x1fc   : > { %2927 = vst.msk [vmem:[%s4403_s6 + $0x248] sm:$0xff] %vm2853_vm1, %v2815_v51  ;;  %v2649_v53 = vmax.f32 %v7120_v7, %v2335_v17  ;;  %1919 = vrot.lane.b32.xlu0 %v7121_v43, %s3277_s30  ;;  %v5353_v51 = vadd.f32 %v4521_v48, %v3640_v46  ;;  %7125 = vst [vmem:[#allocation75_spill] sm:$0xff] %v5359_v44  ;;  %v7127_v48 = vmax.f32 %v5319_v42, 0.0 }
 0x1fd   : > { %2474 = vrot.lane.b32.xlu1 %v7122_v55, %s3277_s30  ;;  %v1892_v17 = vpop.permute.xlu0 %1891  ;;  %v7126_v55 = vmax.f32 %v4573_v32, 0.0 }
 0x1fe   : > { %v2760_v52 = vmax.f32 %v2094_v58, %v2649_v53  ;;  %v2150_v7 = vmax.f32 %v7124_v24, %v1892_v17  ;;  %v5371_v53 = vadd.f32 %v4549_v3, %v3640_v46  ;;  %v7128_v58 = vmax.f32 %v5327_v31, 0.0  ;;  %v5381_v24 = vpop.f32.mrb[100].mxu0 }
 0x1ff   : > { %v2447_v43 = vpop.permute.xlu1 %2446  ;;  %7130 = vst [vmem:[#allocation78_spill] sm:$0xff] %v5381_v24  ;;  %v5385_v3 = vpop.f32.mrb[101].mxu0 }
 0x200   : > { %2872 = vst.msk [vmem:[%s4403_s6 + $0x90] sm:$0xff] %vm2853_vm1, %v2760_v52  ;;  %v2705_v21 = vmax.f32 %v7126_v55, %v2447_v43  ;;  %2364 = vrot.lane.b32.xlu0 %v7127_v48, %s3277_s30  ;;  %v5379_v52 = vadd.f32 %v4553_v9, %v3643_v47  ;;  %v7131_v43 = vmax.f32 %v4591_v12, 0.0  ;;  %7132 = vst [vmem:[#allocation79_spill] sm:$0xff] %v5385_v3  ;;  %v7134_v9 = vmax.f32 %v5345_v62, 0.0 }
 0x201   : > { %1809 = vrot.lane.b32.xlu1 %v7128_v58, %s3277_s30  ;;  %v7133_v58 = vmax.f32 %v4599_v49, 0.0 }
 0x202   : > { %7129 = vst [vmem:[#allocation77_spill] sm:$0xff] %v5379_v52  ;;  %v2816_v32 = vmax.f32 %v2150_v7, %v2705_v21  ;;  %v2337_v17 = vpop.permute.xlu0 %2336  ;;  %v7135_v21 = vld [vmem:[#allocation27_spill] sm:$0xff] }
 0x203   : > { %v2650_v55 = vmax.f32 %v7131_v43, %v2337_v17  ;;  %v1782_v48 = vpop.permute.xlu1 %1781  ;;  %v5397_v7 = vadd.f32 %v7135_v21, %v3640_v46  ;;  %v7137_v17 = vmax.f32 %v5353_v51, 0.0 }
 0x204   : > { %2928 = vst.msk [vmem:[%s4403_s6 + $0x250] sm:$0xff] %vm2853_vm1, %v2816_v32  ;;  %v2095_v15 = vmax.f32 %v7133_v58, %v1782_v48  ;;  %2476 = vrot.lane.b32.xlu0 %v7134_v9, %s3277_s30  ;;  %v7138_v32 = vld [vmem:[#allocation2_spill] sm:$0xff]  ;;  %v5407_v58 = vpop.f32.mrb[100].mxu1  ;;  %v7142_v9 = vmax.f32 %v7141_v22, 0.0  ;;  %v7162_v22 = vld [vmem:[#allocation9_spill] sm:$0xff] }
 0x205   : > { %7136 = vst [vmem:[#allocation80_spill] sm:$0xff] %v5397_v7  ;;  %1921 = vrot.lane.b32.xlu1 %v7137_v17, %s3277_s30  ;;  %v5405_v43 = vadd.f32 %v7138_v32, %v3643_v47  ;;  %7140 = vst [vmem:[#allocation27_spill] sm:$0xff] %v5407_v58  ;;  %v5411_v21 = vpop.f32.mrb[101].mxu1  ;;  %v7144_v17 = vld [vmem:[#allocation31_spill] sm:$0xff] }
 0x206   : > { %v2761_v49 = vmax.f32 %v2095_v15, %v2650_v55  ;;  %v2449_v48 = vpop.permute.xlu0 %2448  ;;  %7143 = vst [vmem:[#allocation2_spill] sm:$0xff] %v5411_v21  ;;  %v7145_v57 = vmax.f32 %v7144_v17, 0.0  ;;  %v7146_v15 = vmax.f32 %v5371_v53, 0.0  ;;  %v7147_v55 = vld [vmem:[#allocation4_spill] sm:$0xff] }
 0x207   : > { %7139 = vst [vmem:[#allocation81_spill] sm:$0xff] %v5405_v43  ;;  %v2706_v3 = vmax.f32 %v7142_v9, %v2449_v48  ;;  %v1894_v24 = vpop.permute.xlu1 %1893  ;;  %v5423_v32 = vadd.f32 %v7147_v55, %v3643_v47  ;;  %v7148_v48 = vmax.f32 %v5379_v52, 0.0 }
 0x208   : > { %2873 = vst.msk [vmem:[%s4403_s6 + $0x98] sm:$0xff] %vm2853_vm1, %v2761_v49  ;;  %v2151_v44 = vmax.f32 %v7145_v57, %v1894_v24  ;;  %1811 = vrot.lane.b32.xlu0 %v7146_v15, %s3277_s30  ;;  %v7149_v49 = vld [vmem:[#allocation3_spill] sm:$0xff]  ;;  %v5433_v24 = vpop.f32.mrb[102].mxu0  ;;  %v7152_v15 = vmax.f32 %v4643_v39, 0.0 }
 0x209   : > { %2366 = vrot.lane.b32.xlu1 %v7148_v48, %s3277_s30  ;;  %v5431_v9 = vadd.f32 %v7149_v49, %v3640_v46  ;;  %7151 = vst [vmem:[#allocation31_spill] sm:$0xff] %v5433_v24  ;;  %v5437_v55 = vpop.f32.mrb[103].mxu0  ;;  %v7154_v48 = vld [vmem:[#allocation7_spill] sm:$0xff] }
 0x20a   : > { %v2817_v17 = vmax.f32 %v2151_v44, %v2706_v3  ;;  %v1784_v57 = vpop.permute.xlu0 %1783  ;;  %7153 = vst [vmem:[#allocation4_spill] sm:$0xff] %v5437_v55  ;;  %v7155_v58 = vmax.f32 %v7154_v48, 0.0  ;;  %v7156_v44 = vmax.f32 %v5397_v7, 0.0  ;;  %v7157_v3 = vld [vmem:[#allocation6_spill] sm:$0xff] }
 0x20b   : > { %7150 = vst [vmem:[#allocation5_spill] sm:$0xff] %v5431_v9  ;;  %v2096_v12 = vmax.f32 %v7152_v15, %v1784_v57  ;;  %v2339_v21 = vpop.permute.xlu1 %2338  ;;  %v5449_v49 = vadd.f32 %v7157_v3, %v3643_v47  ;;  %v7158_v57 = vmax.f32 %v5405_v43, 0.0 }
 0x20c   : > { %2929 = vst.msk [vmem:[%s4403_s6 + $0x258] sm:$0xff] %vm2853_vm1, %v2817_v17  ;;  %v2651_v52 = vmax.f32 %v7155_v58, %v2339_v21  ;;  %1923 = vrot.lane.b32.xlu0 %v7156_v44, %s3277_s30  ;;  %v7159_v17 = vld [vmem:[#allocation29_spill] sm:$0xff]  ;;  %v5459_v21 = vpop.f32.mrb[102].mxu1  ;;  %v7163_v44 = vmax.f32 %v7162_v22, 0.0 }
 0x20d   : > { %2478 = vrot.lane.b32.xlu1 %v7158_v57, %s3277_s30  ;;  %v5457_v15 = vadd.f32 %v7159_v17, %v3640_v46  ;;  %7161 = vst [vmem:[#allocation7_spill] sm:$0xff] %v5459_v21  ;;  %v5463_v3 = vpop.f32.mrb[103].mxu1  ;;  %v7165_v57 = vld [vmem:[#allocation33_spill] sm:$0xff] }
 0x20e   : > { %v2762_v48 = vmax.f32 %v2096_v12, %v2651_v52  ;;  %v1896_v58 = vpop.permute.xlu0 %1895  ;;  %7164 = vst [vmem:[#allocation6_spill] sm:$0xff] %v5463_v3  ;;  %v7166_v43 = vmax.f32 %v7165_v57, 0.0  ;;  %v7167_v52 = vmax.f32 %v5423_v32, 0.0  ;;  %v7168_v12 = vld [vmem:[#allocation82_spill] sm:$0xff] }
 0x20f   : > { %7160 = vst [vmem:[#allocation3_spill] sm:$0xff] %v5457_v15  ;;  %v2152_v24 = vmax.f32 %v7163_v44, %v1896_v58  ;;  %v2451_v55 = vpop.permute.xlu1 %2450  ;;  %v5475_v17 = vadd.f32 %v7168_v12, %v3640_v46  ;;  %v7169_v58 = vmax.f32 %v5431_v9, 0.0 }
 0x210   : > { %2874 = vst.msk [vmem:[%s4403_s6 + $0xa0] sm:$0xff] %vm2853_vm1, %v2762_v48  ;;  %v2707_v7 = vmax.f32 %v7166_v43, %v2451_v55  ;;  %2368 = vrot.lane.b32.xlu0 %v7167_v52, %s3277_s30  ;;  %v7170_v48 = vld [vmem:[#allocation8_spill] sm:$0xff]  ;;  %v5485_v55 = vpop.f32.mrb[104].mxu0  ;;  %v7172_v52 = vmax.f32 %v4695_v20, 0.0 }
 0x211   : > { %1813 = vrot.lane.b32.xlu1 %v7169_v58, %s3277_s30  ;;  %v5483_v44 = vadd.f32 %v7170_v48, %v3643_v47  ;;  %7171 = vst [vmem:[#allocation29_spill] sm:$0xff] %v5485_v55  ;;  %v5489_v12 = vpop.f32.mrb[105].mxu0  ;;  %v7174_v58 = vld [vmem:[#allocation11_spill] sm:$0xff] }
 0x212   : > { %v2818_v57 = vmax.f32 %v2152_v24, %v2707_v7  ;;  %v2341_v43 = vpop.permute.xlu0 %2340  ;;  %7173 = vst [vmem:[#allocation9_spill] sm:$0xff] %v5489_v12  ;;  %v7175_v3 = vmax.f32 %v7174_v58, 0.0  ;;  %v7176_v7 = vmax.f32 %v5449_v49, 0.0  ;;  %v7177_v24 = vld [vmem:[#allocation35_spill] sm:$0xff] }
 0x213   : > { %v2652_v39 = vmax.f32 %v7172_v52, %v2341_v43  ;;  %v1786_v21 = vpop.permute.xlu1 %1785  ;;  %v5501_v48 = vadd.f32 %v7177_v24, %v3640_v46  ;;  %v7178_v43 = vmax.f32 %v5457_v15, 0.0 }
 0x214   : > { %2930 = vst.msk [vmem:[%s4403_s6 + $0x260] sm:$0xff] %vm2853_vm1, %v2818_v57  ;;  %v2097_v9 = vmax.f32 %v7175_v3, %v1786_v21  ;;  %2480 = vrot.lane.b32.xlu0 %v7176_v7, %s3277_s30  ;;  %v7179_v57 = vld [vmem:[#allocation10_spill] sm:$0xff]  ;;  %v5511_v3 = vpop.f32.mrb[104].mxu1  ;;  %v7181_v7 = vmax.f32 %v4721_v26, 0.0 }
 0x215   : > { %1925 = vrot.lane.b32.xlu1 %v7178_v43, %s3277_s30  ;;  %v5509_v52 = vadd.f32 %v7179_v57, %v3643_v47  ;;  %7180 = vst [vmem:[#allocation33_spill] sm:$0xff] %v5511_v3  ;;  %v5515_v24 = vpop.f32.mrb[105].mxu1  ;;  %v7183_v43 = vld [vmem:[#allocation13_spill] sm:$0xff] }
 0x216   : > { %v2763_v58 = vmax.f32 %v2097_v9, %v2652_v39  ;;  %v2453_v21 = vpop.permute.xlu0 %2452  ;;  %7182 = vst [vmem:[#allocation82_spill] sm:$0xff] %v5515_v24  ;;  %v7184_v55 = vmax.f32 %v7183_v43, 0.0  ;;  %v7185_v9 = vmax.f32 %v5475_v17, 0.0  ;;  %v7186_v39 = vld [vmem:[#allocation12_spill] sm:$0xff] }
 0x217   : > { %v2708_v22 = vmax.f32 %v7181_v7, %v2453_v21  ;;  %v1898_v12 = vpop.permute.xlu1 %1897  ;;  %v5527_v57 = vadd.f32 %v7186_v39, %v3643_v47  ;;  %v7187_v21 = vmax.f32 %v5483_v44, 0.0 }
 0x218   : > { %2875 = vst.msk [vmem:[%s4403_s6 + $0xa8] sm:$0xff] %vm2853_vm1, %v2763_v58  ;;  %v2153_v15 = vmax.f32 %v7184_v55, %v1898_v12  ;;  %1815 = vrot.lane.b32.xlu0 %v7185_v9, %s3277_s30  ;;  %v7188_v58 = vld [vmem:[#allocation37_spill] sm:$0xff]  ;;  %v5537_v12 = vpop.f32.mrb[106].mxu0  ;;  %v7190_v9 = vmax.f32 %v4747_v16, 0.0  ;;  %v7201_v16 = vld [vmem:[#allocation42_spill] sm:$0xff] }
 0x219   : > { %2370 = vrot.lane.b32.xlu1 %v7187_v21, %s3277_s30  ;;  %v5535_v7 = vadd.f32 %v7188_v58, %v3640_v46  ;;  %7189 = vst [vmem:[#allocation8_spill] sm:$0xff] %v5537_v12  ;;  %v5541_v24 = vpop.f32.mrb[107].mxu0  ;;  %v7192_v21 = vmax.f32 %v4755_v2, 0.0 }
 0x21a   : > { %v2819_v43 = vmax.f32 %v2153_v15, %v2708_v22  ;;  %v1788_v55 = vpop.permute.xlu0 %1787  ;;  %7191 = vst [vmem:[#allocation11_spill] sm:$0xff] %v5541_v24  ;;  %v7193_v15 = vmax.f32 %v5501_v48, 0.0  ;;  %v7194_v22 = vld [vmem:[#allocation38_spill] sm:$0xff]  ;;  %v7202_v24 = vmax.f32 %v7201_v16, 0.0 }
 0x21b   : > { %v2098_v20 = vmax.f32 %v7190_v9, %v1788_v55  ;;  %v2343_v39 = vpop.permute.xlu1 %2342  ;;  %v5553_v58 = vadd.f32 %v7194_v22, %v3643_v47  ;;  %v7196_v55 = vmax.f32 %v5509_v52, 0.0  ;;  %v5565_v12 = vpop.f32.mrb[108].mxu0 }
 0x21c   : > { %2931 = vst.msk [vmem:[%s4403_s6 + $0x268] sm:$0xff] %vm2853_vm1, %v2819_v43  ;;  %v2653_v3 = vmax.f32 %v7192_v21, %v2343_v39  ;;  %1927 = vrot.lane.b32.xlu0 %v7193_v15, %s3277_s30  ;;  %v7197_v43 = vld [vmem:[#allocation40_spill] sm:$0xff]  ;;  %v7199_v21 = vmax.f32 %v4773_v54, 0.0  ;;  %7200 = vst [vmem:[#allocation13_spill] sm:$0xff] %v5565_v12  ;;  %v5579_v54 = vpop.f32.mrb[106].mxu1 }
 0x21d   : > { %7195 = vst [vmem:[#allocation35_spill] sm:$0xff] %v5553_v58  ;;  %2482 = vrot.lane.b32.xlu1 %v7196_v55, %s3277_s30  ;;  %v5561_v9 = vadd.f32 %v7197_v43, %v3640_v46  ;;  %v7203_v43 = vmax.f32 %v5527_v57, 0.0  ;;  %7205 = vst [vmem:[#allocation12_spill] sm:$0xff] %v5579_v54 }
 0x21e   : > { %v2764_v2 = vmax.f32 %v2098_v20, %v2653_v3  ;;  %v1900_v39 = vpop.permute.xlu0 %1899  ;;  %v7204_v20 = vld [vmem:[#allocation14_spill] sm:$0xff] }
 0x21f   : > { %7198 = vst [vmem:[#allocation10_spill] sm:$0xff] %v5561_v9  ;;  %v2154_v26 = vmax.f32 %v7199_v21, %v1900_v39  ;;  %v2455_v15 = vpop.permute.xlu1 %2454  ;;  %v5577_v3 = vadd.f32 %v7204_v20, %v3640_v46  ;;  %v5581_v39 = vpop.f32.mrb[109].mxu0  ;;  %v7210_v20 = vmax.f32 %v4799_v10, 0.0 }
 0x220   : > { %2876 = vst.msk [vmem:[%s4403_s6 + $0xb0] sm:$0xff] %vm2853_vm1, %v2764_v2  ;;  %v2709_v55 = vmax.f32 %v7202_v24, %v2455_v15  ;;  %2372 = vrot.lane.b32.xlu0 %v7203_v43, %s3277_s30  ;;  %7206 = vst [vmem:[#allocation37_spill] sm:$0xff] %v5581_v39  ;;  %v7207_v2 = vmax.f32 %v5535_v7, 0.0  ;;  %v7208_v24 = vld [vmem:[#allocation15_spill] sm:$0xff]  ;;  %v5591_v15 = vpop.f32.mrb[107].mxu1  ;;  %v7211_v39 = vmax.f32 %v4807_v36, 0.0 }
 0x221   : > { %v5589_v16 = vadd.f32 %v7208_v24, %v3643_v47  ;;  %7209 = vst [vmem:[#allocation38_spill] sm:$0xff] %v5591_v15  ;;  %v7212_v24 = vmax.f32 %v5553_v58, 0.0  ;;  %v7213_v15 = vld [vmem:[#allocation16_spill] sm:$0xff] }
 0x222   : > { %1817 = vrot.lane.b32.xlu1 %v7207_v2, %s3277_s30  ;;  %v2820_v43 = vmax.f32 %v2154_v26, %v2709_v55  ;;  %v2345_v22 = vpop.permute.xlu0 %2344  ;;  %v5605_v26 = vadd.f32 %v7213_v15, %v3640_v46  ;;  %v5607_v55 = vpop.f32.mrb[108].mxu1  ;;  %v7220_v15 = vmax.f32 %v4825_v14, 0.0  ;;  %v7230_v14 = vld [vmem:[#allocation46_spill] sm:$0xff] }
 0x223   : > { %v2654_v12 = vmax.f32 %v7210_v20, %v2345_v22  ;;  %v1790_v54 = vpop.permute.xlu1 %1789  ;;  %7215 = vst [vmem:[#allocation42_spill] sm:$0xff] %v5607_v55  ;;  %v7216_v22 = vmax.f32 %v5561_v9, 0.0  ;;  %v7222_v9 = vld [vmem:[#allocation19_spill] sm:$0xff] }
 0x224   : > { %2932 = vst.msk [vmem:[%s4403_s6 + $0x270] sm:$0xff] %vm2853_vm1, %v2820_v43  ;;  %v2099_v2 = vmax.f32 %v7211_v39, %v1790_v54  ;;  %2484 = vrot.lane.b32.xlu0 %v7212_v24, %s3277_s30  ;;  %7214 = vst [vmem:[#allocation40_spill] sm:$0xff] %v5605_v26  ;;  %v7217_v43 = vld [vmem:[#allocation17_spill] sm:$0xff]  ;;  %v5617_v54 = vpop.f32.mrb[109].mxu1  ;;  %v5619_v24 = vpop.f32.mrb[110].mxu0 }
 0x225   : > { %v5615_v36 = vadd.f32 %v7217_v43, %v3643_v47  ;;  %7218 = vst [vmem:[#allocation14_spill] sm:$0xff] %v5617_v54  ;;  %7219 = vst [vmem:[#allocation15_spill] sm:$0xff] %v5619_v24  ;;  %v5623_v10 = vpop.f32.mrb[111].mxu0  ;;  %v7223_v43 = vmax.f32 %v7222_v9, 0.0  ;;  %v7231_v24 = vmax.f32 %v7230_v14, 0.0 }
 0x226   : > { %1929 = vrot.lane.b32.xlu1 %v7216_v22, %s3277_s30  ;;  %v2765_v39 = vmax.f32 %v2099_v2, %v2654_v12  ;;  %v2457_v20 = vpop.permute.xlu0 %2456  ;;  %7221 = vst [vmem:[#allocation16_spill] sm:$0xff] %v5623_v10  ;;  %v7224_v12 = vmax.f32 %v5577_v3, 0.0  ;;  %v7225_v2 = vld [vmem:[#allocation18_spill] sm:$0xff] }
 0x227   : > { %v2710_v21 = vmax.f32 %v7220_v15, %v2457_v20  ;;  %v1902_v55 = vpop.permute.xlu1 %1901  ;;  %v5635_v54 = vadd.f32 %v7225_v2, %v3643_v47  ;;  %v7227_v20 = vmax.f32 %v5589_v16, 0.0 }
 0x228   : > { %2877 = vst.msk [vmem:[%s4403_s6 + $0xb8] sm:$0xff] %vm2853_vm1, %v2765_v39  ;;  %v2155_v58 = vmax.f32 %v7223_v43, %v1902_v55  ;;  %1819 = vrot.lane.b32.xlu0 %v7224_v12, %s3277_s30  ;;  %v7228_v39 = vld [vmem:[#allocation43_spill] sm:$0xff]  ;;  %v7229_v43 = vmax.f32 %v4851_v38, 0.0  ;;  %v7235_v38 = vmax.f32 %v5615_v36, 0.0 }
 0x229   : > { %7226 = vst [vmem:[#allocation17_spill] sm:$0xff] %v5635_v54  ;;  %v5643_v15 = vadd.f32 %v7228_v39, %v3640_v46  ;;  %v7233_v39 = vld [vmem:[#allocation21_spill] sm:$0xff] }
 0x22a   : > { %2374 = vrot.lane.b32.xlu1 %v7227_v20, %s3277_s30  ;;  %v2821_v9 = vmax.f32 %v2155_v58, %v2710_v21  ;;  %v1792_v55 = vpop.permute.xlu0 %1791  ;;  %v7232_v20 = vmax.f32 %v5605_v26, 0.0  ;;  %v5657_v58 = vadd.f32 %v7233_v39, %v3643_v47  ;;  %v7238_v21 = vld [vmem:[#allocation24_spill] sm:$0xff] }
 0x22b   : > { %v2100_v12 = vmax.f32 %v7229_v43, %v1792_v55  ;;  %v2347_v22 = vpop.permute.xlu1 %2346  ;;  %v7239_v2 = vmax.f32 %v7238_v21, 0.0 }
 0x22c   : > { %2933 = vst.msk [vmem:[%s4403_s6 + $0x278] sm:$0xff] %vm2853_vm1, %v2821_v9  ;;  %v2655_v10 = vmax.f32 %v7231_v24, %v2347_v22  ;;  %1931 = vrot.lane.b32.xlu0 %v7232_v20, %s3277_s30  ;;  %7234 = vst [vmem:[#allocation19_spill] sm:$0xff] %v5657_v58  ;;  %v7236_v9 = vld [vmem:[#allocation20_spill] sm:$0xff]  ;;  %v7237_v22 = vmax.f32 %v4877_v13, 0.0  ;;  %v7243_v13 = vmax.f32 %v5643_v15, 0.0 }
 0x22d   : > { %v5665_v55 = vadd.f32 %v7236_v9, %v3640_v46  ;;  %v7241_v9 = vld [vmem:[#allocation22_spill] sm:$0xff] }
 0x22e   : > { %2486 = vrot.lane.b32.xlu1 %v7235_v38, %s3277_s30  ;;  %v2766_v14 = vmax.f32 %v2100_v12, %v2655_v10  ;;  %v1904_v24 = vpop.permute.xlu0 %1903  ;;  %v7240_v38 = vmax.f32 %v5635_v54, 0.0  ;;  %v5679_v10 = vadd.f32 %v7241_v9, %v3640_v46  ;;  %v7246_v12 = vld [vmem:[#allocation26_spill] sm:$0xff] }
 0x22f   : > { %v2156_v43 = vmax.f32 %v7237_v22, %v1904_v24  ;;  %v2459_v20 = vpop.permute.xlu1 %2458  ;;  %v7245_v22 = vmax.f32 %v4903_v25, 0.0  ;;  %v7247_v39 = vmax.f32 %v7246_v12, 0.0  ;;  %v7251_v25 = vmax.f32 %v5665_v55, 0.0 }
 0x230   : > { %2878 = vst.msk [vmem:[%s4403_s6 + $0xc0] sm:$0xff] %vm2853_vm1, %v2766_v14  ;;  %v2711_v26 = vmax.f32 %v7239_v2, %v2459_v20  ;;  %2376 = vrot.lane.b32.xlu0 %v7240_v38, %s3277_s30  ;;  %7242 = vst [vmem:[#allocation18_spill] sm:$0xff] %v5679_v10  ;;  %v7244_v14 = vld [vmem:[#allocation23_spill] sm:$0xff] }
 0x231   : > { %v5687_v24 = vadd.f32 %v7244_v14, %v3643_v47  ;;  %v7249_v14 = vld [vmem:[#allocation25_spill] sm:$0xff] }
 0x232   : > { %1821 = vrot.lane.b32.xlu1 %v7243_v13, %s3277_s30  ;;  %v2822_v21 = vmax.f32 %v2156_v43, %v2711_v26  ;;  %v2349_v2 = vpop.permute.xlu0 %2348  ;;  %v7248_v13 = vmax.f32 %v5657_v58, 0.0  ;;  %v5701_v26 = vadd.f32 %v7249_v14, %v3640_v46  ;;  %v7254_v43 = vld [vmem:[#allocation30_spill] sm:$0xff] }
 0x233   : > { %v2656_v20 = vmax.f32 %v7245_v22, %v2349_v2  ;;  %v1794_v38 = vpop.permute.xlu1 %1793  ;;  %v7253_v22 = vmax.f32 %v4929_v18, 0.0  ;;  %v7255_v9 = vmax.f32 %v7254_v43, 0.0  ;;  %v7259_v18 = vmax.f32 %v5687_v24, 0.0 }
 0x234   : > { %2934 = vst.msk [vmem:[%s4403_s6 + $0x280] sm:$0xff] %vm2853_vm1, %v2822_v21  ;;  %v2101_v54 = vmax.f32 %v7247_v39, %v1794_v38  ;;  %2488 = vrot.lane.b32.xlu0 %v7248_v13, %s3277_s30  ;;  %7250 = vst [vmem:[#allocation43_spill] sm:$0xff] %v5701_v26  ;;  %v7252_v21 = vld [vmem:[#allocation49_spill] sm:$0xff] }
 0x235   : > { %v5709_v2 = vadd.f32 %v7252_v21, %v3643_v47  ;;  %v7257_v21 = vld [vmem:[#allocation52_spill] sm:$0xff] }
 0x236   : > { %1933 = vrot.lane.b32.xlu1 %v7251_v25, %s3277_s30  ;;  %v2767_v12 = vmax.f32 %v2101_v54, %v2656_v20  ;;  %v2461_v39 = vpop.permute.xlu0 %2460  ;;  %v7256_v25 = vmax.f32 %v5679_v10, 0.0  ;;  %v5723_v54 = vadd.f32 %v7257_v21, %v3643_v47  ;;  %v7263_v20 = vld [vmem:[#allocation34_spill] sm:$0xff] }
 0x237   : > { %v2712_v38 = vmax.f32 %v7253_v22, %v2461_v39  ;;  %v1906_v13 = vpop.permute.xlu1 %1905  ;;  %v7262_v22 = vmax.f32 %v4955_v8, 0.0  ;;  %v7264_v14 = vmax.f32 %v7263_v20, 0.0  ;;  %v7268_v8 = vmax.f32 %v5709_v2, 0.0 }
 0x238   : > { %2879 = vst.msk [vmem:[%s4403_s6 + $0xc8] sm:$0xff] %vm2853_vm1, %v2767_v12  ;;  %v2157_v58 = vmax.f32 %v7255_v9, %v1906_v13  ;;  %1823 = vrot.lane.b32.xlu0 %v7256_v25, %s3277_s30  ;;  %7258 = vst [vmem:[#allocation46_spill] sm:$0xff] %v5723_v54  ;;  %v7260_v12 = vld [vmem:[#allocation28_spill] sm:$0xff] }
 0x239   : > { %v5731_v39 = vadd.f32 %v7260_v12, %v3640_v46  ;;  %v7266_v12 = vld [vmem:[#allocation53_spill] sm:$0xff] }
 0x23a   : > { %2378 = vrot.lane.b32.xlu1 %v7259_v18, %s3277_s30  ;;  %v2823_v43 = vmax.f32 %v2157_v58, %v2712_v38  ;;  %v1796_v9 = vpop.permute.xlu0 %1795  ;;  %v7265_v18 = vmax.f32 %v5701_v26, 0.0  ;;  %v5745_v58 = vadd.f32 %v7266_v12, %v3643_v47  ;;  %v7272_v38 = vld [vmem:[#allocation39_spill] sm:$0xff] }
 0x23b   : > { %7261 = vst [vmem:[#allocation21_spill] sm:$0xff] %v5731_v39  ;;  %v2102_v13 = vmax.f32 %v7262_v22, %v1796_v9  ;;  %v2351_v25 = vpop.permute.xlu1 %2350  ;;  %v7271_v22 = vmax.f32 %v4981_v37, 0.0  ;;  %v7273_v21 = vmax.f32 %v7272_v38, 0.0  ;;  %v7277_v37 = vmax.f32 %v5731_v39, 0.0 }
 0x23c   : > { %2935 = vst.msk [vmem:[%s4403_s6 + $0x288] sm:$0xff] %vm2853_vm1, %v2823_v43  ;;  %v2657_v10 = vmax.f32 %v7264_v14, %v2351_v25  ;;  %1935 = vrot.lane.b32.xlu0 %v7265_v18, %s3277_s30  ;;  %7267 = vst [vmem:[#allocation20_spill] sm:$0xff] %v5745_v58  ;;  %v7269_v43 = vld [vmem:[#allocation32_spill] sm:$0xff] }
 0x23d   : > { %v5753_v9 = vadd.f32 %v7269_v43, %v3640_v46  ;;  %v7275_v43 = vld [vmem:[#allocation36_spill] sm:$0xff] }
 0x23e   : > { %2490 = vrot.lane.b32.xlu1 %v7268_v8, %s3277_s30  ;;  %v2768_v20 = vmax.f32 %v2102_v13, %v2657_v10  ;;  %v1908_v14 = vpop.permute.xlu0 %1907  ;;  %v7274_v8 = vmax.f32 %v5723_v54, 0.0  ;;  %v5767_v10 = vadd.f32 %v7275_v43, %v3640_v46  ;;  %v7280_v13 = vld [vmem:[#allocation44_spill] sm:$0xff] }
 0x23f   : > { %7270 = vst [vmem:[#allocation24_spill] sm:$0xff] %v5753_v9  ;;  %v2158_v25 = vmax.f32 %v7271_v22, %v1908_v14  ;;  %v2463_v18 = vpop.permute.xlu1 %2462  ;;  %v7279_v22 = vmax.f32 %v5007_v30, 0.0  ;;  %v7281_v12 = vmax.f32 %v7280_v13, 0.0  ;;  %v7284_v30 = vmax.f32 %v5753_v9, 0.0 }
 0x240   : > { %2880 = vst.msk [vmem:[%s4403_s6 + $0xd0] sm:$0xff] %vm2853_vm1, %v2768_v20  ;;  %v2713_v26 = vmax.f32 %v7273_v21, %v2463_v18  ;;  %2380 = vrot.lane.b32.xlu0 %v7274_v8, %s3277_s30  ;;  %7276 = vst [vmem:[#allocation22_spill] sm:$0xff] %v5767_v10  ;;  %v7278_v20 = vld [vmem:[#allocation56_spill] sm:$0xff] }
 0x241   : > { %v5775_v14 = vadd.f32 %v7278_v20, %v3643_v47  ;;  %v7283_v20 = vld [vmem:[#allocation41_spill] sm:$0xff] }
 0x242   : > { %1825 = vrot.lane.b32.xlu1 %v7277_v37, %s3277_s30  ;;  %v2824_v38 = vmax.f32 %v2158_v25, %v2713_v26  ;;  %v2353_v21 = vpop.permute.xlu0 %2352  ;;  %v7282_v37 = vmax.f32 %v5745_v58, 0.0  ;;  %v5789_v26 = vadd.f32 %v7283_v20, %v3640_v46  ;;  %v7288_v25 = vld [vmem:[#allocation48_spill] sm:$0xff] }
 0x243   : > { %v2658_v18 = vmax.f32 %v7279_v22, %v2353_v21  ;;  %v1798_v8 = vpop.permute.xlu1 %1797  ;;  %v7286_v22 = vld [vmem:[#allocation47_spill] sm:$0xff]  ;;  %v7289_v58 = vmax.f32 %v7288_v25, 0.0 }
 0x244   : > { %2936 = vst.msk [vmem:[%s4403_s6 + $0x290] sm:$0xff] %vm2853_vm1, %v2824_v38  ;;  %v2103_v54 = vmax.f32 %v7281_v12, %v1798_v8  ;;  %2492 = vrot.lane.b32.xlu0 %v7282_v37, %s3277_s30  ;;  %v7285_v38 = vld [vmem:[#allocation57_spill] sm:$0xff]  ;;  %v7287_v8 = vmax.f32 %v7286_v22, 0.0 }
 0x245   : > { %v5797_v21 = vadd.f32 %v7285_v38, %v3643_v47  ;;  %v7291_v38 = vld [vmem:[#allocation60_spill] sm:$0xff] }
 0x246   : > { %1937 = vrot.lane.b32.xlu1 %v7284_v30, %s3277_s30  ;;  %v2769_v13 = vmax.f32 %v2103_v54, %v2658_v18  ;;  %v2465_v12 = vpop.permute.xlu0 %2464  ;;  %v7290_v30 = vmax.f32 %v5767_v10, 0.0  ;;  %v5811_v54 = vadd.f32 %v7291_v38, %v3643_v47  ;;  %v7296_v18 = vld [vmem:[#allocation64_spill] sm:$0xff] }
 0x247   : > { %v2714_v37 = vmax.f32 %v7287_v8, %v2465_v12  ;;  %v1910_v43 = vpop.permute.xlu1 %1909  ;;  %v7292_v12 = vmax.f32 %v5775_v14, 0.0  ;;  %v7297_v10 = vmax.f32 %v7296_v18, 0.0 }
 0x248   : > { %2881 = vst.msk [vmem:[%s4403_s6 + $0xd8] sm:$0xff] %vm2853_vm1, %v2769_v13  ;;  %v2159_v39 = vmax.f32 %v7289_v58, %v1910_v43  ;;  %1827 = vrot.lane.b32.xlu0 %v7290_v30, %s3277_s30  ;;  %v7293_v13 = vld [vmem:[#allocation45_spill] sm:$0xff]  ;;  %v7294_v43 = vld [vmem:[#allocation51_spill] sm:$0xff] }
 0x249   : > { %v5819_v22 = vadd.f32 %v7293_v13, %v3640_v46  ;;  %v7295_v8 = vmax.f32 %v7294_v43, 0.0  ;;  %v7299_v13 = vld [vmem:[#allocation50_spill] sm:$0xff] }
 0x24a   : > { %2382 = vrot.lane.b32.xlu1 %v7292_v12, %s3277_s30  ;;  %v2825_v25 = vmax.f32 %v2159_v39, %v2714_v37  ;;  %v1800_v58 = vpop.permute.xlu0 %1799  ;;  %v7298_v12 = vmax.f32 %v5789_v26, 0.0  ;;  %v5833_v39 = vadd.f32 %v7299_v13, %v3643_v47  ;;  %v7303_v37 = vmax.f32 %v5093_v6, 0.0 }
 0x24b   : > { %v2104_v30 = vmax.f32 %v7295_v8, %v1800_v58  ;;  %v2355_v20 = vpop.permute.xlu1 %2354  ;;  %v7300_v58 = vmax.f32 %v5797_v21, 0.0 }
 0x24c   : > { %2937 = vst.msk [vmem:[%s4403_s6 + $0x298] sm:$0xff] %vm2853_vm1, %v2825_v25  ;;  %v2659_v9 = vmax.f32 %v7297_v10, %v2355_v20  ;;  %1939 = vrot.lane.b32.xlu0 %v7298_v12, %s3277_s30  ;;  %v7301_v25 = vld [vmem:[#allocation61_spill] sm:$0xff]  ;;  %v7302_v20 = vmax.f32 %v5085_v33, 0.0  ;;  %v7306_v33 = vmax.f32 %v5819_v22, 0.0 }
 0x24d   : > { %v5841_v43 = vadd.f32 %v7301_v25, %v3640_v46  ;;  %v7305_v25 = vld [vmem:[#allocation83_spill] sm:$0xff] }
 0x24e   : > { %2494 = vrot.lane.b32.xlu1 %v7300_v58, %s3277_s30  ;;  %v2770_v18 = vmax.f32 %v2104_v30, %v2659_v9  ;;  %v1912_v10 = vpop.permute.xlu0 %1911  ;;  %v7304_v58 = vmax.f32 %v5811_v54, 0.0  ;;  %v5855_v9 = vadd.f32 %v7305_v25, %v3640_v46  ;;  %v7309_v30 = vmax.f32 %v5119_v11, 0.0 }
 0x24f   : > { %v2160_v8 = vmax.f32 %v7302_v20, %v1912_v10  ;;  %v2467_v12 = vpop.permute.xlu1 %2466  ;;  %v7308_v20 = vmax.f32 %v5111_v34, 0.0  ;;  %v7312_v34 = vmax.f32 %v5841_v43, 0.0 }
 0x250   : > { %2882 = vst.msk [vmem:[%s4403_s6 + $0xe0] sm:$0xff] %vm2853_vm1, %v2770_v18  ;;  %v2715_v38 = vmax.f32 %v7303_v37, %v2467_v12  ;;  %2384 = vrot.lane.b32.xlu0 %v7304_v58, %s3277_s30  ;;  %v7307_v18 = vld [vmem:[#allocation54_spill] sm:$0xff] }
 0x251   : > { %v5863_v10 = vadd.f32 %v7307_v18, %v3643_v47  ;;  %v7311_v18 = vld [vmem:[#allocation55_spill] sm:$0xff] }
 0x252   : > { %1829 = vrot.lane.b32.xlu1 %v7306_v33, %s3277_s30  ;;  %v2826_v6 = vmax.f32 %v2160_v8, %v2715_v38  ;;  %v2357_v37 = vpop.permute.xlu0 %2356  ;;  %v7310_v33 = vmax.f32 %v5833_v39, 0.0  ;;  %v5877_v38 = vadd.f32 %v7311_v18, %v3640_v46  ;;  %v7315_v8 = vmax.f32 %v5145_v50, 0.0 }
 0x253   : > { %v2660_v12 = vmax.f32 %v7308_v20, %v2357_v37  ;;  %v1802_v58 = vpop.permute.xlu1 %1801  ;;  %v7314_v20 = vmax.f32 %v5137_v23, 0.0  ;;  %v7318_v23 = vmax.f32 %v5863_v10, 0.0 }
 0x254   : > { %2938 = vst.msk [vmem:[%s4403_s6 + $0x2a0] sm:$0xff] %vm2853_vm1, %v2826_v6  ;;  %v2105_v13 = vmax.f32 %v7309_v30, %v1802_v58  ;;  %2496 = vrot.lane.b32.xlu0 %v7310_v33, %s3277_s30  ;;  %v7313_v6 = vld [vmem:[#allocation65_spill] sm:$0xff] }
 0x255   : > { %v5885_v37 = vadd.f32 %v7313_v6, %v3643_v47  ;;  %v7317_v6 = vld [vmem:[#allocation58_spill] sm:$0xff] }
 0x256   : > { %1941 = vrot.lane.b32.xlu1 %v7312_v34, %s3277_s30  ;;  %v2771_v11 = vmax.f32 %v2105_v13, %v2660_v12  ;;  %v2469_v30 = vpop.permute.xlu0 %2468  ;;  %v7316_v34 = vmax.f32 %v5855_v9, 0.0  ;;  %v5899_v13 = vadd.f32 %v7317_v6, %v3643_v47  ;;  %v7321_v12 = vmax.f32 %v5171_v40, 0.0 }
 0x257   : > { %v2716_v58 = vmax.f32 %v7314_v20, %v2469_v30  ;;  %v1914_v33 = vpop.permute.xlu1 %1913  ;;  %v7320_v20 = vmax.f32 %v5163_v0, 0.0  ;;  %v7324_v0 = vmax.f32 %v5885_v37, 0.0 }
 0x258   : > { %2883 = vst.msk [vmem:[%s4403_s6 + $0xe8] sm:$0xff] %vm2853_vm1, %v2771_v11  ;;  %v2161_v25 = vmax.f32 %v7315_v8, %v1914_v33  ;;  %1831 = vrot.lane.b32.xlu0 %v7316_v34, %s3277_s30  ;;  %v7319_v11 = vld [vmem:[#allocation66_spill] sm:$0xff] }
 0x259   : > { %v5907_v30 = vadd.f32 %v7319_v11, %v3640_v46  ;;  %v7323_v11 = vld [vmem:[#allocation69_spill] sm:$0xff] }
 0x25a   : > { %2386 = vrot.lane.b32.xlu1 %v7318_v23, %s3277_s30  ;;  %v2827_v50 = vmax.f32 %v2161_v25, %v2716_v58  ;;  %v1804_v8 = vpop.permute.xlu0 %1803  ;;  %v7322_v23 = vmax.f32 %v5877_v38, 0.0  ;;  %v5921_v25 = vadd.f32 %v7323_v11, %v3643_v47  ;;  %v7327_v58 = vmax.f32 %v5197_v1, 0.0 }
 0x25b   : > { %v2106_v33 = vmax.f32 %v7320_v20, %v1804_v8  ;;  %v2359_v34 = vpop.permute.xlu1 %2358  ;;  %v7326_v20 = vmax.f32 %v5189_v29, 0.0  ;;  %v7329_v29 = vmax.f32 %v5907_v30, 0.0 }
 0x25c   : > { %2939 = vst.msk [vmem:[%s4403_s6 + $0x2a8] sm:$0xff] %vm2853_vm1, %v2827_v50  ;;  %v2661_v18 = vmax.f32 %v7321_v12, %v2359_v34  ;;  %1943 = vrot.lane.b32.xlu0 %v7322_v23, %s3277_s30  ;;  %v7325_v50 = vld [vmem:[#allocation59_spill] sm:$0xff]  ;;  %v6684_v11 = vmax.f32 %v5921_v25, 0.0 }
 0x25d   : > { %v5929_v8 = vadd.f32 %v7325_v50, %v3640_v46  ;;  %v7330_v50 = vld [vmem:[#allocation67_spill] sm:$0xff] }
 0x25e   : > { %2498 = vrot.lane.b32.xlu1 %v7324_v0, %s3277_s30  ;;  %v2772_v40 = vmax.f32 %v2106_v33, %v2661_v18  ;;  %v1916_v12 = vpop.permute.xlu0 %1915  ;;  %v7328_v0 = vmax.f32 %v5899_v13, 0.0  ;;  %v5943_v18 = vadd.f32 %v5173_v61, %v3640_v46 }
 0x25f   : > { %v2162_v34 = vmax.f32 %v7326_v20, %v1916_v12  ;;  %v2471_v23 = vpop.permute.xlu1 %2470  ;;  %v7331_v12 = vmax.f32 %v5215_v59, 0.0  ;;  %v7333_v59 = vmax.f32 %v5929_v8, 0.0 }
 0x260   : > { %2884 = vst.msk [vmem:[%s4403_s6 + $0xf0] sm:$0xff] %vm2853_vm1, %v2772_v40  ;;  %v2717_v6 = vmax.f32 %v7327_v58, %v2471_v23  ;;  %2388 = vrot.lane.b32.xlu0 %v7328_v0, %s3277_s30  ;;  %v5951_v40 = vadd.f32 %v7330_v50, %v3643_v47  ;;  %v6685_v61 = vmax.f32 %v5943_v18, 0.0  ;;  %v7332_v0 = vmax.f32 %v5223_v35, 0.0 }
 0x262   : > { %1833 = vrot.lane.b32.xlu1 %v7329_v29, %s3277_s30  ;;  %v2828_v1 = vmax.f32 %v2162_v34, %v2717_v6  ;;  %v2361_v58 = vpop.permute.xlu0 %2360  ;;  %v5965_v6 = vadd.f32 %v5199_v19, %v3640_v46  ;;  %v6687_v34 = vmax.f32 %v5951_v40, 0.0  ;;  %v7334_v29 = vld [vmem:[#allocation62_spill] sm:$0xff] }
 0x263   : > { %v2662_v20 = vmax.f32 %v7331_v12, %v2361_v58  ;;  %v1806_v23 = vpop.permute.xlu1 %1805  ;;  %v5973_v50 = vadd.f32 %v7334_v29, %v3643_v47  ;;  %v7335_v58 = vmax.f32 %v5241_v5, 0.0  ;;  %v7338_v5 = vld [vmem:[#allocation63_spill] sm:$0xff] }
 0x264   : > { %2940 = vst.msk [vmem:[%s4403_s6 + $0x2b0] sm:$0xff] %vm2853_vm1, %v2828_v1  ;;  %v2107_v33 = vmax.f32 %v7332_v0, %v1806_v23  ;;  %2500 = vrot.lane.b32.xlu0 %v6684_v11, %s3277_s30  ;;  %v6686_v19 = vmax.f32 %v5965_v6, 0.0  ;;  %v7336_v0 = vmax.f32 %v5249_v27, 0.0  ;;  %v5995_v29 = vadd.f32 %v7338_v5, %v3640_v46  ;;  %v7341_v5 = vld [vmem:[#allocation71_spill] sm:$0xff] }
 0x266   : > { %1945 = vrot.lane.b32.xlu1 %v7333_v59, %s3277_s30  ;;  %v2773_v35 = vmax.f32 %v2107_v33, %v2662_v20  ;;  %v2473_v1 = vpop.permute.xlu0 %2472  ;;  %v7337_v59 = vld [vmem:[#allocation70_spill] sm:$0xff]  ;;  %v6689_v20 = vmax.f32 %v5973_v50, 0.0 }
 0x267   : > { %v2718_v12 = vmax.f32 %v7335_v58, %v2473_v1  ;;  %v1918_v23 = vpop.permute.xlu1 %1917  ;;  %v5987_v33 = vadd.f32 %v7337_v59, %v3643_v47  ;;  %v7339_v1 = vmax.f32 %v5267_v60, 0.0  ;;  %v7340_v59 = vmax.f32 %v5275_v45, 0.0  ;;  %v7342_v60 = vld [vmem:[#allocation68_spill] sm:$0xff] }
 0x268   : > { %2885 = vst.msk [vmem:[%s4403_s6 + $0xf8] sm:$0xff] %vm2853_vm1, %v2773_v35  ;;  %v2163_v11 = vmax.f32 %v7336_v0, %v1918_v23  ;;  %1835 = vrot.lane.b32.xlu0 %v6685_v61, %s3277_s30 }
 0x269   : > { %v6688_v0 = vmax.f32 %v5987_v33, 0.0 }
 0x26a   : > { %2390 = vrot.lane.b32.xlu1 %v6687_v34, %s3277_s30  ;;  %v2829_v27 = vmax.f32 %v2163_v11, %v2718_v12  ;;  %v1808_v35 = vpop.permute.xlu0 %1807  ;;  %v6009_v11 = vadd.f32 %v7341_v5, %v3643_v47  ;;  %v6695_v12 = vmax.f32 %v5995_v29, 0.0 }
 0x26b   : > { %v2108_v58 = vmax.f32 %v7339_v1, %v1808_v35  ;;  %v2363_v23 = vpop.permute.xlu1 %2362  ;;  %v7343_v1 = vmax.f32 %v5293_v56, 0.0  ;;  %v7346_v56 = vld [vmem:[#allocation73_spill] sm:$0xff] }
 0x26c   : > { %2941 = vst.msk [vmem:[%s4403_s6 + $0x2b8] sm:$0xff] %vm2853_vm1, %v2829_v27  ;;  %v2663_v61 = vmax.f32 %v7340_v59, %v2363_v23  ;;  %1947 = vrot.lane.b32.xlu0 %v6686_v19, %s3277_s30  ;;  %v6017_v27 = vadd.f32 %v7342_v60, %v3640_v46  ;;  %v6690_v5 = vmax.f32 %v6009_v11, 0.0  ;;  %v7344_v19 = vmax.f32 %v5301_v28, 0.0  ;;  %v7345_v60 = vld [vmem:[#allocation72_spill] sm:$0xff] }
 0x26e   : > { %2502 = vrot.lane.b32.xlu1 %v6689_v20, %s3277_s30  ;;  %v2774_v45 = vmax.f32 %v2108_v58, %v2663_v61  ;;  %v1920_v35 = vpop.permute.xlu0 %1919  ;;  %v6031_v61 = vadd.f32 %v7345_v60, %v3640_v46  ;;  %v6694_v58 = vmax.f32 %v6017_v27, 0.0 }
 0x26f   : > { %v2164_v23 = vmax.f32 %v7343_v1, %v1920_v35  ;;  %v2475_v59 = vpop.permute.xlu1 %2474  ;;  %v7347_v35 = vmax.f32 %v5319_v42, 0.0  ;;  %v7349_v42 = vld [vmem:[#allocation74_spill] sm:$0xff] }
 0x270   : > { %2886 = vst.msk [vmem:[%s4403_s6 + $0x100] sm:$0xff] %vm2853_vm1, %v2774_v45  ;;  %v2719_v34 = vmax.f32 %v7344_v19, %v2475_v59  ;;  %2392 = vrot.lane.b32.xlu0 %v6688_v0, %s3277_s30  ;;  %v6039_v45 = vadd.f32 %v7346_v56, %v3643_v47  ;;  %v6691_v60 = vmax.f32 %v6031_v61, 0.0  ;;  %v7348_v0 = vmax.f32 %v5327_v31, 0.0 }
 0x271   : > { %v6061_v56 = vadd.f32 %v7349_v42, %v3643_v47 }
 0x272   : > { %1837 = vrot.lane.b32.xlu1 %v6695_v12, %s3277_s30  ;;  %v2830_v28 = vmax.f32 %v2164_v23, %v2719_v34  ;;  %v2365_v19 = vpop.permute.xlu0 %2364  ;;  %v6053_v34 = vadd.f32 %v5303_v41, %v3640_v46  ;;  %v6693_v23 = vmax.f32 %v6039_v45, 0.0 }
 0x273   : > { %v2664_v1 = vmax.f32 %v7347_v35, %v2365_v19  ;;  %v1810_v59 = vpop.permute.xlu1 %1809 }
 0x274   : > { %2942 = vst.msk [vmem:[%s4403_s6 + $0x2c0] sm:$0xff] %vm2853_vm1, %v2830_v28  ;;  %v2109_v20 = vmax.f32 %v7348_v0, %v1810_v59  ;;  %2504 = vrot.lane.b32.xlu0 %v6690_v5, %s3277_s30  ;;  %v7350_v28 = vmax.f32 %v5345_v62, 0.0  ;;  %v6692_v41 = vmax.f32 %v6053_v34, 0.0  ;;  %v7351_v59 = vmax.f32 %v5353_v51, 0.0 }
 0x275   : > { %v6083_v62 = vadd.f32 %v5329_v4, %v3640_v46  ;;  %v7355_v4 = vld [vmem:[#allocation75_spill] sm:$0xff] }
 0x276   : > { %1949 = vrot.lane.b32.xlu1 %v6694_v58, %s3277_s30  ;;  %v2775_v31 = vmax.f32 %v2109_v20, %v2664_v1  ;;  %v2477_v0 = vpop.permute.xlu0 %2476  ;;  %v6075_v20 = vadd.f32 %v5333_v63, %v3643_v47  ;;  %v6697_v1 = vmax.f32 %v6061_v56, 0.0 }
 0x277   : > { %v2720_v19 = vmax.f32 %v7350_v28, %v2477_v0  ;;  %v1922_v35 = vpop.permute.xlu1 %1921 }
 0x278   : > { %2887 = vst.msk [vmem:[%s4403_s6 + $0x108] sm:$0xff] %vm2853_vm1, %v2775_v31  ;;  %v2165_v5 = vmax.f32 %v7351_v59, %v1922_v35  ;;  %1839 = vrot.lane.b32.xlu0 %v6691_v60, %s3277_s30  ;;  %v7352_v31 = vmax.f32 %v5371_v53, 0.0  ;;  %v6696_v63 = vmax.f32 %v6075_v20, 0.0  ;;  %v7353_v35 = vld [vmem:[#allocation77_spill] sm:$0xff]  ;;  %v7356_v53 = vld [vmem:[#allocation76_spill] sm:$0xff] }
 0x279   : > { %v7354_v59 = vmax.f32 %v7353_v35, 0.0 }
 0x27a   : > { %2394 = vrot.lane.b32.xlu1 %v6693_v23, %s3277_s30  ;;  %v2831_v51 = vmax.f32 %v2165_v5, %v2720_v19  ;;  %v1812_v42 = vpop.permute.xlu0 %1811  ;;  %v6097_v5 = vadd.f32 %v7355_v4, %v3643_v47  ;;  %v6699_v19 = vmax.f32 %v6083_v62, 0.0  ;;  %v7359_v23 = vld [vmem:[#allocation81_spill] sm:$0xff] }
 0x27b   : > { %v2110_v0 = vmax.f32 %v7352_v31, %v1812_v42  ;;  %v2367_v28 = vpop.permute.xlu1 %2366  ;;  %v7360_v58 = vmax.f32 %v7359_v23, 0.0 }
 0x27c   : > { %2943 = vst.msk [vmem:[%s4403_s6 + $0x2c8] sm:$0xff] %vm2853_vm1, %v2831_v51  ;;  %v2665_v60 = vmax.f32 %v7354_v59, %v2367_v28  ;;  %1951 = vrot.lane.b32.xlu0 %v6692_v41, %s3277_s30  ;;  %v6105_v51 = vadd.f32 %v7356_v53, %v3640_v46  ;;  %v7357_v28 = vld [vmem:[#allocation80_spill] sm:$0xff]  ;;  %v6698_v4 = vmax.f32 %v6097_v5, 0.0  ;;  %v7361_v53 = vld [vmem:[#allocation78_spill] sm:$0xff] }
 0x27d   : > { %v7358_v35 = vmax.f32 %v7357_v28, 0.0 }
 0x27e   : > { %2506 = vrot.lane.b32.xlu1 %v6697_v1, %s3277_s30  ;;  %v2776_v42 = vmax.f32 %v2110_v0, %v2665_v60  ;;  %v1924_v31 = vpop.permute.xlu0 %1923  ;;  %v6119_v60 = vadd.f32 %v7361_v53, %v3640_v46 }
 0x27f   : > { %v2166_v59 = vmax.f32 %v7358_v35, %v1924_v31  ;;  %v2479_v41 = vpop.permute.xlu1 %2478 }
 0x280   : > { %2888 = vst.msk [vmem:[%s4403_s6 + $0x110] sm:$0xff] %vm2853_vm1, %v2776_v42  ;;  %v2721_v12 = vmax.f32 %v7360_v58, %v2479_v41  ;;  %2396 = vrot.lane.b32.xlu0 %v6696_v63, %s3277_s30  ;;  %v7362_v42 = vld [vmem:[#allocation79_spill] sm:$0xff]  ;;  %v7363_v41 = vmax.f32 %v5423_v32, 0.0  ;;  %v7364_v63 = vld [vmem:[#allocation5_spill] sm:$0xff]  ;;  %v7367_v32 = vmax.f32 %v6105_v51, 0.0 }
 0x281   : > { %v6127_v31 = vadd.f32 %v7362_v42, %v3643_v47  ;;  %v7365_v1 = vmax.f32 %v7364_v63, 0.0  ;;  %v7366_v42 = vld [vmem:[#allocation27_spill] sm:$0xff] }
 0x282   : > { %1841 = vrot.lane.b32.xlu1 %v6699_v19, %s3277_s30  ;;  %v2832_v23 = vmax.f32 %v2166_v59, %v2721_v12  ;;  %v2369_v58 = vpop.permute.xlu0 %2368  ;;  %v6141_v12 = vadd.f32 %v7366_v42, %v3640_v46  ;;  %v7370_v19 = vld [vmem:[#allocation3_spill] sm:$0xff] }
 0x283   : > { %v2666_v28 = vmax.f32 %v7363_v41, %v2369_v58  ;;  %v1814_v35 = vpop.permute.xlu1 %1813  ;;  %v7369_v41 = vmax.f32 %v5449_v49, 0.0  ;;  %v7371_v59 = vmax.f32 %v7370_v19, 0.0  ;;  %v7374_v49 = vmax.f32 %v6127_v31, 0.0 }
 0x284   : > { %2944 = vst.msk [vmem:[%s4403_s6 + $0x2d0] sm:$0xff] %vm2853_vm1, %v2832_v23  ;;  %v2111_v0 = vmax.f32 %v7365_v1, %v1814_v35  ;;  %2508 = vrot.lane.b32.xlu0 %v6698_v4, %s3277_s30  ;;  %v7368_v23 = vld [vmem:[#allocation2_spill] sm:$0xff] }
 0x285   : > { %v6149_v58 = vadd.f32 %v7368_v23, %v3643_v47  ;;  %v7373_v23 = vld [vmem:[#allocation4_spill] sm:$0xff] }
 0x286   : > { %1953 = vrot.lane.b32.xlu1 %v7367_v32, %s3277_s30  ;;  %v2777_v63 = vmax.f32 %v2111_v0, %v2666_v28  ;;  %v2481_v1 = vpop.permute.xlu0 %2480  ;;  %v7372_v32 = vmax.f32 %v6119_v60, 0.0  ;;  %v6163_v0 = vadd.f32 %v7373_v23, %v3643_v47  ;;  %v7378_v28 = vmax.f32 %v5483_v44, 0.0 }
 0x287   : > { %v2722_v35 = vmax.f32 %v7369_v41, %v2481_v1  ;;  %v1926_v4 = vpop.permute.xlu1 %1925 }
 0x288   : > { %2889 = vst.msk [vmem:[%s4403_s6 + $0x118] sm:$0xff] %vm2853_vm1, %v2777_v63  ;;  %v2167_v53 = vmax.f32 %v7371_v59, %v1926_v4  ;;  %1843 = vrot.lane.b32.xlu0 %v7372_v32, %s3277_s30  ;;  %v7375_v63 = vld [vmem:[#allocation31_spill] sm:$0xff]  ;;  %v7377_v59 = vmax.f32 %v5475_v17, 0.0  ;;  %v7382_v17 = vmax.f32 %v6149_v58, 0.0 }
 0x289   : > { %v6171_v1 = vadd.f32 %v7375_v63, %v3640_v46  ;;  %v7380_v63 = vld [vmem:[#allocation6_spill] sm:$0xff] }
 0x28a   : > { %2398 = vrot.lane.b32.xlu1 %v7374_v49, %s3277_s30  ;;  %v2833_v19 = vmax.f32 %v2167_v53, %v2722_v35  ;;  %v1816_v4 = vpop.permute.xlu0 %1815  ;;  %v7379_v49 = vmax.f32 %v6141_v12, 0.0  ;;  %v6185_v53 = vadd.f32 %v7380_v63, %v3643_v47  ;;  %v7385_v35 = vmax.f32 %v5509_v52, 0.0 }
 0x28b   : > { %7376 = vst [vmem:[#allocation23_spill] sm:$0xff] %v6171_v1  ;;  %v2112_v41 = vmax.f32 %v7377_v59, %v1816_v4  ;;  %v2371_v32 = vpop.permute.xlu1 %2370  ;;  %v7384_v59 = vmax.f32 %v5501_v48, 0.0  ;;  %v7388_v48 = vmax.f32 %v6171_v1, 0.0 }
 0x28c   : > { %2945 = vst.msk [vmem:[%s4403_s6 + $0x2d8] sm:$0xff] %vm2853_vm1, %v2833_v19  ;;  %v2667_v42 = vmax.f32 %v7378_v28, %v2371_v32  ;;  %1955 = vrot.lane.b32.xlu0 %v7379_v49, %s3277_s30  ;;  %7381 = vst [vmem:[#allocation26_spill] sm:$0xff] %v6185_v53  ;;  %v7383_v19 = vld [vmem:[#allocation7_spill] sm:$0xff] }
 0x28d   : > { %v6193_v4 = vadd.f32 %v7383_v19, %v3640_v46  ;;  %v7387_v19 = vld [vmem:[#allocation29_spill] sm:$0xff] }
 0x28e   : > { %2510 = vrot.lane.b32.xlu1 %v7382_v17, %s3277_s30  ;;  %v2778_v44 = vmax.f32 %v2112_v41, %v2667_v42  ;;  %v1928_v28 = vpop.permute.xlu0 %1927  ;;  %v7386_v17 = vmax.f32 %v6163_v0, 0.0  ;;  %v6207_v42 = vadd.f32 %v7387_v19, %v3640_v46  ;;  %v7391_v41 = vmax.f32 %v5535_v7, 0.0 }
 0x28f   : > { %v2168_v32 = vmax.f32 %v7384_v59, %v1928_v28  ;;  %v2483_v49 = vpop.permute.xlu1 %2482  ;;  %v7390_v59 = vmax.f32 %v5527_v57, 0.0  ;;  %v7395_v57 = vmax.f32 %v6193_v4, 0.0 }
 0x290   : > { %2890 = vst.msk [vmem:[%s4403_s6 + $0x120] sm:$0xff] %vm2853_vm1, %v2778_v44  ;;  %v2723_v23 = vmax.f32 %v7385_v35, %v2483_v49  ;;  %2400 = vrot.lane.b32.xlu0 %v7386_v17, %s3277_s30  ;;  %v7389_v44 = vld [vmem:[#allocation9_spill] sm:$0xff] }
 0x291   : > { %v6215_v28 = vadd.f32 %v7389_v44, %v3643_v47  ;;  %v7393_v44 = vld [vmem:[#allocation33_spill] sm:$0xff] }
 0x292   : > { %1845 = vrot.lane.b32.xlu1 %v7388_v48, %s3277_s30  ;;  %v2834_v52 = vmax.f32 %v2168_v32, %v2723_v23  ;;  %v2373_v35 = vpop.permute.xlu0 %2372  ;;  %v7392_v48 = vmax.f32 %v6185_v53, 0.0  ;;  %v6229_v23 = vadd.f32 %v7393_v44, %v3640_v46  ;;  %v7399_v32 = vld [vmem:[#allocation10_spill] sm:$0xff] }
 0x293   : > { %v2668_v49 = vmax.f32 %v7390_v59, %v2373_v35  ;;  %v7397_v59 = vld [vmem:[#allocation35_spill] sm:$0xff]  ;;  %v7400_v53 = vmax.f32 %v7399_v32, 0.0 }
 0x294   : > { %v1818_v17 = vpop.permute.xlu1 %1817  ;;  %2946 = vst.msk [vmem:[%s4403_s6 + $0x2e0] sm:$0xff] %vm2853_vm1, %v2834_v52  ;;  %2512 = vrot.lane.b32.xlu0 %v7392_v48, %s3277_s30  ;;  %7394 = vst [vmem:[#allocation25_spill] sm:$0xff] %v6229_v23  ;;  %v7396_v52 = vld [vmem:[#allocation82_spill] sm:$0xff] }
 0x295   : > { %v2113_v63 = vmax.f32 %v7391_v41, %v1818_v17  ;;  %v6237_v35 = vadd.f32 %v7396_v52, %v3643_v47  ;;  %v7398_v17 = vmax.f32 %v7397_v59, 0.0  ;;  %v7402_v52 = vld [vmem:[#allocation11_spill] sm:$0xff] }
 0x296   : > { %1957 = vrot.lane.b32.xlu1 %v7395_v57, %s3277_s30  ;;  %v2485_v41 = vpop.permute.xlu0 %2484  ;;  %v7401_v57 = vmax.f32 %v6207_v42, 0.0 }
 0x297   : > { %v2779_v7 = vmax.f32 %v2113_v63, %v2668_v49  ;;  %v2724_v48 = vmax.f32 %v7398_v17, %v2485_v41  ;;  %v6251_v63 = vadd.f32 %v7402_v52, %v3643_v47  ;;  %v7404_v41 = vmax.f32 %v6215_v28, 0.0 }
 0x298   : > { %v1930_v19 = vpop.permute.xlu1 %1929  ;;  %1847 = vrot.lane.b32.xlu0 %v7401_v57, %s3277_s30  ;;  %v7407_v49 = vmax.f32 %v5589_v16, 0.0 }
 0x299   : > { %2891 = vst.msk [vmem:[%s4403_s6 + $0x128] sm:$0xff] %vm2853_vm1, %v2779_v7  ;;  %v2169_v1 = vmax.f32 %v7400_v53, %v1930_v19  ;;  %7403 = vst [vmem:[#allocation49_spill] sm:$0xff] %v6251_v63  ;;  %v7405_v7 = vld [vmem:[#allocation8_spill] sm:$0xff]  ;;  %v7406_v19 = vmax.f32 %v5577_v3, 0.0  ;;  %v7410_v3 = vmax.f32 %v6237_v35, 0.0 }
 0x29a   : > { %2402 = vrot.lane.b32.xlu1 %v7404_v41, %s3277_s30  ;;  %v6259_v59 = vadd.f32 %v7405_v7, %v3640_v46  ;;  %v1820_v53 = vpop.permute.xlu0 %1819  ;;  %v7408_v41 = vmax.f32 %v6229_v23, 0.0  ;;  %v7409_v7 = vld [vmem:[#allocation13_spill] sm:$0xff] }
 0x29b   : > { %v2835_v32 = vmax.f32 %v2169_v1, %v2724_v48  ;;  %v2114_v17 = vmax.f32 %v7406_v19, %v1820_v53  ;;  %v6273_v1 = vadd.f32 %v7409_v7, %v3640_v46  ;;  %v7413_v19 = vld [vmem:[#allocation40_spill] sm:$0xff]  ;;  %v7415_v48 = vmax.f32 %v5615_v36, 0.0 }
 0x29c   : > { %v2375_v57 = vpop.permute.xlu1 %2374  ;;  %1959 = vrot.lane.b32.xlu0 %v7408_v41, %s3277_s30 }
 0x29d   : > { %2947 = vst.msk [vmem:[%s4403_s6 + $0x2e8] sm:$0xff] %vm2853_vm1, %v2835_v32  ;;  %v2669_v44 = vmax.f32 %v7407_v49, %v2375_v57  ;;  %v7411_v32 = vld [vmem:[#allocation12_spill] sm:$0xff]  ;;  %v7414_v57 = vmax.f32 %v7413_v19, 0.0 }
 0x29e   : > { %2514 = vrot.lane.b32.xlu1 %v7410_v3, %s3277_s30  ;;  %v6281_v53 = vadd.f32 %v7411_v32, %v3640_v46  ;;  %v1932_v49 = vpop.permute.xlu0 %1931  ;;  %v7416_v3 = vmax.f32 %v6251_v63, 0.0  ;;  %v7417_v32 = vld [vmem:[#allocation42_spill] sm:$0xff] }
 0x29f   : > { %v2780_v16 = vmax.f32 %v2114_v17, %v2669_v44  ;;  %v2170_v41 = vmax.f32 %v7414_v57, %v1932_v49  ;;  %v6295_v44 = vadd.f32 %v7417_v32, %v3640_v46  ;;  %v7419_v49 = vmax.f32 %v6259_v59, 0.0  ;;  %v7420_v57 = vld [vmem:[#allocation37_spill] sm:$0xff] }
 0x2a0   : > { %7412 = vst [vmem:[#allocation30_spill] sm:$0xff] %v6281_v53  ;;  %v2487_v52 = vpop.permute.xlu1 %2486  ;;  %2404 = vrot.lane.b32.xlu0 %v7416_v3, %s3277_s30  ;;  %v6303_v36 = vadd.f32 %v7420_v57, %v3643_v47  ;;  %v7423_v17 = vmax.f32 %v5643_v15, 0.0  ;;  %v7426_v57 = vmax.f32 %v6281_v53, 0.0  ;;  %v7430_v53 = vmax.f32 %v5665_v55, 0.0  ;;  %v7434_v55 = vld [vmem:[#allocation14_spill] sm:$0xff] }
 0x2a1   : > { %2892 = vst.msk [vmem:[%s4403_s6 + $0x130] sm:$0xff] %vm2853_vm1, %v2780_v16  ;;  %v2725_v23 = vmax.f32 %v7415_v48, %v2487_v52  ;;  %7418 = vst [vmem:[#allocation52_spill] sm:$0xff] %v6295_v44  ;;  %v7421_v52 = vld [vmem:[#allocation17_spill] sm:$0xff] }
 0x2a2   : > { %1849 = vrot.lane.b32.xlu1 %v7419_v49, %s3277_s30  ;;  %v2377_v19 = vpop.permute.xlu0 %2376  ;;  %v7422_v48 = vmax.f32 %v7421_v52, 0.0  ;;  %v6705_v15 = vmax.f32 %v6303_v36, 0.0 }
 0x2a3   : > { %v2836_v16 = vmax.f32 %v2170_v41, %v2725_v23  ;;  %v7424_v23 = vmax.f32 %v6273_v1, 0.0  ;;  %v7425_v41 = vld [vmem:[#allocation16_spill] sm:$0xff] }
 0x2a4   : > { %v2670_v3 = vmax.f32 %v7422_v48, %v2377_v19  ;;  %v1822_v7 = vpop.permute.xlu1 %1821  ;;  %v6317_v49 = vadd.f32 %v7425_v41, %v3643_v47  ;;  %v7427_v19 = vld [vmem:[#allocation15_spill] sm:$0xff] }
 0x2a5   : > { %2948 = vst.msk [vmem:[%s4403_s6 + $0x2f0] sm:$0xff] %vm2853_vm1, %v2836_v16  ;;  %v2115_v63 = vmax.f32 %v7423_v17, %v1822_v7  ;;  %1851 = vrot.lane.b32.xlu0 %v7424_v23, %s3277_s30  ;;  %v6324_v16 = vadd.f32 %v7427_v19, %v3640_v46  ;;  %v7428_v7 = vld [vmem:[#allocation19_spill] sm:$0xff]  ;;  %v7431_v46 = vmax.f32 %v6295_v44, 0.0 }
 0x2a6   : > { %1961 = vrot.lane.b32.xlu1 %v7426_v57, %s3277_s30  ;;  %v2489_v48 = vpop.permute.xlu0 %2488  ;;  %v7429_v17 = vmax.f32 %v7428_v7, 0.0  ;;  %v6707_v41 = vmax.f32 %v6317_v49, 0.0 }
 0x2a7   : > { %v2781_v52 = vmax.f32 %v2115_v63, %v2670_v3  ;;  %v7432_v3 = vld [vmem:[#allocation38_spill] sm:$0xff]  ;;  %v7438_v63 = vmax.f32 %v5687_v24, 0.0 }
 0x2a8   : > { %v2726_v23 = vmax.f32 %v7429_v17, %v2489_v48  ;;  %v1934_v32 = vpop.permute.xlu1 %1933  ;;  %v6343_v19 = vadd.f32 %v7432_v3, %v3643_v47 }
 0x2a9   : > { %2893 = vst.msk [vmem:[%s4403_s6 + $0x138] sm:$0xff] %vm2853_vm1, %v2781_v52  ;;  %v2171_v57 = vmax.f32 %v7430_v53, %v1934_v32  ;;  %1963 = vrot.lane.b32.xlu0 %v7431_v46, %s3277_s30  ;;  %v6347_v53 = vadd.f32 %v7434_v55, %v3643_v47  ;;  %v7436_v32 = vld [vmem:[#allocation18_spill] sm:$0xff]  ;;  %v7440_v55 = vld [vmem:[#allocation43_spill] sm:$0xff] }
 0x2aa   : > { %2406 = vrot.lane.b32.xlu1 %v6705_v15, %s3277_s30  ;;  %7433 = vst [vmem:[#allocation28_spill] sm:$0xff] %v6343_v19  ;;  %v1824_v48 = vpop.permute.xlu0 %1823  ;;  %v7437_v7 = vmax.f32 %v7436_v32, 0.0  ;;  %v6706_v47 = vmax.f32 %v6343_v19, 0.0 }
 0x2ab   : > { %v2837_v52 = vmax.f32 %v2171_v57, %v2726_v23  ;;  %7435 = vst [vmem:[#allocation34_spill] sm:$0xff] %v6347_v53  ;;  %v7439_v23 = vmax.f32 %v6324_v16, 0.0 }
 0x2ac   : > { %v2116_v17 = vmax.f32 %v7437_v7, %v1824_v48  ;;  %v2379_v46 = vpop.permute.xlu1 %2378  ;;  %v6710_v48 = vmax.f32 %v6347_v53, 0.0 }
 0x2ad   : > { %2949 = vst.msk [vmem:[%s4403_s6 + $0x2f8] sm:$0xff] %vm2853_vm1, %v2837_v52  ;;  %v2671_v15 = vmax.f32 %v7438_v63, %v2379_v46  ;;  %2408 = vrot.lane.b32.xlu0 %v6707_v41, %s3277_s30  ;;  %v7441_v52 = vmax.f32 %v7440_v55, 0.0  ;;  %v7442_v63 = vmax.f32 %v5709_v2, 0.0  ;;  %v7443_v46 = vld [vmem:[#allocation46_spill] sm:$0xff] }
 0x2ae   : > { %1853 = vrot.lane.b32.xlu1 %v7439_v23, %s3277_s30  ;;  %v1936_v3 = vpop.permute.xlu0 %1935  ;;  %v7444_v23 = vmax.f32 %v7443_v46, 0.0 }
 0x2af   : > { %v2782_v57 = vmax.f32 %v2116_v17, %v2671_v15  ;;  %v2172_v32 = vmax.f32 %v7441_v52, %v1936_v3 }
 0x2b0   : > { %v2491_v24 = vpop.permute.xlu1 %2490 }
 0x2b1   : > { %2894 = vst.msk [vmem:[%s4403_s6 + $0x140] sm:$0xff] %vm2853_vm1, %v2782_v57  ;;  %v2727_v7 = vmax.f32 %v7442_v63, %v2491_v24  ;;  %2516 = vrot.lane.b32.xlu0 %v6706_v47, %s3277_s30  ;;  %v7445_v57 = vld [vmem:[#allocation21_spill] sm:$0xff]  ;;  %v7447_v47 = vld [vmem:[#allocation20_spill] sm:$0xff] }
 0x2b2   : > { %2518 = vrot.lane.b32.xlu1 %v6710_v48, %s3277_s30  ;;  %v2381_v17 = vpop.permute.xlu0 %2380  ;;  %v7446_v2 = vmax.f32 %v7445_v57, 0.0  ;;  %v7448_v41 = vmax.f32 %v7447_v47, 0.0 }
 0x2b3   : > { %v2838_v15 = vmax.f32 %v2172_v32, %v2727_v7  ;;  %v2672_v3 = vmax.f32 %v7444_v23, %v2381_v17  ;;  %v7449_v32 = vld [vmem:[#allocation24_spill] sm:$0xff]  ;;  %v7451_v23 = vld [vmem:[#allocation22_spill] sm:$0xff] }
 0x2b4   : > { %v1826_v55 = vpop.permute.xlu1 %1825  ;;  %v7450_v7 = vmax.f32 %v7449_v32, 0.0  ;;  %v7456_v32 = vmax.f32 %v5811_v54, 0.0 }
 0x2b5   : > { %2950 = vst.msk [vmem:[%s4403_s6 + $0x300] sm:$0xff] %vm2853_vm1, %v2838_v15  ;;  %v2117_v52 = vmax.f32 %v7446_v2, %v1826_v55  ;;  %v7452_v15 = vmax.f32 %v7451_v23, 0.0  ;;  %v7454_v2 = vmax.f32 %v5789_v26, 0.0  ;;  %v7458_v23 = vmax.f32 %v5833_v39, 0.0 }
 0x2b6   : > { %v2493_v63 = vpop.permute.xlu0 %2492 }
 0x2b7   : > { %v2783_v24 = vmax.f32 %v2117_v52, %v2672_v3  ;;  %v2728_v44 = vmax.f32 %v7448_v41, %v2493_v63  ;;  %v7453_v3 = vmax.f32 %v5775_v14, 0.0 }
 0x2b8   : > { %v1938_v53 = vpop.permute.xlu1 %1937 }
 0x2b9   : > { %2895 = vst.msk [vmem:[%s4403_s6 + $0x148] sm:$0xff] %vm2853_vm1, %v2783_v24  ;;  %v2173_v48 = vmax.f32 %v7450_v7, %v1938_v53 }
 0x2ba   : > { %v1828_v17 = vpop.permute.xlu0 %1827 }
 0x2bb   : > { %v2839_v46 = vmax.f32 %v2173_v48, %v2728_v44  ;;  %v2118_v19 = vmax.f32 %v7452_v15, %v1828_v17  ;;  %v7455_v44 = vmax.f32 %v5797_v21, 0.0 }
 0x2bc   : > { %v2383_v57 = vpop.permute.xlu1 %2382 }
 0x2bd   : > { %2951 = vst.msk [vmem:[%s4403_s6 + $0x308] sm:$0xff] %vm2853_vm1, %v2839_v46  ;;  %v2673_v55 = vmax.f32 %v7453_v3, %v2383_v57  ;;  %v7459_v57 = vmax.f32 %v5841_v43, 0.0 }
 0x2be   : > { %v1940_v41 = vpop.permute.xlu0 %1939 }
 0x2bf   : > { %v2784_v47 = vmax.f32 %v2118_v19, %v2673_v55  ;;  %v2174_v52 = vmax.f32 %v7454_v2, %v1940_v41  ;;  %v7457_v19 = vmax.f32 %v5819_v22, 0.0  ;;  %v7461_v2 = vmax.f32 %v5863_v10, 0.0 }
 0x2c0   : > { %v2495_v24 = vpop.permute.xlu1 %2494 }
 0x2c1   : > { %2896 = vst.msk [vmem:[%s4403_s6 + $0x150] sm:$0xff] %vm2853_vm1, %v2784_v47  ;;  %v2729_v53 = vmax.f32 %v7455_v44, %v2495_v24  ;;  %v7460_v47 = vmax.f32 %v5855_v9, 0.0  ;;  %v7462_v44 = vmax.f32 %v5877_v38, 0.0 }
 0x2c2   : > { %v2385_v63 = vpop.permute.xlu0 %2384 }
 0x2c3   : > { %v2840_v48 = vmax.f32 %v2174_v52, %v2729_v53  ;;  %v2674_v7 = vmax.f32 %v7456_v32, %v2385_v63 }
 0x2c4   : > { %v1830_v14 = vpop.permute.xlu1 %1829 }
 0x2c5   : > { %2952 = vst.msk [vmem:[%s4403_s6 + $0x310] sm:$0xff] %vm2853_vm1, %v2840_v48  ;;  %v2119_v46 = vmax.f32 %v7457_v19, %v1830_v14  ;;  %v7463_v48 = vmax.f32 %v5885_v37, 0.0  ;;  %v7465_v19 = vmax.f32 %v5907_v30, 0.0 }
 0x2c6   : > { %v2497_v17 = vpop.permute.xlu0 %2496 }
 0x2c7   : > { %v2785_v26 = vmax.f32 %v2119_v46, %v2674_v7  ;;  %v2730_v15 = vmax.f32 %v7458_v23, %v2497_v17  ;;  %v7464_v7 = vmax.f32 %v5899_v13, 0.0  ;;  %v7466_v17 = vmax.f32 %v5921_v25, 0.0 }
 0x2c8   : > { %v1942_v21 = vpop.permute.xlu1 %1941 }
 0x2c9   : > { %2897 = vst.msk [vmem:[%s4403_s6 + $0x158] sm:$0xff] %vm2853_vm1, %v2785_v26  ;;  %v2175_v3 = vmax.f32 %v7459_v57, %v1942_v21 }
 0x2ca   : > { %v1832_v55 = vpop.permute.xlu0 %1831 }
 0x2cb   : > { %v2841_v54 = vmax.f32 %v2175_v3, %v2730_v15  ;;  %v2120_v41 = vmax.f32 %v7460_v47, %v1832_v55  ;;  %v7467_v15 = vmax.f32 %v5929_v8, 0.0  ;;  %v7468_v3 = vmax.f32 %v5943_v18, 0.0 }
 0x2cc   : > { %v2387_v22 = vpop.permute.xlu1 %2386  ;;  %v7469_v55 = vmax.f32 %v5951_v40, 0.0 }
 0x2cd   : > { %2953 = vst.msk [vmem:[%s4403_s6 + $0x318] sm:$0xff] %vm2853_vm1, %v2841_v54  ;;  %v2675_v52 = vmax.f32 %v7461_v2, %v2387_v22  ;;  %v7470_v22 = vmax.f32 %v5965_v6, 0.0 }
 0x2ce   : > { %v1944_v24 = vpop.permute.xlu0 %1943 }
 0x2cf   : > { %v2786_v39 = vmax.f32 %v2120_v41, %v2675_v52  ;;  %v2176_v53 = vmax.f32 %v7462_v44, %v1944_v24  ;;  %v7471_v52 = vmax.f32 %v5973_v50, 0.0  ;;  %v7472_v44 = vmax.f32 %v5987_v33, 0.0 }
 0x2d0   : > { %v2499_v43 = vpop.permute.xlu1 %2498 }
 0x2d1   : > { %2898 = vst.msk [vmem:[%s4403_s6 + $0x160] sm:$0xff] %vm2853_vm1, %v2786_v39  ;;  %v2731_v63 = vmax.f32 %v7463_v48, %v2499_v43  ;;  %v7473_v43 = vmax.f32 %v5995_v29, 0.0 }
 0x2d2   : > { %v2389_v32 = vpop.permute.xlu0 %2388 }
 0x2d3   : > { %v2842_v9 = vmax.f32 %v2176_v53, %v2731_v63  ;;  %v2676_v14 = vmax.f32 %v7464_v7, %v2389_v32  ;;  %v7475_v7 = vmax.f32 %v6017_v27, 0.0 }
 0x2d4   : > { %v1834_v10 = vpop.permute.xlu1 %1833 }
 0x2d5   : > { %2954 = vst.msk [vmem:[%s4403_s6 + $0x320] sm:$0xff] %vm2853_vm1, %v2842_v9  ;;  %v2121_v46 = vmax.f32 %v7465_v19, %v1834_v10  ;;  %v7474_v9 = vmax.f32 %v6009_v11, 0.0  ;;  %v7476_v19 = vmax.f32 %v6031_v61, 0.0 }
 0x2d6   : > { %v2501_v26 = vpop.permute.xlu0 %2500 }
 0x2d7   : > { %v2787_v38 = vmax.f32 %v2121_v46, %v2676_v14  ;;  %v2732_v23 = vmax.f32 %v7466_v17, %v2501_v26 }
 0x2d8   : > { %v1946_v37 = vpop.permute.xlu1 %1945 }
 0x2d9   : > { %2899 = vst.msk [vmem:[%s4403_s6 + $0x168] sm:$0xff] %vm2853_vm1, %v2787_v38  ;;  %v2177_v21 = vmax.f32 %v7467_v15, %v1946_v37  ;;  %v7477_v38 = vmax.f32 %v6039_v45, 0.0  ;;  %v7479_v15 = vmax.f32 %v6061_v56, 0.0 }
 0x2da   : > { %v1836_v57 = vpop.permute.xlu0 %1835 }
 0x2db   : > { %v2843_v13 = vmax.f32 %v2177_v21, %v2732_v23  ;;  %v2122_v54 = vmax.f32 %v7468_v3, %v1836_v57  ;;  %v7478_v23 = vmax.f32 %v6053_v34, 0.0  ;;  %v7480_v57 = vmax.f32 %v6075_v20, 0.0 }
 0x2dc   : > { %v2391_v30 = vpop.permute.xlu1 %2390 }
 0x2dd   : > { %2955 = vst.msk [vmem:[%s4403_s6 + $0x328] sm:$0xff] %vm2853_vm1, %v2843_v13  ;;  %v2677_v47 = vmax.f32 %v7469_v55, %v2391_v30 }
 0x2de   : > { %v1948_v41 = vpop.permute.xlu0 %1947 }
 0x2df   : > { %v2788_v25 = vmax.f32 %v2122_v54, %v2677_v47  ;;  %v2178_v2 = vmax.f32 %v7470_v22, %v1948_v41  ;;  %v7481_v54 = vmax.f32 %v6083_v62, 0.0  ;;  %v7482_v47 = vmax.f32 %v6097_v5, 0.0 }
 0x2e0   : > { %v2503_v8 = vpop.permute.xlu1 %2502  ;;  %v7483_v41 = vmax.f32 %v6105_v51, 0.0 }
 0x2e1   : > { %2900 = vst.msk [vmem:[%s4403_s6 + $0x170] sm:$0xff] %vm2853_vm1, %v2788_v25  ;;  %v2733_v39 = vmax.f32 %v7471_v52, %v2503_v8  ;;  %v7484_v8 = vmax.f32 %v6119_v60, 0.0 }
 0x2e2   : > { %v2393_v24 = vpop.permute.xlu0 %2392 }
 0x2e3   : > { %v2844_v18 = vmax.f32 %v2178_v2, %v2733_v39  ;;  %v2678_v53 = vmax.f32 %v7472_v44, %v2393_v24  ;;  %v7485_v39 = vmax.f32 %v6127_v31, 0.0  ;;  %v7486_v44 = vmax.f32 %v6141_v12, 0.0 }
 0x2e4   : > { %v1838_v40 = vpop.permute.xlu1 %1837 }
 0x2e5   : > { %2956 = vst.msk [vmem:[%s4403_s6 + $0x330] sm:$0xff] %vm2853_vm1, %v2844_v18  ;;  %v2123_v48 = vmax.f32 %v7473_v43, %v1838_v40  ;;  %v7487_v40 = vmax.f32 %v6149_v58, 0.0 }
 0x2e6   : > { %v2505_v63 = vpop.permute.xlu0 %2504 }
 0x2e7   : > { %v2789_v6 = vmax.f32 %v2123_v48, %v2678_v53  ;;  %v2734_v32 = vmax.f32 %v7474_v9, %v2505_v63  ;;  %v7489_v9 = vld [vmem:[#allocation23_spill] sm:$0xff] }
 0x2e8   : > { %v1950_v50 = vpop.permute.xlu1 %1949 }
 0x2e9   : > { %2901 = vst.msk [vmem:[%s4403_s6 + $0x178] sm:$0xff] %vm2853_vm1, %v2789_v6  ;;  %v2179_v14 = vmax.f32 %v7475_v7, %v1950_v50  ;;  %v7488_v6 = vmax.f32 %v6163_v0, 0.0 }
 0x2ea   : > { %v1840_v10 = vpop.permute.xlu0 %1839 }
 0x2eb   : > { %v2845_v33 = vmax.f32 %v2179_v14, %v2734_v32  ;;  %v2124_v46 = vmax.f32 %v7476_v19, %v1840_v10  ;;  %v7490_v32 = vmax.f32 %v7489_v9, 0.0  ;;  %v7491_v14 = vld [vmem:[#allocation26_spill] sm:$0xff]  ;;  %v7493_v19 = vmax.f32 %v6193_v4, 0.0 }
 0x2ec   : > { %v2395_v29 = vpop.permute.xlu1 %2394 }
 0x2ed   : > { %2957 = vst.msk [vmem:[%s4403_s6 + $0x338] sm:$0xff] %vm2853_vm1, %v2845_v33  ;;  %v2679_v26 = vmax.f32 %v7477_v38, %v2395_v29  ;;  %v7492_v33 = vmax.f32 %v7491_v14, 0.0  ;;  %v7494_v38 = vmax.f32 %v6207_v42, 0.0 }
 0x2ee   : > { %v1952_v17 = vpop.permute.xlu0 %1951 }
 0x2ef   : > { %v2790_v11 = vmax.f32 %v2124_v46, %v2679_v26  ;;  %v2180_v37 = vmax.f32 %v7478_v23, %v1952_v17  ;;  %v7495_v17 = vmax.f32 %v6215_v28, 0.0 }
 0x2f0   : > { %v2507_v27 = vpop.permute.xlu1 %2506 }
 0x2f1   : > { %2902 = vst.msk [vmem:[%s4403_s6 + $0x180] sm:$0xff] %vm2853_vm1, %v2790_v11  ;;  %v2735_v21 = vmax.f32 %v7479_v15, %v2507_v27  ;;  %v7496_v15 = vld [vmem:[#allocation25_spill] sm:$0xff] }
 0x2f2   : > { %v2397_v13 = vpop.permute.xlu0 %2396 }
 0x2f3   : > { %v2846_v61 = vmax.f32 %v2180_v37, %v2735_v21  ;;  %v2680_v3 = vmax.f32 %v7480_v57, %v2397_v13  ;;  %v7497_v21 = vmax.f32 %v7496_v15, 0.0  ;;  %v7498_v13 = vmax.f32 %v6237_v35, 0.0 }
 0x2f4   : > { %v1842_v45 = vpop.permute.xlu1 %1841 }
 0x2f5   : > { %2958 = vst.msk [vmem:[%s4403_s6 + $0x340] sm:$0xff] %vm2853_vm1, %v2846_v61  ;;  %v2125_v30 = vmax.f32 %v7481_v54, %v1842_v45  ;;  %v7499_v45 = vld [vmem:[#allocation49_spill] sm:$0xff] }
 0x2f6   : > { %v2509_v55 = vpop.permute.xlu0 %2508  ;;  %v7500_v54 = vmax.f32 %v7499_v45, 0.0 }
 0x2f7   : > { %v2791_v34 = vmax.f32 %v2125_v30, %v2680_v3  ;;  %v2736_v25 = vmax.f32 %v7482_v47, %v2509_v55 }
 0x2f8   : > { %v1954_v56 = vpop.permute.xlu1 %1953 }
 0x2f9   : > { %2903 = vst.msk [vmem:[%s4403_s6 + $0x188] sm:$0xff] %vm2853_vm1, %v2791_v34  ;;  %v2181_v22 = vmax.f32 %v7483_v41, %v1954_v56  ;;  %v7501_v34 = vmax.f32 %v6259_v59, 0.0  ;;  %v7504_v59 = vmax.f32 %v6317_v49, 0.0 }
 0x2fa   : > { %v1844_v2 = vpop.permute.xlu0 %1843 }
 0x2fb   : > { %v2847_v20 = vmax.f32 %v2181_v22, %v2736_v25  ;;  %v2126_v52 = vmax.f32 %v7484_v8, %v1844_v2  ;;  %v7502_v22 = vmax.f32 %v6273_v1, 0.0  ;;  %v7503_v2 = vmax.f32 %v6303_v36, 0.0  ;;  %v7506_v1 = vld [vmem:[#allocation30_spill] sm:$0xff]  ;;  %v7508_v36 = vld [vmem:[#allocation28_spill] sm:$0xff] }
 0x2fc   : > { %v2399_v62 = vpop.permute.xlu1 %2398 }
 0x2fd   : > { %2959 = vst.msk [vmem:[%s4403_s6 + $0x348] sm:$0xff] %vm2853_vm1, %v2847_v20  ;;  %v2681_v18 = vmax.f32 %v7485_v39, %v2399_v62 }
 0x2fe   : > { %v1956_v24 = vpop.permute.xlu0 %1955 }
 0x2ff   : > { %v2792_v5 = vmax.f32 %v2126_v52, %v2681_v18  ;;  %v2182_v53 = vmax.f32 %v7486_v44, %v1956_v24 }
 0x300   : > { %v2511_v51 = vpop.permute.xlu1 %2510 }
 0x301   : > { %2904 = vst.msk [vmem:[%s4403_s6 + $0x190] sm:$0xff] %vm2853_vm1, %v2792_v5  ;;  %v2737_v43 = vmax.f32 %v7487_v40, %v2511_v51  ;;  %v7505_v5 = vmax.f32 %v6324_v16, 0.0  ;;  %v7507_v51 = vmax.f32 %v7506_v1, 0.0 }
 0x302   : > { %v2401_v48 = vpop.permute.xlu0 %2400 }
 0x303   : > { %v2848_v60 = vmax.f32 %v2182_v53, %v2737_v43  ;;  %v2682_v63 = vmax.f32 %v7488_v6, %v2401_v48  ;;  %v7509_v43 = vmax.f32 %v7508_v36, 0.0  ;;  %v7510_v6 = vld [vmem:[#allocation52_spill] sm:$0xff] }
 0x304   : > { %v1846_v31 = vpop.permute.xlu1 %1845 }
 0x305   : > { %2960 = vst.msk [vmem:[%s4403_s6 + $0x350] sm:$0xff] %vm2853_vm1, %v2848_v60  ;;  %v2127_v50 = vmax.f32 %v7490_v32, %v1846_v31  ;;  %v7512_v31 = vld [vmem:[#allocation34_spill] sm:$0xff] }
 0x306   : > { %v2513_v7 = vpop.permute.xlu0 %2512  ;;  %v7513_v9 = vmax.f32 %v7512_v31, 0.0 }
 0x307   : > { %v2793_v12 = vmax.f32 %v2127_v50, %v2682_v63  ;;  %v2738_v10 = vmax.f32 %v7492_v33, %v2513_v7  ;;  %v7511_v63 = vmax.f32 %v7510_v6, 0.0 }
 0x308   : > { %v1958_v58 = vpop.permute.xlu1 %1957 }
 0x309   : > { %2905 = vst.msk [vmem:[%s4403_s6 + $0x198] sm:$0xff] %vm2853_vm1, %v2793_v12  ;;  %v2183_v46 = vmax.f32 %v7493_v19, %v1958_v58 }
 0x30a   : > { %v1848_v29 = vpop.permute.xlu0 %1847 }
 0x30b   : > { %v2849_v0 = vmax.f32 %v2183_v46, %v2738_v10  ;;  %v2128_v26 = vmax.f32 %v7494_v38, %v1848_v29 }
 0x30c   : > { %v2403_v11 = vpop.permute.xlu1 %2402 }
 0x30d   : > { %2961 = vst.msk [vmem:[%s4403_s6 + $0x358] sm:$0xff] %vm2853_vm1, %v2849_v0  ;;  %v2683_v23 = vmax.f32 %v7495_v17, %v2403_v11 }
 0x30e   : > { %v1960_v27 = vpop.permute.xlu0 %1959 }
 0x30f   : > { %v2794_v37 = vmax.f32 %v2128_v26, %v2683_v23  ;;  %v2184_v61 = vmax.f32 %v7497_v21, %v1960_v27 }
 0x310   : > { %v2515_v4 = vpop.permute.xlu1 %2514 }
 0x311   : > { %2906 = vst.msk [vmem:[%s4403_s6 + $0x1a0] sm:$0xff] %vm2853_vm1, %v2794_v37  ;;  %v2739_v57 = vmax.f32 %v7498_v13, %v2515_v4 }
 0x312   : > { %v2405_v3 = vpop.permute.xlu0 %2404 }
 0x313   : > { %v2850_v42 = vmax.f32 %v2184_v61, %v2739_v57  ;;  %v2684_v30 = vmax.f32 %v7500_v54, %v2405_v3 }
 0x314   : > { %v1850_v28 = vpop.permute.xlu1 %1849 }
 0x315   : > { %2962 = vst.msk [vmem:[%s4403_s6 + $0x360] sm:$0xff] %vm2853_vm1, %v2850_v42  ;;  %v2129_v55 = vmax.f32 %v7501_v34, %v1850_v28 }
 0x317   : > { %v2795_v47 = vmax.f32 %v2129_v55, %v2684_v30  ;;  %v1852_v25 = vpop.permute.xlu0 %1851 }
 0x318   : > { %v1962_v56 = vpop.permute.xlu1 %1961  ;;  %v2130_v20 = vmax.f32 %v7502_v22, %v1852_v25 }
 0x319   : > { %2907 = vst.msk [vmem:[%s4403_s6 + $0x1a8] sm:$0xff] %vm2853_vm1, %v2795_v47  ;;  %v2185_v40 = vmax.f32 %v7507_v51, %v1962_v56 }
 0x31b   : > { %v1964_v41 = vpop.permute.xlu0 %1963 }
 0x31c   : > { %v2407_v35 = vpop.permute.xlu1 %2406  ;;  %v2186_v49 = vmax.f32 %v7511_v63, %v1964_v41 }
 0x31d   : > { %v2685_v8 = vmax.f32 %v7503_v2, %v2407_v35 }
 0x31f   : > { %v2796_v52 = vmax.f32 %v2130_v20, %v2685_v8  ;;  %v2409_v62 = vpop.permute.xlu0 %2408 }
 0x320   : > { %v2686_v39 = vmax.f32 %v7504_v59, %v2409_v62  ;;  %v1854_v18 = vpop.permute.xlu1 %1853 }
 0x321   : > { %2908 = vst.msk [vmem:[%s4403_s6 + $0x1b0] sm:$0xff] %vm2853_vm1, %v2796_v52  ;;  %v2131_v24 = vmax.f32 %v7505_v5, %v1854_v18 }
 0x323   : > { %v2797_v44 = vmax.f32 %v2131_v24, %v2686_v39  ;;  %v2517_v53 = vpop.permute.xlu0 %2516 }
 0x324   : > { %v2740_v60 = vmax.f32 %v7509_v43, %v2517_v53  ;;  %v2519_v48 = vpop.permute.xlu1 %2518 }
 0x325   : > { %2909 = vst.msk [vmem:[%s4403_s6 + $0x1b8] sm:$0xff] %vm2853_vm1, %v2797_v44  ;;  %v2741_v32 = vmax.f32 %v7513_v9, %v2519_v48 }
 0x326   : > { %v2851_v50 = vmax.f32 %v2185_v40, %v2740_v60 }
 0x327   : > { %v2852_v16 = vmax.f32 %v2186_v49, %v2741_v32 }
 0x328   : > { %2963 = vst.msk [vmem:[%s4403_s6 + $0x368] sm:$0xff] %vm2853_vm1, %v2851_v50 }
 0x329   : > { %2964 = vst.msk [vmem:[%s4403_s6 + $0x370] sm:$0xff] %vm2853_vm1, %v2852_v16 }
 0x32a PF: > { %s13_s16 = sadd.s32 1, %s3274_s16   ;;  %s7514_s12 = smov %s3266_s14 }
 0x32b   : > { %p10_p7 = scmp.ge.s32.totalorder %s13_s16, 30   ;;  %s7515_s13 = smov %s3270_s15 }
 0x32c   : > { %s7516_s14 = smov %s7519_s17  ;;  %s7517_s15 = smov %s7523_s18 }
 0x32d   :  { %12 = sbr.rel (!%p10_p7) target bundleno = 3 (0x3), region = 62 }

// kernel: example_model_forward.3
= control target key start
LH: loop header
LB: loop body
LE: loop exit
PB: predicated region body
PF: predicated region fallthrough
CT: control target
= control target key end

     0   :  { %7 = vsyncpa [#allocation4], 0  ;;  %s21893_s0 = inlined_call_operand.vmem [shape: f32[2,795648], index: 0, kind: input, shape index: {}]   ;;  %s21894_s1 = inlined_call_operand.hbm [shape: f32[10,795648], index: 1, kind: input, shape index: {}]   ;;  %s21895_s2 = inlined_call_operand.vmem [shape: f32[2,2,10], index: 2, kind: output, shape index: {}]  }
   0x1   :  { %9 = vsyncpa [#allocation4 + $0x1], 0  ;;  %s20515_s9 = smov 0   ;;  %s20517_s10 = smov 0  }
   0x2   :  { %s20519_s11 = smov 0   ;;  %s20521_s12 = smov 0  }
   0x3   :  { %s20523_s13 = smov 0   ;;  %s20525_s14 = smov 0  }
   0x4   :  { %s20527_s15 = smov 0   ;;  %s20529_s16 = smov 0  }
   0x5 LB: > { %s19306_s17 = sadd.s32 4294967295, %s20492_s16   ;;  %s24_s18 = sadd.s32 1, %s20484_s14  ;;  %s20492_s16 = sphi %s20529_s16, %s15_s16   ;;  %s20488_s15 = sphi %s20527_s15, %s21905_s15   ;;  %s20484_s14 = sphi %s20525_s14, %s21904_s14   ;;  %s20480_s13 = sphi %s20523_s13, %s21903_s13   ;;  %s20476_s12 = sphi %s20521_s12, %s21902_s12   ;;  %s20472_s11 = sphi %s20519_s11, %s21901_s11   ;;  %s20468_s10 = sphi %s20517_s10, %s21900_s10   ;;  %s20464_s9 = sphi %s20515_s9, %s21899_s9  }
   0x6   : > { %p25_p0 = scmp.ge.s32.totalorder %s24_s18, 7  ;;  %s27_s19 = sadd.s32 1, %s20488_s15 }
   0x7   : > { %s61_s20 = smul.u32 7, %s20488_s15  ;;  %s68_s21 = sadd.s32 1, %s20472_s11 }
   0x8   : > { %s21907_s18 = smov (%p25_p0, %s24_s18), 0  ;;  %s21909_s19 = smov (!%p25_p0, %s27_s19), %s20488_s15 }
   0x9   : > { %s62_s22 = sadd.s32 %s20484_s14, %s61_s20  ;;  %p75_p1 = scmp.ne.s32.totalorder %s20472_s11, %s20468_s10 }
   0xa   : > { %p29_p2 = scmp.ge.s32.totalorder %s21909_s19, 2  ;;  %p76_p3 = scmp.eq.s32.totalorder %s20492_s16, 0 }
   0xb   : > { %p81_p4 = scmp.ne.s32.totalorder %s20468_s10, %s20464_s9  ;;  %p82_p5 = scmp.eq.s32.totalorder %s19306_s17, 0 }
   0xc   : > { %s21911_s19 = smov (%p29_p2, %s21909_s19), 0  ;;  %p77_p6 = por %p76_p3, %p75_p1 }
   0xd   : > { %p20568_p7 = por %p82_p5, %p81_p4  ;;  %s63_s24 = smul.u32 7, %s21911_s19 }
   0xe   : > { %p20215_p8 = scmp.lt.s32.totalorder %s20492_s16, 14  ;;  %s144_s25 = sand.u32 1, %s20472_s11  }
   0xf   : > { %s64_s26 = sadd.s32 %s63_s24, %s21907_s18  ;;  %s20207_s28 = smul.u32 7104, %s144_s25 }
  0x10   : > { %s65_s27 = ssub.s32 %s62_s22, %s64_s26  ;;  %s19318_s29 = smul.u32 56832, %s62_s22 }
  0x11   : > { %p66_p9 = scmp.eq.s32.totalorder %s65_s27, 0  ;;  %p20576_p10 = pnand %p20215_p8, %p77_p6 }
  0x12   : > { %s20586_s6 = scalar_lea.hbm %s21894_s1, %s19318_s29  ;;  %s148_s7 = scalar_lea.vmem [#allocation3], %s20207_s28 }
  0x13   : > { %s20581_s3 = scalar_select %p66_p9, %s20472_s11, %s68_s21  }
  0x14   : > { %s157_s8 = sshll.u32 %s148_s7, 4  ;;  %s20591_s9 = scalar_lea.sflag [#allocation4], %s144_s25  ;;  %s20588_s8 = int_to_ptr.vmem [resolvable:$true] %s157_s8 }
  0x15   : > { %s20396_s17 = scalar_lea.hbm %s20586_s6, 113664  ;;  %p20398_p13 = pneg %p20576_p10 }
  0x16   : > { %p20397_p12 = scmp.ne.s32.totalorder %s20586_s6, %s20396_s17  ;;  %s20401_s22 = scalar_lea.hbm %s21894_s1, 1591296 }
  0x17   : > { %p20402_p2 = scmp.lt.u32.totalorder %s20586_s6, %s21894_s1  ;;  %p20403_p3 = scmp.lt.u32.totalorder %s20401_s22, %s20396_s17 }
  0x18   : > { %p20399_p0 = pnand %p20398_p13, %p20397_p12  ;;  %p20405_p5 = scmp.lt.u32.totalorder %s20396_s17, %s20586_s6 }
  0x19   : > { %p20404_p4 = por %p20403_p3, %p20402_p2 }
  0x1a   : > { %p20400_p1 = pneg %p20399_p0 }
  0x1b   : > { %p20406_p6 = por %p20405_p5, %p20404_p4 }
  0x1d   : > { %p20407_p8 = pnand %p20406_p6, %p20400_p1 }
  0x1f   : > { %20410 = shalt.err (!%p20407_p8)
}
  0x20   : > { %s20411_s25 = scalar_lea.vmem %s20588_s8, 113664  ;;  %s20494_s27 = smov [#allocation3]  }
  0x21   : > { %p20412_p9 = scmp.ne.s32.totalorder %s20588_s8, %s20411_s25  ;;  %s20416_s28 = sshll.u32 %s20494_s27, 4  ;;  %s20417_s28 = int_to_ptr.vmem [resolvable:$false] %s20416_s28 }
  0x22   : > { %s20418_s29 = scalar_lea.vmem %s20417_s28, 227328  ;;  %p20419_p11 = scmp.lt.s32.totalorder %s20588_s8, %s20417_s28 }
  0x23   : > { %p20414_p12 = pnand %p20412_p9, %p20398_p13  ;;  %p20420_p2 = scmp.lt.s32.totalorder %s20418_s29, %s20411_s25 }
  0x25   : > { %p20415_p0 = pneg %p20414_p12  ;;  %p20421_p3 = por %p20420_p2, %p20419_p11 }
  0x27   : > { %p20422_p4 = pnand %p20421_p3, %p20415_p0 }
  0x29   : > { %20425 = shalt.err (!%p20422_p4)
}
  0x2a   : > { %s20495_s4 = smov 795648   ;;  %s20496_s5 = smov 56832  }
  0x2b   : > { %s20497_s7 = smov 3552   ;;  %p165_p13 = scmp.lt.s32.totalorder %s20492_s16, 15 }
  0x2c   : > { %20214 = dma.hbm_to_vmem [thread:$0]  (!%p20576_p10), %s20586_s6, 113664, %s20588_s8, %s20591_s9, %s20495_s4, %s20496_s5, %s20497_s7  }
  0x2d   : > { %p21898_p1 = scmp.ge.s32.totalorder %s20492_s16, 1 }
  0x2f   : > { %p166_p5 = pnand %p21898_p1, %p165_p13 }
  0x30   : > { %s171_s17 = sand.u32 (!%p166_p5), 1, %s20468_s10  }
  0x31   : > { %169 = sbr.rel (%p166_p5) target bundleno = 1187 (0x4a3), region = 28  ;;  %s172_s21 = scalar_lea.sflag (!%p166_p5), [#allocation4], %s171_s17 }
  0x32   : > { %s20208_s20 = smul.u32 (!%p166_p5), 7104, %s171_s17 }
  0x34   : > { %s20623_s22 = scalar_lea.vmem (!%p166_p5), [#allocation3], %s20208_s20 }
  0x38   : > { %20459 = dma.done.wait (%p20568_p7), %s172_s21, 113664  }
  0x39   : > { %20461 = vsyncadd (%p20568_p7), %s172_s21, 4294853632  ;;  %s202_s30 = smul.u32 7, %s20480_s13  ;;  %p215_p10 = scmp.lt.s32.totalorder %s20480_s13, 1 }
  0x3a   : > { %p19314_p7 = scmp.ne.s32.totalorder %s20476_s12, 0 }
  0x3b   : > { %s203_s6 = sadd.s32 %s20476_s12, %s202_s30  ;;  %s21913_s13 = smov (!%p215_p10, %s20480_s13), 1  ;;  %vm223_vm0 = vcmask (!%p19314_p7), 74752   ;;  %v20498_v0 = vmov (!%p19314_p7), 0.0  }
  0x3c   : > { %s204_s8 = smul.u32 444, %s203_s6  ;;  %s19313_s9 = sshll.u32 %s21913_s13, 1  ;;  %224 = vst.msk [vmem:[#allocation2] sm:$0x3] (!%p19314_p7), %vm223_vm0, %v20498_v0 }
  0x3d   : > { %s20636_s25 = scalar_lea.vmem %s21895_s2, %s19313_s9  ;;  %222 = sbr.rel (%p19314_p7) target bundleno = 68 (0x44), region = 36 }
  0x3e   : > { %p205_p11 = scmp.lt.s32.totalorder %s204_s8, 6215 }
  0x40   : > { %s21915_s8 = smov (!%p205_p11, %s204_s8), 6215 }
  0x41   : > { %s19312_s27 = sshll.u32 %s21915_s8, 1 }
  0x42   : > { %s20641_s29 = scalar_lea.vmem %s21893_s0, %s19312_s27 }
  0x44 PF: > { %v338_v1 = vld [vmem:[%s20623_s22 + $0x8] sm:$0xff]  ;;  %v337_v3 = vld [vmem:[%s20623_s22] sm:$0xff]  ;;  %v1340_v4 = vlaneseq  ;;  %v340_v7 = vld [vmem:[%s20623_s22 + $0x18] sm:$0xff]  ;;  %v20499_v9 = vmov 1983009808   ;;  %vm19208_vm1 = vcmask 74752  }
  0x45   : > { %v782_v2 = vld [vmem:[%s20623_s22 + $0xde8] sm:$0x3]  ;;  %v781_v6 = vld [vmem:[%s20623_s22 + $0xde0] sm:$0x3]  ;;  %v784_v8 = vld [vmem:[%s20623_s22 + $0xdf8] sm:$0x3]  ;;  %v1338_v10 = vunpack.c.l.s4 %v20499_v9 }
  0x46   : > { %v19319_v5 = vpack.c.bf16 %v782_v2, %v338_v1  ;;  %v19321_v11 = vpack.c.bf16 %v781_v6, %v337_v3  ;;  %v19323_v12 = vpack.c.bf16 %v784_v8, %v340_v7  ;;  %v339_v13 = vld [vmem:[%s20623_s22 + $0x10] sm:$0xff]  ;;  %v226_v15 = vld [vmem:[%s20641_s29] sm:$0xff]  ;;  %v1341_v16 = vshrl.u32 %v1340_v4, 7  ;;  %v342_v20 = vld [vmem:[%s20623_s22 + $0x28] sm:$0xff]  ;;  %p19315_p6 = scmp.ne.s32.totalorder %s20476_s12, 6 }
  0x47   : > { %v783_v14 = vld [vmem:[%s20623_s22 + $0xdf0] sm:$0x3]  ;;  %v1339_v18 = vunpack.c.0.s8 %v1338_v10  ;;  %v1336_v19 = vcombine.high %v226_v15, %v226_v15  ;;  %v786_v21 = vld [vmem:[%s20623_s22 + $0xe08] sm:$0x3]  ;;  %v344_v23 = vld [vmem:[%s20623_s22 + $0x38] sm:$0xff] }
  0x48   : > { %19320 = vmatprep.subr.bf16.mxu0 %v19319_v5  ;;  %v19325_v17 = vpack.c.bf16 %v783_v14, %v339_v13  ;;  %19324 = vmatprep.subr.bf16.mxu1 %v19323_v12  ;;  %v19327_v22 = vpack.c.bf16 %v786_v21, %v342_v20  ;;  %v788_v24 = vld [vmem:[%s20623_s22 + $0xe18] sm:$0x3]  ;;  %v341_v26 = vld [vmem:[%s20623_s22 + $0x20] sm:$0xff]  ;;  %v343_v30 = vld [vmem:[%s20623_s22 + $0x30] sm:$0xff] }
  0x49   : > { %19322 = vmatpush1.bf16.xpose.msra.mxu0 %v19321_v11  ;;  %v20657_v25 = vsub.s32 %v1339_v18, %v1341_v16  ;;  %v19331_v27 = vpack.c.bf16 %v788_v24, %v344_v23  ;;  %v227_v28 = vld [vmem:[%s20641_s29 + $0x8] sm:$0xff]  ;;  %v785_v29 = vld [vmem:[%s20623_s22 + $0xe00] sm:$0x3]  ;;  %v787_v31 = vld [vmem:[%s20623_s22 + $0xe10] sm:$0x3] }
  0x4a   : > { %19326 = vmatpush1.bf16.xpose.msra.mxu1 %v19325_v17  ;;  %19328 = vmatprep.subr.bf16.mxu0 %v19327_v22  ;;  %v1353_v32 = vcombine.high %v227_v28, %v227_v28  ;;  %v346_v36 = vld [vmem:[%s20623_s22 + $0x48] sm:$0xff]  ;;  %v348_v39 = vld [vmem:[%s20623_s22 + $0x58] sm:$0xff]  ;;  %v19329_v44 = vpack.c.bf16 %v785_v29, %v341_v26  ;;  %v19333_v45 = vpack.c.bf16 %v787_v31, %v343_v30  ;;  %v345_v51 = vld [vmem:[%s20623_s22 + $0x40] sm:$0xff] }
  0x4b   : > { %v1343_v33 = vrot.slane %v226_v15, %v20657_v25  ;;  %v1350_v34 = vrot.slane %v1336_v19, %v20657_v25  ;;  %19332 = vmatprep.subr.bf16.mxu1 %v19331_v27  ;;  %v1360_v35 = vrot.slane %v227_v28, %v20657_v25  ;;  %v790_v37 = vld [vmem:[%s20623_s22 + $0xe28] sm:$0x3]  ;;  %v792_v40 = vld [vmem:[%s20623_s22 + $0xe38] sm:$0x3]  ;;  %v228_v41 = vld [vmem:[%s20641_s29 + $0x10] sm:$0xff] }
  0x4c   : > { %v1367_v38 = vrot.slane %v1353_v32, %v20657_v25  ;;  %v19335_v47 = vpack.c.bf16 %v790_v37, %v346_v36  ;;  %v19339_v49 = vpack.c.bf16 %v792_v40, %v348_v39  ;;  %v1370_v50 = vcombine.high %v228_v41, %v228_v41  ;;  %v789_v52 = vld [vmem:[%s20623_s22 + $0xe20] sm:$0x3]  ;;  %v347_v53 = vld [vmem:[%s20623_s22 + $0x50] sm:$0xff]  ;;  %v350_v56 = vld [vmem:[%s20623_s22 + $0x68] sm:$0xff] }
  0x4d   : > { %v1351_v42 = vcombine.high %v1343_v33, %v1343_v33  ;;  %v1352_v43 = vcombine.high %v1350_v34, %v1350_v34  ;;  %v1368_v46 = vcombine.high %v1360_v35, %v1360_v35  ;;  %v791_v54 = vld [vmem:[%s20623_s22 + $0xe30] sm:$0x3]  ;;  %v1377_v55 = vrot.slane %v228_v41, %v20657_v25  ;;  %v794_v57 = vld [vmem:[%s20623_s22 + $0xe48] sm:$0x3]  ;;  %v352_v59 = vld [vmem:[%s20623_s22 + $0x78] sm:$0xff] }
  0x4e   : > { %v1369_v48 = vcombine.high %v1367_v38, %v1367_v38  ;;  %v1384_v58 = vrot.slane %v1370_v50, %v20657_v25  ;;  %v796_v60 = vld [vmem:[%s20623_s22 + $0xe58] sm:$0x3]  ;;  %v19337_v62 = vpack.c.bf16 %v789_v52, %v345_v51  ;;  %v19341_v63 = vpack.c.bf16 %v791_v54, %v347_v53  ;;  %v349_v5 = vld [vmem:[%s20623_s22 + $0x60] sm:$0xff]  ;;  %v351_v7 = vld [vmem:[%s20623_s22 + $0x70] sm:$0xff] }
  0x4f   : > { %3731 = vmatprep.mubr.f32.mxu0 %v1351_v42  ;;  %3801 = vmatprep.mubr.f32.mxu1 %v1352_v43  ;;  %v229_v61 = vld [vmem:[%s20641_s29 + $0x18] sm:$0xff]  ;;  %v1385_v0 = vcombine.high %v1377_v55, %v1377_v55  ;;  %v19343_v1 = vpack.c.bf16 %v794_v57, %v350_v56  ;;  %v19347_v3 = vpack.c.bf16 %v796_v60, %v352_v59  ;;  %v793_v6 = vld [vmem:[%s20623_s22 + $0xe40] sm:$0x3]  ;;  %v795_v8 = vld [vmem:[%s20623_s22 + $0xe50] sm:$0x3] }
  0x50   : > { %3732 = vmatmul.mubr.f32.vlgmr.msra.gmra.mrb[0].mxu0 %v1343_v33  ;;  %v1386_v2 = vcombine.high %v1384_v58, %v1384_v58  ;;  %v1387_v4 = vcombine.high %v229_v61, %v229_v61  ;;  %v1394_v9 = vrot.slane %v229_v61, %v20657_v25  ;;  %v354_v10 = vld [vmem:[%s20623_s22 + $0x88] sm:$0xff]  ;;  %v356_v13 = vld [vmem:[%s20623_s22 + $0x98] sm:$0xff]  ;;  %v19345_v16 = vpack.c.bf16 %v793_v6, %v349_v5  ;;  %v353_v23 = vld [vmem:[%s20623_s22 + $0x80] sm:$0xff] }
  0x51   : > { %3802 = vmatmul.mubr.f32.vlgmr.msra.gmra.mrb[0].mxu1 %v1350_v34  ;;  %19330 = vmatpush1.bf16.xpose.msra.mxu0 %v19329_v44  ;;  %v798_v11 = vld [vmem:[%s20623_s22 + $0xe68] sm:$0x3]  ;;  %v800_v14 = vld [vmem:[%s20623_s22 + $0xe78] sm:$0x3]  ;;  %v230_v15 = vld [vmem:[%s20641_s29 + $0x20] sm:$0xff]  ;;  %v19349_v17 = vpack.c.bf16 %v795_v8, %v351_v7 }
  0x52   : > { %19334 = vmatpush1.bf16.xpose.msra.mxu1 %v19333_v45  ;;  %3871 = vmatprep.mubr.f32.mxu0 %v1368_v46  ;;  %v1401_v12 = vrot.slane %v1387_v4, %v20657_v25  ;;  %v1402_v18 = vcombine.high %v1394_v9, %v1394_v9  ;;  %v19351_v19 = vpack.c.bf16 %v798_v11, %v354_v10  ;;  %v797_v24 = vld [vmem:[%s20623_s22 + $0xe60] sm:$0x3]  ;;  %v355_v26 = vld [vmem:[%s20623_s22 + $0x90] sm:$0xff]  ;;  %v358_v29 = vld [vmem:[%s20623_s22 + $0xa8] sm:$0xff] }
  0x53   : > { %19336 = vmatprep.subr.bf16.mxu0 %v19335_v47  ;;  %3941 = vmatprep.mubr.f32.mxu1 %v1369_v48  ;;  %v19355_v21 = vpack.c.bf16 %v800_v14, %v356_v13  ;;  %v1404_v22 = vcombine.high %v230_v15, %v230_v15  ;;  %v799_v27 = vld [vmem:[%s20623_s22 + $0xe70] sm:$0x3]  ;;  %v1411_v28 = vrot.slane %v230_v15, %v20657_v25  ;;  %v802_v30 = vld [vmem:[%s20623_s22 + $0xe88] sm:$0x3]  ;;  %v360_v32 = vld [vmem:[%s20623_s22 + $0xb8] sm:$0xff] }
  0x54   : > { %19340 = vmatprep.subr.bf16.mxu1 %v19339_v49  ;;  %v1403_v20 = vcombine.high %v1401_v12, %v1401_v12  ;;  %v804_v33 = vld [vmem:[%s20623_s22 + $0xe98] sm:$0x3]  ;;  %v231_v34 = vld [vmem:[%s20641_s29 + $0x28] sm:$0xff]  ;;  %v19357_v36 = vpack.c.bf16 %v799_v27, %v355_v26  ;;  %v801_v43 = vld [vmem:[%s20623_s22 + $0xe80] sm:$0x3] }
  0x55   : > { %v1418_v31 = vrot.slane %v1404_v22, %v20657_v25  ;;  %v1419_v37 = vcombine.high %v1411_v28, %v1411_v28  ;;  %v19363_v40 = vpack.c.bf16 %v804_v33, %v360_v32  ;;  %v1421_v41 = vcombine.high %v231_v34, %v231_v34  ;;  %v357_v42 = vld [vmem:[%s20623_s22 + $0xa0] sm:$0xff]  ;;  %v359_v44 = vld [vmem:[%s20623_s22 + $0xb0] sm:$0xff]  ;;  %v362_v47 = vld [vmem:[%s20623_s22 + $0xc8] sm:$0xff] }
  0x56   : > { %v803_v45 = vld [vmem:[%s20623_s22 + $0xe90] sm:$0x3]  ;;  %v1428_v46 = vrot.slane %v231_v34, %v20657_v25  ;;  %v806_v48 = vld [vmem:[%s20623_s22 + $0xea8] sm:$0x3]  ;;  %v364_v50 = vld [vmem:[%s20623_s22 + $0xd8] sm:$0xff]  ;;  %v19361_v53 = vpack.c.bf16 %v801_v43, %v357_v42 }
  0x57   : > { %v1420_v39 = vcombine.high %v1418_v31, %v1418_v31  ;;  %v1435_v49 = vrot.slane %v1421_v41, %v20657_v25  ;;  %v808_v51 = vld [vmem:[%s20623_s22 + $0xeb8] sm:$0x3]  ;;  %v232_v52 = vld [vmem:[%s20641_s29 + $0x30] sm:$0xff]  ;;  %v19365_v54 = vpack.c.bf16 %v803_v45, %v359_v44  ;;  %v19367_v56 = vpack.c.bf16 %v806_v48, %v362_v47  ;;  %v361_v60 = vld [vmem:[%s20623_s22 + $0xc0] sm:$0xff] }
  0x58   : > { %3872 = vmatmul.mubr.f32.vlgmr.msra.gmra.mrb[2].mxu0 %v1360_v35  ;;  %v19353_v35 = vpack.c.bf16 %v797_v24, %v353_v23  ;;  %v1438_v59 = vcombine.high %v232_v52, %v232_v52  ;;  %v805_v61 = vld [vmem:[%s20623_s22 + $0xea0] sm:$0x3]  ;;  %v368_v4 = vld [vmem:[%s20623_s22 + $0xf8] sm:$0xff]  ;;  %v235_v43 = vld [vmem:[%s20641_s29 + $0x48] sm:$0xff] }
  0x59   : > { %3942 = vmatmul.mubr.f32.vlgmr.msra.gmra.mrb[2].mxu1 %v1367_v38  ;;  %19338 = vmatpush1.bf16.xpose.msra.mxu0 %v19337_v62  ;;  %v19359_v38 = vpack.c.bf16 %v802_v30, %v358_v29  ;;  %v1437_v57 = vcombine.high %v1435_v49, %v1435_v49  ;;  %v363_v62 = vld [vmem:[%s20623_s22 + $0xd0] sm:$0xff]  ;;  %v812_v5 = vld [vmem:[%s20623_s22 + $0xed8] sm:$0x3]  ;;  %v19369_v7 = vpack.c.bf16 %v805_v61, %v361_v60  ;;  %v365_v14 = vld [vmem:[%s20623_s22 + $0xe0] sm:$0xff] }
  0x5a   : > { %19342 = vmatpush1.bf16.xpose.msra.mxu1 %v19341_v63  ;;  %4011 = vmatprep.mubr.f32.mxu0 %v1385_v0  ;;  %v807_v63 = vld [vmem:[%s20623_s22 + $0xeb0] sm:$0x3]  ;;  %v1445_v0 = vrot.slane %v232_v52, %v20657_v25  ;;  %v233_v6 = vld [vmem:[%s20641_s29 + $0x38] sm:$0xff]  ;;  %v809_v15 = vld [vmem:[%s20623_s22 + $0xec0] sm:$0x3] }
  0x5b   : > { %19344 = vmatprep.subr.bf16.mxu0 %v19343_v1  ;;  %4081 = vmatprep.mubr.f32.mxu1 %v1386_v2  ;;  %v366_v1 = vld [vmem:[%s20623_s22 + $0xe8] sm:$0xff]  ;;  %v19373_v8 = vpack.c.bf16 %v807_v63, %v363_v62  ;;  %v1455_v13 = vcombine.high %v233_v6, %v233_v6  ;;  %v372_v22 = vld [vmem:[%s20623_s22 + $0x118] sm:$0xff]  ;;  %v19377_v26 = vpack.c.bf16 %v809_v15, %v365_v14  ;;  %v369_v33 = vld [vmem:[%s20623_s22 + $0x100] sm:$0xff] }
  0x5c   : > { %19348 = vmatprep.subr.bf16.mxu1 %v19347_v3  ;;  %v810_v2 = vld [vmem:[%s20623_s22 + $0xec8] sm:$0x3]  ;;  %v1452_v3 = vrot.slane %v1438_v59, %v20657_v25  ;;  %v816_v23 = vld [vmem:[%s20623_s22 + $0xef8] sm:$0x3]  ;;  %v234_v24 = vld [vmem:[%s20641_s29 + $0x40] sm:$0xff] }
  0x5d   : > { %v19375_v10 = vpack.c.bf16 %v810_v2, %v366_v1  ;;  %v1472_v32 = vcombine.high %v234_v24, %v234_v24  ;;  %v813_v34 = vld [vmem:[%s20623_s22 + $0xee0] sm:$0x3]  ;;  %v376_v41 = vld [vmem:[%s20623_s22 + $0x138] sm:$0xff]  ;;  %v236_v61 = vld [vmem:[%s20641_s29 + $0x50] sm:$0xff] }
  0x5e   : > { %v1454_v11 = vcombine.high %v1452_v3, %v1452_v3  ;;  %v820_v42 = vld [vmem:[%s20623_s22 + $0xf18] sm:$0x3]  ;;  %v19385_v44 = vpack.c.bf16 %v813_v34, %v369_v33  ;;  %v817_v52 = vld [vmem:[%s20623_s22 + $0xf00] sm:$0x3] }
  0x5f   : > { %v380_v59 = vld [vmem:[%s20623_s22 + $0x158] sm:$0xff] }
  0x60   : > { %4012 = vmatmul.mubr.f32.vlgmr.msra.gmra.mrb[4].mxu0 %v1377_v55  ;;  %v1436_v55 = vcombine.high %v1428_v46, %v1428_v46  ;;  %v824_v60 = vld [vmem:[%s20623_s22 + $0xf38] sm:$0x3]  ;;  %v238_v34 = vld [vmem:[%s20641_s29 + $0x60] sm:$0xff] }
  0x61   : > { %4082 = vmatmul.mubr.f32.vlgmr.msra.gmra.mrb[4].mxu1 %v1384_v58  ;;  %19346 = vmatpush1.bf16.xpose.msra.mxu0 %v19345_v16  ;;  %v19371_v58 = vpack.c.bf16 %v808_v51, %v364_v50  ;;  %v367_v16 = vld [vmem:[%s20623_s22 + $0xf0] sm:$0xff]  ;;  %v1489_v50 = vcombine.high %v235_v43, %v235_v43  ;;  %v373_v51 = vld [vmem:[%s20623_s22 + $0x120] sm:$0xff]  ;;  %v828_v14 = vld [vmem:[%s20623_s22 + $0xf58] sm:$0x3] }
  0x62   : > { %19350 = vmatpush1.bf16.xpose.msra.mxu1 %v19349_v17  ;;  %4151 = vmatprep.mubr.f32.mxu0 %v1402_v18  ;;  %v811_v17 = vld [vmem:[%s20623_s22 + $0xed0] sm:$0x3]  ;;  %v1462_v18 = vrot.slane %v233_v6, %v20657_v25  ;;  %v19393_v62 = vpack.c.bf16 %v817_v52, %v373_v51  ;;  %v821_v6 = vld [vmem:[%s20623_s22 + $0xf20] sm:$0x3]  ;;  %v237_v15 = vld [vmem:[%s20641_s29 + $0x58] sm:$0xff] }
  0x63   : > { %19352 = vmatprep.subr.bf16.mxu0 %v19351_v19  ;;  %4221 = vmatprep.mubr.f32.mxu1 %v1403_v20  ;;  %v370_v19 = vld [vmem:[%s20623_s22 + $0x108] sm:$0xff]  ;;  %v19381_v27 = vpack.c.bf16 %v811_v17, %v367_v16  ;;  %v832_v33 = vld [vmem:[%s20623_s22 + $0xf78] sm:$0x3] }
  0x64   : > { %19356 = vmatprep.subr.bf16.mxu1 %v19355_v21  ;;  %v814_v20 = vld [vmem:[%s20623_s22 + $0xee8] sm:$0x3]  ;;  %v1469_v21 = vrot.slane %v1455_v13, %v20657_v25  ;;  %v384_v13 = vld [vmem:[%s20623_s22 + $0x178] sm:$0xff] }
  0x65   : > { %v19383_v29 = vpack.c.bf16 %v814_v20, %v370_v19  ;;  %v836_v51 = vld [vmem:[%s20623_s22 + $0xf98] sm:$0x3]  ;;  %v239_v52 = vld [vmem:[%s20641_s29 + $0x68] sm:$0xff] }
  0x66   : > { %v1471_v30 = vcombine.high %v1469_v21, %v1469_v21 }
  0x68   : > { %4152 = vmatmul.mubr.f32.vlgmr.msra.gmra.mrb[6].mxu0 %v1394_v9  ;;  %v1453_v9 = vcombine.high %v1445_v0, %v1445_v0 }
  0x69   : > { %4222 = vmatmul.mubr.f32.vlgmr.msra.gmra.mrb[6].mxu1 %v1401_v12  ;;  %19354 = vmatpush1.bf16.xpose.msra.mxu0 %v19353_v35  ;;  %v19379_v12 = vpack.c.bf16 %v812_v5, %v368_v4  ;;  %v371_v35 = vld [vmem:[%s20623_s22 + $0x110] sm:$0xff]  ;;  %v1506_v4 = vcombine.high %v236_v61, %v236_v61  ;;  %v377_v5 = vld [vmem:[%s20623_s22 + $0x140] sm:$0xff] }
  0x6a   : > { %19358 = vmatpush1.bf16.xpose.msra.mxu1 %v19357_v36  ;;  %4291 = vmatprep.mubr.f32.mxu0 %v1419_v37  ;;  %v815_v36 = vld [vmem:[%s20623_s22 + $0xef0] sm:$0x3]  ;;  %v1479_v37 = vrot.slane %v234_v24, %v20657_v25  ;;  %v19401_v16 = vpack.c.bf16 %v821_v6, %v377_v5  ;;  %v825_v24 = vld [vmem:[%s20623_s22 + $0xf40] sm:$0x3]  ;;  %v840_v5 = vld [vmem:[%s20623_s22 + $0xfb8] sm:$0x3] }
  0x6b   : > { %19360 = vmatprep.subr.bf16.mxu0 %v19359_v38  ;;  %4361 = vmatprep.mubr.f32.mxu1 %v1420_v39  ;;  %v374_v38 = vld [vmem:[%s20623_s22 + $0x128] sm:$0xff]  ;;  %v19389_v45 = vpack.c.bf16 %v815_v36, %v371_v35 }
  0x6c   : > { %19364 = vmatprep.subr.bf16.mxu1 %v19363_v40  ;;  %v818_v39 = vld [vmem:[%s20623_s22 + $0xf08] sm:$0x3]  ;;  %v1486_v40 = vrot.slane %v1472_v32, %v20657_v25  ;;  %v388_v32 = vld [vmem:[%s20623_s22 + $0x198] sm:$0xff]  ;;  %v240_v6 = vld [vmem:[%s20641_s29 + $0x70] sm:$0xff] }
  0x6d   : > { %v19391_v47 = vpack.c.bf16 %v818_v39, %v374_v38 }
  0x6e   : > { %v1488_v48 = vcombine.high %v1486_v40, %v1486_v40 }
  0x70   : > { %4292 = vmatmul.mubr.f32.vlgmr.msra.gmra.mrb[8].mxu0 %v1411_v28  ;;  %v1470_v28 = vcombine.high %v1462_v18, %v1462_v18 }
  0x71   : > { %4362 = vmatmul.mubr.f32.vlgmr.msra.gmra.mrb[8].mxu1 %v1418_v31  ;;  %19362 = vmatpush1.bf16.xpose.msra.mxu0 %v19361_v53  ;;  %v19387_v31 = vpack.c.bf16 %v816_v23, %v372_v22  ;;  %v375_v53 = vld [vmem:[%s20623_s22 + $0x130] sm:$0xff]  ;;  %v1523_v22 = vcombine.high %v237_v15, %v237_v15  ;;  %v381_v23 = vld [vmem:[%s20623_s22 + $0x160] sm:$0xff] }
  0x72   : > { %19366 = vmatpush1.bf16.xpose.msra.mxu1 %v19365_v54  ;;  %4431 = vmatprep.mubr.f32.mxu0 %v1436_v55  ;;  %v819_v54 = vld [vmem:[%s20623_s22 + $0xf10] sm:$0x3]  ;;  %v1496_v55 = vrot.slane %v235_v43, %v20657_v25  ;;  %v19409_v35 = vpack.c.bf16 %v825_v24, %v381_v23  ;;  %v829_v43 = vld [vmem:[%s20623_s22 + $0xf60] sm:$0x3]  ;;  %v844_v23 = vld [vmem:[%s20623_s22 + $0xfd8] sm:$0x3] }
  0x73   : > { %19368 = vmatprep.subr.bf16.mxu0 %v19367_v56  ;;  %4501 = vmatprep.mubr.f32.mxu1 %v1437_v57  ;;  %v378_v56 = vld [vmem:[%s20623_s22 + $0x148] sm:$0xff]  ;;  %v19397_v63 = vpack.c.bf16 %v819_v54, %v375_v53  ;;  %v241_v24 = vld [vmem:[%s20641_s29 + $0x78] sm:$0xff] }
  0x74   : > { %19372 = vmatprep.subr.bf16.mxu1 %v19371_v58  ;;  %v822_v57 = vld [vmem:[%s20623_s22 + $0xf28] sm:$0x3]  ;;  %v1503_v58 = vrot.slane %v1489_v50, %v20657_v25  ;;  %v392_v50 = vld [vmem:[%s20623_s22 + $0x1b8] sm:$0xff] }
  0x75   : > { %v19399_v1 = vpack.c.bf16 %v822_v57, %v378_v56 }
  0x76   : > { %v1505_v2 = vcombine.high %v1503_v58, %v1503_v58 }
  0x78   : > { %4432 = vmatmul.mubr.f32.vlgmr.msra.gmra.mrb[10].mxu0 %v1428_v46  ;;  %v1487_v46 = vcombine.high %v1479_v37, %v1479_v37 }
  0x79   : > { %4502 = vmatmul.mubr.f32.vlgmr.msra.gmra.mrb[10].mxu1 %v1435_v49  ;;  %19370 = vmatpush1.bf16.xpose.msra.mxu0 %v19369_v7  ;;  %v19395_v49 = vpack.c.bf16 %v820_v42, %v376_v41  ;;  %v379_v7 = vld [vmem:[%s20623_s22 + $0x150] sm:$0xff]  ;;  %v1540_v41 = vcombine.high %v238_v34, %v238_v34  ;;  %v385_v42 = vld [vmem:[%s20623_s22 + $0x180] sm:$0xff] }
  0x7a   : > { %19374 = vmatpush1.bf16.xpose.msra.mxu1 %v19373_v8  ;;  %4571 = vmatprep.mubr.f32.mxu0 %v1453_v9  ;;  %v823_v8 = vld [vmem:[%s20623_s22 + $0xf30] sm:$0x3]  ;;  %v1513_v9 = vrot.slane %v236_v61, %v20657_v25  ;;  %v19417_v53 = vpack.c.bf16 %v829_v43, %v385_v42  ;;  %v833_v61 = vld [vmem:[%s20623_s22 + $0xf80] sm:$0x3]  ;;  %v848_v42 = vld [vmem:[%s20623_s22 + $0xff8] sm:$0x3] }
  0x7b   : > { %19376 = vmatprep.subr.bf16.mxu0 %v19375_v10  ;;  %4641 = vmatprep.mubr.f32.mxu1 %v1454_v11  ;;  %v382_v10 = vld [vmem:[%s20623_s22 + $0x168] sm:$0xff]  ;;  %v19405_v17 = vpack.c.bf16 %v823_v8, %v379_v7  ;;  %v242_v43 = vld [vmem:[%s20641_s29 + $0x80] sm:$0xff] }
  0x7c   : > { %19380 = vmatprep.subr.bf16.mxu1 %v19379_v12  ;;  %v826_v11 = vld [vmem:[%s20623_s22 + $0xf48] sm:$0x3]  ;;  %v1520_v12 = vrot.slane %v1506_v4, %v20657_v25  ;;  %v396_v4 = vld [vmem:[%s20623_s22 + $0x1d8] sm:$0xff] }
  0x7d   : > { %v19407_v19 = vpack.c.bf16 %v826_v11, %v382_v10 }
  0x7e   : > { %v1522_v20 = vcombine.high %v1520_v12, %v1520_v12 }
  0x80   : > { %4572 = vmatmul.mubr.f32.vlgmr.msra.gmra.mrb[12].mxu0 %v1445_v0  ;;  %v1504_v0 = vcombine.high %v1496_v55, %v1496_v55 }
  0x81   : > { %4642 = vmatmul.mubr.f32.vlgmr.msra.gmra.mrb[12].mxu1 %v1452_v3  ;;  %19378 = vmatpush1.bf16.xpose.msra.mxu0 %v19377_v26  ;;  %v19403_v3 = vpack.c.bf16 %v824_v60, %v380_v59  ;;  %v383_v26 = vld [vmem:[%s20623_s22 + $0x170] sm:$0xff]  ;;  %v1557_v59 = vcombine.high %v239_v52, %v239_v52  ;;  %v389_v60 = vld [vmem:[%s20623_s22 + $0x1a0] sm:$0xff] }
  0x82   : > { %19382 = vmatpush1.bf16.xpose.msra.mxu1 %v19381_v27  ;;  %4711 = vmatprep.mubr.f32.mxu0 %v1470_v28  ;;  %v827_v27 = vld [vmem:[%s20623_s22 + $0xf50] sm:$0x3]  ;;  %v1530_v28 = vrot.slane %v237_v15, %v20657_v25  ;;  %v19425_v7 = vpack.c.bf16 %v833_v61, %v389_v60  ;;  %v837_v15 = vld [vmem:[%s20623_s22 + $0xfa0] sm:$0x3]  ;;  %v852_v60 = vld [vmem:[%s20623_s22 + $0x1018] sm:$0x3] }
  0x83   : > { %19384 = vmatprep.subr.bf16.mxu0 %v19383_v29  ;;  %4781 = vmatprep.mubr.f32.mxu1 %v1471_v30  ;;  %v386_v29 = vld [vmem:[%s20623_s22 + $0x188] sm:$0xff]  ;;  %v19413_v36 = vpack.c.bf16 %v827_v27, %v383_v26 }
  0x84   : > { %19388 = vmatprep.subr.bf16.mxu1 %v19387_v31  ;;  %v830_v30 = vld [vmem:[%s20623_s22 + $0xf68] sm:$0x3]  ;;  %v1537_v31 = vrot.slane %v1523_v22, %v20657_v25  ;;  %v400_v22 = vld [vmem:[%s20623_s22 + $0x1f8] sm:$0xff] }
  0x85   : > { %v19415_v38 = vpack.c.bf16 %v830_v30, %v386_v29  ;;  %v243_v61 = vld [vmem:[%s20641_s29 + $0x88] sm:$0xff] }
  0x86   : > { %v1539_v39 = vcombine.high %v1537_v31, %v1537_v31 }
  0x88   : > { %4712 = vmatmul.mubr.f32.vlgmr.msra.gmra.mrb[14].mxu0 %v1462_v18  ;;  %v1521_v18 = vcombine.high %v1513_v9, %v1513_v9 }
  0x89   : > { %4782 = vmatmul.mubr.f32.vlgmr.msra.gmra.mrb[14].mxu1 %v1469_v21  ;;  %19386 = vmatpush1.bf16.xpose.msra.mxu0 %v19385_v44  ;;  %v19411_v21 = vpack.c.bf16 %v828_v14, %v384_v13  ;;  %v387_v44 = vld [vmem:[%s20623_s22 + $0x190] sm:$0xff]  ;;  %v1574_v13 = vcombine.high %v240_v6, %v240_v6  ;;  %v393_v14 = vld [vmem:[%s20623_s22 + $0x1c0] sm:$0xff] }
  0x8a   : > { %19390 = vmatpush1.bf16.xpose.msra.mxu1 %v19389_v45  ;;  %4851 = vmatprep.mubr.f32.mxu0 %v1487_v46  ;;  %v831_v45 = vld [vmem:[%s20623_s22 + $0xf70] sm:$0x3]  ;;  %v1547_v46 = vrot.slane %v238_v34, %v20657_v25  ;;  %v19433_v26 = vpack.c.bf16 %v837_v15, %v393_v14  ;;  %v841_v34 = vld [vmem:[%s20623_s22 + $0xfc0] sm:$0x3]  ;;  %v856_v14 = vld [vmem:[%s20623_s22 + $0x1038] sm:$0x3] }
  0x8b   : > { %19392 = vmatprep.subr.bf16.mxu0 %v19391_v47  ;;  %4921 = vmatprep.mubr.f32.mxu1 %v1488_v48  ;;  %v390_v47 = vld [vmem:[%s20623_s22 + $0x1a8] sm:$0xff]  ;;  %v19421_v54 = vpack.c.bf16 %v831_v45, %v387_v44 }
  0x8c   : > { %19396 = vmatprep.subr.bf16.mxu1 %v19395_v49  ;;  %v834_v48 = vld [vmem:[%s20623_s22 + $0xf88] sm:$0x3]  ;;  %v1554_v49 = vrot.slane %v1540_v41, %v20657_v25  ;;  %v404_v41 = vld [vmem:[%s20623_s22 + $0x218] sm:$0xff]  ;;  %v244_v15 = vld [vmem:[%s20641_s29 + $0x90] sm:$0xff] }
  0x8d   : > { %v19423_v56 = vpack.c.bf16 %v834_v48, %v390_v47 }
  0x8e   : > { %v1556_v57 = vcombine.high %v1554_v49, %v1554_v49 }
  0x90   : > { %4852 = vmatmul.mubr.f32.vlgmr.msra.gmra.mrb[16].mxu0 %v1479_v37  ;;  %v1538_v37 = vcombine.high %v1530_v28, %v1530_v28 }
  0x91   : > { %4922 = vmatmul.mubr.f32.vlgmr.msra.gmra.mrb[16].mxu1 %v1486_v40  ;;  %19394 = vmatpush1.bf16.xpose.msra.mxu0 %v19393_v62  ;;  %v19419_v40 = vpack.c.bf16 %v832_v33, %v388_v32  ;;  %v391_v62 = vld [vmem:[%s20623_s22 + $0x1b0] sm:$0xff]  ;;  %v1591_v32 = vcombine.high %v241_v24, %v241_v24  ;;  %v397_v33 = vld [vmem:[%s20623_s22 + $0x1e0] sm:$0xff] }
  0x92   : > { %19398 = vmatpush1.bf16.xpose.msra.mxu1 %v19397_v63  ;;  %4991 = vmatprep.mubr.f32.mxu0 %v1504_v0  ;;  %v835_v63 = vld [vmem:[%s20623_s22 + $0xf90] sm:$0x3]  ;;  %v1564_v0 = vrot.slane %v239_v52, %v20657_v25  ;;  %v19441_v44 = vpack.c.bf16 %v841_v34, %v397_v33  ;;  %v845_v52 = vld [vmem:[%s20623_s22 + $0xfe0] sm:$0x3]  ;;  %v860_v33 = vld [vmem:[%s20623_s22 + $0x1058] sm:$0x3] }
  0x93   : > { %19400 = vmatprep.subr.bf16.mxu0 %v19399_v1  ;;  %5061 = vmatprep.mubr.f32.mxu1 %v1505_v2  ;;  %v394_v1 = vld [vmem:[%s20623_s22 + $0x1c8] sm:$0xff]  ;;  %v19429_v8 = vpack.c.bf16 %v835_v63, %v391_v62  ;;  %v245_v34 = vld [vmem:[%s20641_s29 + $0x98] sm:$0xff] }
  0x94   : > { %19404 = vmatprep.subr.bf16.mxu1 %v19403_v3  ;;  %v838_v2 = vld [vmem:[%s20623_s22 + $0xfa8] sm:$0x3]  ;;  %v1571_v3 = vrot.slane %v1557_v59, %v20657_v25  ;;  %v408_v59 = vld [vmem:[%s20623_s22 + $0x238] sm:$0xff] }
  0x95   : > { %v19431_v10 = vpack.c.bf16 %v838_v2, %v394_v1 }
  0x96   : > { %v1573_v11 = vcombine.high %v1571_v3, %v1571_v3 }
  0x98   : > { %4992 = vmatmul.mubr.f32.vlgmr.msra.gmra.mrb[18].mxu0 %v1496_v55  ;;  %v1555_v55 = vcombine.high %v1547_v46, %v1547_v46 }
  0x99   : > { %5062 = vmatmul.mubr.f32.vlgmr.msra.gmra.mrb[18].mxu1 %v1503_v58  ;;  %19402 = vmatpush1.bf16.xpose.msra.mxu0 %v19401_v16  ;;  %v19427_v58 = vpack.c.bf16 %v836_v51, %v392_v50  ;;  %v395_v16 = vld [vmem:[%s20623_s22 + $0x1d0] sm:$0xff]  ;;  %v1608_v50 = vcombine.high %v242_v43, %v242_v43  ;;  %v401_v51 = vld [vmem:[%s20623_s22 + $0x200] sm:$0xff] }
  0x9a   : > { %19406 = vmatpush1.bf16.xpose.msra.mxu1 %v19405_v17  ;;  %5131 = vmatprep.mubr.f32.mxu0 %v1521_v18  ;;  %v839_v17 = vld [vmem:[%s20623_s22 + $0xfb0] sm:$0x3]  ;;  %v1581_v18 = vrot.slane %v240_v6, %v20657_v25  ;;  %v19449_v62 = vpack.c.bf16 %v845_v52, %v401_v51  ;;  %v849_v6 = vld [vmem:[%s20623_s22 + $0x1000] sm:$0x3]  ;;  %v864_v51 = vld [vmem:[%s20623_s22 + $0x1078] sm:$0x3] }
  0x9b   : > { %19408 = vmatprep.subr.bf16.mxu0 %v19407_v19  ;;  %5201 = vmatprep.mubr.f32.mxu1 %v1522_v20  ;;  %v398_v19 = vld [vmem:[%s20623_s22 + $0x1e8] sm:$0xff]  ;;  %v19437_v27 = vpack.c.bf16 %v839_v17, %v395_v16  ;;  %v246_v52 = vld [vmem:[%s20641_s29 + $0xa0] sm:$0xff] }
  0x9c   : > { %19412 = vmatprep.subr.bf16.mxu1 %v19411_v21  ;;  %v842_v20 = vld [vmem:[%s20623_s22 + $0xfc8] sm:$0x3]  ;;  %v1588_v21 = vrot.slane %v1574_v13, %v20657_v25  ;;  %v412_v13 = vld [vmem:[%s20623_s22 + $0x258] sm:$0xff] }
  0x9d   : > { %v19439_v29 = vpack.c.bf16 %v842_v20, %v398_v19 }
  0x9e   : > { %v1590_v30 = vcombine.high %v1588_v21, %v1588_v21 }
  0xa0   : > { %5132 = vmatmul.mubr.f32.vlgmr.msra.gmra.mrb[20].mxu0 %v1513_v9  ;;  %v1572_v9 = vcombine.high %v1564_v0, %v1564_v0 }
  0xa1   : > { %5202 = vmatmul.mubr.f32.vlgmr.msra.gmra.mrb[20].mxu1 %v1520_v12  ;;  %19410 = vmatpush1.bf16.xpose.msra.mxu0 %v19409_v35  ;;  %v19435_v12 = vpack.c.bf16 %v840_v5, %v396_v4  ;;  %v399_v35 = vld [vmem:[%s20623_s22 + $0x1f0] sm:$0xff]  ;;  %v1625_v4 = vcombine.high %v243_v61, %v243_v61  ;;  %v405_v5 = vld [vmem:[%s20623_s22 + $0x220] sm:$0xff] }
  0xa2   : > { %19414 = vmatpush1.bf16.xpose.msra.mxu1 %v19413_v36  ;;  %5271 = vmatprep.mubr.f32.mxu0 %v1538_v37  ;;  %v843_v36 = vld [vmem:[%s20623_s22 + $0xfd0] sm:$0x3]  ;;  %v1598_v37 = vrot.slane %v241_v24, %v20657_v25  ;;  %v19457_v16 = vpack.c.bf16 %v849_v6, %v405_v5  ;;  %v853_v24 = vld [vmem:[%s20623_s22 + $0x1020] sm:$0x3]  ;;  %v868_v5 = vld [vmem:[%s20623_s22 + $0x1098] sm:$0x3] }
  0xa3   : > { %19416 = vmatprep.subr.bf16.mxu0 %v19415_v38  ;;  %5341 = vmatprep.mubr.f32.mxu1 %v1539_v39  ;;  %v402_v38 = vld [vmem:[%s20623_s22 + $0x208] sm:$0xff]  ;;  %v19445_v45 = vpack.c.bf16 %v843_v36, %v399_v35 }
  0xa4   : > { %19420 = vmatprep.subr.bf16.mxu1 %v19419_v40  ;;  %v846_v39 = vld [vmem:[%s20623_s22 + $0xfe8] sm:$0x3]  ;;  %v1605_v40 = vrot.slane %v1591_v32, %v20657_v25  ;;  %v416_v32 = vld [vmem:[%s20623_s22 + $0x278] sm:$0xff] }
  0xa5   : > { %v19447_v47 = vpack.c.bf16 %v846_v39, %v402_v38  ;;  %v247_v6 = vld [vmem:[%s20641_s29 + $0xa8] sm:$0xff] }
  0xa6   : > { %v1607_v48 = vcombine.high %v1605_v40, %v1605_v40 }
  0xa8   : > { %5272 = vmatmul.mubr.f32.vlgmr.msra.gmra.mrb[22].mxu0 %v1530_v28  ;;  %v1589_v28 = vcombine.high %v1581_v18, %v1581_v18 }
  0xa9   : > { %5342 = vmatmul.mubr.f32.vlgmr.msra.gmra.mrb[22].mxu1 %v1537_v31  ;;  %19418 = vmatpush1.bf16.xpose.msra.mxu0 %v19417_v53  ;;  %v19443_v31 = vpack.c.bf16 %v844_v23, %v400_v22  ;;  %v403_v53 = vld [vmem:[%s20623_s22 + $0x210] sm:$0xff]  ;;  %v1642_v22 = vcombine.high %v244_v15, %v244_v15  ;;  %v409_v23 = vld [vmem:[%s20623_s22 + $0x240] sm:$0xff] }
  0xaa   : > { %19422 = vmatpush1.bf16.xpose.msra.mxu1 %v19421_v54  ;;  %5411 = vmatprep.mubr.f32.mxu0 %v1555_v55  ;;  %v847_v54 = vld [vmem:[%s20623_s22 + $0xff0] sm:$0x3]  ;;  %v1615_v55 = vrot.slane %v242_v43, %v20657_v25  ;;  %v19465_v35 = vpack.c.bf16 %v853_v24, %v409_v23  ;;  %v857_v43 = vld [vmem:[%s20623_s22 + $0x1040] sm:$0x3]  ;;  %v872_v23 = vld [vmem:[%s20623_s22 + $0x10b8] sm:$0x3] }
  0xab   : > { %19424 = vmatprep.subr.bf16.mxu0 %v19423_v56  ;;  %5481 = vmatprep.mubr.f32.mxu1 %v1556_v57  ;;  %v406_v56 = vld [vmem:[%s20623_s22 + $0x228] sm:$0xff]  ;;  %v19453_v63 = vpack.c.bf16 %v847_v54, %v403_v53 }
  0xac   : > { %19428 = vmatprep.subr.bf16.mxu1 %v19427_v58  ;;  %v850_v57 = vld [vmem:[%s20623_s22 + $0x1008] sm:$0x3]  ;;  %v1622_v58 = vrot.slane %v1608_v50, %v20657_v25  ;;  %v420_v50 = vld [vmem:[%s20623_s22 + $0x298] sm:$0xff]  ;;  %v248_v24 = vld [vmem:[%s20641_s29 + $0xb0] sm:$0xff] }
  0xad   : > { %v19455_v1 = vpack.c.bf16 %v850_v57, %v406_v56 }
  0xae   : > { %v1624_v2 = vcombine.high %v1622_v58, %v1622_v58 }
  0xb0   : > { %5412 = vmatmul.mubr.f32.vlgmr.msra.gmra.mrb[24].mxu0 %v1547_v46  ;;  %v1606_v46 = vcombine.high %v1598_v37, %v1598_v37 }
  0xb1   : > { %5482 = vmatmul.mubr.f32.vlgmr.msra.gmra.mrb[24].mxu1 %v1554_v49  ;;  %19426 = vmatpush1.bf16.xpose.msra.mxu0 %v19425_v7  ;;  %v19451_v49 = vpack.c.bf16 %v848_v42, %v404_v41  ;;  %v407_v7 = vld [vmem:[%s20623_s22 + $0x230] sm:$0xff]  ;;  %v1659_v41 = vcombine.high %v245_v34, %v245_v34  ;;  %v413_v42 = vld [vmem:[%s20623_s22 + $0x260] sm:$0xff] }
  0xb2   : > { %19430 = vmatpush1.bf16.xpose.msra.mxu1 %v19429_v8  ;;  %5551 = vmatprep.mubr.f32.mxu0 %v1572_v9  ;;  %v851_v8 = vld [vmem:[%s20623_s22 + $0x1010] sm:$0x3]  ;;  %v1632_v9 = vrot.slane %v243_v61, %v20657_v25  ;;  %v19473_v53 = vpack.c.bf16 %v857_v43, %v413_v42  ;;  %v861_v61 = vld [vmem:[%s20623_s22 + $0x1060] sm:$0x3]  ;;  %v876_v42 = vld [vmem:[%s20623_s22 + $0x10d8] sm:$0x3] }
  0xb3   : > { %19432 = vmatprep.subr.bf16.mxu0 %v19431_v10  ;;  %5621 = vmatprep.mubr.f32.mxu1 %v1573_v11  ;;  %v410_v10 = vld [vmem:[%s20623_s22 + $0x248] sm:$0xff]  ;;  %v19461_v17 = vpack.c.bf16 %v851_v8, %v407_v7  ;;  %v249_v43 = vld [vmem:[%s20641_s29 + $0xb8] sm:$0xff] }
  0xb4   : > { %19436 = vmatprep.subr.bf16.mxu1 %v19435_v12  ;;  %v854_v11 = vld [vmem:[%s20623_s22 + $0x1028] sm:$0x3]  ;;  %v1639_v12 = vrot.slane %v1625_v4, %v20657_v25  ;;  %v424_v4 = vld [vmem:[%s20623_s22 + $0x2b8] sm:$0xff] }
  0xb5   : > { %v19463_v19 = vpack.c.bf16 %v854_v11, %v410_v10 }
  0xb6   : > { %v1641_v20 = vcombine.high %v1639_v12, %v1639_v12 }
  0xb8   : > { %5552 = vmatmul.mubr.f32.vlgmr.msra.gmra.mrb[26].mxu0 %v1564_v0  ;;  %v1623_v0 = vcombine.high %v1615_v55, %v1615_v55 }
  0xb9   : > { %5622 = vmatmul.mubr.f32.vlgmr.msra.gmra.mrb[26].mxu1 %v1571_v3  ;;  %19434 = vmatpush1.bf16.xpose.msra.mxu0 %v19433_v26  ;;  %v19459_v3 = vpack.c.bf16 %v852_v60, %v408_v59  ;;  %v411_v26 = vld [vmem:[%s20623_s22 + $0x250] sm:$0xff]  ;;  %v1676_v59 = vcombine.high %v246_v52, %v246_v52  ;;  %v417_v60 = vld [vmem:[%s20623_s22 + $0x280] sm:$0xff] }
  0xba   : > { %19438 = vmatpush1.bf16.xpose.msra.mxu1 %v19437_v27  ;;  %5691 = vmatprep.mubr.f32.mxu0 %v1589_v28  ;;  %v855_v27 = vld [vmem:[%s20623_s22 + $0x1030] sm:$0x3]  ;;  %v1649_v28 = vrot.slane %v244_v15, %v20657_v25  ;;  %v19481_v7 = vpack.c.bf16 %v861_v61, %v417_v60  ;;  %v865_v15 = vld [vmem:[%s20623_s22 + $0x1080] sm:$0x3]  ;;  %v880_v60 = vld [vmem:[%s20623_s22 + $0x10f8] sm:$0x3] }
  0xbb   : > { %19440 = vmatprep.subr.bf16.mxu0 %v19439_v29  ;;  %5761 = vmatprep.mubr.f32.mxu1 %v1590_v30  ;;  %v414_v29 = vld [vmem:[%s20623_s22 + $0x268] sm:$0xff]  ;;  %v19469_v36 = vpack.c.bf16 %v855_v27, %v411_v26  ;;  %v250_v61 = vld [vmem:[%s20641_s29 + $0xc0] sm:$0xff] }
  0xbc   : > { %19444 = vmatprep.subr.bf16.mxu1 %v19443_v31  ;;  %v858_v30 = vld [vmem:[%s20623_s22 + $0x1048] sm:$0x3]  ;;  %v1656_v31 = vrot.slane %v1642_v22, %v20657_v25  ;;  %v428_v22 = vld [vmem:[%s20623_s22 + $0x2d8] sm:$0xff] }
  0xbd   : > { %v19471_v38 = vpack.c.bf16 %v858_v30, %v414_v29 }
  0xbe   : > { %v1658_v39 = vcombine.high %v1656_v31, %v1656_v31 }
  0xc0   : > { %5692 = vmatmul.mubr.f32.vlgmr.msra.gmra.mrb[28].mxu0 %v1581_v18  ;;  %v1640_v18 = vcombine.high %v1632_v9, %v1632_v9 }
  0xc1   : > { %5762 = vmatmul.mubr.f32.vlgmr.msra.gmra.mrb[28].mxu1 %v1588_v21  ;;  %19442 = vmatpush1.bf16.xpose.msra.mxu0 %v19441_v44  ;;  %v19467_v21 = vpack.c.bf16 %v856_v14, %v412_v13  ;;  %v415_v44 = vld [vmem:[%s20623_s22 + $0x270] sm:$0xff]  ;;  %v1693_v13 = vcombine.high %v247_v6, %v247_v6  ;;  %v421_v14 = vld [vmem:[%s20623_s22 + $0x2a0] sm:$0xff] }
  0xc2   : > { %19446 = vmatpush1.bf16.xpose.msra.mxu1 %v19445_v45  ;;  %5831 = vmatprep.mubr.f32.mxu0 %v1606_v46  ;;  %v859_v45 = vld [vmem:[%s20623_s22 + $0x1050] sm:$0x3]  ;;  %v1666_v46 = vrot.slane %v245_v34, %v20657_v25  ;;  %v19489_v26 = vpack.c.bf16 %v865_v15, %v421_v14  ;;  %v869_v34 = vld [vmem:[%s20623_s22 + $0x10a0] sm:$0x3]  ;;  %v884_v14 = vld [vmem:[%s20623_s22 + $0x1118] sm:$0x3] }
  0xc3   : > { %19448 = vmatprep.subr.bf16.mxu0 %v19447_v47  ;;  %5901 = vmatprep.mubr.f32.mxu1 %v1607_v48  ;;  %v418_v47 = vld [vmem:[%s20623_s22 + $0x288] sm:$0xff]  ;;  %v19477_v54 = vpack.c.bf16 %v859_v45, %v415_v44 }
  0xc4   : > { %19452 = vmatprep.subr.bf16.mxu1 %v19451_v49  ;;  %v862_v48 = vld [vmem:[%s20623_s22 + $0x1068] sm:$0x3]  ;;  %v1673_v49 = vrot.slane %v1659_v41, %v20657_v25  ;;  %v432_v41 = vld [vmem:[%s20623_s22 + $0x2f8] sm:$0xff] }
  0xc5   : > { %v19479_v56 = vpack.c.bf16 %v862_v48, %v418_v47  ;;  %v251_v15 = vld [vmem:[%s20641_s29 + $0xc8] sm:$0xff] }
  0xc6   : > { %v1675_v57 = vcombine.high %v1673_v49, %v1673_v49 }
  0xc8   : > { %5832 = vmatmul.mubr.f32.vlgmr.msra.gmra.mrb[30].mxu0 %v1598_v37  ;;  %v1657_v37 = vcombine.high %v1649_v28, %v1649_v28 }
  0xc9   : > { %5902 = vmatmul.mubr.f32.vlgmr.msra.gmra.mrb[30].mxu1 %v1605_v40  ;;  %19450 = vmatpush1.bf16.xpose.msra.mxu0 %v19449_v62  ;;  %v19475_v40 = vpack.c.bf16 %v860_v33, %v416_v32  ;;  %v419_v62 = vld [vmem:[%s20623_s22 + $0x290] sm:$0xff]  ;;  %v1710_v32 = vcombine.high %v248_v24, %v248_v24  ;;  %v425_v33 = vld [vmem:[%s20623_s22 + $0x2c0] sm:$0xff] }
  0xca   : > { %19454 = vmatpush1.bf16.xpose.msra.mxu1 %v19453_v63  ;;  %5971 = vmatprep.mubr.f32.mxu0 %v1623_v0  ;;  %v863_v63 = vld [vmem:[%s20623_s22 + $0x1070] sm:$0x3]  ;;  %v1683_v0 = vrot.slane %v246_v52, %v20657_v25  ;;  %v19497_v44 = vpack.c.bf16 %v869_v34, %v425_v33  ;;  %v873_v52 = vld [vmem:[%s20623_s22 + $0x10c0] sm:$0x3]  ;;  %v888_v33 = vld [vmem:[%s20623_s22 + $0x1138] sm:$0x3] }
  0xcb   : > { %19456 = vmatprep.subr.bf16.mxu0 %v19455_v1  ;;  %6041 = vmatprep.mubr.f32.mxu1 %v1624_v2  ;;  %v422_v1 = vld [vmem:[%s20623_s22 + $0x2a8] sm:$0xff]  ;;  %v19485_v8 = vpack.c.bf16 %v863_v63, %v419_v62 }
  0xcc   : > { %19460 = vmatprep.subr.bf16.mxu1 %v19459_v3  ;;  %v866_v2 = vld [vmem:[%s20623_s22 + $0x1088] sm:$0x3]  ;;  %v1690_v3 = vrot.slane %v1676_v59, %v20657_v25  ;;  %v436_v59 = vld [vmem:[%s20623_s22 + $0x318] sm:$0xff]  ;;  %v252_v34 = vld [vmem:[%s20641_s29 + $0xd0] sm:$0xff] }
  0xcd   : > { %v19487_v10 = vpack.c.bf16 %v866_v2, %v422_v1 }
  0xce   : > { %v1692_v11 = vcombine.high %v1690_v3, %v1690_v3 }
  0xd0   : > { %5972 = vmatmul.mubr.f32.vlgmr.msra.gmra.mrb[32].mxu0 %v1615_v55  ;;  %v1674_v55 = vcombine.high %v1666_v46, %v1666_v46 }
  0xd1   : > { %6042 = vmatmul.mubr.f32.vlgmr.msra.gmra.mrb[32].mxu1 %v1622_v58  ;;  %19458 = vmatpush1.bf16.xpose.msra.mxu0 %v19457_v16  ;;  %v19483_v58 = vpack.c.bf16 %v864_v51, %v420_v50  ;;  %v423_v16 = vld [vmem:[%s20623_s22 + $0x2b0] sm:$0xff]  ;;  %v1727_v50 = vcombine.high %v249_v43, %v249_v43  ;;  %v429_v51 = vld [vmem:[%s20623_s22 + $0x2e0] sm:$0xff] }
  0xd2   : > { %19462 = vmatpush1.bf16.xpose.msra.mxu1 %v19461_v17  ;;  %6111 = vmatprep.mubr.f32.mxu0 %v1640_v18  ;;  %v867_v17 = vld [vmem:[%s20623_s22 + $0x1090] sm:$0x3]  ;;  %v1700_v18 = vrot.slane %v247_v6, %v20657_v25  ;;  %v19505_v62 = vpack.c.bf16 %v873_v52, %v429_v51  ;;  %v877_v6 = vld [vmem:[%s20623_s22 + $0x10e0] sm:$0x3]  ;;  %v892_v51 = vld [vmem:[%s20623_s22 + $0x1158] sm:$0x3] }
  0xd3   : > { %19464 = vmatprep.subr.bf16.mxu0 %v19463_v19  ;;  %6181 = vmatprep.mubr.f32.mxu1 %v1641_v20  ;;  %v426_v19 = vld [vmem:[%s20623_s22 + $0x2c8] sm:$0xff]  ;;  %v19493_v27 = vpack.c.bf16 %v867_v17, %v423_v16  ;;  %v253_v52 = vld [vmem:[%s20641_s29 + $0xd8] sm:$0xff] }
  0xd4   : > { %19468 = vmatprep.subr.bf16.mxu1 %v19467_v21  ;;  %v870_v20 = vld [vmem:[%s20623_s22 + $0x10a8] sm:$0x3]  ;;  %v1707_v21 = vrot.slane %v1693_v13, %v20657_v25  ;;  %v440_v13 = vld [vmem:[%s20623_s22 + $0x338] sm:$0xff] }
  0xd5   : > { %v19495_v29 = vpack.c.bf16 %v870_v20, %v426_v19 }
  0xd6   : > { %v1709_v30 = vcombine.high %v1707_v21, %v1707_v21 }
  0xd8   : > { %6112 = vmatmul.mubr.f32.vlgmr.msra.gmra.mrb[34].mxu0 %v1632_v9  ;;  %v1691_v9 = vcombine.high %v1683_v0, %v1683_v0 }
  0xd9   : > { %6182 = vmatmul.mubr.f32.vlgmr.msra.gmra.mrb[34].mxu1 %v1639_v12  ;;  %19466 = vmatpush1.bf16.xpose.msra.mxu0 %v19465_v35  ;;  %v19491_v12 = vpack.c.bf16 %v868_v5, %v424_v4  ;;  %v427_v35 = vld [vmem:[%s20623_s22 + $0x2d0] sm:$0xff]  ;;  %v1744_v4 = vcombine.high %v250_v61, %v250_v61  ;;  %v433_v5 = vld [vmem:[%s20623_s22 + $0x300] sm:$0xff] }
  0xda   : > { %19470 = vmatpush1.bf16.xpose.msra.mxu1 %v19469_v36  ;;  %6251 = vmatprep.mubr.f32.mxu0 %v1657_v37  ;;  %v871_v36 = vld [vmem:[%s20623_s22 + $0x10b0] sm:$0x3]  ;;  %v1717_v37 = vrot.slane %v248_v24, %v20657_v25  ;;  %v19513_v16 = vpack.c.bf16 %v877_v6, %v433_v5  ;;  %v881_v24 = vld [vmem:[%s20623_s22 + $0x1100] sm:$0x3]  ;;  %v896_v5 = vld [vmem:[%s20623_s22 + $0x1178] sm:$0x3] }
  0xdb   : > { %19472 = vmatprep.subr.bf16.mxu0 %v19471_v38  ;;  %6321 = vmatprep.mubr.f32.mxu1 %v1658_v39  ;;  %v430_v38 = vld [vmem:[%s20623_s22 + $0x2e8] sm:$0xff]  ;;  %v19501_v45 = vpack.c.bf16 %v871_v36, %v427_v35  ;;  %v254_v6 = vld [vmem:[%s20641_s29 + $0xe0] sm:$0xff] }
  0xdc   : > { %19476 = vmatprep.subr.bf16.mxu1 %v19475_v40  ;;  %v874_v39 = vld [vmem:[%s20623_s22 + $0x10c8] sm:$0x3]  ;;  %v1724_v40 = vrot.slane %v1710_v32, %v20657_v25  ;;  %v444_v32 = vld [vmem:[%s20623_s22 + $0x358] sm:$0xff] }
  0xdd   : > { %v19503_v47 = vpack.c.bf16 %v874_v39, %v430_v38 }
  0xde   : > { %v1726_v48 = vcombine.high %v1724_v40, %v1724_v40 }
  0xe0   : > { %6252 = vmatmul.mubr.f32.vlgmr.msra.gmra.mrb[36].mxu0 %v1649_v28  ;;  %v1708_v28 = vcombine.high %v1700_v18, %v1700_v18 }
  0xe1   : > { %6322 = vmatmul.mubr.f32.vlgmr.msra.gmra.mrb[36].mxu1 %v1656_v31  ;;  %19474 = vmatpush1.bf16.xpose.msra.mxu0 %v19473_v53  ;;  %v19499_v31 = vpack.c.bf16 %v872_v23, %v428_v22  ;;  %v431_v53 = vld [vmem:[%s20623_s22 + $0x2f0] sm:$0xff]  ;;  %v1761_v22 = vcombine.high %v251_v15, %v251_v15  ;;  %v437_v23 = vld [vmem:[%s20623_s22 + $0x320] sm:$0xff] }
  0xe2   : > { %19478 = vmatpush1.bf16.xpose.msra.mxu1 %v19477_v54  ;;  %6391 = vmatprep.mubr.f32.mxu0 %v1674_v55  ;;  %v875_v54 = vld [vmem:[%s20623_s22 + $0x10d0] sm:$0x3]  ;;  %v1734_v55 = vrot.slane %v249_v43, %v20657_v25  ;;  %v19521_v35 = vpack.c.bf16 %v881_v24, %v437_v23  ;;  %v885_v43 = vld [vmem:[%s20623_s22 + $0x1120] sm:$0x3] }
  0xe3   : > { %19480 = vmatprep.subr.bf16.mxu0 %v19479_v56  ;;  %6461 = vmatprep.mubr.f32.mxu1 %v1675_v57  ;;  %v434_v56 = vld [vmem:[%s20623_s22 + $0x308] sm:$0xff]  ;;  %v19509_v63 = vpack.c.bf16 %v875_v54, %v431_v53 }
  0xe4   : > { %19484 = vmatprep.subr.bf16.mxu1 %v19483_v58  ;;  %v878_v57 = vld [vmem:[%s20623_s22 + $0x10e8] sm:$0x3]  ;;  %v1741_v58 = vrot.slane %v1727_v50, %v20657_v25  ;;  %v448_v50 = vld [vmem:[%s20623_s22 + $0x378] sm:$0xff] }
  0xe5   : > { %v19511_v1 = vpack.c.bf16 %v878_v57, %v434_v56 }
  0xe6   : > { %v1743_v2 = vcombine.high %v1741_v58, %v1741_v58 }
  0xe8   : > { %6392 = vmatmul.mubr.f32.vlgmr.msra.gmra.mrb[38].mxu0 %v1666_v46  ;;  %v1725_v46 = vcombine.high %v1717_v37, %v1717_v37 }
  0xe9   : > { %6462 = vmatmul.mubr.f32.vlgmr.msra.gmra.mrb[38].mxu1 %v1673_v49  ;;  %19482 = vmatpush1.bf16.xpose.msra.mxu0 %v19481_v7  ;;  %v19507_v49 = vpack.c.bf16 %v876_v42, %v432_v41  ;;  %v435_v7 = vld [vmem:[%s20623_s22 + $0x310] sm:$0xff]  ;;  %v1778_v41 = vcombine.high %v252_v34, %v252_v34  ;;  %v441_v42 = vld [vmem:[%s20623_s22 + $0x340] sm:$0xff] }
  0xea   : > { %19486 = vmatpush1.bf16.xpose.msra.mxu1 %v19485_v8  ;;  %6531 = vmatprep.mubr.f32.mxu0 %v1691_v9  ;;  %v879_v8 = vld [vmem:[%s20623_s22 + $0x10f0] sm:$0x3]  ;;  %v1751_v9 = vrot.slane %v250_v61, %v20657_v25  ;;  %v19529_v53 = vpack.c.bf16 %v885_v43, %v441_v42  ;;  %v889_v61 = vld [vmem:[%s20623_s22 + $0x1140] sm:$0x3] }
  0xeb   : > { %19488 = vmatprep.subr.bf16.mxu0 %v19487_v10  ;;  %6601 = vmatprep.mubr.f32.mxu1 %v1692_v11  ;;  %v438_v10 = vld [vmem:[%s20623_s22 + $0x328] sm:$0xff]  ;;  %v19517_v17 = vpack.c.bf16 %v879_v8, %v435_v7 }
  0xec   : > { %19492 = vmatprep.subr.bf16.mxu1 %v19491_v12  ;;  %v882_v11 = vld [vmem:[%s20623_s22 + $0x1108] sm:$0x3]  ;;  %v1758_v12 = vrot.slane %v1744_v4, %v20657_v25  ;;  %v452_v4 = vld [vmem:[%s20623_s22 + $0x398] sm:$0xff] }
  0xed   : > { %v19519_v19 = vpack.c.bf16 %v882_v11, %v438_v10 }
  0xee   : > { %v1760_v20 = vcombine.high %v1758_v12, %v1758_v12 }
  0xf0   : > { %6532 = vmatmul.mubr.f32.vlgmr.msra.gmra.mrb[40].mxu0 %v1683_v0  ;;  %v1742_v0 = vcombine.high %v1734_v55, %v1734_v55 }
  0xf1   : > { %6602 = vmatmul.mubr.f32.vlgmr.msra.gmra.mrb[40].mxu1 %v1690_v3  ;;  %19490 = vmatpush1.bf16.xpose.msra.mxu0 %v19489_v26  ;;  %v19515_v3 = vpack.c.bf16 %v880_v60, %v436_v59  ;;  %v439_v26 = vld [vmem:[%s20623_s22 + $0x330] sm:$0xff]  ;;  %v1795_v59 = vcombine.high %v253_v52, %v253_v52  ;;  %v445_v60 = vld [vmem:[%s20623_s22 + $0x360] sm:$0xff] }
  0xf2   : > { %19494 = vmatpush1.bf16.xpose.msra.mxu1 %v19493_v27  ;;  %6671 = vmatprep.mubr.f32.mxu0 %v1708_v28  ;;  %v883_v27 = vld [vmem:[%s20623_s22 + $0x1110] sm:$0x3]  ;;  %v1768_v28 = vrot.slane %v251_v15, %v20657_v25  ;;  %v19537_v7 = vpack.c.bf16 %v889_v61, %v445_v60  ;;  %v893_v15 = vld [vmem:[%s20623_s22 + $0x1160] sm:$0x3] }
  0xf3   : > { %19496 = vmatprep.subr.bf16.mxu0 %v19495_v29  ;;  %6741 = vmatprep.mubr.f32.mxu1 %v1709_v30  ;;  %v442_v29 = vld [vmem:[%s20623_s22 + $0x348] sm:$0xff]  ;;  %v19525_v36 = vpack.c.bf16 %v883_v27, %v439_v26 }
  0xf4   : > { %19500 = vmatprep.subr.bf16.mxu1 %v19499_v31  ;;  %v886_v30 = vld [vmem:[%s20623_s22 + $0x1128] sm:$0x3]  ;;  %v1775_v31 = vrot.slane %v1761_v22, %v20657_v25 }
  0xf5   : > { %v19527_v38 = vpack.c.bf16 %v886_v30, %v442_v29  ;;  %v898_v22 = vld [vmem:[%s20623_s22 + $0x1188] sm:$0x3]  ;;  %v900_v29 = vld [vmem:[%s20623_s22 + $0x1198] sm:$0x3] }
  0xf6   : > { %v1777_v39 = vcombine.high %v1775_v31, %v1775_v31  ;;  %v255_v30 = vld [vmem:[%s20641_s29 + $0xe8] sm:$0xff] }
  0xf7   : > { %v1836_v42 = vrot.slane %v255_v30, %v20657_v25 }
  0xf8   : > { %6672 = vmatmul.mubr.f32.vlgmr.msra.gmra.mrb[42].mxu0 %v1700_v18  ;;  %v1759_v18 = vcombine.high %v1751_v9, %v1751_v9 }
  0xf9   : > { %6742 = vmatmul.mubr.f32.vlgmr.msra.gmra.mrb[42].mxu1 %v1707_v21  ;;  %19498 = vmatpush1.bf16.xpose.msra.mxu0 %v19497_v44  ;;  %v19523_v21 = vpack.c.bf16 %v884_v14, %v440_v13  ;;  %v443_v44 = vld [vmem:[%s20623_s22 + $0x350] sm:$0xff]  ;;  %v1812_v13 = vcombine.high %v254_v6, %v254_v6  ;;  %v449_v14 = vld [vmem:[%s20623_s22 + $0x380] sm:$0xff] }
  0xfa   : > { %19502 = vmatpush1.bf16.xpose.msra.mxu1 %v19501_v45  ;;  %6811 = vmatprep.mubr.f32.mxu0 %v1725_v46  ;;  %v887_v45 = vld [vmem:[%s20623_s22 + $0x1130] sm:$0x3]  ;;  %v1785_v46 = vrot.slane %v252_v34, %v20657_v25 }
  0xfb   : > { %19504 = vmatprep.subr.bf16.mxu0 %v19503_v47  ;;  %6881 = vmatprep.mubr.f32.mxu1 %v1726_v48  ;;  %v446_v47 = vld [vmem:[%s20623_s22 + $0x368] sm:$0xff]  ;;  %v19533_v54 = vpack.c.bf16 %v887_v45, %v443_v44  ;;  %v1826_v23 = vrot.slane %v1812_v13, %v20657_v25  ;;  %v257_v13 = vld [vmem:[%s20641_s29 + $0xf8] sm:$0xff] }
  0xfc   : > { %19508 = vmatprep.subr.bf16.mxu1 %v19507_v49  ;;  %v890_v48 = vld [vmem:[%s20623_s22 + $0x1148] sm:$0x3]  ;;  %v1792_v49 = vrot.slane %v1778_v41, %v20657_v25  ;;  %v899_v41 = vld [vmem:[%s20623_s22 + $0x1190] sm:$0x3] }
  0xfd   : > { %v19535_v56 = vpack.c.bf16 %v890_v48, %v446_v47  ;;  %v458_v45 = vld [vmem:[%s20623_s22 + $0x3c8] sm:$0xff] }
  0xfe   : > { %v1794_v57 = vcombine.high %v1792_v49, %v1792_v49 }
 0x100   : > { %6812 = vmatmul.mubr.f32.vlgmr.msra.gmra.mrb[44].mxu0 %v1717_v37  ;;  %v1776_v37 = vcombine.high %v1768_v28, %v1768_v28 }
 0x101   : > { %6882 = vmatmul.mubr.f32.vlgmr.msra.gmra.mrb[44].mxu1 %v1724_v40  ;;  %19506 = vmatpush1.bf16.xpose.msra.mxu0 %v19505_v62  ;;  %v19531_v40 = vpack.c.bf16 %v888_v33, %v444_v32  ;;  %v447_v62 = vld [vmem:[%s20623_s22 + $0x370] sm:$0xff] }
 0x102   : > { %19510 = vmatpush1.bf16.xpose.msra.mxu1 %v19509_v63  ;;  %6951 = vmatprep.mubr.f32.mxu0 %v1742_v0  ;;  %v891_v63 = vld [vmem:[%s20623_s22 + $0x1150] sm:$0x3]  ;;  %v1802_v0 = vrot.slane %v253_v52, %v20657_v25  ;;  %v904_v52 = vld [vmem:[%s20623_s22 + $0x11b8] sm:$0x3] }
 0x103   : > { %19512 = vmatprep.subr.bf16.mxu0 %v19511_v1  ;;  %7021 = vmatprep.mubr.f32.mxu1 %v1743_v2  ;;  %v450_v1 = vld [vmem:[%s20623_s22 + $0x388] sm:$0xff]  ;;  %v19541_v8 = vpack.c.bf16 %v891_v63, %v447_v62  ;;  %v457_v62 = vld [vmem:[%s20623_s22 + $0x3c0] sm:$0xff] }
 0x104   : > { %19516 = vmatprep.subr.bf16.mxu1 %v19515_v3  ;;  %v894_v2 = vld [vmem:[%s20623_s22 + $0x1168] sm:$0x3]  ;;  %v1809_v3 = vrot.slane %v1795_v59, %v20657_v25  ;;  %v901_v63 = vld [vmem:[%s20623_s22 + $0x11a0] sm:$0x3] }
 0x105   : > { %v19543_v10 = vpack.c.bf16 %v894_v2, %v450_v1  ;;  %v903_v1 = vld [vmem:[%s20623_s22 + $0x11b0] sm:$0x3] }
 0x106   : > { %v1811_v11 = vcombine.high %v1809_v3, %v1809_v3 }
 0x108   : > { %6952 = vmatmul.mubr.f32.vlgmr.msra.gmra.mrb[46].mxu0 %v1734_v55  ;;  %v1793_v55 = vcombine.high %v1785_v46, %v1785_v46 }
 0x109   : > { %7022 = vmatmul.mubr.f32.vlgmr.msra.gmra.mrb[46].mxu1 %v1741_v58  ;;  %19514 = vmatpush1.bf16.xpose.msra.mxu0 %v19513_v16  ;;  %v19539_v58 = vpack.c.bf16 %v892_v51, %v448_v50  ;;  %v451_v16 = vld [vmem:[%s20623_s22 + $0x390] sm:$0xff]  ;;  %v460_v51 = vld [vmem:[%s20623_s22 + $0x3d8] sm:$0xff] }
 0x10a   : > { %19518 = vmatpush1.bf16.xpose.msra.mxu1 %v19517_v17  ;;  %7091 = vmatprep.mubr.f32.mxu0 %v1759_v18  ;;  %v895_v17 = vld [vmem:[%s20623_s22 + $0x1170] sm:$0x3]  ;;  %v1819_v18 = vrot.slane %v254_v6, %v20657_v25  ;;  %v19563_v60 = vpack.c.bf16 %v904_v52, %v460_v51  ;;  %v906_v6 = vld [vmem:[%s20623_s22 + $0x11c8] sm:$0x3] }
 0x10b   : > { %19520 = vmatprep.subr.bf16.mxu0 %v19519_v19  ;;  %7161 = vmatprep.mubr.f32.mxu1 %v1760_v20  ;;  %v19549_v32 = vpack.c.bf16 %v895_v17, %v451_v16 }
 0x10c   : > { %19524 = vmatprep.subr.bf16.mxu1 %v19523_v21  ;;  %v454_v21 = vld [vmem:[%s20623_s22 + $0x3a8] sm:$0xff]  ;;  %v1827_v33 = vcombine.high %v1819_v18, %v1819_v18 }
 0x10d   : > { %v19551_v34 = vpack.c.bf16 %v898_v22, %v454_v21  ;;  %v1863_v21 = vcombine.high %v257_v13, %v257_v13  ;;  %v461_v22 = vld [vmem:[%s20623_s22 + $0x3e0] sm:$0xff] }
 0x110   : > { %7092 = vmatmul.mubr.f32.vlgmr.msra.gmra.mrb[48].mxu0 %v1751_v9  ;;  %v1810_v9 = vcombine.high %v1802_v0, %v1802_v0 }
 0x111   : > { %7162 = vmatmul.mubr.f32.vlgmr.msra.gmra.mrb[48].mxu1 %v1758_v12  ;;  %19522 = vmatpush1.bf16.xpose.msra.mxu0 %v19521_v35  ;;  %v19547_v12 = vpack.c.bf16 %v896_v5, %v452_v4  ;;  %v1828_v35 = vcombine.high %v1826_v23, %v1826_v23  ;;  %v462_v5 = vld [vmem:[%s20623_s22 + $0x3e8] sm:$0xff] }
 0x112   : > { %19526 = vmatpush1.bf16.xpose.msra.mxu1 %v19525_v36  ;;  %7231 = vmatprep.mubr.f32.mxu0 %v1776_v37  ;;  %v1829_v37 = vcombine.high %v255_v30, %v255_v30  ;;  %v466_v30 = vld [vmem:[%s20623_s22 + $0x408] sm:$0xff] }
 0x113   : > { %19528 = vmatprep.subr.bf16.mxu0 %v19527_v38  ;;  %7301 = vmatprep.mubr.f32.mxu1 %v1777_v39  ;;  %v453_v38 = vld [vmem:[%s20623_s22 + $0x3a0] sm:$0xff] }
 0x114   : > { %19532 = vmatprep.subr.bf16.mxu1 %v19531_v40  ;;  %v897_v39 = vld [vmem:[%s20623_s22 + $0x1180] sm:$0x3]  ;;  %v455_v40 = vld [vmem:[%s20623_s22 + $0x3b0] sm:$0xff]  ;;  %v1843_v47 = vrot.slane %v1829_v37, %v20657_v25  ;;  %v912_v37 = vld [vmem:[%s20623_s22 + $0x11f8] sm:$0x3] }
 0x116   : > { %v1845_v59 = vcombine.high %v1843_v47, %v1843_v47 }
 0x118   : > { %7232 = vmatmul.mubr.f32.vlgmr.msra.gmra.mrb[50].mxu0 %v1768_v28  ;;  %v456_v28 = vld [vmem:[%s20623_s22 + $0x3b8] sm:$0xff] }
 0x119   : > { %7302 = vmatmul.mubr.f32.vlgmr.msra.gmra.mrb[50].mxu1 %v1775_v31  ;;  %19530 = vmatpush1.bf16.xpose.msra.mxu0 %v19529_v53  ;;  %v19545_v31 = vpack.c.bf16 %v893_v15, %v449_v14  ;;  %v19555_v36 = vpack.c.bf16 %v900_v29, %v456_v28  ;;  %v256_v53 = vld [vmem:[%s20641_s29 + $0xf0] sm:$0xff]  ;;  %v19561_v14 = vpack.c.bf16 %v901_v63, %v457_v62  ;;  %v259_v62 = vld [vmem:[%s20641_s29 + $0x108] sm:$0xff] }
 0x11a   : > { %19534 = vmatpush1.bf16.xpose.msra.mxu1 %v19533_v54  ;;  %7371 = vmatprep.mubr.f32.mxu0 %v1793_v55  ;;  %v19553_v54 = vpack.c.bf16 %v897_v39, %v453_v38  ;;  %v19557_v55 = vpack.c.bf16 %v899_v41, %v455_v40  ;;  %v1846_v61 = vcombine.high %v256_v53, %v256_v53  ;;  %v258_v38 = vld [vmem:[%s20641_s29 + $0x100] sm:$0xff] }
 0x11b   : > { %19536 = vmatprep.subr.bf16.mxu0 %v19535_v56  ;;  %7441 = vmatprep.mubr.f32.mxu1 %v1794_v57  ;;  %v1844_v57 = vcombine.high %v1836_v42, %v1836_v42  ;;  %v1853_v2 = vrot.slane %v256_v53, %v20657_v25  ;;  %v1887_v51 = vrot.slane %v258_v38, %v20657_v25 }
 0x11c   : > { %19540 = vmatprep.subr.bf16.mxu1 %v19539_v58 }
 0x11d   : > { %v1861_v17 = vcombine.high %v1853_v2, %v1853_v2 }
 0x120   : > { %7372 = vmatmul.mubr.f32.vlgmr.msra.gmra.mrb[52].mxu0 %v1785_v46  ;;  %v902_v46 = vld [vmem:[%s20623_s22 + $0x11a8] sm:$0x3] }
 0x121   : > { %7442 = vmatmul.mubr.f32.vlgmr.msra.gmra.mrb[52].mxu1 %v1792_v49  ;;  %19538 = vmatpush1.bf16.xpose.msra.mxu0 %v19537_v7  ;;  %v19559_v58 = vpack.c.bf16 %v902_v46, %v458_v45  ;;  %v1860_v7 = vrot.slane %v1846_v61, %v20657_v25  ;;  %v1880_v46 = vcombine.high %v258_v38, %v258_v38  ;;  %v916_v61 = vld [vmem:[%s20623_s22 + $0x1218] sm:$0x3] }
 0x122   : > { %19542 = vmatpush1.bf16.xpose.msra.mxu1 %v19541_v8  ;;  %7511 = vmatprep.mubr.f32.mxu0 %v1810_v9 }
 0x123   : > { %19544 = vmatprep.subr.bf16.mxu0 %v19543_v10  ;;  %v3733_v19 = vpop.f32.mrb[0].mxu0  ;;  %7581 = vmatprep.mubr.f32.mxu1 %v1811_v11  ;;  %v464_v11 = vld [vmem:[%s20623_s22 + $0x3f8] sm:$0xff] }
 0x124   : > { %v3803_v20 = vpop.f32.mrb[0].mxu1  ;;  %19548 = vmatprep.subr.bf16.mxu1 %v19547_v12  ;;  %v3735_v26 = vpop.f32.mrb[1].mxu0  ;;  %v908_v12 = vld [vmem:[%s20623_s22 + $0x11d8] sm:$0x3] }
 0x125   : > { %v3804_v24 = vadd.f32 %v3803_v20, %v3733_v19  ;;  %v3805_v27 = vpop.f32.mrb[1].mxu1  ;;  %v1862_v19 = vcombine.high %v1860_v7, %v1860_v7  ;;  %v19571_v20 = vpack.c.bf16 %v908_v12, %v464_v11  ;;  %v907_v26 = vld [vmem:[%s20623_s22 + $0x11d0] sm:$0x3]  ;;  %v1904_v11 = vrot.slane %v259_v62, %v20657_v25 }
 0x126   : > { %v1870_v27 = vrot.slane %v257_v13, %v20657_v25 }
 0x128   : > { %7512 = vmatmul.mubr.f32.vlgmr.msra.gmra.mrb[54].mxu0 %v1802_v0  ;;  %v459_v0 = vld [vmem:[%s20623_s22 + $0x3d0] sm:$0xff] }
 0x129   : > { %7582 = vmatmul.mubr.f32.vlgmr.msra.gmra.mrb[54].mxu1 %v1809_v3  ;;  %19546 = vmatpush1.bf16.xpose.msra.mxu0 %v19545_v31  ;;  %v19565_v15 = vpack.c.bf16 %v903_v1, %v459_v0  ;;  %v910_v31 = vld [vmem:[%s20623_s22 + $0x11e8] sm:$0x3] }
 0x12a   : > { %19550 = vmatpush1.bf16.xpose.msra.mxu1 %v19549_v32  ;;  %7651 = vmatprep.mubr.f32.mxu0 %v1827_v33  ;;  %v1877_v32 = vrot.slane %v1863_v21, %v20657_v25  ;;  %v920_v21 = vld [vmem:[%s20623_s22 + $0x1238] sm:$0x3] }
 0x12b   : > { %19552 = vmatprep.subr.bf16.mxu0 %v19551_v34  ;;  %v3873_v43 = vpop.f32.mrb[2].mxu0  ;;  %7721 = vmatprep.mubr.f32.mxu1 %v1828_v35 }
 0x12c   : > { %v3943_v44 = vpop.f32.mrb[2].mxu1  ;;  %19556 = vmatprep.subr.bf16.mxu1 %v19555_v36  ;;  %v3874_v48 = vadd.f32 %v3873_v43, %v3804_v24  ;;  %v3875_v49 = vpop.f32.mrb[3].mxu0  ;;  %v463_v24 = vld [vmem:[%s20623_s22 + $0x3f0] sm:$0xff]  ;;  %v468_v36 = vld [vmem:[%s20623_s22 + $0x418] sm:$0xff]  ;;  %v19575_v43 = vpack.c.bf16 %v910_v31, %v466_v30 }
 0x12d   : > { %v3945_v50 = vpop.f32.mrb[3].mxu1  ;;  %v19573_v40 = vpack.c.bf16 %v907_v26, %v463_v24  ;;  %v19579_v45 = vpack.c.bf16 %v912_v37, %v468_v36  ;;  %v467_v49 = vld [vmem:[%s20623_s22 + $0x410] sm:$0xff] }
 0x12e   : > { %v3944_v56 = vadd.f32 %v3943_v44, %v3874_v48  ;;  %v1879_v44 = vcombine.high %v1877_v32, %v1877_v32  ;;  %v909_v48 = vld [vmem:[%s20623_s22 + $0x11e0] sm:$0x3]  ;;  %v911_v50 = vld [vmem:[%s20623_s22 + $0x11f0] sm:$0x3] }
 0x12f   : > { %v19581_v0 = vpack.c.bf16 %v911_v50, %v467_v49 }
 0x130   : > { %7652 = vmatmul.mubr.f32.vlgmr.msra.gmra.mrb[56].mxu0 %v1819_v18  ;;  %v19567_v18 = vpack.c.bf16 %v906_v6, %v462_v5  ;;  %v1897_v6 = vcombine.high %v259_v62, %v259_v62 }
 0x131   : > { %7722 = vmatmul.mubr.f32.vlgmr.msra.gmra.mrb[56].mxu1 %v1826_v23  ;;  %19554 = vmatpush1.bf16.xpose.msra.mxu0 %v19553_v54  ;;  %v905_v23 = vld [vmem:[%s20623_s22 + $0x11c0] sm:$0x3]  ;;  %v470_v54 = vld [vmem:[%s20623_s22 + $0x428] sm:$0xff] }
 0x132   : > { %19558 = vmatpush1.bf16.xpose.msra.mxu1 %v19557_v55  ;;  %7791 = vmatprep.mubr.f32.mxu0 %v1844_v57  ;;  %v19569_v39 = vpack.c.bf16 %v905_v23, %v461_v22  ;;  %v914_v55 = vld [vmem:[%s20623_s22 + $0x1208] sm:$0x3]  ;;  %v260_v22 = vld [vmem:[%s20641_s29 + $0x110] sm:$0xff] }
 0x133   : > { %19560 = vmatprep.subr.bf16.mxu0 %v19559_v58  ;;  %v4013_v3 = vpop.f32.mrb[4].mxu0  ;;  %7861 = vmatprep.mubr.f32.mxu1 %v1845_v59  ;;  %v1914_v31 = vcombine.high %v260_v22, %v260_v22  ;;  %v1921_v36 = vrot.slane %v260_v22, %v20657_v25 }
 0x134   : > { %v4083_v4 = vpop.f32.mrb[4].mxu1  ;;  %19564 = vmatprep.subr.bf16.mxu1 %v19563_v60  ;;  %v4014_v8 = vadd.f32 %v4013_v3, %v3944_v56  ;;  %v4015_v9 = vpop.f32.mrb[5].mxu0  ;;  %v1894_v56 = vrot.slane %v1880_v46, %v20657_v25  ;;  %v472_v60 = vld [vmem:[%s20623_s22 + $0x438] sm:$0xff]  ;;  %v19583_v3 = vpack.c.bf16 %v914_v55, %v470_v54 }
 0x135   : > { %v4085_v10 = vpop.f32.mrb[5].mxu1  ;;  %v19587_v5 = vpack.c.bf16 %v916_v61, %v472_v60  ;;  %v471_v9 = vld [vmem:[%s20623_s22 + $0x430] sm:$0xff]  ;;  %v924_v46 = vld [vmem:[%s20623_s22 + $0x1258] sm:$0x3] }
 0x136   : > { %v4084_v16 = vadd.f32 %v4083_v4, %v4014_v8  ;;  %v1896_v4 = vcombine.high %v1894_v56, %v1894_v56  ;;  %v913_v8 = vld [vmem:[%s20623_s22 + $0x1200] sm:$0x3]  ;;  %v915_v10 = vld [vmem:[%s20623_s22 + $0x1210] sm:$0x3] }
 0x137   : > { %v19589_v24 = vpack.c.bf16 %v915_v10, %v471_v9 }
 0x138   : > { %7792 = vmatmul.mubr.f32.vlgmr.msra.gmra.mrb[58].mxu0 %v1836_v42  ;;  %v1878_v42 = vcombine.high %v1870_v27, %v1870_v27 }
 0x139   : > { %7862 = vmatmul.mubr.f32.vlgmr.msra.gmra.mrb[58].mxu1 %v1843_v47  ;;  %19562 = vmatpush1.bf16.xpose.msra.mxu0 %v19561_v14  ;;  %v465_v47 = vld [vmem:[%s20623_s22 + $0x400] sm:$0xff]  ;;  %v474_v14 = vld [vmem:[%s20623_s22 + $0x448] sm:$0xff] }
 0x13a   : > { %19566 = vmatpush1.bf16.xpose.msra.mxu1 %v19565_v15  ;;  %7931 = vmatprep.mubr.f32.mxu0 %v1861_v17  ;;  %v19577_v63 = vpack.c.bf16 %v909_v48, %v465_v47  ;;  %v918_v15 = vld [vmem:[%s20623_s22 + $0x1228] sm:$0x3]  ;;  %v261_v47 = vld [vmem:[%s20641_s29 + $0x118] sm:$0xff] }
 0x13b   : > { %19568 = vmatprep.subr.bf16.mxu0 %v19567_v18  ;;  %v4153_v28 = vpop.f32.mrb[6].mxu0  ;;  %8001 = vmatprep.mubr.f32.mxu1 %v1862_v19  ;;  %v1931_v55 = vcombine.high %v261_v47, %v261_v47  ;;  %v1938_v60 = vrot.slane %v261_v47, %v20657_v25 }
 0x13c   : > { %v4223_v29 = vpop.f32.mrb[6].mxu1  ;;  %19572 = vmatprep.subr.bf16.mxu1 %v19571_v20  ;;  %v4154_v33 = vadd.f32 %v4153_v28, %v4084_v16  ;;  %v4155_v34 = vpop.f32.mrb[7].mxu0  ;;  %v1911_v16 = vrot.slane %v1897_v6, %v20657_v25  ;;  %v476_v20 = vld [vmem:[%s20623_s22 + $0x458] sm:$0xff]  ;;  %v19591_v28 = vpack.c.bf16 %v918_v15, %v474_v14 }
 0x13d   : > { %v4225_v35 = vpop.f32.mrb[7].mxu1  ;;  %v19595_v30 = vpack.c.bf16 %v920_v21, %v476_v20  ;;  %v475_v34 = vld [vmem:[%s20623_s22 + $0x450] sm:$0xff]  ;;  %v928_v6 = vld [vmem:[%s20623_s22 + $0x1278] sm:$0x3] }
 0x13e   : > { %v4224_v41 = vadd.f32 %v4223_v29, %v4154_v33  ;;  %v1913_v29 = vcombine.high %v1911_v16, %v1911_v16  ;;  %v917_v33 = vld [vmem:[%s20623_s22 + $0x1220] sm:$0x3]  ;;  %v919_v35 = vld [vmem:[%s20623_s22 + $0x1230] sm:$0x3] }
 0x13f   : > { %v19597_v49 = vpack.c.bf16 %v919_v35, %v475_v34 }
 0x140   : > { %7932 = vmatmul.mubr.f32.vlgmr.msra.gmra.mrb[60].mxu0 %v1853_v2  ;;  %v1895_v2 = vcombine.high %v1887_v51, %v1887_v51 }
 0x141   : > { %8002 = vmatmul.mubr.f32.vlgmr.msra.gmra.mrb[60].mxu1 %v1860_v7  ;;  %19570 = vmatpush1.bf16.xpose.msra.mxu0 %v19569_v39  ;;  %v469_v7 = vld [vmem:[%s20623_s22 + $0x420] sm:$0xff]  ;;  %v478_v39 = vld [vmem:[%s20623_s22 + $0x468] sm:$0xff] }
 0x142   : > { %19574 = vmatpush1.bf16.xpose.msra.mxu1 %v19573_v40  ;;  %8071 = vmatprep.mubr.f32.mxu0 %v1878_v42  ;;  %v19585_v23 = vpack.c.bf16 %v913_v8, %v469_v7  ;;  %v922_v40 = vld [vmem:[%s20623_s22 + $0x1248] sm:$0x3]  ;;  %v262_v7 = vld [vmem:[%s20641_s29 + $0x120] sm:$0xff] }
 0x143   : > { %19576 = vmatprep.subr.bf16.mxu0 %v19575_v43  ;;  %v4293_v52 = vpop.f32.mrb[8].mxu0  ;;  %8141 = vmatprep.mubr.f32.mxu1 %v1879_v44  ;;  %v1948_v15 = vcombine.high %v262_v7, %v262_v7  ;;  %v1955_v20 = vrot.slane %v262_v7, %v20657_v25 }
 0x144   : > { %v4363_v53 = vpop.f32.mrb[8].mxu1  ;;  %19580 = vmatprep.subr.bf16.mxu1 %v19579_v45  ;;  %v4294_v57 = vadd.f32 %v4293_v52, %v4224_v41  ;;  %v4295_v58 = vpop.f32.mrb[9].mxu0  ;;  %v1928_v41 = vrot.slane %v1914_v31, %v20657_v25  ;;  %v480_v45 = vld [vmem:[%s20623_s22 + $0x478] sm:$0xff]  ;;  %v19599_v52 = vpack.c.bf16 %v922_v40, %v478_v39 }
 0x145   : > { %v4365_v59 = vpop.f32.mrb[9].mxu1  ;;  %v19603_v54 = vpack.c.bf16 %v924_v46, %v480_v45  ;;  %v479_v58 = vld [vmem:[%s20623_s22 + $0x470] sm:$0xff]  ;;  %v932_v31 = vld [vmem:[%s20623_s22 + $0x1298] sm:$0x3] }
 0x146   : > { %v4364_v1 = vadd.f32 %v4363_v53, %v4294_v57  ;;  %v1930_v53 = vcombine.high %v1928_v41, %v1928_v41  ;;  %v921_v57 = vld [vmem:[%s20623_s22 + $0x1240] sm:$0x3]  ;;  %v923_v59 = vld [vmem:[%s20623_s22 + $0x1250] sm:$0x3] }
 0x147   : > { %v19605_v9 = vpack.c.bf16 %v923_v59, %v479_v58 }
 0x148   : > { %8072 = vmatmul.mubr.f32.vlgmr.msra.gmra.mrb[62].mxu0 %v1870_v27  ;;  %v1912_v27 = vcombine.high %v1904_v11, %v1904_v11 }
 0x149   : > { %8142 = vmatmul.mubr.f32.vlgmr.msra.gmra.mrb[62].mxu1 %v1877_v32  ;;  %19578 = vmatpush1.bf16.xpose.msra.mxu0 %v19577_v63  ;;  %v473_v32 = vld [vmem:[%s20623_s22 + $0x440] sm:$0xff]  ;;  %v482_v63 = vld [vmem:[%s20623_s22 + $0x488] sm:$0xff] }
 0x14a   : > { %19582 = vmatpush1.bf16.xpose.msra.mxu1 %v19581_v0  ;;  %8211 = vmatprep.mubr.f32.mxu0 %v1895_v2  ;;  %v19593_v48 = vpack.c.bf16 %v917_v33, %v473_v32  ;;  %v926_v0 = vld [vmem:[%s20623_s22 + $0x1268] sm:$0x3] }
 0x14b   : > { %19584 = vmatprep.subr.bf16.mxu0 %v19583_v3  ;;  %v4433_v12 = vpop.f32.mrb[10].mxu0  ;;  %8281 = vmatprep.mubr.f32.mxu1 %v1896_v4  ;;  %v263_v32 = vld [vmem:[%s20641_s29 + $0x128] sm:$0xff] }
 0x14c   : > { %v4503_v13 = vpop.f32.mrb[10].mxu1  ;;  %19588 = vmatprep.subr.bf16.mxu1 %v19587_v5  ;;  %v4434_v17 = vadd.f32 %v4433_v12, %v4364_v1  ;;  %v4435_v18 = vpop.f32.mrb[11].mxu0  ;;  %v1945_v1 = vrot.slane %v1931_v55, %v20657_v25  ;;  %v484_v5 = vld [vmem:[%s20623_s22 + $0x498] sm:$0xff]  ;;  %v19607_v12 = vpack.c.bf16 %v926_v0, %v482_v63  ;;  %v1965_v40 = vcombine.high %v263_v32, %v263_v32 }
 0x14d   : > { %v4505_v19 = vpop.f32.mrb[11].mxu1  ;;  %v19611_v14 = vpack.c.bf16 %v928_v6, %v484_v5  ;;  %v483_v18 = vld [vmem:[%s20623_s22 + $0x490] sm:$0xff]  ;;  %v1972_v45 = vrot.slane %v263_v32, %v20657_v25  ;;  %v936_v55 = vld [vmem:[%s20623_s22 + $0x12b8] sm:$0x3] }
 0x14e   : > { %v4504_v26 = vadd.f32 %v4503_v13, %v4434_v17  ;;  %v1947_v13 = vcombine.high %v1945_v1, %v1945_v1  ;;  %v925_v17 = vld [vmem:[%s20623_s22 + $0x1260] sm:$0x3]  ;;  %v927_v19 = vld [vmem:[%s20623_s22 + $0x1270] sm:$0x3] }
 0x14f   : > { %v19613_v34 = vpack.c.bf16 %v927_v19, %v483_v18 }
 0x150   : > { %8212 = vmatmul.mubr.f32.vlgmr.msra.gmra.mrb[64].mxu0 %v1887_v51  ;;  %v1929_v51 = vcombine.high %v1921_v36, %v1921_v36 }
 0x151   : > { %8282 = vmatmul.mubr.f32.vlgmr.msra.gmra.mrb[64].mxu1 %v1894_v56  ;;  %19586 = vmatpush1.bf16.xpose.msra.mxu0 %v19585_v23  ;;  %v477_v56 = vld [vmem:[%s20623_s22 + $0x460] sm:$0xff]  ;;  %v486_v23 = vld [vmem:[%s20623_s22 + $0x4a8] sm:$0xff] }
 0x152   : > { %19590 = vmatpush1.bf16.xpose.msra.mxu1 %v19589_v24  ;;  %8351 = vmatprep.mubr.f32.mxu0 %v1912_v27  ;;  %v19601_v8 = vpack.c.bf16 %v921_v57, %v477_v56  ;;  %v930_v24 = vld [vmem:[%s20623_s22 + $0x1288] sm:$0x3]  ;;  %v264_v56 = vld [vmem:[%s20641_s29 + $0x130] sm:$0xff] }
 0x153   : > { %19592 = vmatprep.subr.bf16.mxu0 %v19591_v28  ;;  %v4573_v37 = vpop.f32.mrb[12].mxu0  ;;  %8421 = vmatprep.mubr.f32.mxu1 %v1913_v29  ;;  %v1982_v0 = vcombine.high %v264_v56, %v264_v56  ;;  %v1989_v5 = vrot.slane %v264_v56, %v20657_v25 }
 0x154   : > { %v4643_v38 = vpop.f32.mrb[12].mxu1  ;;  %19596 = vmatprep.subr.bf16.mxu1 %v19595_v30  ;;  %v4574_v42 = vadd.f32 %v4573_v37, %v4504_v26  ;;  %v4575_v43 = vpop.f32.mrb[13].mxu0  ;;  %v1962_v26 = vrot.slane %v1948_v15, %v20657_v25  ;;  %v488_v30 = vld [vmem:[%s20623_s22 + $0x4b8] sm:$0xff]  ;;  %v19615_v37 = vpack.c.bf16 %v930_v24, %v486_v23 }
 0x155   : > { %v4645_v44 = vpop.f32.mrb[13].mxu1  ;;  %v19619_v39 = vpack.c.bf16 %v932_v31, %v488_v30  ;;  %v487_v43 = vld [vmem:[%s20623_s22 + $0x4b0] sm:$0xff]  ;;  %v940_v15 = vld [vmem:[%s20623_s22 + $0x12d8] sm:$0x3] }
 0x156   : > { %v4644_v50 = vadd.f32 %v4643_v38, %v4574_v42  ;;  %v1964_v38 = vcombine.high %v1962_v26, %v1962_v26  ;;  %v929_v42 = vld [vmem:[%s20623_s22 + $0x1280] sm:$0x3]  ;;  %v931_v44 = vld [vmem:[%s20623_s22 + $0x1290] sm:$0x3] }
 0x157   : > { %v19621_v58 = vpack.c.bf16 %v931_v44, %v487_v43 }
 0x158   : > { %8352 = vmatmul.mubr.f32.vlgmr.msra.gmra.mrb[66].mxu0 %v1904_v11  ;;  %v1946_v11 = vcombine.high %v1938_v60, %v1938_v60 }
 0x159   : > { %8422 = vmatmul.mubr.f32.vlgmr.msra.gmra.mrb[66].mxu1 %v1911_v16  ;;  %19594 = vmatpush1.bf16.xpose.msra.mxu0 %v19593_v48  ;;  %v481_v16 = vld [vmem:[%s20623_s22 + $0x480] sm:$0xff]  ;;  %v490_v48 = vld [vmem:[%s20623_s22 + $0x4c8] sm:$0xff] }
 0x15a   : > { %19598 = vmatpush1.bf16.xpose.msra.mxu1 %v19597_v49  ;;  %8491 = vmatprep.mubr.f32.mxu0 %v1929_v51  ;;  %v19609_v33 = vpack.c.bf16 %v925_v17, %v481_v16  ;;  %v934_v49 = vld [vmem:[%s20623_s22 + $0x12a8] sm:$0x3]  ;;  %v265_v16 = vld [vmem:[%s20641_s29 + $0x138] sm:$0xff] }
 0x15b   : > { %19600 = vmatprep.subr.bf16.mxu0 %v19599_v52  ;;  %v4713_v61 = vpop.f32.mrb[14].mxu0  ;;  %8561 = vmatprep.mubr.f32.mxu1 %v1930_v53  ;;  %v1999_v24 = vcombine.high %v265_v16, %v265_v16  ;;  %v2006_v30 = vrot.slane %v265_v16, %v20657_v25 }
 0x15c   : > { %v4783_v62 = vpop.f32.mrb[14].mxu1  ;;  %19604 = vmatprep.subr.bf16.mxu1 %v19603_v54  ;;  %v4714_v2 = vadd.f32 %v4713_v61, %v4644_v50  ;;  %v4715_v3 = vpop.f32.mrb[15].mxu0  ;;  %v1979_v50 = vrot.slane %v1965_v40, %v20657_v25  ;;  %v492_v54 = vld [vmem:[%s20623_s22 + $0x4d8] sm:$0xff]  ;;  %v19623_v61 = vpack.c.bf16 %v934_v49, %v490_v48 }
 0x15d   : > { %v4785_v4 = vpop.f32.mrb[15].mxu1  ;;  %v19627_v63 = vpack.c.bf16 %v936_v55, %v492_v54  ;;  %v491_v3 = vld [vmem:[%s20623_s22 + $0x4d0] sm:$0xff]  ;;  %v944_v40 = vld [vmem:[%s20623_s22 + $0x12f8] sm:$0x3] }
 0x15e   : > { %v4784_v10 = vadd.f32 %v4783_v62, %v4714_v2  ;;  %v1981_v62 = vcombine.high %v1979_v50, %v1979_v50  ;;  %v933_v2 = vld [vmem:[%s20623_s22 + $0x12a0] sm:$0x3]  ;;  %v935_v4 = vld [vmem:[%s20623_s22 + $0x12b0] sm:$0x3] }
 0x15f   : > { %v19629_v18 = vpack.c.bf16 %v935_v4, %v491_v3 }
 0x160   : > { %8492 = vmatmul.mubr.f32.vlgmr.msra.gmra.mrb[68].mxu0 %v1921_v36  ;;  %v1963_v36 = vcombine.high %v1955_v20, %v1955_v20 }
 0x161   : > { %8562 = vmatmul.mubr.f32.vlgmr.msra.gmra.mrb[68].mxu1 %v1928_v41  ;;  %19602 = vmatpush1.bf16.xpose.msra.mxu0 %v19601_v8  ;;  %v485_v41 = vld [vmem:[%s20623_s22 + $0x4a0] sm:$0xff]  ;;  %v494_v8 = vld [vmem:[%s20623_s22 + $0x4e8] sm:$0xff] }
 0x162   : > { %19606 = vmatpush1.bf16.xpose.msra.mxu1 %v19605_v9  ;;  %8631 = vmatprep.mubr.f32.mxu0 %v1946_v11  ;;  %v19617_v57 = vpack.c.bf16 %v929_v42, %v485_v41  ;;  %v938_v9 = vld [vmem:[%s20623_s22 + $0x12c8] sm:$0x3]  ;;  %v266_v41 = vld [vmem:[%s20641_s29 + $0x140] sm:$0xff] }
 0x163   : > { %19608 = vmatprep.subr.bf16.mxu0 %v19607_v12  ;;  %v4853_v21 = vpop.f32.mrb[16].mxu0  ;;  %8701 = vmatprep.mubr.f32.mxu1 %v1947_v13  ;;  %v2016_v49 = vcombine.high %v266_v41, %v266_v41  ;;  %v2023_v54 = vrot.slane %v266_v41, %v20657_v25 }
 0x164   : > { %v4923_v22 = vpop.f32.mrb[16].mxu1  ;;  %19612 = vmatprep.subr.bf16.mxu1 %v19611_v14  ;;  %v4854_v27 = vadd.f32 %v4853_v21, %v4784_v10  ;;  %v4855_v28 = vpop.f32.mrb[17].mxu0  ;;  %v1996_v10 = vrot.slane %v1982_v0, %v20657_v25  ;;  %v496_v14 = vld [vmem:[%s20623_s22 + $0x4f8] sm:$0xff]  ;;  %v19631_v21 = vpack.c.bf16 %v938_v9, %v494_v8 }
 0x165   : > { %v4925_v29 = vpop.f32.mrb[17].mxu1  ;;  %v19635_v23 = vpack.c.bf16 %v940_v15, %v496_v14  ;;  %v495_v28 = vld [vmem:[%s20623_s22 + $0x4f0] sm:$0xff]  ;;  %v948_v0 = vld [vmem:[%s20623_s22 + $0x1318] sm:$0x3] }
 0x166   : > { %v4924_v35 = vadd.f32 %v4923_v22, %v4854_v27  ;;  %v1998_v22 = vcombine.high %v1996_v10, %v1996_v10  ;;  %v937_v27 = vld [vmem:[%s20623_s22 + $0x12c0] sm:$0x3]  ;;  %v939_v29 = vld [vmem:[%s20623_s22 + $0x12d0] sm:$0x3] }
 0x167   : > { %v19637_v43 = vpack.c.bf16 %v939_v29, %v495_v28 }
 0x168   : > { %8632 = vmatmul.mubr.f32.vlgmr.msra.gmra.mrb[70].mxu0 %v1938_v60  ;;  %v1980_v60 = vcombine.high %v1972_v45, %v1972_v45 }
 0x169   : > { %8702 = vmatmul.mubr.f32.vlgmr.msra.gmra.mrb[70].mxu1 %v1945_v1  ;;  %19610 = vmatpush1.bf16.xpose.msra.mxu0 %v19609_v33  ;;  %v489_v1 = vld [vmem:[%s20623_s22 + $0x4c0] sm:$0xff]  ;;  %v498_v33 = vld [vmem:[%s20623_s22 + $0x508] sm:$0xff] }
 0x16a   : > { %19614 = vmatpush1.bf16.xpose.msra.mxu1 %v19613_v34  ;;  %8771 = vmatprep.mubr.f32.mxu0 %v1963_v36  ;;  %v19625_v17 = vpack.c.bf16 %v933_v2, %v489_v1  ;;  %v942_v34 = vld [vmem:[%s20623_s22 + $0x12e8] sm:$0x3] }
 0x16b   : > { %19616 = vmatprep.subr.bf16.mxu0 %v19615_v37  ;;  %v4993_v46 = vpop.f32.mrb[18].mxu0  ;;  %8841 = vmatprep.mubr.f32.mxu1 %v1964_v38  ;;  %v267_v1 = vld [vmem:[%s20641_s29 + $0x148] sm:$0xff] }
 0x16c   : > { %v5063_v47 = vpop.f32.mrb[18].mxu1  ;;  %19620 = vmatprep.subr.bf16.mxu1 %v19619_v39  ;;  %v4994_v51 = vadd.f32 %v4993_v46, %v4924_v35  ;;  %v4995_v52 = vpop.f32.mrb[19].mxu0  ;;  %v2013_v35 = vrot.slane %v1999_v24, %v20657_v25  ;;  %v500_v39 = vld [vmem:[%s20623_s22 + $0x518] sm:$0xff]  ;;  %v19639_v46 = vpack.c.bf16 %v942_v34, %v498_v33  ;;  %v2033_v9 = vcombine.high %v267_v1, %v267_v1 }
 0x16d   : > { %v5065_v53 = vpop.f32.mrb[19].mxu1  ;;  %v19643_v48 = vpack.c.bf16 %v944_v40, %v500_v39  ;;  %v499_v52 = vld [vmem:[%s20623_s22 + $0x510] sm:$0xff]  ;;  %v2040_v14 = vrot.slane %v267_v1, %v20657_v25  ;;  %v952_v24 = vld [vmem:[%s20623_s22 + $0x1338] sm:$0x3] }
 0x16e   : > { %v5064_v59 = vadd.f32 %v5063_v47, %v4994_v51  ;;  %v2015_v47 = vcombine.high %v2013_v35, %v2013_v35  ;;  %v941_v51 = vld [vmem:[%s20623_s22 + $0x12e0] sm:$0x3]  ;;  %v943_v53 = vld [vmem:[%s20623_s22 + $0x12f0] sm:$0x3] }
 0x16f   : > { %v19645_v3 = vpack.c.bf16 %v943_v53, %v499_v52 }
 0x170   : > { %8772 = vmatmul.mubr.f32.vlgmr.msra.gmra.mrb[72].mxu0 %v1955_v20  ;;  %v1997_v20 = vcombine.high %v1989_v5, %v1989_v5 }
 0x171   : > { %8842 = vmatmul.mubr.f32.vlgmr.msra.gmra.mrb[72].mxu1 %v1962_v26  ;;  %19618 = vmatpush1.bf16.xpose.msra.mxu0 %v19617_v57  ;;  %v493_v26 = vld [vmem:[%s20623_s22 + $0x4e0] sm:$0xff]  ;;  %v502_v57 = vld [vmem:[%s20623_s22 + $0x528] sm:$0xff] }
 0x172   : > { %19622 = vmatpush1.bf16.xpose.msra.mxu1 %v19621_v58  ;;  %8911 = vmatprep.mubr.f32.mxu0 %v1980_v60  ;;  %v19633_v42 = vpack.c.bf16 %v937_v27, %v493_v26  ;;  %v946_v58 = vld [vmem:[%s20623_s22 + $0x1308] sm:$0x3]  ;;  %v268_v26 = vld [vmem:[%s20641_s29 + $0x150] sm:$0xff] }
 0x173   : > { %19624 = vmatprep.subr.bf16.mxu0 %v19623_v61  ;;  %v5133_v6 = vpop.f32.mrb[20].mxu0  ;;  %8981 = vmatprep.mubr.f32.mxu1 %v1981_v62  ;;  %v2050_v34 = vcombine.high %v268_v26, %v268_v26  ;;  %v2057_v39 = vrot.slane %v268_v26, %v20657_v25 }
 0x174   : > { %v5203_v7 = vpop.f32.mrb[20].mxu1  ;;  %19628 = vmatprep.subr.bf16.mxu1 %v19627_v63  ;;  %v5134_v11 = vadd.f32 %v5133_v6, %v5064_v59  ;;  %v5135_v12 = vpop.f32.mrb[21].mxu0  ;;  %v2030_v59 = vrot.slane %v2016_v49, %v20657_v25  ;;  %v504_v63 = vld [vmem:[%s20623_s22 + $0x538] sm:$0xff]  ;;  %v19647_v6 = vpack.c.bf16 %v946_v58, %v502_v57 }
 0x175   : > { %v5205_v13 = vpop.f32.mrb[21].mxu1  ;;  %v19651_v8 = vpack.c.bf16 %v948_v0, %v504_v63  ;;  %v503_v12 = vld [vmem:[%s20623_s22 + $0x530] sm:$0xff]  ;;  %v956_v49 = vld [vmem:[%s20623_s22 + $0x1358] sm:$0x3] }
 0x176   : > { %v5204_v19 = vadd.f32 %v5203_v7, %v5134_v11  ;;  %v2032_v7 = vcombine.high %v2030_v59, %v2030_v59  ;;  %v945_v11 = vld [vmem:[%s20623_s22 + $0x1300] sm:$0x3]  ;;  %v947_v13 = vld [vmem:[%s20623_s22 + $0x1310] sm:$0x3] }
 0x177   : > { %v19653_v28 = vpack.c.bf16 %v947_v13, %v503_v12 }
 0x178   : > { %8912 = vmatmul.mubr.f32.vlgmr.msra.gmra.mrb[74].mxu0 %v1972_v45  ;;  %v2014_v45 = vcombine.high %v2006_v30, %v2006_v30 }
 0x179   : > { %8982 = vmatmul.mubr.f32.vlgmr.msra.gmra.mrb[74].mxu1 %v1979_v50  ;;  %19626 = vmatpush1.bf16.xpose.msra.mxu0 %v19625_v17  ;;  %v497_v50 = vld [vmem:[%s20623_s22 + $0x500] sm:$0xff]  ;;  %v506_v17 = vld [vmem:[%s20623_s22 + $0x548] sm:$0xff] }
 0x17a   : > { %19630 = vmatpush1.bf16.xpose.msra.mxu1 %v19629_v18  ;;  %9051 = vmatprep.mubr.f32.mxu0 %v1997_v20  ;;  %v19641_v2 = vpack.c.bf16 %v941_v51, %v497_v50  ;;  %v950_v18 = vld [vmem:[%s20623_s22 + $0x1328] sm:$0x3]  ;;  %v269_v50 = vld [vmem:[%s20641_s29 + $0x158] sm:$0xff] }
 0x17b   : > { %19632 = vmatprep.subr.bf16.mxu0 %v19631_v21  ;;  %v5273_v31 = vpop.f32.mrb[22].mxu0  ;;  %9121 = vmatprep.mubr.f32.mxu1 %v1998_v22  ;;  %v2067_v58 = vcombine.high %v269_v50, %v269_v50  ;;  %v2074_v63 = vrot.slane %v269_v50, %v20657_v25 }
 0x17c   : > { %v5343_v32 = vpop.f32.mrb[22].mxu1  ;;  %19636 = vmatprep.subr.bf16.mxu1 %v19635_v23  ;;  %v5274_v36 = vadd.f32 %v5273_v31, %v5204_v19  ;;  %v5275_v37 = vpop.f32.mrb[23].mxu0  ;;  %v2047_v19 = vrot.slane %v2033_v9, %v20657_v25  ;;  %v508_v23 = vld [vmem:[%s20623_s22 + $0x558] sm:$0xff]  ;;  %v19655_v31 = vpack.c.bf16 %v950_v18, %v506_v17 }
 0x17d   : > { %v5345_v38 = vpop.f32.mrb[23].mxu1  ;;  %v19659_v33 = vpack.c.bf16 %v952_v24, %v508_v23  ;;  %v507_v37 = vld [vmem:[%s20623_s22 + $0x550] sm:$0xff]  ;;  %v960_v9 = vld [vmem:[%s20623_s22 + $0x1378] sm:$0x3] }
 0x17e   : > { %v5344_v44 = vadd.f32 %v5343_v32, %v5274_v36  ;;  %v2049_v32 = vcombine.high %v2047_v19, %v2047_v19  ;;  %v949_v36 = vld [vmem:[%s20623_s22 + $0x1320] sm:$0x3]  ;;  %v951_v38 = vld [vmem:[%s20623_s22 + $0x1330] sm:$0x3] }
 0x17f   : > { %v19661_v52 = vpack.c.bf16 %v951_v38, %v507_v37 }
 0x180   : > { %9052 = vmatmul.mubr.f32.vlgmr.msra.gmra.mrb[76].mxu0 %v1989_v5  ;;  %v2031_v5 = vcombine.high %v2023_v54, %v2023_v54 }
 0x181   : > { %9122 = vmatmul.mubr.f32.vlgmr.msra.gmra.mrb[76].mxu1 %v1996_v10  ;;  %19634 = vmatpush1.bf16.xpose.msra.mxu0 %v19633_v42  ;;  %v501_v10 = vld [vmem:[%s20623_s22 + $0x520] sm:$0xff]  ;;  %v510_v42 = vld [vmem:[%s20623_s22 + $0x568] sm:$0xff] }
 0x182   : > { %19638 = vmatpush1.bf16.xpose.msra.mxu1 %v19637_v43  ;;  %9191 = vmatprep.mubr.f32.mxu0 %v2014_v45  ;;  %v19649_v27 = vpack.c.bf16 %v945_v11, %v501_v10  ;;  %v954_v43 = vld [vmem:[%s20623_s22 + $0x1348] sm:$0x3]  ;;  %v270_v10 = vld [vmem:[%s20641_s29 + $0x160] sm:$0xff] }
 0x183   : > { %19640 = vmatprep.subr.bf16.mxu0 %v19639_v46  ;;  %v5413_v55 = vpop.f32.mrb[24].mxu0  ;;  %9261 = vmatprep.mubr.f32.mxu1 %v2015_v47  ;;  %v2084_v18 = vcombine.high %v270_v10, %v270_v10  ;;  %v2091_v23 = vrot.slane %v270_v10, %v20657_v25 }
 0x184   : > { %v5483_v56 = vpop.f32.mrb[24].mxu1  ;;  %19644 = vmatprep.subr.bf16.mxu1 %v19643_v48  ;;  %v5414_v60 = vadd.f32 %v5413_v55, %v5344_v44  ;;  %v5415_v61 = vpop.f32.mrb[25].mxu0  ;;  %v2064_v44 = vrot.slane %v2050_v34, %v20657_v25  ;;  %v512_v48 = vld [vmem:[%s20623_s22 + $0x578] sm:$0xff]  ;;  %v19663_v55 = vpack.c.bf16 %v954_v43, %v510_v42 }
 0x185   : > { %v5485_v62 = vpop.f32.mrb[25].mxu1  ;;  %v19667_v57 = vpack.c.bf16 %v956_v49, %v512_v48  ;;  %v511_v61 = vld [vmem:[%s20623_s22 + $0x570] sm:$0xff]  ;;  %v964_v34 = vld [vmem:[%s20623_s22 + $0x1398] sm:$0x3] }
 0x186   : > { %v5484_v4 = vadd.f32 %v5483_v56, %v5414_v60  ;;  %v2066_v56 = vcombine.high %v2064_v44, %v2064_v44  ;;  %v953_v60 = vld [vmem:[%s20623_s22 + $0x1340] sm:$0x3]  ;;  %v955_v62 = vld [vmem:[%s20623_s22 + $0x1350] sm:$0x3] }
 0x187   : > { %v19669_v12 = vpack.c.bf16 %v955_v62, %v511_v61 }
 0x188   : > { %9192 = vmatmul.mubr.f32.vlgmr.msra.gmra.mrb[78].mxu0 %v2006_v30  ;;  %v2048_v30 = vcombine.high %v2040_v14, %v2040_v14 }
 0x189   : > { %9262 = vmatmul.mubr.f32.vlgmr.msra.gmra.mrb[78].mxu1 %v2013_v35  ;;  %19642 = vmatpush1.bf16.xpose.msra.mxu0 %v19641_v2  ;;  %v505_v35 = vld [vmem:[%s20623_s22 + $0x540] sm:$0xff]  ;;  %v514_v2 = vld [vmem:[%s20623_s22 + $0x588] sm:$0xff] }
 0x18a   : > { %19646 = vmatpush1.bf16.xpose.msra.mxu1 %v19645_v3  ;;  %9331 = vmatprep.mubr.f32.mxu0 %v2031_v5  ;;  %v19657_v51 = vpack.c.bf16 %v949_v36, %v505_v35  ;;  %v958_v3 = vld [vmem:[%s20623_s22 + $0x1368] sm:$0x3] }
 0x18b   : > { %19648 = vmatprep.subr.bf16.mxu0 %v19647_v6  ;;  %v5553_v15 = vpop.f32.mrb[26].mxu0  ;;  %9401 = vmatprep.mubr.f32.mxu1 %v2032_v7  ;;  %v271_v35 = vld [vmem:[%s20641_s29 + $0x168] sm:$0xff] }
 0x18c   : > { %v5623_v16 = vpop.f32.mrb[26].mxu1  ;;  %19652 = vmatprep.subr.bf16.mxu1 %v19651_v8  ;;  %v5554_v20 = vadd.f32 %v5553_v15, %v5484_v4  ;;  %v5555_v21 = vpop.f32.mrb[27].mxu0  ;;  %v2081_v4 = vrot.slane %v2067_v58, %v20657_v25  ;;  %v516_v8 = vld [vmem:[%s20623_s22 + $0x598] sm:$0xff]  ;;  %v19671_v15 = vpack.c.bf16 %v958_v3, %v514_v2  ;;  %v2101_v43 = vcombine.high %v271_v35, %v271_v35 }
 0x18d   : > { %v5625_v22 = vpop.f32.mrb[27].mxu1  ;;  %v19675_v17 = vpack.c.bf16 %v960_v9, %v516_v8  ;;  %v515_v21 = vld [vmem:[%s20623_s22 + $0x590] sm:$0xff]  ;;  %v2108_v48 = vrot.slane %v271_v35, %v20657_v25  ;;  %v968_v58 = vld [vmem:[%s20623_s22 + $0x13b8] sm:$0x3] }
 0x18e   : > { %v5624_v29 = vadd.f32 %v5623_v16, %v5554_v20  ;;  %v2083_v16 = vcombine.high %v2081_v4, %v2081_v4  ;;  %v957_v20 = vld [vmem:[%s20623_s22 + $0x1360] sm:$0x3]  ;;  %v959_v22 = vld [vmem:[%s20623_s22 + $0x1370] sm:$0x3] }
 0x18f   : > { %v19677_v37 = vpack.c.bf16 %v959_v22, %v515_v21 }
 0x190   : > { %9332 = vmatmul.mubr.f32.vlgmr.msra.gmra.mrb[80].mxu0 %v2023_v54  ;;  %v2065_v54 = vcombine.high %v2057_v39, %v2057_v39 }
 0x191   : > { %9402 = vmatmul.mubr.f32.vlgmr.msra.gmra.mrb[80].mxu1 %v2030_v59  ;;  %19650 = vmatpush1.bf16.xpose.msra.mxu0 %v19649_v27  ;;  %v509_v59 = vld [vmem:[%s20623_s22 + $0x560] sm:$0xff]  ;;  %v518_v27 = vld [vmem:[%s20623_s22 + $0x5a8] sm:$0xff] }
 0x192   : > { %19654 = vmatpush1.bf16.xpose.msra.mxu1 %v19653_v28  ;;  %9471 = vmatprep.mubr.f32.mxu0 %v2048_v30  ;;  %v19665_v11 = vpack.c.bf16 %v953_v60, %v509_v59  ;;  %v962_v28 = vld [vmem:[%s20623_s22 + $0x1388] sm:$0x3]  ;;  %v272_v59 = vld [vmem:[%s20641_s29 + $0x170] sm:$0xff] }
 0x193   : > { %19656 = vmatprep.subr.bf16.mxu0 %v19655_v31  ;;  %v5693_v40 = vpop.f32.mrb[28].mxu0  ;;  %9541 = vmatprep.mubr.f32.mxu1 %v2049_v32  ;;  %v2118_v3 = vcombine.high %v272_v59, %v272_v59  ;;  %v2125_v8 = vrot.slane %v272_v59, %v20657_v25 }
 0x194   : > { %v5763_v41 = vpop.f32.mrb[28].mxu1  ;;  %19660 = vmatprep.subr.bf16.mxu1 %v19659_v33  ;;  %v5694_v45 = vadd.f32 %v5693_v40, %v5624_v29  ;;  %v5695_v46 = vpop.f32.mrb[29].mxu0  ;;  %v2098_v29 = vrot.slane %v2084_v18, %v20657_v25  ;;  %v520_v33 = vld [vmem:[%s20623_s22 + $0x5b8] sm:$0xff]  ;;  %v19679_v40 = vpack.c.bf16 %v962_v28, %v518_v27 }
 0x195   : > { %v5765_v47 = vpop.f32.mrb[29].mxu1  ;;  %v19683_v42 = vpack.c.bf16 %v964_v34, %v520_v33  ;;  %v519_v46 = vld [vmem:[%s20623_s22 + $0x5b0] sm:$0xff]  ;;  %v972_v18 = vld [vmem:[%s20623_s22 + $0x13d8] sm:$0x3] }
 0x196   : > { %v5764_v53 = vadd.f32 %v5763_v41, %v5694_v45  ;;  %v2100_v41 = vcombine.high %v2098_v29, %v2098_v29  ;;  %v961_v45 = vld [vmem:[%s20623_s22 + $0x1380] sm:$0x3]  ;;  %v963_v47 = vld [vmem:[%s20623_s22 + $0x1390] sm:$0x3] }
 0x197   : > { %v19685_v61 = vpack.c.bf16 %v963_v47, %v519_v46 }
 0x198   : > { %9472 = vmatmul.mubr.f32.vlgmr.msra.gmra.mrb[82].mxu0 %v2040_v14  ;;  %v2082_v14 = vcombine.high %v2074_v63, %v2074_v63 }
 0x199   : > { %9542 = vmatmul.mubr.f32.vlgmr.msra.gmra.mrb[82].mxu1 %v2047_v19  ;;  %19658 = vmatpush1.bf16.xpose.msra.mxu0 %v19657_v51  ;;  %v513_v19 = vld [vmem:[%s20623_s22 + $0x580] sm:$0xff]  ;;  %v522_v51 = vld [vmem:[%s20623_s22 + $0x5c8] sm:$0xff] }
 0x19a   : > { %19662 = vmatpush1.bf16.xpose.msra.mxu1 %v19661_v52  ;;  %9611 = vmatprep.mubr.f32.mxu0 %v2065_v54  ;;  %v19673_v36 = vpack.c.bf16 %v957_v20, %v513_v19  ;;  %v966_v52 = vld [vmem:[%s20623_s22 + $0x13a8] sm:$0x3]  ;;  %v273_v19 = vld [vmem:[%s20641_s29 + $0x178] sm:$0xff] }
 0x19b   : > { %19664 = vmatprep.subr.bf16.mxu0 %v19663_v55  ;;  %v5833_v0 = vpop.f32.mrb[30].mxu0  ;;  %9681 = vmatprep.mubr.f32.mxu1 %v2066_v56  ;;  %v2135_v28 = vcombine.high %v273_v19, %v273_v19  ;;  %v2142_v33 = vrot.slane %v273_v19, %v20657_v25 }
 0x19c   : > { %v5903_v1 = vpop.f32.mrb[30].mxu1  ;;  %19668 = vmatprep.subr.bf16.mxu1 %v19667_v57  ;;  %v5834_v5 = vadd.f32 %v5833_v0, %v5764_v53  ;;  %v5835_v6 = vpop.f32.mrb[31].mxu0  ;;  %v2115_v53 = vrot.slane %v2101_v43, %v20657_v25  ;;  %v524_v57 = vld [vmem:[%s20623_s22 + $0x5d8] sm:$0xff]  ;;  %v19687_v0 = vpack.c.bf16 %v966_v52, %v522_v51 }
 0x19d   : > { %v5905_v7 = vpop.f32.mrb[31].mxu1  ;;  %v19691_v2 = vpack.c.bf16 %v968_v58, %v524_v57  ;;  %v523_v6 = vld [vmem:[%s20623_s22 + $0x5d0] sm:$0xff]  ;;  %v976_v43 = vld [vmem:[%s20623_s22 + $0x13f8] sm:$0x3] }
 0x19e   : > { %v5904_v13 = vadd.f32 %v5903_v1, %v5834_v5  ;;  %v2117_v1 = vcombine.high %v2115_v53, %v2115_v53  ;;  %v965_v5 = vld [vmem:[%s20623_s22 + $0x13a0] sm:$0x3]  ;;  %v967_v7 = vld [vmem:[%s20623_s22 + $0x13b0] sm:$0x3] }
 0x19f   : > { %v19693_v21 = vpack.c.bf16 %v967_v7, %v523_v6 }
 0x1a0   : > { %9612 = vmatmul.mubr.f32.vlgmr.msra.gmra.mrb[84].mxu0 %v2057_v39  ;;  %v2099_v39 = vcombine.high %v2091_v23, %v2091_v23 }
 0x1a1   : > { %9682 = vmatmul.mubr.f32.vlgmr.msra.gmra.mrb[84].mxu1 %v2064_v44  ;;  %19666 = vmatpush1.bf16.xpose.msra.mxu0 %v19665_v11  ;;  %v517_v44 = vld [vmem:[%s20623_s22 + $0x5a0] sm:$0xff]  ;;  %v526_v11 = vld [vmem:[%s20623_s22 + $0x5e8] sm:$0xff] }
 0x1a2   : > { %19670 = vmatpush1.bf16.xpose.msra.mxu1 %v19669_v12  ;;  %9751 = vmatprep.mubr.f32.mxu0 %v2082_v14  ;;  %v19681_v60 = vpack.c.bf16 %v961_v45, %v517_v44  ;;  %v970_v12 = vld [vmem:[%s20623_s22 + $0x13c8] sm:$0x3]  ;;  %v274_v44 = vld [vmem:[%s20641_s29 + $0x180] sm:$0xff] }
 0x1a3   : > { %19672 = vmatprep.subr.bf16.mxu0 %v19671_v15  ;;  %v5973_v24 = vpop.f32.mrb[32].mxu0  ;;  %9821 = vmatprep.mubr.f32.mxu1 %v2083_v16  ;;  %v2152_v52 = vcombine.high %v274_v44, %v274_v44  ;;  %v2159_v57 = vrot.slane %v274_v44, %v20657_v25 }
 0x1a4   : > { %v6043_v26 = vpop.f32.mrb[32].mxu1  ;;  %19676 = vmatprep.subr.bf16.mxu1 %v19675_v17  ;;  %v5974_v30 = vadd.f32 %v5973_v24, %v5904_v13  ;;  %v5975_v31 = vpop.f32.mrb[33].mxu0  ;;  %v2132_v13 = vrot.slane %v2118_v3, %v20657_v25  ;;  %v528_v17 = vld [vmem:[%s20623_s22 + $0x5f8] sm:$0xff]  ;;  %v19695_v24 = vpack.c.bf16 %v970_v12, %v526_v11 }
 0x1a5   : > { %v6045_v32 = vpop.f32.mrb[33].mxu1  ;;  %v19699_v27 = vpack.c.bf16 %v972_v18, %v528_v17  ;;  %v527_v31 = vld [vmem:[%s20623_s22 + $0x5f0] sm:$0xff]  ;;  %v980_v3 = vld [vmem:[%s20623_s22 + $0x1418] sm:$0x3] }
 0x1a6   : > { %v6044_v38 = vadd.f32 %v6043_v26, %v5974_v30  ;;  %v2134_v26 = vcombine.high %v2132_v13, %v2132_v13  ;;  %v969_v30 = vld [vmem:[%s20623_s22 + $0x13c0] sm:$0x3]  ;;  %v971_v32 = vld [vmem:[%s20623_s22 + $0x13d0] sm:$0x3] }
 0x1a7   : > { %v19701_v46 = vpack.c.bf16 %v971_v32, %v527_v31 }
 0x1a8   : > { %9752 = vmatmul.mubr.f32.vlgmr.msra.gmra.mrb[86].mxu0 %v2074_v63  ;;  %v2116_v63 = vcombine.high %v2108_v48, %v2108_v48 }
 0x1a9   : > { %9822 = vmatmul.mubr.f32.vlgmr.msra.gmra.mrb[86].mxu1 %v2081_v4  ;;  %19674 = vmatpush1.bf16.xpose.msra.mxu0 %v19673_v36  ;;  %v521_v4 = vld [vmem:[%s20623_s22 + $0x5c0] sm:$0xff]  ;;  %v530_v36 = vld [vmem:[%s20623_s22 + $0x608] sm:$0xff] }
 0x1aa   : > { %19678 = vmatpush1.bf16.xpose.msra.mxu1 %v19677_v37  ;;  %9891 = vmatprep.mubr.f32.mxu0 %v2099_v39  ;;  %v19689_v20 = vpack.c.bf16 %v965_v5, %v521_v4  ;;  %v974_v37 = vld [vmem:[%s20623_s22 + $0x13e8] sm:$0x3] }
 0x1ab   : > { %19680 = vmatprep.subr.bf16.mxu0 %v19679_v40  ;;  %v6113_v49 = vpop.f32.mrb[34].mxu0  ;;  %9961 = vmatprep.mubr.f32.mxu1 %v2100_v41  ;;  %v275_v4 = vld [vmem:[%s20641_s29 + $0x188] sm:$0xff] }
 0x1ac   : > { %v6183_v50 = vpop.f32.mrb[34].mxu1  ;;  %19684 = vmatprep.subr.bf16.mxu1 %v19683_v42  ;;  %v6114_v54 = vadd.f32 %v6113_v49, %v6044_v38  ;;  %v6115_v55 = vpop.f32.mrb[35].mxu0  ;;  %v2149_v38 = vrot.slane %v2135_v28, %v20657_v25  ;;  %v532_v42 = vld [vmem:[%s20623_s22 + $0x618] sm:$0xff]  ;;  %v19703_v49 = vpack.c.bf16 %v974_v37, %v530_v36  ;;  %v2169_v12 = vcombine.high %v275_v4, %v275_v4 }
 0x1ad   : > { %v6185_v56 = vpop.f32.mrb[35].mxu1  ;;  %v19707_v51 = vpack.c.bf16 %v976_v43, %v532_v42  ;;  %v531_v55 = vld [vmem:[%s20623_s22 + $0x610] sm:$0xff]  ;;  %v2176_v17 = vrot.slane %v275_v4, %v20657_v25  ;;  %v984_v28 = vld [vmem:[%s20623_s22 + $0x1438] sm:$0x3] }
 0x1ae   : > { %v6184_v62 = vadd.f32 %v6183_v50, %v6114_v54  ;;  %v2151_v50 = vcombine.high %v2149_v38, %v2149_v38  ;;  %v973_v54 = vld [vmem:[%s20623_s22 + $0x13e0] sm:$0x3]  ;;  %v975_v56 = vld [vmem:[%s20623_s22 + $0x13f0] sm:$0x3] }
 0x1af   : > { %v19709_v6 = vpack.c.bf16 %v975_v56, %v531_v55 }
 0x1b0   : > { %9892 = vmatmul.mubr.f32.vlgmr.msra.gmra.mrb[88].mxu0 %v2091_v23  ;;  %v2133_v23 = vcombine.high %v2125_v8, %v2125_v8 }
 0x1b1   : > { %9962 = vmatmul.mubr.f32.vlgmr.msra.gmra.mrb[88].mxu1 %v2098_v29  ;;  %19682 = vmatpush1.bf16.xpose.msra.mxu0 %v19681_v60  ;;  %v525_v29 = vld [vmem:[%s20623_s22 + $0x5e0] sm:$0xff]  ;;  %v534_v60 = vld [vmem:[%s20623_s22 + $0x628] sm:$0xff] }
 0x1b2   : > { %19686 = vmatpush1.bf16.xpose.msra.mxu1 %v19685_v61  ;;  %10031 = vmatprep.mubr.f32.mxu0 %v2116_v63  ;;  %v19697_v45 = vpack.c.bf16 %v969_v30, %v525_v29  ;;  %v978_v61 = vld [vmem:[%s20623_s22 + $0x1408] sm:$0x3]  ;;  %v276_v29 = vld [vmem:[%s20641_s29 + $0x190] sm:$0xff] }
 0x1b3   : > { %19688 = vmatprep.subr.bf16.mxu0 %v19687_v0  ;;  %v6253_v9 = vpop.f32.mrb[36].mxu0  ;;  %10101 = vmatprep.mubr.f32.mxu1 %v2117_v1  ;;  %v2186_v37 = vcombine.high %v276_v29, %v276_v29  ;;  %v2193_v42 = vrot.slane %v276_v29, %v20657_v25 }
 0x1b4   : > { %v6323_v10 = vpop.f32.mrb[36].mxu1  ;;  %19692 = vmatprep.subr.bf16.mxu1 %v19691_v2  ;;  %v6254_v14 = vadd.f32 %v6253_v9, %v6184_v62  ;;  %v6255_v15 = vpop.f32.mrb[37].mxu0  ;;  %v2166_v62 = vrot.slane %v2152_v52, %v20657_v25  ;;  %v536_v2 = vld [vmem:[%s20623_s22 + $0x638] sm:$0xff]  ;;  %v19711_v9 = vpack.c.bf16 %v978_v61, %v534_v60 }
 0x1b5   : > { %v6325_v16 = vpop.f32.mrb[37].mxu1  ;;  %v19715_v11 = vpack.c.bf16 %v980_v3, %v536_v2  ;;  %v535_v15 = vld [vmem:[%s20623_s22 + $0x630] sm:$0xff]  ;;  %v988_v52 = vld [vmem:[%s20623_s22 + $0x1458] sm:$0x3] }
 0x1b6   : > { %v6324_v22 = vadd.f32 %v6323_v10, %v6254_v14  ;;  %v2168_v10 = vcombine.high %v2166_v62, %v2166_v62  ;;  %v977_v14 = vld [vmem:[%s20623_s22 + $0x1400] sm:$0x3]  ;;  %v979_v16 = vld [vmem:[%s20623_s22 + $0x1410] sm:$0x3] }
 0x1b7   : > { %v19717_v31 = vpack.c.bf16 %v979_v16, %v535_v15 }
 0x1b8   : > { %10032 = vmatmul.mubr.f32.vlgmr.msra.gmra.mrb[90].mxu0 %v2108_v48  ;;  %v2150_v48 = vcombine.high %v2142_v33, %v2142_v33 }
 0x1b9   : > { %10102 = vmatmul.mubr.f32.vlgmr.msra.gmra.mrb[90].mxu1 %v2115_v53  ;;  %19690 = vmatpush1.bf16.xpose.msra.mxu0 %v19689_v20  ;;  %v529_v53 = vld [vmem:[%s20623_s22 + $0x600] sm:$0xff]  ;;  %v538_v20 = vld [vmem:[%s20623_s22 + $0x648] sm:$0xff] }
 0x1ba   : > { %19694 = vmatpush1.bf16.xpose.msra.mxu1 %v19693_v21  ;;  %10171 = vmatprep.mubr.f32.mxu0 %v2133_v23  ;;  %v19705_v5 = vpack.c.bf16 %v973_v54, %v529_v53  ;;  %v982_v21 = vld [vmem:[%s20623_s22 + $0x1428] sm:$0x3]  ;;  %v277_v53 = vld [vmem:[%s20641_s29 + $0x198] sm:$0xff] }
 0x1bb   : > { %19696 = vmatprep.subr.bf16.mxu0 %v19695_v24  ;;  %v6393_v34 = vpop.f32.mrb[38].mxu0  ;;  %10241 = vmatprep.mubr.f32.mxu1 %v2134_v26  ;;  %v2203_v61 = vcombine.high %v277_v53, %v277_v53  ;;  %v2210_v2 = vrot.slane %v277_v53, %v20657_v25 }
 0x1bc   : > { %v6463_v35 = vpop.f32.mrb[38].mxu1  ;;  %19700 = vmatprep.subr.bf16.mxu1 %v19699_v27  ;;  %v6394_v39 = vadd.f32 %v6393_v34, %v6324_v22  ;;  %v6395_v40 = vpop.f32.mrb[39].mxu0  ;;  %v2183_v22 = vrot.slane %v2169_v12, %v20657_v25  ;;  %v540_v27 = vld [vmem:[%s20623_s22 + $0x658] sm:$0xff]  ;;  %v19719_v34 = vpack.c.bf16 %v982_v21, %v538_v20 }
 0x1bd   : > { %v6465_v41 = vpop.f32.mrb[39].mxu1  ;;  %v19723_v36 = vpack.c.bf16 %v984_v28, %v540_v27  ;;  %v539_v40 = vld [vmem:[%s20623_s22 + $0x650] sm:$0xff]  ;;  %v992_v12 = vld [vmem:[%s20623_s22 + $0x1478] sm:$0x3] }
 0x1be   : > { %v6464_v47 = vadd.f32 %v6463_v35, %v6394_v39  ;;  %v2185_v35 = vcombine.high %v2183_v22, %v2183_v22  ;;  %v981_v39 = vld [vmem:[%s20623_s22 + $0x1420] sm:$0x3]  ;;  %v983_v41 = vld [vmem:[%s20623_s22 + $0x1430] sm:$0x3] }
 0x1bf   : > { %v19725_v55 = vpack.c.bf16 %v983_v41, %v539_v40 }
 0x1c0   : > { %10172 = vmatmul.mubr.f32.vlgmr.msra.gmra.mrb[92].mxu0 %v2125_v8  ;;  %v2167_v8 = vcombine.high %v2159_v57, %v2159_v57 }
 0x1c1   : > { %10242 = vmatmul.mubr.f32.vlgmr.msra.gmra.mrb[92].mxu1 %v2132_v13  ;;  %19698 = vmatpush1.bf16.xpose.msra.mxu0 %v19697_v45  ;;  %v533_v13 = vld [vmem:[%s20623_s22 + $0x620] sm:$0xff]  ;;  %v542_v45 = vld [vmem:[%s20623_s22 + $0x668] sm:$0xff] }
 0x1c2   : > { %19702 = vmatpush1.bf16.xpose.msra.mxu1 %v19701_v46  ;;  %10311 = vmatprep.mubr.f32.mxu0 %v2150_v48  ;;  %v19713_v30 = vpack.c.bf16 %v977_v14, %v533_v13  ;;  %v986_v46 = vld [vmem:[%s20623_s22 + $0x1448] sm:$0x3]  ;;  %v278_v13 = vld [vmem:[%s20641_s29 + $0x1a0] sm:$0xff] }
 0x1c3   : > { %19704 = vmatprep.subr.bf16.mxu0 %v19703_v49  ;;  %v6533_v58 = vpop.f32.mrb[40].mxu0  ;;  %10381 = vmatprep.mubr.f32.mxu1 %v2151_v50  ;;  %v2220_v21 = vcombine.high %v278_v13, %v278_v13  ;;  %v2227_v27 = vrot.slane %v278_v13, %v20657_v25 }
 0x1c4   : > { %v6603_v59 = vpop.f32.mrb[40].mxu1  ;;  %19708 = vmatprep.subr.bf16.mxu1 %v19707_v51  ;;  %v6534_v63 = vadd.f32 %v6533_v58, %v6464_v47  ;;  %v6535_v0 = vpop.f32.mrb[41].mxu0  ;;  %v2200_v47 = vrot.slane %v2186_v37, %v20657_v25  ;;  %v544_v51 = vld [vmem:[%s20623_s22 + $0x678] sm:$0xff]  ;;  %v19727_v58 = vpack.c.bf16 %v986_v46, %v542_v45 }
 0x1c5   : > { %v6605_v1 = vpop.f32.mrb[41].mxu1  ;;  %v19731_v60 = vpack.c.bf16 %v988_v52, %v544_v51  ;;  %v543_v0 = vld [vmem:[%s20623_s22 + $0x670] sm:$0xff]  ;;  %v996_v37 = vld [vmem:[%s20623_s22 + $0x1498] sm:$0x3] }
 0x1c6   : > { %v6604_v7 = vadd.f32 %v6603_v59, %v6534_v63  ;;  %v2202_v59 = vcombine.high %v2200_v47, %v2200_v47  ;;  %v985_v63 = vld [vmem:[%s20623_s22 + $0x1440] sm:$0x3]  ;;  %v987_v1 = vld [vmem:[%s20623_s22 + $0x1450] sm:$0x3] }
 0x1c7   : > { %v19733_v15 = vpack.c.bf16 %v987_v1, %v543_v0 }
 0x1c8   : > { %10312 = vmatmul.mubr.f32.vlgmr.msra.gmra.mrb[94].mxu0 %v2142_v33  ;;  %v2184_v33 = vcombine.high %v2176_v17, %v2176_v17 }
 0x1c9   : > { %10382 = vmatmul.mubr.f32.vlgmr.msra.gmra.mrb[94].mxu1 %v2149_v38  ;;  %19706 = vmatpush1.bf16.xpose.msra.mxu0 %v19705_v5  ;;  %v537_v38 = vld [vmem:[%s20623_s22 + $0x640] sm:$0xff]  ;;  %v546_v5 = vld [vmem:[%s20623_s22 + $0x688] sm:$0xff] }
 0x1ca   : > { %19710 = vmatpush1.bf16.xpose.msra.mxu1 %v19709_v6  ;;  %10451 = vmatprep.mubr.f32.mxu0 %v2167_v8  ;;  %v19721_v54 = vpack.c.bf16 %v981_v39, %v537_v38  ;;  %v990_v6 = vld [vmem:[%s20623_s22 + $0x1468] sm:$0x3] }
 0x1cb   : > { %19712 = vmatprep.subr.bf16.mxu0 %v19711_v9  ;;  %v6673_v18 = vpop.f32.mrb[42].mxu0  ;;  %10521 = vmatprep.mubr.f32.mxu1 %v2168_v10  ;;  %v279_v38 = vld [vmem:[%s20641_s29 + $0x1a8] sm:$0xff] }
 0x1cc   : > { %v6743_v19 = vpop.f32.mrb[42].mxu1  ;;  %19716 = vmatprep.subr.bf16.mxu1 %v19715_v11  ;;  %v6674_v23 = vadd.f32 %v6673_v18, %v6604_v7  ;;  %v6675_v24 = vpop.f32.mrb[43].mxu0  ;;  %v2217_v7 = vrot.slane %v2203_v61, %v20657_v25  ;;  %v548_v11 = vld [vmem:[%s20623_s22 + $0x698] sm:$0xff]  ;;  %v19735_v18 = vpack.c.bf16 %v990_v6, %v546_v5  ;;  %v2237_v46 = vcombine.high %v279_v38, %v279_v38 }
 0x1cd   : > { %v6745_v26 = vpop.f32.mrb[43].mxu1  ;;  %v19739_v20 = vpack.c.bf16 %v992_v12, %v548_v11  ;;  %v547_v24 = vld [vmem:[%s20623_s22 + $0x690] sm:$0xff]  ;;  %v2244_v51 = vrot.slane %v279_v38, %v20657_v25  ;;  %v1000_v61 = vld [vmem:[%s20623_s22 + $0x14b8] sm:$0x3] }
 0x1ce   : > { %v6744_v32 = vadd.f32 %v6743_v19, %v6674_v23  ;;  %v2219_v19 = vcombine.high %v2217_v7, %v2217_v7  ;;  %v989_v23 = vld [vmem:[%s20623_s22 + $0x1460] sm:$0x3]  ;;  %v991_v26 = vld [vmem:[%s20623_s22 + $0x1470] sm:$0x3] }
 0x1cf   : > { %v19741_v40 = vpack.c.bf16 %v991_v26, %v547_v24 }
 0x1d0   : > { %10452 = vmatmul.mubr.f32.vlgmr.msra.gmra.mrb[96].mxu0 %v2159_v57  ;;  %v2201_v57 = vcombine.high %v2193_v42, %v2193_v42 }
 0x1d1   : > { %10522 = vmatmul.mubr.f32.vlgmr.msra.gmra.mrb[96].mxu1 %v2166_v62  ;;  %19714 = vmatpush1.bf16.xpose.msra.mxu0 %v19713_v30  ;;  %v541_v62 = vld [vmem:[%s20623_s22 + $0x660] sm:$0xff]  ;;  %v550_v30 = vld [vmem:[%s20623_s22 + $0x6a8] sm:$0xff] }
 0x1d2   : > { %19718 = vmatpush1.bf16.xpose.msra.mxu1 %v19717_v31  ;;  %10591 = vmatprep.mubr.f32.mxu0 %v2184_v33  ;;  %v19729_v14 = vpack.c.bf16 %v985_v63, %v541_v62  ;;  %v994_v31 = vld [vmem:[%s20623_s22 + $0x1488] sm:$0x3]  ;;  %v280_v62 = vld [vmem:[%s20641_s29 + $0x1b0] sm:$0xff] }
 0x1d3   : > { %19720 = vmatprep.subr.bf16.mxu0 %v19719_v34  ;;  %v6813_v43 = vpop.f32.mrb[44].mxu0  ;;  %10661 = vmatprep.mubr.f32.mxu1 %v2185_v35  ;;  %v2254_v6 = vcombine.high %v280_v62, %v280_v62  ;;  %v2261_v11 = vrot.slane %v280_v62, %v20657_v25 }
 0x1d4   : > { %v6883_v44 = vpop.f32.mrb[44].mxu1  ;;  %19724 = vmatprep.subr.bf16.mxu1 %v19723_v36  ;;  %v6814_v48 = vadd.f32 %v6813_v43, %v6744_v32  ;;  %v6815_v49 = vpop.f32.mrb[45].mxu0  ;;  %v2234_v32 = vrot.slane %v2220_v21, %v20657_v25  ;;  %v552_v36 = vld [vmem:[%s20623_s22 + $0x6b8] sm:$0xff]  ;;  %v19743_v43 = vpack.c.bf16 %v994_v31, %v550_v30 }
 0x1d5   : > { %v6885_v50 = vpop.f32.mrb[45].mxu1  ;;  %v19747_v45 = vpack.c.bf16 %v996_v37, %v552_v36  ;;  %v551_v49 = vld [vmem:[%s20623_s22 + $0x6b0] sm:$0xff]  ;;  %v1004_v21 = vld [vmem:[%s20623_s22 + $0x14d8] sm:$0x3] }
 0x1d6   : > { %v6884_v56 = vadd.f32 %v6883_v44, %v6814_v48  ;;  %v2236_v44 = vcombine.high %v2234_v32, %v2234_v32  ;;  %v993_v48 = vld [vmem:[%s20623_s22 + $0x1480] sm:$0x3]  ;;  %v995_v50 = vld [vmem:[%s20623_s22 + $0x1490] sm:$0x3] }
 0x1d7   : > { %v19749_v0 = vpack.c.bf16 %v995_v50, %v551_v49 }
 0x1d8   : > { %10592 = vmatmul.mubr.f32.vlgmr.msra.gmra.mrb[98].mxu0 %v2176_v17  ;;  %v2218_v17 = vcombine.high %v2210_v2, %v2210_v2 }
 0x1d9   : > { %10662 = vmatmul.mubr.f32.vlgmr.msra.gmra.mrb[98].mxu1 %v2183_v22  ;;  %19722 = vmatpush1.bf16.xpose.msra.mxu0 %v19721_v54  ;;  %v545_v22 = vld [vmem:[%s20623_s22 + $0x680] sm:$0xff]  ;;  %v554_v54 = vld [vmem:[%s20623_s22 + $0x6c8] sm:$0xff] }
 0x1da   : > { %19726 = vmatpush1.bf16.xpose.msra.mxu1 %v19725_v55  ;;  %10731 = vmatprep.mubr.f32.mxu0 %v2201_v57  ;;  %v19737_v39 = vpack.c.bf16 %v989_v23, %v545_v22  ;;  %v998_v55 = vld [vmem:[%s20623_s22 + $0x14a8] sm:$0x3]  ;;  %v281_v22 = vld [vmem:[%s20641_s29 + $0x1b8] sm:$0xff] }
 0x1db   : > { %19728 = vmatprep.subr.bf16.mxu0 %v19727_v58  ;;  %v6953_v3 = vpop.f32.mrb[46].mxu0  ;;  %10801 = vmatprep.mubr.f32.mxu1 %v2202_v59  ;;  %v2271_v31 = vcombine.high %v281_v22, %v281_v22  ;;  %v2278_v36 = vrot.slane %v281_v22, %v20657_v25 }
 0x1dc   : > { %v7023_v4 = vpop.f32.mrb[46].mxu1  ;;  %19732 = vmatprep.subr.bf16.mxu1 %v19731_v60  ;;  %v6954_v8 = vadd.f32 %v6953_v3, %v6884_v56  ;;  %v6955_v9 = vpop.f32.mrb[47].mxu0  ;;  %v2251_v56 = vrot.slane %v2237_v46, %v20657_v25  ;;  %v556_v60 = vld [vmem:[%s20623_s22 + $0x6d8] sm:$0xff]  ;;  %v19751_v3 = vpack.c.bf16 %v998_v55, %v554_v54 }
 0x1dd   : > { %v7025_v10 = vpop.f32.mrb[47].mxu1  ;;  %v19755_v5 = vpack.c.bf16 %v1000_v61, %v556_v60  ;;  %v555_v9 = vld [vmem:[%s20623_s22 + $0x6d0] sm:$0xff]  ;;  %v1008_v46 = vld [vmem:[%s20623_s22 + $0x14f8] sm:$0x3] }
 0x1de   : > { %v7024_v16 = vadd.f32 %v7023_v4, %v6954_v8  ;;  %v2253_v4 = vcombine.high %v2251_v56, %v2251_v56  ;;  %v997_v8 = vld [vmem:[%s20623_s22 + $0x14a0] sm:$0x3]  ;;  %v999_v10 = vld [vmem:[%s20623_s22 + $0x14b0] sm:$0x3] }
 0x1df   : > { %v19757_v24 = vpack.c.bf16 %v999_v10, %v555_v9 }
 0x1e0   : > { %10732 = vmatmul.mubr.f32.vlgmr.msra.gmra.mrb[100].mxu0 %v2193_v42  ;;  %v2235_v42 = vcombine.high %v2227_v27, %v2227_v27 }
 0x1e1   : > { %10802 = vmatmul.mubr.f32.vlgmr.msra.gmra.mrb[100].mxu1 %v2200_v47  ;;  %19730 = vmatpush1.bf16.xpose.msra.mxu0 %v19729_v14  ;;  %v549_v47 = vld [vmem:[%s20623_s22 + $0x6a0] sm:$0xff]  ;;  %v558_v14 = vld [vmem:[%s20623_s22 + $0x6e8] sm:$0xff] }
 0x1e2   : > { %19734 = vmatpush1.bf16.xpose.msra.mxu1 %v19733_v15  ;;  %10871 = vmatprep.mubr.f32.mxu0 %v2218_v17  ;;  %v19745_v63 = vpack.c.bf16 %v993_v48, %v549_v47  ;;  %v1002_v15 = vld [vmem:[%s20623_s22 + $0x14c8] sm:$0x3]  ;;  %v282_v47 = vld [vmem:[%s20641_s29 + $0x1c0] sm:$0xff] }
 0x1e3   : > { %19736 = vmatprep.subr.bf16.mxu0 %v19735_v18  ;;  %v7093_v28 = vpop.f32.mrb[48].mxu0  ;;  %10941 = vmatprep.mubr.f32.mxu1 %v2219_v19  ;;  %v2288_v55 = vcombine.high %v282_v47, %v282_v47  ;;  %v2295_v60 = vrot.slane %v282_v47, %v20657_v25 }
 0x1e4   : > { %v7163_v29 = vpop.f32.mrb[48].mxu1  ;;  %19740 = vmatprep.subr.bf16.mxu1 %v19739_v20  ;;  %v7094_v33 = vadd.f32 %v7093_v28, %v7024_v16  ;;  %v7095_v34 = vpop.f32.mrb[49].mxu0  ;;  %v2268_v16 = vrot.slane %v2254_v6, %v20657_v25  ;;  %v560_v20 = vld [vmem:[%s20623_s22 + $0x6f8] sm:$0xff]  ;;  %v19759_v28 = vpack.c.bf16 %v1002_v15, %v558_v14 }
 0x1e5   : > { %v7165_v35 = vpop.f32.mrb[49].mxu1  ;;  %v19763_v30 = vpack.c.bf16 %v1004_v21, %v560_v20  ;;  %v559_v34 = vld [vmem:[%s20623_s22 + $0x6f0] sm:$0xff]  ;;  %v1012_v6 = vld [vmem:[%s20623_s22 + $0x1518] sm:$0x3] }
 0x1e6   : > { %v7164_v41 = vadd.f32 %v7163_v29, %v7094_v33  ;;  %v2270_v29 = vcombine.high %v2268_v16, %v2268_v16  ;;  %v1001_v33 = vld [vmem:[%s20623_s22 + $0x14c0] sm:$0x3]  ;;  %v1003_v35 = vld [vmem:[%s20623_s22 + $0x14d0] sm:$0x3] }
 0x1e7   : > { %v19765_v49 = vpack.c.bf16 %v1003_v35, %v559_v34 }
 0x1e8   : > { %10872 = vmatmul.mubr.f32.vlgmr.msra.gmra.mrb[102].mxu0 %v2210_v2  ;;  %v2252_v2 = vcombine.high %v2244_v51, %v2244_v51 }
 0x1e9   : > { %10942 = vmatmul.mubr.f32.vlgmr.msra.gmra.mrb[102].mxu1 %v2217_v7  ;;  %19738 = vmatpush1.bf16.xpose.msra.mxu0 %v19737_v39  ;;  %v553_v7 = vld [vmem:[%s20623_s22 + $0x6c0] sm:$0xff]  ;;  %v562_v39 = vld [vmem:[%s20623_s22 + $0x708] sm:$0xff] }
 0x1ea   : > { %19742 = vmatpush1.bf16.xpose.msra.mxu1 %v19741_v40  ;;  %11011 = vmatprep.mubr.f32.mxu0 %v2235_v42  ;;  %v19753_v23 = vpack.c.bf16 %v997_v8, %v553_v7  ;;  %v1006_v40 = vld [vmem:[%s20623_s22 + $0x14e8] sm:$0x3] }
 0x1eb   : > { %19744 = vmatprep.subr.bf16.mxu0 %v19743_v43  ;;  %v7233_v52 = vpop.f32.mrb[50].mxu0  ;;  %11081 = vmatprep.mubr.f32.mxu1 %v2236_v44  ;;  %v283_v7 = vld [vmem:[%s20641_s29 + $0x1c8] sm:$0xff] }
 0x1ec   : > { %v7303_v53 = vpop.f32.mrb[50].mxu1  ;;  %19748 = vmatprep.subr.bf16.mxu1 %v19747_v45  ;;  %v7234_v57 = vadd.f32 %v7233_v52, %v7164_v41  ;;  %v7235_v58 = vpop.f32.mrb[51].mxu0  ;;  %v2285_v41 = vrot.slane %v2271_v31, %v20657_v25  ;;  %v564_v45 = vld [vmem:[%s20623_s22 + $0x718] sm:$0xff]  ;;  %v19767_v52 = vpack.c.bf16 %v1006_v40, %v562_v39  ;;  %v2305_v15 = vcombine.high %v283_v7, %v283_v7 }
 0x1ed   : > { %v7305_v59 = vpop.f32.mrb[51].mxu1  ;;  %v19771_v54 = vpack.c.bf16 %v1008_v46, %v564_v45  ;;  %v563_v58 = vld [vmem:[%s20623_s22 + $0x710] sm:$0xff]  ;;  %v2312_v20 = vrot.slane %v283_v7, %v20657_v25  ;;  %v1016_v31 = vld [vmem:[%s20623_s22 + $0x1538] sm:$0x3] }
 0x1ee   : > { %v7304_v1 = vadd.f32 %v7303_v53, %v7234_v57  ;;  %v2287_v53 = vcombine.high %v2285_v41, %v2285_v41  ;;  %v1005_v57 = vld [vmem:[%s20623_s22 + $0x14e0] sm:$0x3]  ;;  %v1007_v59 = vld [vmem:[%s20623_s22 + $0x14f0] sm:$0x3] }
 0x1ef   : > { %v19773_v9 = vpack.c.bf16 %v1007_v59, %v563_v58 }
 0x1f0   : > { %11012 = vmatmul.mubr.f32.vlgmr.msra.gmra.mrb[104].mxu0 %v2227_v27  ;;  %v2269_v27 = vcombine.high %v2261_v11, %v2261_v11 }
 0x1f1   : > { %11082 = vmatmul.mubr.f32.vlgmr.msra.gmra.mrb[104].mxu1 %v2234_v32  ;;  %19746 = vmatpush1.bf16.xpose.msra.mxu0 %v19745_v63  ;;  %v557_v32 = vld [vmem:[%s20623_s22 + $0x6e0] sm:$0xff]  ;;  %v566_v63 = vld [vmem:[%s20623_s22 + $0x728] sm:$0xff] }
 0x1f2   : > { %19750 = vmatpush1.bf16.xpose.msra.mxu1 %v19749_v0  ;;  %11151 = vmatprep.mubr.f32.mxu0 %v2252_v2  ;;  %v19761_v48 = vpack.c.bf16 %v1001_v33, %v557_v32  ;;  %v1010_v0 = vld [vmem:[%s20623_s22 + $0x1508] sm:$0x3]  ;;  %v284_v32 = vld [vmem:[%s20641_s29 + $0x1d0] sm:$0xff] }
 0x1f3   : > { %19752 = vmatprep.subr.bf16.mxu0 %v19751_v3  ;;  %v7373_v12 = vpop.f32.mrb[52].mxu0  ;;  %11221 = vmatprep.mubr.f32.mxu1 %v2253_v4  ;;  %v2322_v40 = vcombine.high %v284_v32, %v284_v32  ;;  %v2329_v45 = vrot.slane %v284_v32, %v20657_v25 }
 0x1f4   : > { %v7443_v13 = vpop.f32.mrb[52].mxu1  ;;  %19756 = vmatprep.subr.bf16.mxu1 %v19755_v5  ;;  %v7374_v17 = vadd.f32 %v7373_v12, %v7304_v1  ;;  %v7375_v18 = vpop.f32.mrb[53].mxu0  ;;  %v2302_v1 = vrot.slane %v2288_v55, %v20657_v25  ;;  %v568_v5 = vld [vmem:[%s20623_s22 + $0x738] sm:$0xff]  ;;  %v19775_v12 = vpack.c.bf16 %v1010_v0, %v566_v63 }
 0x1f5   : > { %v7445_v19 = vpop.f32.mrb[53].mxu1  ;;  %v19779_v14 = vpack.c.bf16 %v1012_v6, %v568_v5  ;;  %v567_v18 = vld [vmem:[%s20623_s22 + $0x730] sm:$0xff]  ;;  %v1020_v55 = vld [vmem:[%s20623_s22 + $0x1558] sm:$0x3] }
 0x1f6   : > { %v7444_v26 = vadd.f32 %v7443_v13, %v7374_v17  ;;  %v2304_v13 = vcombine.high %v2302_v1, %v2302_v1  ;;  %v1009_v17 = vld [vmem:[%s20623_s22 + $0x1500] sm:$0x3]  ;;  %v1011_v19 = vld [vmem:[%s20623_s22 + $0x1510] sm:$0x3] }
 0x1f7   : > { %v19781_v34 = vpack.c.bf16 %v1011_v19, %v567_v18 }
 0x1f8   : > { %11152 = vmatmul.mubr.f32.vlgmr.msra.gmra.mrb[106].mxu0 %v2244_v51  ;;  %v2286_v51 = vcombine.high %v2278_v36, %v2278_v36 }
 0x1f9   : > { %11222 = vmatmul.mubr.f32.vlgmr.msra.gmra.mrb[106].mxu1 %v2251_v56  ;;  %19754 = vmatpush1.bf16.xpose.msra.mxu0 %v19753_v23  ;;  %v561_v56 = vld [vmem:[%s20623_s22 + $0x700] sm:$0xff]  ;;  %v570_v23 = vld [vmem:[%s20623_s22 + $0x748] sm:$0xff] }
 0x1fa   : > { %19758 = vmatpush1.bf16.xpose.msra.mxu1 %v19757_v24  ;;  %11291 = vmatprep.mubr.f32.mxu0 %v2269_v27  ;;  %v19769_v8 = vpack.c.bf16 %v1005_v57, %v561_v56  ;;  %v1014_v24 = vld [vmem:[%s20623_s22 + $0x1528] sm:$0x3]  ;;  %v285_v56 = vld [vmem:[%s20641_s29 + $0x1d8] sm:$0xff] }
 0x1fb   : > { %19760 = vmatprep.subr.bf16.mxu0 %v19759_v28  ;;  %v7513_v37 = vpop.f32.mrb[54].mxu0  ;;  %11361 = vmatprep.mubr.f32.mxu1 %v2270_v29  ;;  %v2339_v0 = vcombine.high %v285_v56, %v285_v56  ;;  %v2346_v5 = vrot.slane %v285_v56, %v20657_v25 }
 0x1fc   : > { %v7583_v38 = vpop.f32.mrb[54].mxu1  ;;  %19764 = vmatprep.subr.bf16.mxu1 %v19763_v30  ;;  %v7514_v42 = vadd.f32 %v7513_v37, %v7444_v26  ;;  %v7515_v43 = vpop.f32.mrb[55].mxu0  ;;  %v2319_v26 = vrot.slane %v2305_v15, %v20657_v25  ;;  %v572_v30 = vld [vmem:[%s20623_s22 + $0x758] sm:$0xff]  ;;  %v19783_v37 = vpack.c.bf16 %v1014_v24, %v570_v23 }
 0x1fd   : > { %v7585_v44 = vpop.f32.mrb[55].mxu1  ;;  %v19787_v39 = vpack.c.bf16 %v1016_v31, %v572_v30  ;;  %v571_v43 = vld [vmem:[%s20623_s22 + $0x750] sm:$0xff]  ;;  %v1024_v15 = vld [vmem:[%s20623_s22 + $0x1578] sm:$0x3] }
 0x1fe   : > { %v7584_v50 = vadd.f32 %v7583_v38, %v7514_v42  ;;  %v2321_v38 = vcombine.high %v2319_v26, %v2319_v26  ;;  %v1013_v42 = vld [vmem:[%s20623_s22 + $0x1520] sm:$0x3]  ;;  %v1015_v44 = vld [vmem:[%s20623_s22 + $0x1530] sm:$0x3] }
 0x1ff   : > { %v19789_v58 = vpack.c.bf16 %v1015_v44, %v571_v43 }
 0x200   : > { %11292 = vmatmul.mubr.f32.vlgmr.msra.gmra.mrb[108].mxu0 %v2261_v11  ;;  %v2303_v11 = vcombine.high %v2295_v60, %v2295_v60 }
 0x201   : > { %11362 = vmatmul.mubr.f32.vlgmr.msra.gmra.mrb[108].mxu1 %v2268_v16  ;;  %19762 = vmatpush1.bf16.xpose.msra.mxu0 %v19761_v48  ;;  %v565_v16 = vld [vmem:[%s20623_s22 + $0x720] sm:$0xff]  ;;  %v574_v48 = vld [vmem:[%s20623_s22 + $0x768] sm:$0xff] }
 0x202   : > { %19766 = vmatpush1.bf16.xpose.msra.mxu1 %v19765_v49  ;;  %11431 = vmatprep.mubr.f32.mxu0 %v2286_v51  ;;  %v19777_v33 = vpack.c.bf16 %v1009_v17, %v565_v16  ;;  %v1018_v49 = vld [vmem:[%s20623_s22 + $0x1548] sm:$0x3]  ;;  %v286_v16 = vld [vmem:[%s20641_s29 + $0x1e0] sm:$0xff] }
 0x203   : > { %19768 = vmatprep.subr.bf16.mxu0 %v19767_v52  ;;  %v7653_v61 = vpop.f32.mrb[56].mxu0  ;;  %11501 = vmatprep.mubr.f32.mxu1 %v2287_v53  ;;  %v2356_v24 = vcombine.high %v286_v16, %v286_v16  ;;  %v2363_v30 = vrot.slane %v286_v16, %v20657_v25 }
 0x204   : > { %v7723_v62 = vpop.f32.mrb[56].mxu1  ;;  %19772 = vmatprep.subr.bf16.mxu1 %v19771_v54  ;;  %v7654_v2 = vadd.f32 %v7653_v61, %v7584_v50  ;;  %v7655_v3 = vpop.f32.mrb[57].mxu0  ;;  %v2336_v50 = vrot.slane %v2322_v40, %v20657_v25  ;;  %v576_v54 = vld [vmem:[%s20623_s22 + $0x778] sm:$0xff]  ;;  %v19791_v61 = vpack.c.bf16 %v1018_v49, %v574_v48 }
 0x205   : > { %v7725_v4 = vpop.f32.mrb[57].mxu1  ;;  %v19795_v63 = vpack.c.bf16 %v1020_v55, %v576_v54  ;;  %v575_v3 = vld [vmem:[%s20623_s22 + $0x770] sm:$0xff]  ;;  %v1028_v40 = vld [vmem:[%s20623_s22 + $0x1598] sm:$0x3] }
 0x206   : > { %v7724_v10 = vadd.f32 %v7723_v62, %v7654_v2  ;;  %v2338_v62 = vcombine.high %v2336_v50, %v2336_v50  ;;  %v1017_v2 = vld [vmem:[%s20623_s22 + $0x1540] sm:$0x3]  ;;  %v1019_v4 = vld [vmem:[%s20623_s22 + $0x1550] sm:$0x3] }
 0x207   : > { %v19797_v18 = vpack.c.bf16 %v1019_v4, %v575_v3 }
 0x208   : > { %11432 = vmatmul.mubr.f32.vlgmr.msra.gmra.mrb[110].mxu0 %v2278_v36  ;;  %v2320_v36 = vcombine.high %v2312_v20, %v2312_v20 }
 0x209   : > { %11502 = vmatmul.mubr.f32.vlgmr.msra.gmra.mrb[110].mxu1 %v2285_v41  ;;  %19770 = vmatpush1.bf16.xpose.msra.mxu0 %v19769_v8  ;;  %v569_v41 = vld [vmem:[%s20623_s22 + $0x740] sm:$0xff]  ;;  %v578_v8 = vld [vmem:[%s20623_s22 + $0x788] sm:$0xff] }
 0x20a   : > { %19774 = vmatpush1.bf16.xpose.msra.mxu1 %v19773_v9  ;;  %11571 = vmatprep.mubr.f32.mxu0 %v2303_v11  ;;  %v19785_v57 = vpack.c.bf16 %v1013_v42, %v569_v41  ;;  %v1022_v9 = vld [vmem:[%s20623_s22 + $0x1568] sm:$0x3] }
 0x20b   : > { %19776 = vmatprep.subr.bf16.mxu0 %v19775_v12  ;;  %v7793_v21 = vpop.f32.mrb[58].mxu0  ;;  %11641 = vmatprep.mubr.f32.mxu1 %v2304_v13  ;;  %v287_v41 = vld [vmem:[%s20641_s29 + $0x1e8] sm:$0xff] }
 0x20c   : > { %v7863_v22 = vpop.f32.mrb[58].mxu1  ;;  %19780 = vmatprep.subr.bf16.mxu1 %v19779_v14  ;;  %v7794_v27 = vadd.f32 %v7793_v21, %v7724_v10  ;;  %v7795_v28 = vpop.f32.mrb[59].mxu0  ;;  %v2353_v10 = vrot.slane %v2339_v0, %v20657_v25  ;;  %v580_v14 = vld [vmem:[%s20623_s22 + $0x798] sm:$0xff]  ;;  %v19799_v21 = vpack.c.bf16 %v1022_v9, %v578_v8  ;;  %v2373_v49 = vcombine.high %v287_v41, %v287_v41 }
 0x20d   : > { %v7865_v29 = vpop.f32.mrb[59].mxu1  ;;  %v19803_v23 = vpack.c.bf16 %v1024_v15, %v580_v14  ;;  %v579_v28 = vld [vmem:[%s20623_s22 + $0x790] sm:$0xff]  ;;  %v2380_v54 = vrot.slane %v287_v41, %v20657_v25  ;;  %v1032_v0 = vld [vmem:[%s20623_s22 + $0x15b8] sm:$0x3] }
 0x20e   : > { %v7864_v35 = vadd.f32 %v7863_v22, %v7794_v27  ;;  %v2355_v22 = vcombine.high %v2353_v10, %v2353_v10  ;;  %v1021_v27 = vld [vmem:[%s20623_s22 + $0x1560] sm:$0x3]  ;;  %v1023_v29 = vld [vmem:[%s20623_s22 + $0x1570] sm:$0x3] }
 0x20f   : > { %v19805_v43 = vpack.c.bf16 %v1023_v29, %v579_v28 }
 0x210   : > { %11572 = vmatmul.mubr.f32.vlgmr.msra.gmra.mrb[112].mxu0 %v2295_v60  ;;  %v2337_v60 = vcombine.high %v2329_v45, %v2329_v45 }
 0x211   : > { %11642 = vmatmul.mubr.f32.vlgmr.msra.gmra.mrb[112].mxu1 %v2302_v1  ;;  %19778 = vmatpush1.bf16.xpose.msra.mxu0 %v19777_v33  ;;  %v573_v1 = vld [vmem:[%s20623_s22 + $0x760] sm:$0xff]  ;;  %v582_v33 = vld [vmem:[%s20623_s22 + $0x7a8] sm:$0xff] }
 0x212   : > { %19782 = vmatpush1.bf16.xpose.msra.mxu1 %v19781_v34  ;;  %11711 = vmatprep.mubr.f32.mxu0 %v2320_v36  ;;  %v19793_v17 = vpack.c.bf16 %v1017_v2, %v573_v1  ;;  %v1026_v34 = vld [vmem:[%s20623_s22 + $0x1588] sm:$0x3]  ;;  %v288_v1 = vld [vmem:[%s20641_s29 + $0x1f0] sm:$0xff] }
 0x213   : > { %19784 = vmatprep.subr.bf16.mxu0 %v19783_v37  ;;  %v7933_v46 = vpop.f32.mrb[60].mxu0  ;;  %11781 = vmatprep.mubr.f32.mxu1 %v2321_v38  ;;  %v2390_v9 = vcombine.high %v288_v1, %v288_v1  ;;  %v2397_v14 = vrot.slane %v288_v1, %v20657_v25 }
 0x214   : > { %v8003_v47 = vpop.f32.mrb[60].mxu1  ;;  %19788 = vmatprep.subr.bf16.mxu1 %v19787_v39  ;;  %v7934_v51 = vadd.f32 %v7933_v46, %v7864_v35  ;;  %v7935_v52 = vpop.f32.mrb[61].mxu0  ;;  %v2370_v35 = vrot.slane %v2356_v24, %v20657_v25  ;;  %v584_v39 = vld [vmem:[%s20623_s22 + $0x7b8] sm:$0xff]  ;;  %v19807_v46 = vpack.c.bf16 %v1026_v34, %v582_v33 }
 0x215   : > { %v8005_v53 = vpop.f32.mrb[61].mxu1  ;;  %v19811_v48 = vpack.c.bf16 %v1028_v40, %v584_v39  ;;  %v583_v52 = vld [vmem:[%s20623_s22 + $0x7b0] sm:$0xff]  ;;  %v1036_v24 = vld [vmem:[%s20623_s22 + $0x15d8] sm:$0x3] }
 0x216   : > { %v8004_v59 = vadd.f32 %v8003_v47, %v7934_v51  ;;  %v2372_v47 = vcombine.high %v2370_v35, %v2370_v35  ;;  %v1025_v51 = vld [vmem:[%s20623_s22 + $0x1580] sm:$0x3]  ;;  %v1027_v53 = vld [vmem:[%s20623_s22 + $0x1590] sm:$0x3] }
 0x217   : > { %v19813_v3 = vpack.c.bf16 %v1027_v53, %v583_v52 }
 0x218   : > { %11712 = vmatmul.mubr.f32.vlgmr.msra.gmra.mrb[114].mxu0 %v2312_v20  ;;  %v2354_v20 = vcombine.high %v2346_v5, %v2346_v5 }
 0x219   : > { %11782 = vmatmul.mubr.f32.vlgmr.msra.gmra.mrb[114].mxu1 %v2319_v26  ;;  %19786 = vmatpush1.bf16.xpose.msra.mxu0 %v19785_v57  ;;  %v577_v26 = vld [vmem:[%s20623_s22 + $0x780] sm:$0xff]  ;;  %v586_v57 = vld [vmem:[%s20623_s22 + $0x7c8] sm:$0xff] }
 0x21a   : > { %19790 = vmatpush1.bf16.xpose.msra.mxu1 %v19789_v58  ;;  %11851 = vmatprep.mubr.f32.mxu0 %v2337_v60  ;;  %v19801_v42 = vpack.c.bf16 %v1021_v27, %v577_v26  ;;  %v1030_v58 = vld [vmem:[%s20623_s22 + $0x15a8] sm:$0x3]  ;;  %v289_v26 = vld [vmem:[%s20641_s29 + $0x1f8] sm:$0xff] }
 0x21b   : > { %19792 = vmatprep.subr.bf16.mxu0 %v19791_v61  ;;  %v8073_v6 = vpop.f32.mrb[62].mxu0  ;;  %11921 = vmatprep.mubr.f32.mxu1 %v2338_v62  ;;  %v2407_v34 = vcombine.high %v289_v26, %v289_v26  ;;  %v2414_v39 = vrot.slane %v289_v26, %v20657_v25 }
 0x21c   : > { %v8143_v7 = vpop.f32.mrb[62].mxu1  ;;  %19796 = vmatprep.subr.bf16.mxu1 %v19795_v63  ;;  %v8074_v11 = vadd.f32 %v8073_v6, %v8004_v59  ;;  %v8075_v12 = vpop.f32.mrb[63].mxu0  ;;  %v2387_v59 = vrot.slane %v2373_v49, %v20657_v25  ;;  %v588_v63 = vld [vmem:[%s20623_s22 + $0x7d8] sm:$0xff]  ;;  %v19815_v6 = vpack.c.bf16 %v1030_v58, %v586_v57 }
 0x21d   : > { %v8145_v13 = vpop.f32.mrb[63].mxu1  ;;  %v19819_v8 = vpack.c.bf16 %v1032_v0, %v588_v63  ;;  %v587_v12 = vld [vmem:[%s20623_s22 + $0x7d0] sm:$0xff]  ;;  %v1040_v49 = vld [vmem:[%s20623_s22 + $0x15f8] sm:$0x3] }
 0x21e   : > { %v8144_v19 = vadd.f32 %v8143_v7, %v8074_v11  ;;  %v2389_v7 = vcombine.high %v2387_v59, %v2387_v59  ;;  %v1029_v11 = vld [vmem:[%s20623_s22 + $0x15a0] sm:$0x3]  ;;  %v1031_v13 = vld [vmem:[%s20623_s22 + $0x15b0] sm:$0x3] }
 0x21f   : > { %v19821_v28 = vpack.c.bf16 %v1031_v13, %v587_v12 }
 0x220   : > { %11852 = vmatmul.mubr.f32.vlgmr.msra.gmra.mrb[116].mxu0 %v2329_v45  ;;  %v2371_v45 = vcombine.high %v2363_v30, %v2363_v30 }
 0x221   : > { %11922 = vmatmul.mubr.f32.vlgmr.msra.gmra.mrb[116].mxu1 %v2336_v50  ;;  %19794 = vmatpush1.bf16.xpose.msra.mxu0 %v19793_v17  ;;  %v581_v50 = vld [vmem:[%s20623_s22 + $0x7a0] sm:$0xff]  ;;  %v590_v17 = vld [vmem:[%s20623_s22 + $0x7e8] sm:$0xff] }
 0x222   : > { %19798 = vmatpush1.bf16.xpose.msra.mxu1 %v19797_v18  ;;  %11991 = vmatprep.mubr.f32.mxu0 %v2354_v20  ;;  %v19809_v2 = vpack.c.bf16 %v1025_v51, %v581_v50  ;;  %v1034_v18 = vld [vmem:[%s20623_s22 + $0x15c8] sm:$0x3]  ;;  %v290_v50 = vld [vmem:[%s20641_s29 + $0x200] sm:$0xff] }
 0x223   : > { %19800 = vmatprep.subr.bf16.mxu0 %v19799_v21  ;;  %v8213_v31 = vpop.f32.mrb[64].mxu0  ;;  %12061 = vmatprep.mubr.f32.mxu1 %v2355_v22  ;;  %v2424_v58 = vcombine.high %v290_v50, %v290_v50  ;;  %v2431_v63 = vrot.slane %v290_v50, %v20657_v25 }
 0x224   : > { %v8283_v32 = vpop.f32.mrb[64].mxu1  ;;  %19804 = vmatprep.subr.bf16.mxu1 %v19803_v23  ;;  %v8214_v36 = vadd.f32 %v8213_v31, %v8144_v19  ;;  %v8215_v37 = vpop.f32.mrb[65].mxu0  ;;  %v2404_v19 = vrot.slane %v2390_v9, %v20657_v25  ;;  %v592_v23 = vld [vmem:[%s20623_s22 + $0x7f8] sm:$0xff]  ;;  %v19823_v31 = vpack.c.bf16 %v1034_v18, %v590_v17 }
 0x225   : > { %v8285_v38 = vpop.f32.mrb[65].mxu1  ;;  %v19827_v33 = vpack.c.bf16 %v1036_v24, %v592_v23  ;;  %v591_v37 = vld [vmem:[%s20623_s22 + $0x7f0] sm:$0xff]  ;;  %v1044_v9 = vld [vmem:[%s20623_s22 + $0x1618] sm:$0x3] }
 0x226   : > { %v8284_v44 = vadd.f32 %v8283_v32, %v8214_v36  ;;  %v2406_v32 = vcombine.high %v2404_v19, %v2404_v19  ;;  %v1033_v36 = vld [vmem:[%s20623_s22 + $0x15c0] sm:$0x3]  ;;  %v1035_v38 = vld [vmem:[%s20623_s22 + $0x15d0] sm:$0x3] }
 0x227   : > { %v19829_v52 = vpack.c.bf16 %v1035_v38, %v591_v37 }
 0x228   : > { %11992 = vmatmul.mubr.f32.vlgmr.msra.gmra.mrb[118].mxu0 %v2346_v5  ;;  %v2388_v5 = vcombine.high %v2380_v54, %v2380_v54 }
 0x229   : > { %12062 = vmatmul.mubr.f32.vlgmr.msra.gmra.mrb[118].mxu1 %v2353_v10  ;;  %19802 = vmatpush1.bf16.xpose.msra.mxu0 %v19801_v42  ;;  %v585_v10 = vld [vmem:[%s20623_s22 + $0x7c0] sm:$0xff]  ;;  %v594_v42 = vld [vmem:[%s20623_s22 + $0x808] sm:$0xff] }
 0x22a   : > { %19806 = vmatpush1.bf16.xpose.msra.mxu1 %v19805_v43  ;;  %12131 = vmatprep.mubr.f32.mxu0 %v2371_v45  ;;  %v19817_v27 = vpack.c.bf16 %v1029_v11, %v585_v10  ;;  %v1038_v43 = vld [vmem:[%s20623_s22 + $0x15e8] sm:$0x3] }
 0x22b   : > { %19808 = vmatprep.subr.bf16.mxu0 %v19807_v46  ;;  %v8353_v55 = vpop.f32.mrb[66].mxu0  ;;  %12201 = vmatprep.mubr.f32.mxu1 %v2372_v47  ;;  %v291_v10 = vld [vmem:[%s20641_s29 + $0x208] sm:$0xff] }
 0x22c   : > { %v8423_v56 = vpop.f32.mrb[66].mxu1  ;;  %19812 = vmatprep.subr.bf16.mxu1 %v19811_v48  ;;  %v8354_v60 = vadd.f32 %v8353_v55, %v8284_v44  ;;  %v8355_v61 = vpop.f32.mrb[67].mxu0  ;;  %v2421_v44 = vrot.slane %v2407_v34, %v20657_v25  ;;  %v596_v48 = vld [vmem:[%s20623_s22 + $0x818] sm:$0xff]  ;;  %v19831_v55 = vpack.c.bf16 %v1038_v43, %v594_v42  ;;  %v2441_v18 = vcombine.high %v291_v10, %v291_v10 }
 0x22d   : > { %v8425_v62 = vpop.f32.mrb[67].mxu1  ;;  %v19835_v57 = vpack.c.bf16 %v1040_v49, %v596_v48  ;;  %v595_v61 = vld [vmem:[%s20623_s22 + $0x810] sm:$0xff]  ;;  %v2448_v23 = vrot.slane %v291_v10, %v20657_v25  ;;  %v1048_v34 = vld [vmem:[%s20623_s22 + $0x1638] sm:$0x3] }
 0x22e   : > { %v8424_v4 = vadd.f32 %v8423_v56, %v8354_v60  ;;  %v2423_v56 = vcombine.high %v2421_v44, %v2421_v44  ;;  %v1037_v60 = vld [vmem:[%s20623_s22 + $0x15e0] sm:$0x3]  ;;  %v1039_v62 = vld [vmem:[%s20623_s22 + $0x15f0] sm:$0x3] }
 0x22f   : > { %v19837_v12 = vpack.c.bf16 %v1039_v62, %v595_v61 }
 0x230   : > { %12132 = vmatmul.mubr.f32.vlgmr.msra.gmra.mrb[120].mxu0 %v2363_v30  ;;  %v2405_v30 = vcombine.high %v2397_v14, %v2397_v14 }
 0x231   : > { %12202 = vmatmul.mubr.f32.vlgmr.msra.gmra.mrb[120].mxu1 %v2370_v35  ;;  %19810 = vmatpush1.bf16.xpose.msra.mxu0 %v19809_v2  ;;  %v589_v35 = vld [vmem:[%s20623_s22 + $0x7e0] sm:$0xff]  ;;  %v598_v2 = vld [vmem:[%s20623_s22 + $0x828] sm:$0xff] }
 0x232   : > { %19814 = vmatpush1.bf16.xpose.msra.mxu1 %v19813_v3  ;;  %12271 = vmatprep.mubr.f32.mxu0 %v2388_v5  ;;  %v19825_v51 = vpack.c.bf16 %v1033_v36, %v589_v35  ;;  %v1042_v3 = vld [vmem:[%s20623_s22 + $0x1608] sm:$0x3]  ;;  %v292_v35 = vld [vmem:[%s20641_s29 + $0x210] sm:$0xff] }
 0x233   : > { %19816 = vmatprep.subr.bf16.mxu0 %v19815_v6  ;;  %v8493_v15 = vpop.f32.mrb[68].mxu0  ;;  %12341 = vmatprep.mubr.f32.mxu1 %v2389_v7  ;;  %v2458_v43 = vcombine.high %v292_v35, %v292_v35  ;;  %v2465_v48 = vrot.slane %v292_v35, %v20657_v25 }
 0x234   : > { %v8563_v16 = vpop.f32.mrb[68].mxu1  ;;  %19820 = vmatprep.subr.bf16.mxu1 %v19819_v8  ;;  %v8494_v20 = vadd.f32 %v8493_v15, %v8424_v4  ;;  %v8495_v21 = vpop.f32.mrb[69].mxu0  ;;  %v2438_v4 = vrot.slane %v2424_v58, %v20657_v25  ;;  %v600_v8 = vld [vmem:[%s20623_s22 + $0x838] sm:$0xff]  ;;  %v19839_v15 = vpack.c.bf16 %v1042_v3, %v598_v2 }
 0x235   : > { %v8565_v22 = vpop.f32.mrb[69].mxu1  ;;  %v19843_v17 = vpack.c.bf16 %v1044_v9, %v600_v8  ;;  %v599_v21 = vld [vmem:[%s20623_s22 + $0x830] sm:$0xff]  ;;  %v1052_v58 = vld [vmem:[%s20623_s22 + $0x1658] sm:$0x3] }
 0x236   : > { %v8564_v29 = vadd.f32 %v8563_v16, %v8494_v20  ;;  %v2440_v16 = vcombine.high %v2438_v4, %v2438_v4  ;;  %v1041_v20 = vld [vmem:[%s20623_s22 + $0x1600] sm:$0x3]  ;;  %v1043_v22 = vld [vmem:[%s20623_s22 + $0x1610] sm:$0x3] }
 0x237   : > { %v19845_v37 = vpack.c.bf16 %v1043_v22, %v599_v21 }
 0x238   : > { %12272 = vmatmul.mubr.f32.vlgmr.msra.gmra.mrb[122].mxu0 %v2380_v54  ;;  %v2422_v54 = vcombine.high %v2414_v39, %v2414_v39 }
 0x239   : > { %12342 = vmatmul.mubr.f32.vlgmr.msra.gmra.mrb[122].mxu1 %v2387_v59  ;;  %19818 = vmatpush1.bf16.xpose.msra.mxu0 %v19817_v27  ;;  %v593_v59 = vld [vmem:[%s20623_s22 + $0x800] sm:$0xff]  ;;  %v602_v27 = vld [vmem:[%s20623_s22 + $0x848] sm:$0xff] }
 0x23a   : > { %19822 = vmatpush1.bf16.xpose.msra.mxu1 %v19821_v28  ;;  %12411 = vmatprep.mubr.f32.mxu0 %v2405_v30  ;;  %v19833_v11 = vpack.c.bf16 %v1037_v60, %v593_v59  ;;  %v1046_v28 = vld [vmem:[%s20623_s22 + $0x1628] sm:$0x3]  ;;  %v293_v59 = vld [vmem:[%s20641_s29 + $0x218] sm:$0xff] }
 0x23b   : > { %19824 = vmatprep.subr.bf16.mxu0 %v19823_v31  ;;  %v8633_v40 = vpop.f32.mrb[70].mxu0  ;;  %12481 = vmatprep.mubr.f32.mxu1 %v2406_v32  ;;  %v2475_v3 = vcombine.high %v293_v59, %v293_v59  ;;  %v2482_v8 = vrot.slane %v293_v59, %v20657_v25 }
 0x23c   : > { %v8703_v41 = vpop.f32.mrb[70].mxu1  ;;  %19828 = vmatprep.subr.bf16.mxu1 %v19827_v33  ;;  %v8634_v45 = vadd.f32 %v8633_v40, %v8564_v29  ;;  %v8635_v46 = vpop.f32.mrb[71].mxu0  ;;  %v2455_v29 = vrot.slane %v2441_v18, %v20657_v25  ;;  %v604_v33 = vld [vmem:[%s20623_s22 + $0x858] sm:$0xff]  ;;  %v19847_v40 = vpack.c.bf16 %v1046_v28, %v602_v27 }
 0x23d   : > { %v8705_v47 = vpop.f32.mrb[71].mxu1  ;;  %v19851_v42 = vpack.c.bf16 %v1048_v34, %v604_v33  ;;  %v603_v46 = vld [vmem:[%s20623_s22 + $0x850] sm:$0xff]  ;;  %v1056_v18 = vld [vmem:[%s20623_s22 + $0x1678] sm:$0x3] }
 0x23e   : > { %v8704_v53 = vadd.f32 %v8703_v41, %v8634_v45  ;;  %v2457_v41 = vcombine.high %v2455_v29, %v2455_v29  ;;  %v1045_v45 = vld [vmem:[%s20623_s22 + $0x1620] sm:$0x3]  ;;  %v1047_v47 = vld [vmem:[%s20623_s22 + $0x1630] sm:$0x3] }
 0x23f   : > { %v19853_v61 = vpack.c.bf16 %v1047_v47, %v603_v46 }
 0x240   : > { %12412 = vmatmul.mubr.f32.vlgmr.msra.gmra.mrb[124].mxu0 %v2397_v14  ;;  %v2439_v14 = vcombine.high %v2431_v63, %v2431_v63 }
 0x241   : > { %12482 = vmatmul.mubr.f32.vlgmr.msra.gmra.mrb[124].mxu1 %v2404_v19  ;;  %19826 = vmatpush1.bf16.xpose.msra.mxu0 %v19825_v51  ;;  %v597_v19 = vld [vmem:[%s20623_s22 + $0x820] sm:$0xff]  ;;  %v606_v51 = vld [vmem:[%s20623_s22 + $0x868] sm:$0xff] }
 0x242   : > { %19830 = vmatpush1.bf16.xpose.msra.mxu1 %v19829_v52  ;;  %12551 = vmatprep.mubr.f32.mxu0 %v2422_v54  ;;  %v19841_v36 = vpack.c.bf16 %v1041_v20, %v597_v19  ;;  %v1050_v52 = vld [vmem:[%s20623_s22 + $0x1648] sm:$0x3]  ;;  %v294_v19 = vld [vmem:[%s20641_s29 + $0x220] sm:$0xff] }
 0x243   : > { %19832 = vmatprep.subr.bf16.mxu0 %v19831_v55  ;;  %v8773_v0 = vpop.f32.mrb[72].mxu0  ;;  %12621 = vmatprep.mubr.f32.mxu1 %v2423_v56  ;;  %v2492_v28 = vcombine.high %v294_v19, %v294_v19  ;;  %v2499_v33 = vrot.slane %v294_v19, %v20657_v25 }
 0x244   : > { %v8843_v1 = vpop.f32.mrb[72].mxu1  ;;  %19836 = vmatprep.subr.bf16.mxu1 %v19835_v57  ;;  %v8774_v5 = vadd.f32 %v8773_v0, %v8704_v53  ;;  %v8775_v6 = vpop.f32.mrb[73].mxu0  ;;  %v2472_v53 = vrot.slane %v2458_v43, %v20657_v25  ;;  %v608_v57 = vld [vmem:[%s20623_s22 + $0x878] sm:$0xff]  ;;  %v19855_v0 = vpack.c.bf16 %v1050_v52, %v606_v51 }
 0x245   : > { %v8845_v7 = vpop.f32.mrb[73].mxu1  ;;  %v19859_v2 = vpack.c.bf16 %v1052_v58, %v608_v57  ;;  %v607_v6 = vld [vmem:[%s20623_s22 + $0x870] sm:$0xff]  ;;  %v1060_v43 = vld [vmem:[%s20623_s22 + $0x1698] sm:$0x3] }
 0x246   : > { %v8844_v13 = vadd.f32 %v8843_v1, %v8774_v5  ;;  %v2474_v1 = vcombine.high %v2472_v53, %v2472_v53  ;;  %v1049_v5 = vld [vmem:[%s20623_s22 + $0x1640] sm:$0x3]  ;;  %v1051_v7 = vld [vmem:[%s20623_s22 + $0x1650] sm:$0x3] }
 0x247   : > { %v19861_v21 = vpack.c.bf16 %v1051_v7, %v607_v6 }
 0x248   : > { %12552 = vmatmul.mubr.f32.vlgmr.msra.gmra.mrb[126].mxu0 %v2414_v39  ;;  %v2456_v39 = vcombine.high %v2448_v23, %v2448_v23 }
 0x249   : > { %12622 = vmatmul.mubr.f32.vlgmr.msra.gmra.mrb[126].mxu1 %v2421_v44  ;;  %19834 = vmatpush1.bf16.xpose.msra.mxu0 %v19833_v11  ;;  %v601_v44 = vld [vmem:[%s20623_s22 + $0x840] sm:$0xff]  ;;  %v610_v11 = vld [vmem:[%s20623_s22 + $0x888] sm:$0xff] }
 0x24a   : > { %19838 = vmatpush1.bf16.xpose.msra.mxu1 %v19837_v12  ;;  %12691 = vmatprep.mubr.f32.mxu0 %v2439_v14  ;;  %v19849_v60 = vpack.c.bf16 %v1045_v45, %v601_v44  ;;  %v1054_v12 = vld [vmem:[%s20623_s22 + $0x1668] sm:$0x3] }
 0x24b   : > { %19840 = vmatprep.subr.bf16.mxu0 %v19839_v15  ;;  %v8913_v24 = vpop.f32.mrb[74].mxu0  ;;  %12761 = vmatprep.mubr.f32.mxu1 %v2440_v16  ;;  %v295_v44 = vld [vmem:[%s20641_s29 + $0x228] sm:$0xff] }
 0x24c   : > { %v8983_v26 = vpop.f32.mrb[74].mxu1  ;;  %19844 = vmatprep.subr.bf16.mxu1 %v19843_v17  ;;  %v8914_v30 = vadd.f32 %v8913_v24, %v8844_v13  ;;  %v8915_v31 = vpop.f32.mrb[75].mxu0  ;;  %v2489_v13 = vrot.slane %v2475_v3, %v20657_v25  ;;  %v612_v17 = vld [vmem:[%s20623_s22 + $0x898] sm:$0xff]  ;;  %v19863_v24 = vpack.c.bf16 %v1054_v12, %v610_v11  ;;  %v2509_v52 = vcombine.high %v295_v44, %v295_v44 }
 0x24d   : > { %v8985_v32 = vpop.f32.mrb[75].mxu1  ;;  %v19867_v27 = vpack.c.bf16 %v1056_v18, %v612_v17  ;;  %v611_v31 = vld [vmem:[%s20623_s22 + $0x890] sm:$0xff]  ;;  %v2516_v57 = vrot.slane %v295_v44, %v20657_v25  ;;  %v1064_v3 = vld [vmem:[%s20623_s22 + $0x16b8] sm:$0x3] }
 0x24e   : > { %v8984_v38 = vadd.f32 %v8983_v26, %v8914_v30  ;;  %v2491_v26 = vcombine.high %v2489_v13, %v2489_v13  ;;  %v1053_v30 = vld [vmem:[%s20623_s22 + $0x1660] sm:$0x3]  ;;  %v1055_v32 = vld [vmem:[%s20623_s22 + $0x1670] sm:$0x3] }
 0x24f   : > { %v19869_v46 = vpack.c.bf16 %v1055_v32, %v611_v31 }
 0x250   : > { %12692 = vmatmul.mubr.f32.vlgmr.msra.gmra.mrb[128].mxu0 %v2431_v63  ;;  %v2473_v63 = vcombine.high %v2465_v48, %v2465_v48 }
 0x251   : > { %12762 = vmatmul.mubr.f32.vlgmr.msra.gmra.mrb[128].mxu1 %v2438_v4  ;;  %19842 = vmatpush1.bf16.xpose.msra.mxu0 %v19841_v36  ;;  %v605_v4 = vld [vmem:[%s20623_s22 + $0x860] sm:$0xff]  ;;  %v614_v36 = vld [vmem:[%s20623_s22 + $0x8a8] sm:$0xff] }
 0x252   : > { %19846 = vmatpush1.bf16.xpose.msra.mxu1 %v19845_v37  ;;  %12831 = vmatprep.mubr.f32.mxu0 %v2456_v39  ;;  %v19857_v20 = vpack.c.bf16 %v1049_v5, %v605_v4  ;;  %v1058_v37 = vld [vmem:[%s20623_s22 + $0x1688] sm:$0x3]  ;;  %v296_v4 = vld [vmem:[%s20641_s29 + $0x230] sm:$0xff] }
 0x253   : > { %19848 = vmatprep.subr.bf16.mxu0 %v19847_v40  ;;  %v9053_v49 = vpop.f32.mrb[76].mxu0  ;;  %12901 = vmatprep.mubr.f32.mxu1 %v2457_v41  ;;  %v2526_v12 = vcombine.high %v296_v4, %v296_v4  ;;  %v2533_v17 = vrot.slane %v296_v4, %v20657_v25 }
 0x254   : > { %v9123_v50 = vpop.f32.mrb[76].mxu1  ;;  %19852 = vmatprep.subr.bf16.mxu1 %v19851_v42  ;;  %v9054_v54 = vadd.f32 %v9053_v49, %v8984_v38  ;;  %v9055_v55 = vpop.f32.mrb[77].mxu0  ;;  %v2506_v38 = vrot.slane %v2492_v28, %v20657_v25  ;;  %v616_v42 = vld [vmem:[%s20623_s22 + $0x8b8] sm:$0xff]  ;;  %v19871_v49 = vpack.c.bf16 %v1058_v37, %v614_v36 }
 0x255   : > { %v9125_v56 = vpop.f32.mrb[77].mxu1  ;;  %v19875_v51 = vpack.c.bf16 %v1060_v43, %v616_v42  ;;  %v615_v55 = vld [vmem:[%s20623_s22 + $0x8b0] sm:$0xff]  ;;  %v1068_v28 = vld [vmem:[%s20623_s22 + $0x16d8] sm:$0x3] }
 0x256   : > { %v9124_v62 = vadd.f32 %v9123_v50, %v9054_v54  ;;  %v2508_v50 = vcombine.high %v2506_v38, %v2506_v38  ;;  %v1057_v54 = vld [vmem:[%s20623_s22 + $0x1680] sm:$0x3]  ;;  %v1059_v56 = vld [vmem:[%s20623_s22 + $0x1690] sm:$0x3] }
 0x257   : > { %v19877_v6 = vpack.c.bf16 %v1059_v56, %v615_v55 }
 0x258   : > { %12832 = vmatmul.mubr.f32.vlgmr.msra.gmra.mrb[130].mxu0 %v2448_v23  ;;  %v2490_v23 = vcombine.high %v2482_v8, %v2482_v8 }
 0x259   : > { %12902 = vmatmul.mubr.f32.vlgmr.msra.gmra.mrb[130].mxu1 %v2455_v29  ;;  %19850 = vmatpush1.bf16.xpose.msra.mxu0 %v19849_v60  ;;  %v609_v29 = vld [vmem:[%s20623_s22 + $0x880] sm:$0xff]  ;;  %v618_v60 = vld [vmem:[%s20623_s22 + $0x8c8] sm:$0xff] }
 0x25a   : > { %19854 = vmatpush1.bf16.xpose.msra.mxu1 %v19853_v61  ;;  %12971 = vmatprep.mubr.f32.mxu0 %v2473_v63  ;;  %v19865_v45 = vpack.c.bf16 %v1053_v30, %v609_v29  ;;  %v1062_v61 = vld [vmem:[%s20623_s22 + $0x16a8] sm:$0x3]  ;;  %v297_v29 = vld [vmem:[%s20641_s29 + $0x238] sm:$0xff] }
 0x25b   : > { %19856 = vmatprep.subr.bf16.mxu0 %v19855_v0  ;;  %v9193_v9 = vpop.f32.mrb[78].mxu0  ;;  %13041 = vmatprep.mubr.f32.mxu1 %v2474_v1  ;;  %v2543_v37 = vcombine.high %v297_v29, %v297_v29  ;;  %v2550_v42 = vrot.slane %v297_v29, %v20657_v25 }
 0x25c   : > { %v9263_v10 = vpop.f32.mrb[78].mxu1  ;;  %19860 = vmatprep.subr.bf16.mxu1 %v19859_v2  ;;  %v9194_v14 = vadd.f32 %v9193_v9, %v9124_v62  ;;  %v9195_v15 = vpop.f32.mrb[79].mxu0  ;;  %v2523_v62 = vrot.slane %v2509_v52, %v20657_v25  ;;  %v620_v2 = vld [vmem:[%s20623_s22 + $0x8d8] sm:$0xff]  ;;  %v19879_v9 = vpack.c.bf16 %v1062_v61, %v618_v60 }
 0x25d   : > { %v9265_v16 = vpop.f32.mrb[79].mxu1  ;;  %v19883_v11 = vpack.c.bf16 %v1064_v3, %v620_v2  ;;  %v619_v15 = vld [vmem:[%s20623_s22 + $0x8d0] sm:$0xff]  ;;  %v1072_v52 = vld [vmem:[%s20623_s22 + $0x16f8] sm:$0x3] }
 0x25e   : > { %v9264_v22 = vadd.f32 %v9263_v10, %v9194_v14  ;;  %v2525_v10 = vcombine.high %v2523_v62, %v2523_v62  ;;  %v1061_v14 = vld [vmem:[%s20623_s22 + $0x16a0] sm:$0x3]  ;;  %v1063_v16 = vld [vmem:[%s20623_s22 + $0x16b0] sm:$0x3] }
 0x25f   : > { %v19885_v31 = vpack.c.bf16 %v1063_v16, %v619_v15 }
 0x260   : > { %12972 = vmatmul.mubr.f32.vlgmr.msra.gmra.mrb[132].mxu0 %v2465_v48  ;;  %v2507_v48 = vcombine.high %v2499_v33, %v2499_v33 }
 0x261   : > { %13042 = vmatmul.mubr.f32.vlgmr.msra.gmra.mrb[132].mxu1 %v2472_v53  ;;  %19858 = vmatpush1.bf16.xpose.msra.mxu0 %v19857_v20  ;;  %v613_v53 = vld [vmem:[%s20623_s22 + $0x8a0] sm:$0xff]  ;;  %v622_v20 = vld [vmem:[%s20623_s22 + $0x8e8] sm:$0xff] }
 0x262   : > { %19862 = vmatpush1.bf16.xpose.msra.mxu1 %v19861_v21  ;;  %13111 = vmatprep.mubr.f32.mxu0 %v2490_v23  ;;  %v19873_v5 = vpack.c.bf16 %v1057_v54, %v613_v53  ;;  %v1066_v21 = vld [vmem:[%s20623_s22 + $0x16c8] sm:$0x3]  ;;  %v298_v53 = vld [vmem:[%s20641_s29 + $0x240] sm:$0xff] }
 0x263   : > { %19864 = vmatprep.subr.bf16.mxu0 %v19863_v24  ;;  %v9333_v34 = vpop.f32.mrb[80].mxu0  ;;  %13181 = vmatprep.mubr.f32.mxu1 %v2491_v26  ;;  %v2560_v61 = vcombine.high %v298_v53, %v298_v53  ;;  %v2567_v2 = vrot.slane %v298_v53, %v20657_v25 }
 0x264   : > { %v9403_v35 = vpop.f32.mrb[80].mxu1  ;;  %19868 = vmatprep.subr.bf16.mxu1 %v19867_v27  ;;  %v9334_v39 = vadd.f32 %v9333_v34, %v9264_v22  ;;  %v9335_v40 = vpop.f32.mrb[81].mxu0  ;;  %v2540_v22 = vrot.slane %v2526_v12, %v20657_v25  ;;  %v624_v27 = vld [vmem:[%s20623_s22 + $0x8f8] sm:$0xff]  ;;  %v19887_v34 = vpack.c.bf16 %v1066_v21, %v622_v20 }
 0x265   : > { %v9405_v41 = vpop.f32.mrb[81].mxu1  ;;  %v19891_v36 = vpack.c.bf16 %v1068_v28, %v624_v27  ;;  %v623_v40 = vld [vmem:[%s20623_s22 + $0x8f0] sm:$0xff]  ;;  %v1076_v12 = vld [vmem:[%s20623_s22 + $0x1718] sm:$0x3] }
 0x266   : > { %v9404_v47 = vadd.f32 %v9403_v35, %v9334_v39  ;;  %v2542_v35 = vcombine.high %v2540_v22, %v2540_v22  ;;  %v1065_v39 = vld [vmem:[%s20623_s22 + $0x16c0] sm:$0x3]  ;;  %v1067_v41 = vld [vmem:[%s20623_s22 + $0x16d0] sm:$0x3] }
 0x267   : > { %v19893_v55 = vpack.c.bf16 %v1067_v41, %v623_v40 }
 0x268   : > { %13112 = vmatmul.mubr.f32.vlgmr.msra.gmra.mrb[134].mxu0 %v2482_v8  ;;  %v2524_v8 = vcombine.high %v2516_v57, %v2516_v57 }
 0x269   : > { %13182 = vmatmul.mubr.f32.vlgmr.msra.gmra.mrb[134].mxu1 %v2489_v13  ;;  %19866 = vmatpush1.bf16.xpose.msra.mxu0 %v19865_v45  ;;  %v617_v13 = vld [vmem:[%s20623_s22 + $0x8c0] sm:$0xff]  ;;  %v626_v45 = vld [vmem:[%s20623_s22 + $0x908] sm:$0xff] }
 0x26a   : > { %19870 = vmatpush1.bf16.xpose.msra.mxu1 %v19869_v46  ;;  %13251 = vmatprep.mubr.f32.mxu0 %v2507_v48  ;;  %v19881_v30 = vpack.c.bf16 %v1061_v14, %v617_v13  ;;  %v1070_v46 = vld [vmem:[%s20623_s22 + $0x16e8] sm:$0x3] }
 0x26b   : > { %19872 = vmatprep.subr.bf16.mxu0 %v19871_v49  ;;  %v9473_v58 = vpop.f32.mrb[82].mxu0  ;;  %13321 = vmatprep.mubr.f32.mxu1 %v2508_v50  ;;  %v299_v13 = vld [vmem:[%s20641_s29 + $0x248] sm:$0xff] }
 0x26c   : > { %v9543_v59 = vpop.f32.mrb[82].mxu1  ;;  %19876 = vmatprep.subr.bf16.mxu1 %v19875_v51  ;;  %v9474_v63 = vadd.f32 %v9473_v58, %v9404_v47  ;;  %v9475_v0 = vpop.f32.mrb[83].mxu0  ;;  %v2557_v47 = vrot.slane %v2543_v37, %v20657_v25  ;;  %v628_v51 = vld [vmem:[%s20623_s22 + $0x918] sm:$0xff]  ;;  %v19895_v58 = vpack.c.bf16 %v1070_v46, %v626_v45  ;;  %v2577_v21 = vcombine.high %v299_v13, %v299_v13 }
 0x26d   : > { %v9545_v1 = vpop.f32.mrb[83].mxu1  ;;  %v19899_v60 = vpack.c.bf16 %v1072_v52, %v628_v51  ;;  %v627_v0 = vld [vmem:[%s20623_s22 + $0x910] sm:$0xff]  ;;  %v2584_v27 = vrot.slane %v299_v13, %v20657_v25  ;;  %v1080_v37 = vld [vmem:[%s20623_s22 + $0x1738] sm:$0x3] }
 0x26e   : > { %v9544_v7 = vadd.f32 %v9543_v59, %v9474_v63  ;;  %v2559_v59 = vcombine.high %v2557_v47, %v2557_v47  ;;  %v1069_v63 = vld [vmem:[%s20623_s22 + $0x16e0] sm:$0x3]  ;;  %v1071_v1 = vld [vmem:[%s20623_s22 + $0x16f0] sm:$0x3] }
 0x26f   : > { %v19901_v15 = vpack.c.bf16 %v1071_v1, %v627_v0 }
 0x270   : > { %13252 = vmatmul.mubr.f32.vlgmr.msra.gmra.mrb[136].mxu0 %v2499_v33  ;;  %v2541_v33 = vcombine.high %v2533_v17, %v2533_v17 }
 0x271   : > { %13322 = vmatmul.mubr.f32.vlgmr.msra.gmra.mrb[136].mxu1 %v2506_v38  ;;  %19874 = vmatpush1.bf16.xpose.msra.mxu0 %v19873_v5  ;;  %v621_v38 = vld [vmem:[%s20623_s22 + $0x8e0] sm:$0xff]  ;;  %v630_v5 = vld [vmem:[%s20623_s22 + $0x928] sm:$0xff] }
 0x272   : > { %19878 = vmatpush1.bf16.xpose.msra.mxu1 %v19877_v6  ;;  %13391 = vmatprep.mubr.f32.mxu0 %v2524_v8  ;;  %v19889_v54 = vpack.c.bf16 %v1065_v39, %v621_v38  ;;  %v1074_v6 = vld [vmem:[%s20623_s22 + $0x1708] sm:$0x3]  ;;  %v300_v38 = vld [vmem:[%s20641_s29 + $0x250] sm:$0xff] }
 0x273   : > { %19880 = vmatprep.subr.bf16.mxu0 %v19879_v9  ;;  %v9613_v18 = vpop.f32.mrb[84].mxu0  ;;  %13461 = vmatprep.mubr.f32.mxu1 %v2525_v10  ;;  %v2594_v46 = vcombine.high %v300_v38, %v300_v38  ;;  %v2601_v51 = vrot.slane %v300_v38, %v20657_v25 }
 0x274   : > { %v9683_v19 = vpop.f32.mrb[84].mxu1  ;;  %19884 = vmatprep.subr.bf16.mxu1 %v19883_v11  ;;  %v9614_v23 = vadd.f32 %v9613_v18, %v9544_v7  ;;  %v9615_v24 = vpop.f32.mrb[85].mxu0  ;;  %v2574_v7 = vrot.slane %v2560_v61, %v20657_v25  ;;  %v632_v11 = vld [vmem:[%s20623_s22 + $0x938] sm:$0xff]  ;;  %v19903_v18 = vpack.c.bf16 %v1074_v6, %v630_v5 }
 0x275   : > { %v9685_v26 = vpop.f32.mrb[85].mxu1  ;;  %v19907_v20 = vpack.c.bf16 %v1076_v12, %v632_v11  ;;  %v631_v24 = vld [vmem:[%s20623_s22 + $0x930] sm:$0xff]  ;;  %v1084_v61 = vld [vmem:[%s20623_s22 + $0x1758] sm:$0x3] }
 0x276   : > { %v9684_v32 = vadd.f32 %v9683_v19, %v9614_v23  ;;  %v2576_v19 = vcombine.high %v2574_v7, %v2574_v7  ;;  %v1073_v23 = vld [vmem:[%s20623_s22 + $0x1700] sm:$0x3]  ;;  %v1075_v26 = vld [vmem:[%s20623_s22 + $0x1710] sm:$0x3] }
 0x277   : > { %v19909_v40 = vpack.c.bf16 %v1075_v26, %v631_v24 }
 0x278   : > { %13392 = vmatmul.mubr.f32.vlgmr.msra.gmra.mrb[138].mxu0 %v2516_v57  ;;  %v2558_v57 = vcombine.high %v2550_v42, %v2550_v42 }
 0x279   : > { %13462 = vmatmul.mubr.f32.vlgmr.msra.gmra.mrb[138].mxu1 %v2523_v62  ;;  %19882 = vmatpush1.bf16.xpose.msra.mxu0 %v19881_v30  ;;  %v625_v62 = vld [vmem:[%s20623_s22 + $0x900] sm:$0xff]  ;;  %v634_v30 = vld [vmem:[%s20623_s22 + $0x948] sm:$0xff] }
 0x27a   : > { %19886 = vmatpush1.bf16.xpose.msra.mxu1 %v19885_v31  ;;  %13531 = vmatprep.mubr.f32.mxu0 %v2541_v33  ;;  %v19897_v14 = vpack.c.bf16 %v1069_v63, %v625_v62  ;;  %v1078_v31 = vld [vmem:[%s20623_s22 + $0x1728] sm:$0x3]  ;;  %v301_v62 = vld [vmem:[%s20641_s29 + $0x258] sm:$0xff] }
 0x27b   : > { %19888 = vmatprep.subr.bf16.mxu0 %v19887_v34  ;;  %v9753_v43 = vpop.f32.mrb[86].mxu0  ;;  %13601 = vmatprep.mubr.f32.mxu1 %v2542_v35  ;;  %v2611_v6 = vcombine.high %v301_v62, %v301_v62  ;;  %v2618_v11 = vrot.slane %v301_v62, %v20657_v25 }
 0x27c   : > { %v9823_v44 = vpop.f32.mrb[86].mxu1  ;;  %19892 = vmatprep.subr.bf16.mxu1 %v19891_v36  ;;  %v9754_v48 = vadd.f32 %v9753_v43, %v9684_v32  ;;  %v9755_v49 = vpop.f32.mrb[87].mxu0  ;;  %v2591_v32 = vrot.slane %v2577_v21, %v20657_v25  ;;  %v636_v36 = vld [vmem:[%s20623_s22 + $0x958] sm:$0xff]  ;;  %v19911_v43 = vpack.c.bf16 %v1078_v31, %v634_v30 }
 0x27d   : > { %v9825_v50 = vpop.f32.mrb[87].mxu1  ;;  %v19915_v45 = vpack.c.bf16 %v1080_v37, %v636_v36  ;;  %v635_v49 = vld [vmem:[%s20623_s22 + $0x950] sm:$0xff]  ;;  %v1088_v21 = vld [vmem:[%s20623_s22 + $0x1778] sm:$0x3] }
 0x27e   : > { %v9824_v56 = vadd.f32 %v9823_v44, %v9754_v48  ;;  %v2593_v44 = vcombine.high %v2591_v32, %v2591_v32  ;;  %v1077_v48 = vld [vmem:[%s20623_s22 + $0x1720] sm:$0x3]  ;;  %v1079_v50 = vld [vmem:[%s20623_s22 + $0x1730] sm:$0x3] }
 0x27f   : > { %v19917_v0 = vpack.c.bf16 %v1079_v50, %v635_v49 }
 0x280   : > { %13532 = vmatmul.mubr.f32.vlgmr.msra.gmra.mrb[140].mxu0 %v2533_v17  ;;  %v2575_v17 = vcombine.high %v2567_v2, %v2567_v2 }
 0x281   : > { %13602 = vmatmul.mubr.f32.vlgmr.msra.gmra.mrb[140].mxu1 %v2540_v22  ;;  %19890 = vmatpush1.bf16.xpose.msra.mxu0 %v19889_v54  ;;  %v629_v22 = vld [vmem:[%s20623_s22 + $0x920] sm:$0xff]  ;;  %v638_v54 = vld [vmem:[%s20623_s22 + $0x968] sm:$0xff] }
 0x282   : > { %19894 = vmatpush1.bf16.xpose.msra.mxu1 %v19893_v55  ;;  %13671 = vmatprep.mubr.f32.mxu0 %v2558_v57  ;;  %v19905_v39 = vpack.c.bf16 %v1073_v23, %v629_v22  ;;  %v1082_v55 = vld [vmem:[%s20623_s22 + $0x1748] sm:$0x3]  ;;  %v302_v22 = vld [vmem:[%s20641_s29 + $0x260] sm:$0xff] }
 0x283   : > { %19896 = vmatprep.subr.bf16.mxu0 %v19895_v58  ;;  %v9893_v3 = vpop.f32.mrb[88].mxu0  ;;  %13741 = vmatprep.mubr.f32.mxu1 %v2559_v59  ;;  %v2628_v31 = vcombine.high %v302_v22, %v302_v22  ;;  %v2635_v36 = vrot.slane %v302_v22, %v20657_v25 }
 0x284   : > { %v9963_v4 = vpop.f32.mrb[88].mxu1  ;;  %19900 = vmatprep.subr.bf16.mxu1 %v19899_v60  ;;  %v9894_v8 = vadd.f32 %v9893_v3, %v9824_v56  ;;  %v9895_v9 = vpop.f32.mrb[89].mxu0  ;;  %v2608_v56 = vrot.slane %v2594_v46, %v20657_v25  ;;  %v640_v60 = vld [vmem:[%s20623_s22 + $0x978] sm:$0xff]  ;;  %v19919_v3 = vpack.c.bf16 %v1082_v55, %v638_v54 }
 0x285   : > { %v9965_v10 = vpop.f32.mrb[89].mxu1  ;;  %v19923_v5 = vpack.c.bf16 %v1084_v61, %v640_v60  ;;  %v639_v9 = vld [vmem:[%s20623_s22 + $0x970] sm:$0xff]  ;;  %v1092_v46 = vld [vmem:[%s20623_s22 + $0x1798] sm:$0x3] }
 0x286   : > { %v9964_v16 = vadd.f32 %v9963_v4, %v9894_v8  ;;  %v2610_v4 = vcombine.high %v2608_v56, %v2608_v56  ;;  %v1081_v8 = vld [vmem:[%s20623_s22 + $0x1740] sm:$0x3]  ;;  %v1083_v10 = vld [vmem:[%s20623_s22 + $0x1750] sm:$0x3] }
 0x287   : > { %v19925_v24 = vpack.c.bf16 %v1083_v10, %v639_v9 }
 0x288   : > { %13672 = vmatmul.mubr.f32.vlgmr.msra.gmra.mrb[142].mxu0 %v2550_v42  ;;  %v2592_v42 = vcombine.high %v2584_v27, %v2584_v27 }
 0x289   : > { %13742 = vmatmul.mubr.f32.vlgmr.msra.gmra.mrb[142].mxu1 %v2557_v47  ;;  %19898 = vmatpush1.bf16.xpose.msra.mxu0 %v19897_v14  ;;  %v633_v47 = vld [vmem:[%s20623_s22 + $0x940] sm:$0xff]  ;;  %v642_v14 = vld [vmem:[%s20623_s22 + $0x988] sm:$0xff] }
 0x28a   : > { %19902 = vmatpush1.bf16.xpose.msra.mxu1 %v19901_v15  ;;  %13811 = vmatprep.mubr.f32.mxu0 %v2575_v17  ;;  %v19913_v63 = vpack.c.bf16 %v1077_v48, %v633_v47  ;;  %v1086_v15 = vld [vmem:[%s20623_s22 + $0x1768] sm:$0x3] }
 0x28b   : > { %19904 = vmatprep.subr.bf16.mxu0 %v19903_v18  ;;  %v10033_v28 = vpop.f32.mrb[90].mxu0  ;;  %13881 = vmatprep.mubr.f32.mxu1 %v2576_v19  ;;  %v303_v47 = vld [vmem:[%s20641_s29 + $0x268] sm:$0xff] }
 0x28c   : > { %v10103_v29 = vpop.f32.mrb[90].mxu1  ;;  %19908 = vmatprep.subr.bf16.mxu1 %v19907_v20  ;;  %v10034_v33 = vadd.f32 %v10033_v28, %v9964_v16  ;;  %v10035_v34 = vpop.f32.mrb[91].mxu0  ;;  %v2625_v16 = vrot.slane %v2611_v6, %v20657_v25  ;;  %v644_v20 = vld [vmem:[%s20623_s22 + $0x998] sm:$0xff]  ;;  %v19927_v28 = vpack.c.bf16 %v1086_v15, %v642_v14  ;;  %v2645_v55 = vcombine.high %v303_v47, %v303_v47 }
 0x28d   : > { %v10105_v35 = vpop.f32.mrb[91].mxu1  ;;  %v19931_v30 = vpack.c.bf16 %v1088_v21, %v644_v20  ;;  %v643_v34 = vld [vmem:[%s20623_s22 + $0x990] sm:$0xff]  ;;  %v2652_v60 = vrot.slane %v303_v47, %v20657_v25  ;;  %v1096_v6 = vld [vmem:[%s20623_s22 + $0x17b8] sm:$0x3] }
 0x28e   : > { %v10104_v41 = vadd.f32 %v10103_v29, %v10034_v33  ;;  %v2627_v29 = vcombine.high %v2625_v16, %v2625_v16  ;;  %v1085_v33 = vld [vmem:[%s20623_s22 + $0x1760] sm:$0x3]  ;;  %v1087_v35 = vld [vmem:[%s20623_s22 + $0x1770] sm:$0x3] }
 0x28f   : > { %v19933_v49 = vpack.c.bf16 %v1087_v35, %v643_v34 }
 0x290   : > { %13812 = vmatmul.mubr.f32.vlgmr.msra.gmra.mrb[144].mxu0 %v2567_v2  ;;  %v2609_v2 = vcombine.high %v2601_v51, %v2601_v51 }
 0x291   : > { %13882 = vmatmul.mubr.f32.vlgmr.msra.gmra.mrb[144].mxu1 %v2574_v7  ;;  %19906 = vmatpush1.bf16.xpose.msra.mxu0 %v19905_v39  ;;  %v637_v7 = vld [vmem:[%s20623_s22 + $0x960] sm:$0xff]  ;;  %v646_v39 = vld [vmem:[%s20623_s22 + $0x9a8] sm:$0xff] }
 0x292   : > { %19910 = vmatpush1.bf16.xpose.msra.mxu1 %v19909_v40  ;;  %13951 = vmatprep.mubr.f32.mxu0 %v2592_v42  ;;  %v19921_v23 = vpack.c.bf16 %v1081_v8, %v637_v7  ;;  %v1090_v40 = vld [vmem:[%s20623_s22 + $0x1788] sm:$0x3]  ;;  %v304_v7 = vld [vmem:[%s20641_s29 + $0x270] sm:$0xff] }
 0x293   : > { %19912 = vmatprep.subr.bf16.mxu0 %v19911_v43  ;;  %v10173_v52 = vpop.f32.mrb[92].mxu0  ;;  %14021 = vmatprep.mubr.f32.mxu1 %v2593_v44  ;;  %v2662_v15 = vcombine.high %v304_v7, %v304_v7  ;;  %v2669_v20 = vrot.slane %v304_v7, %v20657_v25 }
 0x294   : > { %v10243_v53 = vpop.f32.mrb[92].mxu1  ;;  %19916 = vmatprep.subr.bf16.mxu1 %v19915_v45  ;;  %v10174_v57 = vadd.f32 %v10173_v52, %v10104_v41  ;;  %v10175_v58 = vpop.f32.mrb[93].mxu0  ;;  %v2642_v41 = vrot.slane %v2628_v31, %v20657_v25  ;;  %v648_v45 = vld [vmem:[%s20623_s22 + $0x9b8] sm:$0xff]  ;;  %v19935_v52 = vpack.c.bf16 %v1090_v40, %v646_v39 }
 0x295   : > { %v10245_v59 = vpop.f32.mrb[93].mxu1  ;;  %v19939_v54 = vpack.c.bf16 %v1092_v46, %v648_v45  ;;  %v647_v58 = vld [vmem:[%s20623_s22 + $0x9b0] sm:$0xff]  ;;  %v1100_v31 = vld [vmem:[%s20623_s22 + $0x17d8] sm:$0x3] }
 0x296   : > { %v10244_v1 = vadd.f32 %v10243_v53, %v10174_v57  ;;  %v2644_v53 = vcombine.high %v2642_v41, %v2642_v41  ;;  %v1089_v57 = vld [vmem:[%s20623_s22 + $0x1780] sm:$0x3]  ;;  %v1091_v59 = vld [vmem:[%s20623_s22 + $0x1790] sm:$0x3] }
 0x297   : > { %v19941_v9 = vpack.c.bf16 %v1091_v59, %v647_v58 }
 0x298   : > { %13952 = vmatmul.mubr.f32.vlgmr.msra.gmra.mrb[146].mxu0 %v2584_v27  ;;  %v2626_v27 = vcombine.high %v2618_v11, %v2618_v11 }
 0x299   : > { %14022 = vmatmul.mubr.f32.vlgmr.msra.gmra.mrb[146].mxu1 %v2591_v32  ;;  %19914 = vmatpush1.bf16.xpose.msra.mxu0 %v19913_v63  ;;  %v641_v32 = vld [vmem:[%s20623_s22 + $0x980] sm:$0xff]  ;;  %v650_v63 = vld [vmem:[%s20623_s22 + $0x9c8] sm:$0xff] }
 0x29a   : > { %19918 = vmatpush1.bf16.xpose.msra.mxu1 %v19917_v0  ;;  %14091 = vmatprep.mubr.f32.mxu0 %v2609_v2  ;;  %v19929_v48 = vpack.c.bf16 %v1085_v33, %v641_v32  ;;  %v1094_v0 = vld [vmem:[%s20623_s22 + $0x17a8] sm:$0x3]  ;;  %v305_v32 = vld [vmem:[%s20641_s29 + $0x278] sm:$0xff] }
 0x29b   : > { %19920 = vmatprep.subr.bf16.mxu0 %v19919_v3  ;;  %v10313_v12 = vpop.f32.mrb[94].mxu0  ;;  %14161 = vmatprep.mubr.f32.mxu1 %v2610_v4  ;;  %v2679_v40 = vcombine.high %v305_v32, %v305_v32  ;;  %v2686_v45 = vrot.slane %v305_v32, %v20657_v25 }
 0x29c   : > { %v10383_v13 = vpop.f32.mrb[94].mxu1  ;;  %19924 = vmatprep.subr.bf16.mxu1 %v19923_v5  ;;  %v10314_v17 = vadd.f32 %v10313_v12, %v10244_v1  ;;  %v10315_v18 = vpop.f32.mrb[95].mxu0  ;;  %v2659_v1 = vrot.slane %v2645_v55, %v20657_v25  ;;  %v652_v5 = vld [vmem:[%s20623_s22 + $0x9d8] sm:$0xff]  ;;  %v19943_v12 = vpack.c.bf16 %v1094_v0, %v650_v63 }
 0x29d   : > { %v10385_v19 = vpop.f32.mrb[95].mxu1  ;;  %v19947_v14 = vpack.c.bf16 %v1096_v6, %v652_v5  ;;  %v651_v18 = vld [vmem:[%s20623_s22 + $0x9d0] sm:$0xff]  ;;  %v1104_v55 = vld [vmem:[%s20623_s22 + $0x17f8] sm:$0x3] }
 0x29e   : > { %v10384_v26 = vadd.f32 %v10383_v13, %v10314_v17  ;;  %v2661_v13 = vcombine.high %v2659_v1, %v2659_v1  ;;  %v1093_v17 = vld [vmem:[%s20623_s22 + $0x17a0] sm:$0x3]  ;;  %v1095_v19 = vld [vmem:[%s20623_s22 + $0x17b0] sm:$0x3] }
 0x29f   : > { %v19949_v34 = vpack.c.bf16 %v1095_v19, %v651_v18 }
 0x2a0   : > { %14092 = vmatmul.mubr.f32.vlgmr.msra.gmra.mrb[148].mxu0 %v2601_v51  ;;  %v2643_v51 = vcombine.high %v2635_v36, %v2635_v36 }
 0x2a1   : > { %14162 = vmatmul.mubr.f32.vlgmr.msra.gmra.mrb[148].mxu1 %v2608_v56  ;;  %19922 = vmatpush1.bf16.xpose.msra.mxu0 %v19921_v23  ;;  %v645_v56 = vld [vmem:[%s20623_s22 + $0x9a0] sm:$0xff]  ;;  %v654_v23 = vld [vmem:[%s20623_s22 + $0x9e8] sm:$0xff] }
 0x2a2   : > { %19926 = vmatpush1.bf16.xpose.msra.mxu1 %v19925_v24  ;;  %14231 = vmatprep.mubr.f32.mxu0 %v2626_v27  ;;  %v19937_v8 = vpack.c.bf16 %v1089_v57, %v645_v56  ;;  %v1098_v24 = vld [vmem:[%s20623_s22 + $0x17c8] sm:$0x3]  ;;  %v306_v56 = vld [vmem:[%s20641_s29 + $0x280] sm:$0xff] }
 0x2a3   : > { %19928 = vmatprep.subr.bf16.mxu0 %v19927_v28  ;;  %v10453_v37 = vpop.f32.mrb[96].mxu0  ;;  %14301 = vmatprep.mubr.f32.mxu1 %v2627_v29  ;;  %v2696_v0 = vcombine.high %v306_v56, %v306_v56  ;;  %v2703_v5 = vrot.slane %v306_v56, %v20657_v25 }
 0x2a4   : > { %v10523_v38 = vpop.f32.mrb[96].mxu1  ;;  %19932 = vmatprep.subr.bf16.mxu1 %v19931_v30  ;;  %v10454_v42 = vadd.f32 %v10453_v37, %v10384_v26  ;;  %v10455_v43 = vpop.f32.mrb[97].mxu0  ;;  %v2676_v26 = vrot.slane %v2662_v15, %v20657_v25  ;;  %v656_v30 = vld [vmem:[%s20623_s22 + $0x9f8] sm:$0xff]  ;;  %v19951_v37 = vpack.c.bf16 %v1098_v24, %v654_v23 }
 0x2a5   : > { %v10525_v44 = vpop.f32.mrb[97].mxu1  ;;  %v19955_v39 = vpack.c.bf16 %v1100_v31, %v656_v30  ;;  %v655_v43 = vld [vmem:[%s20623_s22 + $0x9f0] sm:$0xff]  ;;  %v1108_v15 = vld [vmem:[%s20623_s22 + $0x1818] sm:$0x3] }
 0x2a6   : > { %v10524_v50 = vadd.f32 %v10523_v38, %v10454_v42  ;;  %v2678_v38 = vcombine.high %v2676_v26, %v2676_v26  ;;  %v1097_v42 = vld [vmem:[%s20623_s22 + $0x17c0] sm:$0x3]  ;;  %v1099_v44 = vld [vmem:[%s20623_s22 + $0x17d0] sm:$0x3] }
 0x2a7   : > { %v19957_v58 = vpack.c.bf16 %v1099_v44, %v655_v43 }
 0x2a8   : > { %14232 = vmatmul.mubr.f32.vlgmr.msra.gmra.mrb[150].mxu0 %v2618_v11  ;;  %v2660_v11 = vcombine.high %v2652_v60, %v2652_v60 }
 0x2a9   : > { %14302 = vmatmul.mubr.f32.vlgmr.msra.gmra.mrb[150].mxu1 %v2625_v16  ;;  %19930 = vmatpush1.bf16.xpose.msra.mxu0 %v19929_v48  ;;  %v649_v16 = vld [vmem:[%s20623_s22 + $0x9c0] sm:$0xff]  ;;  %v658_v48 = vld [vmem:[%s20623_s22 + $0xa08] sm:$0xff] }
 0x2aa   : > { %19934 = vmatpush1.bf16.xpose.msra.mxu1 %v19933_v49  ;;  %14371 = vmatprep.mubr.f32.mxu0 %v2643_v51  ;;  %v19945_v33 = vpack.c.bf16 %v1093_v17, %v649_v16  ;;  %v1102_v49 = vld [vmem:[%s20623_s22 + $0x17e8] sm:$0x3] }
 0x2ab   : > { %19936 = vmatprep.subr.bf16.mxu0 %v19935_v52  ;;  %v10593_v61 = vpop.f32.mrb[98].mxu0  ;;  %14441 = vmatprep.mubr.f32.mxu1 %v2644_v53  ;;  %v307_v16 = vld [vmem:[%s20641_s29 + $0x288] sm:$0xff] }
 0x2ac   : > { %v10663_v62 = vpop.f32.mrb[98].mxu1  ;;  %19940 = vmatprep.subr.bf16.mxu1 %v19939_v54  ;;  %v10594_v2 = vadd.f32 %v10593_v61, %v10524_v50  ;;  %v10595_v3 = vpop.f32.mrb[99].mxu0  ;;  %v2693_v50 = vrot.slane %v2679_v40, %v20657_v25  ;;  %v660_v54 = vld [vmem:[%s20623_s22 + $0xa18] sm:$0xff]  ;;  %v19959_v61 = vpack.c.bf16 %v1102_v49, %v658_v48  ;;  %v2713_v24 = vcombine.high %v307_v16, %v307_v16 }
 0x2ad   : > { %v10665_v4 = vpop.f32.mrb[99].mxu1  ;;  %v19963_v63 = vpack.c.bf16 %v1104_v55, %v660_v54  ;;  %v659_v3 = vld [vmem:[%s20623_s22 + $0xa10] sm:$0xff]  ;;  %v2720_v30 = vrot.slane %v307_v16, %v20657_v25  ;;  %v1112_v40 = vld [vmem:[%s20623_s22 + $0x1838] sm:$0x3] }
 0x2ae   : > { %v10664_v10 = vadd.f32 %v10663_v62, %v10594_v2  ;;  %v2695_v62 = vcombine.high %v2693_v50, %v2693_v50  ;;  %v1101_v2 = vld [vmem:[%s20623_s22 + $0x17e0] sm:$0x3]  ;;  %v1103_v4 = vld [vmem:[%s20623_s22 + $0x17f0] sm:$0x3] }
 0x2af   : > { %v19965_v18 = vpack.c.bf16 %v1103_v4, %v659_v3 }
 0x2b0   : > { %14372 = vmatmul.mubr.f32.vlgmr.msra.gmra.mrb[152].mxu0 %v2635_v36  ;;  %v2677_v36 = vcombine.high %v2669_v20, %v2669_v20 }
 0x2b1   : > { %14442 = vmatmul.mubr.f32.vlgmr.msra.gmra.mrb[152].mxu1 %v2642_v41  ;;  %19938 = vmatpush1.bf16.xpose.msra.mxu0 %v19937_v8  ;;  %v653_v41 = vld [vmem:[%s20623_s22 + $0x9e0] sm:$0xff]  ;;  %v662_v8 = vld [vmem:[%s20623_s22 + $0xa28] sm:$0xff] }
 0x2b2   : > { %19942 = vmatpush1.bf16.xpose.msra.mxu1 %v19941_v9  ;;  %14511 = vmatprep.mubr.f32.mxu0 %v2660_v11  ;;  %v19953_v57 = vpack.c.bf16 %v1097_v42, %v653_v41  ;;  %v1106_v9 = vld [vmem:[%s20623_s22 + $0x1808] sm:$0x3]  ;;  %v308_v41 = vld [vmem:[%s20641_s29 + $0x290] sm:$0xff] }
 0x2b3   : > { %19944 = vmatprep.subr.bf16.mxu0 %v19943_v12  ;;  %v10733_v21 = vpop.f32.mrb[100].mxu0  ;;  %14581 = vmatprep.mubr.f32.mxu1 %v2661_v13  ;;  %v2730_v49 = vcombine.high %v308_v41, %v308_v41  ;;  %v2737_v54 = vrot.slane %v308_v41, %v20657_v25 }
 0x2b4   : > { %v10803_v22 = vpop.f32.mrb[100].mxu1  ;;  %19948 = vmatprep.subr.bf16.mxu1 %v19947_v14  ;;  %v10734_v27 = vadd.f32 %v10733_v21, %v10664_v10  ;;  %v10735_v28 = vpop.f32.mrb[101].mxu0  ;;  %v2710_v10 = vrot.slane %v2696_v0, %v20657_v25  ;;  %v664_v14 = vld [vmem:[%s20623_s22 + $0xa38] sm:$0xff]  ;;  %v19967_v21 = vpack.c.bf16 %v1106_v9, %v662_v8 }
 0x2b5   : > { %v10805_v29 = vpop.f32.mrb[101].mxu1  ;;  %v19971_v23 = vpack.c.bf16 %v1108_v15, %v664_v14  ;;  %v663_v28 = vld [vmem:[%s20623_s22 + $0xa30] sm:$0xff]  ;;  %v1116_v0 = vld [vmem:[%s20623_s22 + $0x1858] sm:$0x3] }
 0x2b6   : > { %v10804_v35 = vadd.f32 %v10803_v22, %v10734_v27  ;;  %v2712_v22 = vcombine.high %v2710_v10, %v2710_v10  ;;  %v1105_v27 = vld [vmem:[%s20623_s22 + $0x1800] sm:$0x3]  ;;  %v1107_v29 = vld [vmem:[%s20623_s22 + $0x1810] sm:$0x3] }
 0x2b7   : > { %v19973_v43 = vpack.c.bf16 %v1107_v29, %v663_v28 }
 0x2b8   : > { %14512 = vmatmul.mubr.f32.vlgmr.msra.gmra.mrb[154].mxu0 %v2652_v60  ;;  %v2694_v60 = vcombine.high %v2686_v45, %v2686_v45 }
 0x2b9   : > { %14582 = vmatmul.mubr.f32.vlgmr.msra.gmra.mrb[154].mxu1 %v2659_v1  ;;  %19946 = vmatpush1.bf16.xpose.msra.mxu0 %v19945_v33  ;;  %v657_v1 = vld [vmem:[%s20623_s22 + $0xa00] sm:$0xff]  ;;  %v666_v33 = vld [vmem:[%s20623_s22 + $0xa48] sm:$0xff] }
 0x2ba   : > { %19950 = vmatpush1.bf16.xpose.msra.mxu1 %v19949_v34  ;;  %14651 = vmatprep.mubr.f32.mxu0 %v2677_v36  ;;  %v19961_v17 = vpack.c.bf16 %v1101_v2, %v657_v1  ;;  %v1110_v34 = vld [vmem:[%s20623_s22 + $0x1828] sm:$0x3]  ;;  %v309_v1 = vld [vmem:[%s20641_s29 + $0x298] sm:$0xff] }
 0x2bb   : > { %19952 = vmatprep.subr.bf16.mxu0 %v19951_v37  ;;  %v10873_v46 = vpop.f32.mrb[102].mxu0  ;;  %14721 = vmatprep.mubr.f32.mxu1 %v2678_v38  ;;  %v2747_v9 = vcombine.high %v309_v1, %v309_v1  ;;  %v2754_v14 = vrot.slane %v309_v1, %v20657_v25 }
 0x2bc   : > { %v10943_v47 = vpop.f32.mrb[102].mxu1  ;;  %19956 = vmatprep.subr.bf16.mxu1 %v19955_v39  ;;  %v10874_v51 = vadd.f32 %v10873_v46, %v10804_v35  ;;  %v10875_v52 = vpop.f32.mrb[103].mxu0  ;;  %v2727_v35 = vrot.slane %v2713_v24, %v20657_v25  ;;  %v668_v39 = vld [vmem:[%s20623_s22 + $0xa58] sm:$0xff]  ;;  %v19975_v46 = vpack.c.bf16 %v1110_v34, %v666_v33 }
 0x2bd   : > { %v10945_v53 = vpop.f32.mrb[103].mxu1  ;;  %v19979_v48 = vpack.c.bf16 %v1112_v40, %v668_v39  ;;  %v667_v52 = vld [vmem:[%s20623_s22 + $0xa50] sm:$0xff]  ;;  %v1120_v24 = vld [vmem:[%s20623_s22 + $0x1878] sm:$0x3] }
 0x2be   : > { %v10944_v59 = vadd.f32 %v10943_v47, %v10874_v51  ;;  %v2729_v47 = vcombine.high %v2727_v35, %v2727_v35  ;;  %v1109_v51 = vld [vmem:[%s20623_s22 + $0x1820] sm:$0x3]  ;;  %v1111_v53 = vld [vmem:[%s20623_s22 + $0x1830] sm:$0x3] }
 0x2bf   : > { %v19981_v3 = vpack.c.bf16 %v1111_v53, %v667_v52 }
 0x2c0   : > { %14652 = vmatmul.mubr.f32.vlgmr.msra.gmra.mrb[156].mxu0 %v2669_v20  ;;  %v2711_v20 = vcombine.high %v2703_v5, %v2703_v5 }
 0x2c1   : > { %14722 = vmatmul.mubr.f32.vlgmr.msra.gmra.mrb[156].mxu1 %v2676_v26  ;;  %19954 = vmatpush1.bf16.xpose.msra.mxu0 %v19953_v57  ;;  %v661_v26 = vld [vmem:[%s20623_s22 + $0xa20] sm:$0xff]  ;;  %v670_v57 = vld [vmem:[%s20623_s22 + $0xa68] sm:$0xff] }
 0x2c2   : > { %19958 = vmatpush1.bf16.xpose.msra.mxu1 %v19957_v58  ;;  %14791 = vmatprep.mubr.f32.mxu0 %v2694_v60  ;;  %v19969_v42 = vpack.c.bf16 %v1105_v27, %v661_v26  ;;  %v1114_v58 = vld [vmem:[%s20623_s22 + $0x1848] sm:$0x3]  ;;  %v310_v26 = vld [vmem:[%s20641_s29 + $0x2a0] sm:$0xff] }
 0x2c3   : > { %19960 = vmatprep.subr.bf16.mxu0 %v19959_v61  ;;  %v11013_v6 = vpop.f32.mrb[104].mxu0  ;;  %14861 = vmatprep.mubr.f32.mxu1 %v2695_v62  ;;  %v2764_v34 = vcombine.high %v310_v26, %v310_v26  ;;  %v2771_v39 = vrot.slane %v310_v26, %v20657_v25 }
 0x2c4   : > { %v11083_v7 = vpop.f32.mrb[104].mxu1  ;;  %19964 = vmatprep.subr.bf16.mxu1 %v19963_v63  ;;  %v11014_v11 = vadd.f32 %v11013_v6, %v10944_v59  ;;  %v11015_v12 = vpop.f32.mrb[105].mxu0  ;;  %v2744_v59 = vrot.slane %v2730_v49, %v20657_v25  ;;  %v672_v63 = vld [vmem:[%s20623_s22 + $0xa78] sm:$0xff]  ;;  %v19983_v6 = vpack.c.bf16 %v1114_v58, %v670_v57 }
 0x2c5   : > { %v11085_v13 = vpop.f32.mrb[105].mxu1  ;;  %v19987_v8 = vpack.c.bf16 %v1116_v0, %v672_v63  ;;  %v671_v12 = vld [vmem:[%s20623_s22 + $0xa70] sm:$0xff]  ;;  %v1124_v49 = vld [vmem:[%s20623_s22 + $0x1898] sm:$0x3] }
 0x2c6   : > { %v11084_v19 = vadd.f32 %v11083_v7, %v11014_v11  ;;  %v2746_v7 = vcombine.high %v2744_v59, %v2744_v59  ;;  %v1113_v11 = vld [vmem:[%s20623_s22 + $0x1840] sm:$0x3]  ;;  %v1115_v13 = vld [vmem:[%s20623_s22 + $0x1850] sm:$0x3] }
 0x2c7   : > { %v19989_v28 = vpack.c.bf16 %v1115_v13, %v671_v12 }
 0x2c8   : > { %14792 = vmatmul.mubr.f32.vlgmr.msra.gmra.mrb[158].mxu0 %v2686_v45  ;;  %v2728_v45 = vcombine.high %v2720_v30, %v2720_v30 }
 0x2c9   : > { %14862 = vmatmul.mubr.f32.vlgmr.msra.gmra.mrb[158].mxu1 %v2693_v50  ;;  %19962 = vmatpush1.bf16.xpose.msra.mxu0 %v19961_v17  ;;  %v665_v50 = vld [vmem:[%s20623_s22 + $0xa40] sm:$0xff]  ;;  %v674_v17 = vld [vmem:[%s20623_s22 + $0xa88] sm:$0xff] }
 0x2ca   : > { %19966 = vmatpush1.bf16.xpose.msra.mxu1 %v19965_v18  ;;  %14931 = vmatprep.mubr.f32.mxu0 %v2711_v20  ;;  %v19977_v2 = vpack.c.bf16 %v1109_v51, %v665_v50  ;;  %v1118_v18 = vld [vmem:[%s20623_s22 + $0x1868] sm:$0x3] }
 0x2cb   : > { %19968 = vmatprep.subr.bf16.mxu0 %v19967_v21  ;;  %v11153_v31 = vpop.f32.mrb[106].mxu0  ;;  %15001 = vmatprep.mubr.f32.mxu1 %v2712_v22  ;;  %v311_v50 = vld [vmem:[%s20641_s29 + $0x2a8] sm:$0xff] }
 0x2cc   : > { %v11223_v32 = vpop.f32.mrb[106].mxu1  ;;  %19972 = vmatprep.subr.bf16.mxu1 %v19971_v23  ;;  %v11154_v36 = vadd.f32 %v11153_v31, %v11084_v19  ;;  %v11155_v37 = vpop.f32.mrb[107].mxu0  ;;  %v2761_v19 = vrot.slane %v2747_v9, %v20657_v25  ;;  %v676_v23 = vld [vmem:[%s20623_s22 + $0xa98] sm:$0xff]  ;;  %v19991_v31 = vpack.c.bf16 %v1118_v18, %v674_v17  ;;  %v2781_v58 = vcombine.high %v311_v50, %v311_v50 }
 0x2cd   : > { %v11225_v38 = vpop.f32.mrb[107].mxu1  ;;  %v19995_v33 = vpack.c.bf16 %v1120_v24, %v676_v23  ;;  %v675_v37 = vld [vmem:[%s20623_s22 + $0xa90] sm:$0xff]  ;;  %v2788_v63 = vrot.slane %v311_v50, %v20657_v25  ;;  %v1128_v9 = vld [vmem:[%s20623_s22 + $0x18b8] sm:$0x3] }
 0x2ce   : > { %v11224_v44 = vadd.f32 %v11223_v32, %v11154_v36  ;;  %v2763_v32 = vcombine.high %v2761_v19, %v2761_v19  ;;  %v1117_v36 = vld [vmem:[%s20623_s22 + $0x1860] sm:$0x3]  ;;  %v1119_v38 = vld [vmem:[%s20623_s22 + $0x1870] sm:$0x3] }
 0x2cf   : > { %v19997_v52 = vpack.c.bf16 %v1119_v38, %v675_v37 }
 0x2d0   : > { %14932 = vmatmul.mubr.f32.vlgmr.msra.gmra.mrb[160].mxu0 %v2703_v5  ;;  %v2745_v5 = vcombine.high %v2737_v54, %v2737_v54 }
 0x2d1   : > { %15002 = vmatmul.mubr.f32.vlgmr.msra.gmra.mrb[160].mxu1 %v2710_v10  ;;  %19970 = vmatpush1.bf16.xpose.msra.mxu0 %v19969_v42  ;;  %v669_v10 = vld [vmem:[%s20623_s22 + $0xa60] sm:$0xff]  ;;  %v678_v42 = vld [vmem:[%s20623_s22 + $0xaa8] sm:$0xff] }
 0x2d2   : > { %19974 = vmatpush1.bf16.xpose.msra.mxu1 %v19973_v43  ;;  %15071 = vmatprep.mubr.f32.mxu0 %v2728_v45  ;;  %v19985_v27 = vpack.c.bf16 %v1113_v11, %v669_v10  ;;  %v1122_v43 = vld [vmem:[%s20623_s22 + $0x1888] sm:$0x3]  ;;  %v312_v10 = vld [vmem:[%s20641_s29 + $0x2b0] sm:$0xff] }
 0x2d3   : > { %19976 = vmatprep.subr.bf16.mxu0 %v19975_v46  ;;  %v11293_v55 = vpop.f32.mrb[108].mxu0  ;;  %15141 = vmatprep.mubr.f32.mxu1 %v2729_v47  ;;  %v2798_v18 = vcombine.high %v312_v10, %v312_v10  ;;  %v2805_v23 = vrot.slane %v312_v10, %v20657_v25 }
 0x2d4   : > { %v11363_v56 = vpop.f32.mrb[108].mxu1  ;;  %19980 = vmatprep.subr.bf16.mxu1 %v19979_v48  ;;  %v11294_v60 = vadd.f32 %v11293_v55, %v11224_v44  ;;  %v11295_v61 = vpop.f32.mrb[109].mxu0  ;;  %v2778_v44 = vrot.slane %v2764_v34, %v20657_v25  ;;  %v680_v48 = vld [vmem:[%s20623_s22 + $0xab8] sm:$0xff]  ;;  %v19999_v55 = vpack.c.bf16 %v1122_v43, %v678_v42 }
 0x2d5   : > { %v11365_v62 = vpop.f32.mrb[109].mxu1  ;;  %v20003_v57 = vpack.c.bf16 %v1124_v49, %v680_v48  ;;  %v679_v61 = vld [vmem:[%s20623_s22 + $0xab0] sm:$0xff]  ;;  %v1132_v34 = vld [vmem:[%s20623_s22 + $0x18d8] sm:$0x3] }
 0x2d6   : > { %v11364_v4 = vadd.f32 %v11363_v56, %v11294_v60  ;;  %v2780_v56 = vcombine.high %v2778_v44, %v2778_v44  ;;  %v1121_v60 = vld [vmem:[%s20623_s22 + $0x1880] sm:$0x3]  ;;  %v1123_v62 = vld [vmem:[%s20623_s22 + $0x1890] sm:$0x3] }
 0x2d7   : > { %v20005_v12 = vpack.c.bf16 %v1123_v62, %v679_v61 }
 0x2d8   : > { %15072 = vmatmul.mubr.f32.vlgmr.msra.gmra.mrb[162].mxu0 %v2720_v30  ;;  %v2762_v30 = vcombine.high %v2754_v14, %v2754_v14 }
 0x2d9   : > { %15142 = vmatmul.mubr.f32.vlgmr.msra.gmra.mrb[162].mxu1 %v2727_v35  ;;  %19978 = vmatpush1.bf16.xpose.msra.mxu0 %v19977_v2  ;;  %v673_v35 = vld [vmem:[%s20623_s22 + $0xa80] sm:$0xff]  ;;  %v682_v2 = vld [vmem:[%s20623_s22 + $0xac8] sm:$0xff] }
 0x2da   : > { %19982 = vmatpush1.bf16.xpose.msra.mxu1 %v19981_v3  ;;  %15211 = vmatprep.mubr.f32.mxu0 %v2745_v5  ;;  %v19993_v51 = vpack.c.bf16 %v1117_v36, %v673_v35  ;;  %v1126_v3 = vld [vmem:[%s20623_s22 + $0x18a8] sm:$0x3]  ;;  %v313_v35 = vld [vmem:[%s20641_s29 + $0x2b8] sm:$0xff] }
 0x2db   : > { %19984 = vmatprep.subr.bf16.mxu0 %v19983_v6  ;;  %v11433_v15 = vpop.f32.mrb[110].mxu0  ;;  %15281 = vmatprep.mubr.f32.mxu1 %v2746_v7  ;;  %v2815_v43 = vcombine.high %v313_v35, %v313_v35  ;;  %v2822_v48 = vrot.slane %v313_v35, %v20657_v25 }
 0x2dc   : > { %v11503_v16 = vpop.f32.mrb[110].mxu1  ;;  %19988 = vmatprep.subr.bf16.mxu1 %v19987_v8  ;;  %v11434_v20 = vadd.f32 %v11433_v15, %v11364_v4  ;;  %v11435_v21 = vpop.f32.mrb[111].mxu0  ;;  %v2795_v4 = vrot.slane %v2781_v58, %v20657_v25  ;;  %v684_v8 = vld [vmem:[%s20623_s22 + $0xad8] sm:$0xff]  ;;  %v20007_v15 = vpack.c.bf16 %v1126_v3, %v682_v2 }
 0x2dd   : > { %v11505_v22 = vpop.f32.mrb[111].mxu1  ;;  %v20011_v17 = vpack.c.bf16 %v1128_v9, %v684_v8  ;;  %v683_v21 = vld [vmem:[%s20623_s22 + $0xad0] sm:$0xff]  ;;  %v1136_v58 = vld [vmem:[%s20623_s22 + $0x18f8] sm:$0x3] }
 0x2de   : > { %v11504_v29 = vadd.f32 %v11503_v16, %v11434_v20  ;;  %v2797_v16 = vcombine.high %v2795_v4, %v2795_v4  ;;  %v1125_v20 = vld [vmem:[%s20623_s22 + $0x18a0] sm:$0x3]  ;;  %v1127_v22 = vld [vmem:[%s20623_s22 + $0x18b0] sm:$0x3] }
 0x2df   : > { %v20013_v37 = vpack.c.bf16 %v1127_v22, %v683_v21 }
 0x2e0   : > { %15212 = vmatmul.mubr.f32.vlgmr.msra.gmra.mrb[164].mxu0 %v2737_v54  ;;  %v2779_v54 = vcombine.high %v2771_v39, %v2771_v39 }
 0x2e1   : > { %15282 = vmatmul.mubr.f32.vlgmr.msra.gmra.mrb[164].mxu1 %v2744_v59  ;;  %19986 = vmatpush1.bf16.xpose.msra.mxu0 %v19985_v27  ;;  %v677_v59 = vld [vmem:[%s20623_s22 + $0xaa0] sm:$0xff]  ;;  %v686_v27 = vld [vmem:[%s20623_s22 + $0xae8] sm:$0xff] }
 0x2e2   : > { %19990 = vmatpush1.bf16.xpose.msra.mxu1 %v19989_v28  ;;  %15351 = vmatprep.mubr.f32.mxu0 %v2762_v30  ;;  %v20001_v11 = vpack.c.bf16 %v1121_v60, %v677_v59  ;;  %v1130_v28 = vld [vmem:[%s20623_s22 + $0x18c8] sm:$0x3]  ;;  %v314_v59 = vld [vmem:[%s20641_s29 + $0x2c0] sm:$0xff] }
 0x2e3   : > { %19992 = vmatprep.subr.bf16.mxu0 %v19991_v31  ;;  %v11573_v40 = vpop.f32.mrb[112].mxu0  ;;  %15421 = vmatprep.mubr.f32.mxu1 %v2763_v32  ;;  %v2832_v3 = vcombine.high %v314_v59, %v314_v59  ;;  %v2839_v8 = vrot.slane %v314_v59, %v20657_v25 }
 0x2e4   : > { %v11643_v41 = vpop.f32.mrb[112].mxu1  ;;  %19996 = vmatprep.subr.bf16.mxu1 %v19995_v33  ;;  %v11574_v45 = vadd.f32 %v11573_v40, %v11504_v29  ;;  %v11575_v46 = vpop.f32.mrb[113].mxu0  ;;  %v2812_v29 = vrot.slane %v2798_v18, %v20657_v25  ;;  %v688_v33 = vld [vmem:[%s20623_s22 + $0xaf8] sm:$0xff]  ;;  %v20015_v40 = vpack.c.bf16 %v1130_v28, %v686_v27 }
 0x2e5   : > { %v11645_v47 = vpop.f32.mrb[113].mxu1  ;;  %v20019_v42 = vpack.c.bf16 %v1132_v34, %v688_v33  ;;  %v687_v46 = vld [vmem:[%s20623_s22 + $0xaf0] sm:$0xff]  ;;  %v1140_v18 = vld [vmem:[%s20623_s22 + $0x1918] sm:$0x3] }
 0x2e6   : > { %v11644_v53 = vadd.f32 %v11643_v41, %v11574_v45  ;;  %v2814_v41 = vcombine.high %v2812_v29, %v2812_v29  ;;  %v1129_v45 = vld [vmem:[%s20623_s22 + $0x18c0] sm:$0x3]  ;;  %v1131_v47 = vld [vmem:[%s20623_s22 + $0x18d0] sm:$0x3] }
 0x2e7   : > { %v20021_v61 = vpack.c.bf16 %v1131_v47, %v687_v46 }
 0x2e8   : > { %15352 = vmatmul.mubr.f32.vlgmr.msra.gmra.mrb[166].mxu0 %v2754_v14  ;;  %v2796_v14 = vcombine.high %v2788_v63, %v2788_v63 }
 0x2e9   : > { %15422 = vmatmul.mubr.f32.vlgmr.msra.gmra.mrb[166].mxu1 %v2761_v19  ;;  %19994 = vmatpush1.bf16.xpose.msra.mxu0 %v19993_v51  ;;  %v681_v19 = vld [vmem:[%s20623_s22 + $0xac0] sm:$0xff]  ;;  %v690_v51 = vld [vmem:[%s20623_s22 + $0xb08] sm:$0xff] }
 0x2ea   : > { %19998 = vmatpush1.bf16.xpose.msra.mxu1 %v19997_v52  ;;  %15491 = vmatprep.mubr.f32.mxu0 %v2779_v54  ;;  %v20009_v36 = vpack.c.bf16 %v1125_v20, %v681_v19  ;;  %v1134_v52 = vld [vmem:[%s20623_s22 + $0x18e8] sm:$0x3] }
 0x2eb   : > { %20000 = vmatprep.subr.bf16.mxu0 %v19999_v55  ;;  %v11713_v0 = vpop.f32.mrb[114].mxu0  ;;  %15561 = vmatprep.mubr.f32.mxu1 %v2780_v56  ;;  %v315_v19 = vld [vmem:[%s20641_s29 + $0x2c8] sm:$0xff] }
 0x2ec   : > { %v11783_v1 = vpop.f32.mrb[114].mxu1  ;;  %20004 = vmatprep.subr.bf16.mxu1 %v20003_v57  ;;  %v11714_v5 = vadd.f32 %v11713_v0, %v11644_v53  ;;  %v11715_v6 = vpop.f32.mrb[115].mxu0  ;;  %v2829_v53 = vrot.slane %v2815_v43, %v20657_v25  ;;  %v692_v57 = vld [vmem:[%s20623_s22 + $0xb18] sm:$0xff]  ;;  %v20023_v0 = vpack.c.bf16 %v1134_v52, %v690_v51  ;;  %v2849_v28 = vcombine.high %v315_v19, %v315_v19 }
 0x2ed   : > { %v11785_v7 = vpop.f32.mrb[115].mxu1  ;;  %v20027_v2 = vpack.c.bf16 %v1136_v58, %v692_v57  ;;  %v691_v6 = vld [vmem:[%s20623_s22 + $0xb10] sm:$0xff]  ;;  %v2856_v33 = vrot.slane %v315_v19, %v20657_v25  ;;  %v1144_v43 = vld [vmem:[%s20623_s22 + $0x1938] sm:$0x3] }
 0x2ee   : > { %v11784_v13 = vadd.f32 %v11783_v1, %v11714_v5  ;;  %v2831_v1 = vcombine.high %v2829_v53, %v2829_v53  ;;  %v1133_v5 = vld [vmem:[%s20623_s22 + $0x18e0] sm:$0x3]  ;;  %v1135_v7 = vld [vmem:[%s20623_s22 + $0x18f0] sm:$0x3] }
 0x2ef   : > { %v20029_v21 = vpack.c.bf16 %v1135_v7, %v691_v6 }
 0x2f0   : > { %15492 = vmatmul.mubr.f32.vlgmr.msra.gmra.mrb[168].mxu0 %v2771_v39  ;;  %v2813_v39 = vcombine.high %v2805_v23, %v2805_v23 }
 0x2f1   : > { %15562 = vmatmul.mubr.f32.vlgmr.msra.gmra.mrb[168].mxu1 %v2778_v44  ;;  %20002 = vmatpush1.bf16.xpose.msra.mxu0 %v20001_v11  ;;  %v685_v44 = vld [vmem:[%s20623_s22 + $0xae0] sm:$0xff]  ;;  %v694_v11 = vld [vmem:[%s20623_s22 + $0xb28] sm:$0xff] }
 0x2f2   : > { %20006 = vmatpush1.bf16.xpose.msra.mxu1 %v20005_v12  ;;  %15631 = vmatprep.mubr.f32.mxu0 %v2796_v14  ;;  %v20017_v60 = vpack.c.bf16 %v1129_v45, %v685_v44  ;;  %v1138_v12 = vld [vmem:[%s20623_s22 + $0x1908] sm:$0x3]  ;;  %v316_v44 = vld [vmem:[%s20641_s29 + $0x2d0] sm:$0xff] }
 0x2f3   : > { %20008 = vmatprep.subr.bf16.mxu0 %v20007_v15  ;;  %v11853_v24 = vpop.f32.mrb[116].mxu0  ;;  %15701 = vmatprep.mubr.f32.mxu1 %v2797_v16  ;;  %v2866_v52 = vcombine.high %v316_v44, %v316_v44  ;;  %v2873_v57 = vrot.slane %v316_v44, %v20657_v25 }
 0x2f4   : > { %v11923_v26 = vpop.f32.mrb[116].mxu1  ;;  %20012 = vmatprep.subr.bf16.mxu1 %v20011_v17  ;;  %v11854_v30 = vadd.f32 %v11853_v24, %v11784_v13  ;;  %v11855_v31 = vpop.f32.mrb[117].mxu0  ;;  %v2846_v13 = vrot.slane %v2832_v3, %v20657_v25  ;;  %v696_v17 = vld [vmem:[%s20623_s22 + $0xb38] sm:$0xff]  ;;  %v20031_v24 = vpack.c.bf16 %v1138_v12, %v694_v11 }
 0x2f5   : > { %v11925_v32 = vpop.f32.mrb[117].mxu1  ;;  %v20035_v27 = vpack.c.bf16 %v1140_v18, %v696_v17  ;;  %v695_v31 = vld [vmem:[%s20623_s22 + $0xb30] sm:$0xff]  ;;  %v1148_v3 = vld [vmem:[%s20623_s22 + $0x1958] sm:$0x3] }
 0x2f6   : > { %v11924_v38 = vadd.f32 %v11923_v26, %v11854_v30  ;;  %v2848_v26 = vcombine.high %v2846_v13, %v2846_v13  ;;  %v1137_v30 = vld [vmem:[%s20623_s22 + $0x1900] sm:$0x3]  ;;  %v1139_v32 = vld [vmem:[%s20623_s22 + $0x1910] sm:$0x3] }
 0x2f7   : > { %v20037_v46 = vpack.c.bf16 %v1139_v32, %v695_v31 }
 0x2f8   : > { %15632 = vmatmul.mubr.f32.vlgmr.msra.gmra.mrb[170].mxu0 %v2788_v63  ;;  %v2830_v63 = vcombine.high %v2822_v48, %v2822_v48 }
 0x2f9   : > { %15702 = vmatmul.mubr.f32.vlgmr.msra.gmra.mrb[170].mxu1 %v2795_v4  ;;  %20010 = vmatpush1.bf16.xpose.msra.mxu0 %v20009_v36  ;;  %v689_v4 = vld [vmem:[%s20623_s22 + $0xb00] sm:$0xff]  ;;  %v698_v36 = vld [vmem:[%s20623_s22 + $0xb48] sm:$0xff] }
 0x2fa   : > { %20014 = vmatpush1.bf16.xpose.msra.mxu1 %v20013_v37  ;;  %15771 = vmatprep.mubr.f32.mxu0 %v2813_v39  ;;  %v20025_v20 = vpack.c.bf16 %v1133_v5, %v689_v4  ;;  %v1142_v37 = vld [vmem:[%s20623_s22 + $0x1928] sm:$0x3]  ;;  %v317_v4 = vld [vmem:[%s20641_s29 + $0x2d8] sm:$0xff] }
 0x2fb   : > { %20016 = vmatprep.subr.bf16.mxu0 %v20015_v40  ;;  %v11993_v49 = vpop.f32.mrb[118].mxu0  ;;  %15841 = vmatprep.mubr.f32.mxu1 %v2814_v41  ;;  %v2883_v12 = vcombine.high %v317_v4, %v317_v4  ;;  %v2890_v17 = vrot.slane %v317_v4, %v20657_v25 }
 0x2fc   : > { %v12063_v50 = vpop.f32.mrb[118].mxu1  ;;  %20020 = vmatprep.subr.bf16.mxu1 %v20019_v42  ;;  %v11994_v54 = vadd.f32 %v11993_v49, %v11924_v38  ;;  %v11995_v55 = vpop.f32.mrb[119].mxu0  ;;  %v2863_v38 = vrot.slane %v2849_v28, %v20657_v25  ;;  %v700_v42 = vld [vmem:[%s20623_s22 + $0xb58] sm:$0xff]  ;;  %v20039_v49 = vpack.c.bf16 %v1142_v37, %v698_v36 }
 0x2fd   : > { %v12065_v56 = vpop.f32.mrb[119].mxu1  ;;  %v20043_v51 = vpack.c.bf16 %v1144_v43, %v700_v42  ;;  %v699_v55 = vld [vmem:[%s20623_s22 + $0xb50] sm:$0xff]  ;;  %v1152_v28 = vld [vmem:[%s20623_s22 + $0x1978] sm:$0x3] }
 0x2fe   : > { %v12064_v62 = vadd.f32 %v12063_v50, %v11994_v54  ;;  %v2865_v50 = vcombine.high %v2863_v38, %v2863_v38  ;;  %v1141_v54 = vld [vmem:[%s20623_s22 + $0x1920] sm:$0x3]  ;;  %v1143_v56 = vld [vmem:[%s20623_s22 + $0x1930] sm:$0x3] }
 0x2ff   : > { %v20045_v6 = vpack.c.bf16 %v1143_v56, %v699_v55 }
 0x300   : > { %15772 = vmatmul.mubr.f32.vlgmr.msra.gmra.mrb[172].mxu0 %v2805_v23  ;;  %v2847_v23 = vcombine.high %v2839_v8, %v2839_v8 }
 0x301   : > { %15842 = vmatmul.mubr.f32.vlgmr.msra.gmra.mrb[172].mxu1 %v2812_v29  ;;  %20018 = vmatpush1.bf16.xpose.msra.mxu0 %v20017_v60  ;;  %v693_v29 = vld [vmem:[%s20623_s22 + $0xb20] sm:$0xff]  ;;  %v702_v60 = vld [vmem:[%s20623_s22 + $0xb68] sm:$0xff] }
 0x302   : > { %20022 = vmatpush1.bf16.xpose.msra.mxu1 %v20021_v61  ;;  %15911 = vmatprep.mubr.f32.mxu0 %v2830_v63  ;;  %v20033_v45 = vpack.c.bf16 %v1137_v30, %v693_v29  ;;  %v1146_v61 = vld [vmem:[%s20623_s22 + $0x1948] sm:$0x3]  ;;  %v318_v29 = vld [vmem:[%s20641_s29 + $0x2e0] sm:$0xff] }
 0x303   : > { %20024 = vmatprep.subr.bf16.mxu0 %v20023_v0  ;;  %v12133_v9 = vpop.f32.mrb[120].mxu0  ;;  %15981 = vmatprep.mubr.f32.mxu1 %v2831_v1  ;;  %v2900_v37 = vcombine.high %v318_v29, %v318_v29  ;;  %v2907_v42 = vrot.slane %v318_v29, %v20657_v25 }
 0x304   : > { %v12203_v10 = vpop.f32.mrb[120].mxu1  ;;  %20028 = vmatprep.subr.bf16.mxu1 %v20027_v2  ;;  %v12134_v14 = vadd.f32 %v12133_v9, %v12064_v62  ;;  %v12135_v15 = vpop.f32.mrb[121].mxu0  ;;  %v2880_v62 = vrot.slane %v2866_v52, %v20657_v25  ;;  %v704_v2 = vld [vmem:[%s20623_s22 + $0xb78] sm:$0xff]  ;;  %v20047_v9 = vpack.c.bf16 %v1146_v61, %v702_v60 }
 0x305   : > { %v12205_v16 = vpop.f32.mrb[121].mxu1  ;;  %v20051_v11 = vpack.c.bf16 %v1148_v3, %v704_v2  ;;  %v703_v15 = vld [vmem:[%s20623_s22 + $0xb70] sm:$0xff]  ;;  %v1156_v52 = vld [vmem:[%s20623_s22 + $0x1998] sm:$0x3] }
 0x306   : > { %v12204_v22 = vadd.f32 %v12203_v10, %v12134_v14  ;;  %v2882_v10 = vcombine.high %v2880_v62, %v2880_v62  ;;  %v1145_v14 = vld [vmem:[%s20623_s22 + $0x1940] sm:$0x3]  ;;  %v1147_v16 = vld [vmem:[%s20623_s22 + $0x1950] sm:$0x3] }
 0x307   : > { %v20053_v31 = vpack.c.bf16 %v1147_v16, %v703_v15 }
 0x308   : > { %15912 = vmatmul.mubr.f32.vlgmr.msra.gmra.mrb[174].mxu0 %v2822_v48  ;;  %v2864_v48 = vcombine.high %v2856_v33, %v2856_v33 }
 0x309   : > { %15982 = vmatmul.mubr.f32.vlgmr.msra.gmra.mrb[174].mxu1 %v2829_v53  ;;  %20026 = vmatpush1.bf16.xpose.msra.mxu0 %v20025_v20  ;;  %v697_v53 = vld [vmem:[%s20623_s22 + $0xb40] sm:$0xff]  ;;  %v706_v20 = vld [vmem:[%s20623_s22 + $0xb88] sm:$0xff] }
 0x30a   : > { %20030 = vmatpush1.bf16.xpose.msra.mxu1 %v20029_v21  ;;  %16051 = vmatprep.mubr.f32.mxu0 %v2847_v23  ;;  %v20041_v5 = vpack.c.bf16 %v1141_v54, %v697_v53  ;;  %v1150_v21 = vld [vmem:[%s20623_s22 + $0x1968] sm:$0x3] }
 0x30b   : > { %20032 = vmatprep.subr.bf16.mxu0 %v20031_v24  ;;  %v12273_v34 = vpop.f32.mrb[122].mxu0  ;;  %16121 = vmatprep.mubr.f32.mxu1 %v2848_v26  ;;  %v319_v53 = vld [vmem:[%s20641_s29 + $0x2e8] sm:$0xff] }
 0x30c   : > { %v12343_v35 = vpop.f32.mrb[122].mxu1  ;;  %20036 = vmatprep.subr.bf16.mxu1 %v20035_v27  ;;  %v12274_v39 = vadd.f32 %v12273_v34, %v12204_v22  ;;  %v12275_v40 = vpop.f32.mrb[123].mxu0  ;;  %v2897_v22 = vrot.slane %v2883_v12, %v20657_v25  ;;  %v708_v27 = vld [vmem:[%s20623_s22 + $0xb98] sm:$0xff]  ;;  %v20055_v34 = vpack.c.bf16 %v1150_v21, %v706_v20  ;;  %v2917_v61 = vcombine.high %v319_v53, %v319_v53 }
 0x30d   : > { %v12345_v41 = vpop.f32.mrb[123].mxu1  ;;  %v20059_v36 = vpack.c.bf16 %v1152_v28, %v708_v27  ;;  %v707_v40 = vld [vmem:[%s20623_s22 + $0xb90] sm:$0xff]  ;;  %v2924_v2 = vrot.slane %v319_v53, %v20657_v25  ;;  %v1160_v12 = vld [vmem:[%s20623_s22 + $0x19b8] sm:$0x3] }
 0x30e   : > { %v12344_v47 = vadd.f32 %v12343_v35, %v12274_v39  ;;  %v2899_v35 = vcombine.high %v2897_v22, %v2897_v22  ;;  %v1149_v39 = vld [vmem:[%s20623_s22 + $0x1960] sm:$0x3]  ;;  %v1151_v41 = vld [vmem:[%s20623_s22 + $0x1970] sm:$0x3] }
 0x30f   : > { %v20061_v55 = vpack.c.bf16 %v1151_v41, %v707_v40 }
 0x310   : > { %16052 = vmatmul.mubr.f32.vlgmr.msra.gmra.mrb[176].mxu0 %v2839_v8  ;;  %v2881_v8 = vcombine.high %v2873_v57, %v2873_v57 }
 0x311   : > { %16122 = vmatmul.mubr.f32.vlgmr.msra.gmra.mrb[176].mxu1 %v2846_v13  ;;  %20034 = vmatpush1.bf16.xpose.msra.mxu0 %v20033_v45  ;;  %v701_v13 = vld [vmem:[%s20623_s22 + $0xb60] sm:$0xff]  ;;  %v710_v45 = vld [vmem:[%s20623_s22 + $0xba8] sm:$0xff] }
 0x312   : > { %20038 = vmatpush1.bf16.xpose.msra.mxu1 %v20037_v46  ;;  %16191 = vmatprep.mubr.f32.mxu0 %v2864_v48  ;;  %v20049_v30 = vpack.c.bf16 %v1145_v14, %v701_v13  ;;  %v1154_v46 = vld [vmem:[%s20623_s22 + $0x1988] sm:$0x3]  ;;  %v320_v13 = vld [vmem:[%s20641_s29 + $0x2f0] sm:$0xff] }
 0x313   : > { %20040 = vmatprep.subr.bf16.mxu0 %v20039_v49  ;;  %v12413_v58 = vpop.f32.mrb[124].mxu0  ;;  %16261 = vmatprep.mubr.f32.mxu1 %v2865_v50  ;;  %v2934_v21 = vcombine.high %v320_v13, %v320_v13  ;;  %v2941_v27 = vrot.slane %v320_v13, %v20657_v25 }
 0x314   : > { %v12483_v59 = vpop.f32.mrb[124].mxu1  ;;  %20044 = vmatprep.subr.bf16.mxu1 %v20043_v51  ;;  %v12414_v63 = vadd.f32 %v12413_v58, %v12344_v47  ;;  %v12415_v0 = vpop.f32.mrb[125].mxu0  ;;  %v2914_v47 = vrot.slane %v2900_v37, %v20657_v25  ;;  %v712_v51 = vld [vmem:[%s20623_s22 + $0xbb8] sm:$0xff]  ;;  %v20063_v58 = vpack.c.bf16 %v1154_v46, %v710_v45 }
 0x315   : > { %v12485_v1 = vpop.f32.mrb[125].mxu1  ;;  %v20067_v60 = vpack.c.bf16 %v1156_v52, %v712_v51  ;;  %v711_v0 = vld [vmem:[%s20623_s22 + $0xbb0] sm:$0xff]  ;;  %v1164_v37 = vld [vmem:[%s20623_s22 + $0x19d8] sm:$0x3] }
 0x316   : > { %v12484_v7 = vadd.f32 %v12483_v59, %v12414_v63  ;;  %v2916_v59 = vcombine.high %v2914_v47, %v2914_v47  ;;  %v1153_v63 = vld [vmem:[%s20623_s22 + $0x1980] sm:$0x3]  ;;  %v1155_v1 = vld [vmem:[%s20623_s22 + $0x1990] sm:$0x3] }
 0x317   : > { %v20069_v15 = vpack.c.bf16 %v1155_v1, %v711_v0 }
 0x318   : > { %16192 = vmatmul.mubr.f32.vlgmr.msra.gmra.mrb[178].mxu0 %v2856_v33  ;;  %v2898_v33 = vcombine.high %v2890_v17, %v2890_v17 }
 0x319   : > { %16262 = vmatmul.mubr.f32.vlgmr.msra.gmra.mrb[178].mxu1 %v2863_v38  ;;  %20042 = vmatpush1.bf16.xpose.msra.mxu0 %v20041_v5  ;;  %v705_v38 = vld [vmem:[%s20623_s22 + $0xb80] sm:$0xff]  ;;  %v714_v5 = vld [vmem:[%s20623_s22 + $0xbc8] sm:$0xff] }
 0x31a   : > { %20046 = vmatpush1.bf16.xpose.msra.mxu1 %v20045_v6  ;;  %16331 = vmatprep.mubr.f32.mxu0 %v2881_v8  ;;  %v20057_v54 = vpack.c.bf16 %v1149_v39, %v705_v38  ;;  %v1158_v6 = vld [vmem:[%s20623_s22 + $0x19a8] sm:$0x3]  ;;  %v321_v38 = vld [vmem:[%s20641_s29 + $0x2f8] sm:$0xff] }
 0x31b   : > { %20048 = vmatprep.subr.bf16.mxu0 %v20047_v9  ;;  %v12553_v18 = vpop.f32.mrb[126].mxu0  ;;  %16401 = vmatprep.mubr.f32.mxu1 %v2882_v10  ;;  %v2951_v46 = vcombine.high %v321_v38, %v321_v38  ;;  %v2958_v51 = vrot.slane %v321_v38, %v20657_v25 }
 0x31c   : > { %v12623_v19 = vpop.f32.mrb[126].mxu1  ;;  %20052 = vmatprep.subr.bf16.mxu1 %v20051_v11  ;;  %v12554_v23 = vadd.f32 %v12553_v18, %v12484_v7  ;;  %v12555_v24 = vpop.f32.mrb[127].mxu0  ;;  %v2931_v7 = vrot.slane %v2917_v61, %v20657_v25  ;;  %v716_v11 = vld [vmem:[%s20623_s22 + $0xbd8] sm:$0xff]  ;;  %v20071_v18 = vpack.c.bf16 %v1158_v6, %v714_v5 }
 0x31d   : > { %v12625_v26 = vpop.f32.mrb[127].mxu1  ;;  %v20075_v20 = vpack.c.bf16 %v1160_v12, %v716_v11  ;;  %v715_v24 = vld [vmem:[%s20623_s22 + $0xbd0] sm:$0xff]  ;;  %v1168_v61 = vld [vmem:[%s20623_s22 + $0x19f8] sm:$0x3] }
 0x31e   : > { %v12624_v32 = vadd.f32 %v12623_v19, %v12554_v23  ;;  %v2933_v19 = vcombine.high %v2931_v7, %v2931_v7  ;;  %v1157_v23 = vld [vmem:[%s20623_s22 + $0x19a0] sm:$0x3]  ;;  %v1159_v26 = vld [vmem:[%s20623_s22 + $0x19b0] sm:$0x3] }
 0x31f   : > { %v20077_v40 = vpack.c.bf16 %v1159_v26, %v715_v24 }
 0x320   : > { %16332 = vmatmul.mubr.f32.vlgmr.msra.gmra.mrb[180].mxu0 %v2873_v57  ;;  %v2915_v57 = vcombine.high %v2907_v42, %v2907_v42 }
 0x321   : > { %16402 = vmatmul.mubr.f32.vlgmr.msra.gmra.mrb[180].mxu1 %v2880_v62  ;;  %20050 = vmatpush1.bf16.xpose.msra.mxu0 %v20049_v30  ;;  %v709_v62 = vld [vmem:[%s20623_s22 + $0xba0] sm:$0xff]  ;;  %v718_v30 = vld [vmem:[%s20623_s22 + $0xbe8] sm:$0xff] }
 0x322   : > { %20054 = vmatpush1.bf16.xpose.msra.mxu1 %v20053_v31  ;;  %16471 = vmatprep.mubr.f32.mxu0 %v2898_v33  ;;  %v20065_v14 = vpack.c.bf16 %v1153_v63, %v709_v62  ;;  %v1162_v31 = vld [vmem:[%s20623_s22 + $0x19c8] sm:$0x3]  ;;  %v322_v62 = vld [vmem:[%s20641_s29 + $0x300] sm:$0xff] }
 0x323   : > { %20056 = vmatprep.subr.bf16.mxu0 %v20055_v34  ;;  %v12693_v43 = vpop.f32.mrb[128].mxu0  ;;  %16541 = vmatprep.mubr.f32.mxu1 %v2899_v35  ;;  %v2968_v6 = vcombine.high %v322_v62, %v322_v62  ;;  %v2975_v11 = vrot.slane %v322_v62, %v20657_v25 }
 0x324   : > { %v12763_v44 = vpop.f32.mrb[128].mxu1  ;;  %20060 = vmatprep.subr.bf16.mxu1 %v20059_v36  ;;  %v12694_v48 = vadd.f32 %v12693_v43, %v12624_v32  ;;  %v12695_v49 = vpop.f32.mrb[129].mxu0  ;;  %v2948_v32 = vrot.slane %v2934_v21, %v20657_v25  ;;  %v720_v36 = vld [vmem:[%s20623_s22 + $0xbf8] sm:$0xff]  ;;  %v20079_v43 = vpack.c.bf16 %v1162_v31, %v718_v30 }
 0x325   : > { %v12765_v50 = vpop.f32.mrb[129].mxu1  ;;  %v20083_v45 = vpack.c.bf16 %v1164_v37, %v720_v36  ;;  %v719_v49 = vld [vmem:[%s20623_s22 + $0xbf0] sm:$0xff]  ;;  %v1172_v21 = vld [vmem:[%s20623_s22 + $0x1a18] sm:$0x3] }
 0x326   : > { %v12764_v56 = vadd.f32 %v12763_v44, %v12694_v48  ;;  %v2950_v44 = vcombine.high %v2948_v32, %v2948_v32  ;;  %v1161_v48 = vld [vmem:[%s20623_s22 + $0x19c0] sm:$0x3]  ;;  %v1163_v50 = vld [vmem:[%s20623_s22 + $0x19d0] sm:$0x3] }
 0x327   : > { %v20085_v0 = vpack.c.bf16 %v1163_v50, %v719_v49 }
 0x328   : > { %16472 = vmatmul.mubr.f32.vlgmr.msra.gmra.mrb[182].mxu0 %v2890_v17  ;;  %v2932_v17 = vcombine.high %v2924_v2, %v2924_v2 }
 0x329   : > { %16542 = vmatmul.mubr.f32.vlgmr.msra.gmra.mrb[182].mxu1 %v2897_v22  ;;  %20058 = vmatpush1.bf16.xpose.msra.mxu0 %v20057_v54  ;;  %v713_v22 = vld [vmem:[%s20623_s22 + $0xbc0] sm:$0xff]  ;;  %v722_v54 = vld [vmem:[%s20623_s22 + $0xc08] sm:$0xff] }
 0x32a   : > { %20062 = vmatpush1.bf16.xpose.msra.mxu1 %v20061_v55  ;;  %16611 = vmatprep.mubr.f32.mxu0 %v2915_v57  ;;  %v20073_v39 = vpack.c.bf16 %v1157_v23, %v713_v22  ;;  %v1166_v55 = vld [vmem:[%s20623_s22 + $0x19e8] sm:$0x3] }
 0x32b   : > { %20064 = vmatprep.subr.bf16.mxu0 %v20063_v58  ;;  %v12833_v3 = vpop.f32.mrb[130].mxu0  ;;  %16681 = vmatprep.mubr.f32.mxu1 %v2916_v59  ;;  %v323_v22 = vld [vmem:[%s20641_s29 + $0x308] sm:$0xff] }
 0x32c   : > { %v12903_v4 = vpop.f32.mrb[130].mxu1  ;;  %20068 = vmatprep.subr.bf16.mxu1 %v20067_v60  ;;  %v12834_v8 = vadd.f32 %v12833_v3, %v12764_v56  ;;  %v12835_v9 = vpop.f32.mrb[131].mxu0  ;;  %v2965_v56 = vrot.slane %v2951_v46, %v20657_v25  ;;  %v724_v60 = vld [vmem:[%s20623_s22 + $0xc18] sm:$0xff]  ;;  %v20087_v3 = vpack.c.bf16 %v1166_v55, %v722_v54  ;;  %v2985_v31 = vcombine.high %v323_v22, %v323_v22 }
 0x32d   : > { %v12905_v10 = vpop.f32.mrb[131].mxu1  ;;  %v20091_v5 = vpack.c.bf16 %v1168_v61, %v724_v60  ;;  %v723_v9 = vld [vmem:[%s20623_s22 + $0xc10] sm:$0xff]  ;;  %v2992_v36 = vrot.slane %v323_v22, %v20657_v25  ;;  %v1176_v46 = vld [vmem:[%s20623_s22 + $0x1a38] sm:$0x3] }
 0x32e   : > { %v12904_v16 = vadd.f32 %v12903_v4, %v12834_v8  ;;  %v2967_v4 = vcombine.high %v2965_v56, %v2965_v56  ;;  %v1165_v8 = vld [vmem:[%s20623_s22 + $0x19e0] sm:$0x3]  ;;  %v1167_v10 = vld [vmem:[%s20623_s22 + $0x19f0] sm:$0x3] }
 0x32f   : > { %v20093_v24 = vpack.c.bf16 %v1167_v10, %v723_v9 }
 0x330   : > { %16612 = vmatmul.mubr.f32.vlgmr.msra.gmra.mrb[184].mxu0 %v2907_v42  ;;  %v2949_v42 = vcombine.high %v2941_v27, %v2941_v27 }
 0x331   : > { %16682 = vmatmul.mubr.f32.vlgmr.msra.gmra.mrb[184].mxu1 %v2914_v47  ;;  %20066 = vmatpush1.bf16.xpose.msra.mxu0 %v20065_v14  ;;  %v717_v47 = vld [vmem:[%s20623_s22 + $0xbe0] sm:$0xff]  ;;  %v726_v14 = vld [vmem:[%s20623_s22 + $0xc28] sm:$0xff] }
 0x332   : > { %20070 = vmatpush1.bf16.xpose.msra.mxu1 %v20069_v15  ;;  %16751 = vmatprep.mubr.f32.mxu0 %v2932_v17  ;;  %v20081_v63 = vpack.c.bf16 %v1161_v48, %v717_v47  ;;  %v1170_v15 = vld [vmem:[%s20623_s22 + $0x1a08] sm:$0x3]  ;;  %v324_v47 = vld [vmem:[%s20641_s29 + $0x310] sm:$0xff] }
 0x333   : > { %20072 = vmatprep.subr.bf16.mxu0 %v20071_v18  ;;  %v12973_v28 = vpop.f32.mrb[132].mxu0  ;;  %16821 = vmatprep.mubr.f32.mxu1 %v2933_v19  ;;  %v3002_v55 = vcombine.high %v324_v47, %v324_v47  ;;  %v3009_v60 = vrot.slane %v324_v47, %v20657_v25 }
 0x334   : > { %v13043_v29 = vpop.f32.mrb[132].mxu1  ;;  %20076 = vmatprep.subr.bf16.mxu1 %v20075_v20  ;;  %v12974_v33 = vadd.f32 %v12973_v28, %v12904_v16  ;;  %v12975_v34 = vpop.f32.mrb[133].mxu0  ;;  %v2982_v16 = vrot.slane %v2968_v6, %v20657_v25  ;;  %v728_v20 = vld [vmem:[%s20623_s22 + $0xc38] sm:$0xff]  ;;  %v20095_v28 = vpack.c.bf16 %v1170_v15, %v726_v14 }
 0x335   : > { %v13045_v35 = vpop.f32.mrb[133].mxu1  ;;  %v20099_v30 = vpack.c.bf16 %v1172_v21, %v728_v20  ;;  %v727_v34 = vld [vmem:[%s20623_s22 + $0xc30] sm:$0xff]  ;;  %v1180_v6 = vld [vmem:[%s20623_s22 + $0x1a58] sm:$0x3] }
 0x336   : > { %v13044_v41 = vadd.f32 %v13043_v29, %v12974_v33  ;;  %v2984_v29 = vcombine.high %v2982_v16, %v2982_v16  ;;  %v1169_v33 = vld [vmem:[%s20623_s22 + $0x1a00] sm:$0x3]  ;;  %v1171_v35 = vld [vmem:[%s20623_s22 + $0x1a10] sm:$0x3] }
 0x337   : > { %v20101_v49 = vpack.c.bf16 %v1171_v35, %v727_v34 }
 0x338   : > { %16752 = vmatmul.mubr.f32.vlgmr.msra.gmra.mrb[186].mxu0 %v2924_v2  ;;  %v2966_v2 = vcombine.high %v2958_v51, %v2958_v51 }
 0x339   : > { %16822 = vmatmul.mubr.f32.vlgmr.msra.gmra.mrb[186].mxu1 %v2931_v7  ;;  %20074 = vmatpush1.bf16.xpose.msra.mxu0 %v20073_v39  ;;  %v721_v7 = vld [vmem:[%s20623_s22 + $0xc00] sm:$0xff]  ;;  %v730_v39 = vld [vmem:[%s20623_s22 + $0xc48] sm:$0xff] }
 0x33a   : > { %20078 = vmatpush1.bf16.xpose.msra.mxu1 %v20077_v40  ;;  %16891 = vmatprep.mubr.f32.mxu0 %v2949_v42  ;;  %v20089_v23 = vpack.c.bf16 %v1165_v8, %v721_v7  ;;  %v1174_v40 = vld [vmem:[%s20623_s22 + $0x1a28] sm:$0x3]  ;;  %v325_v7 = vld [vmem:[%s20641_s29 + $0x318] sm:$0xff] }
 0x33b   : > { %20080 = vmatprep.subr.bf16.mxu0 %v20079_v43  ;;  %v13113_v52 = vpop.f32.mrb[134].mxu0  ;;  %16961 = vmatprep.mubr.f32.mxu1 %v2950_v44  ;;  %v3019_v15 = vcombine.high %v325_v7, %v325_v7  ;;  %v3026_v20 = vrot.slane %v325_v7, %v20657_v25 }
 0x33c   : > { %v13183_v53 = vpop.f32.mrb[134].mxu1  ;;  %20084 = vmatprep.subr.bf16.mxu1 %v20083_v45  ;;  %v13114_v57 = vadd.f32 %v13113_v52, %v13044_v41  ;;  %v13115_v58 = vpop.f32.mrb[135].mxu0  ;;  %v2999_v41 = vrot.slane %v2985_v31, %v20657_v25  ;;  %v732_v45 = vld [vmem:[%s20623_s22 + $0xc58] sm:$0xff]  ;;  %v20103_v52 = vpack.c.bf16 %v1174_v40, %v730_v39 }
 0x33d   : > { %v13185_v59 = vpop.f32.mrb[135].mxu1  ;;  %v20107_v54 = vpack.c.bf16 %v1176_v46, %v732_v45  ;;  %v731_v58 = vld [vmem:[%s20623_s22 + $0xc50] sm:$0xff]  ;;  %v1184_v31 = vld [vmem:[%s20623_s22 + $0x1a78] sm:$0x3] }
 0x33e   : > { %v13184_v1 = vadd.f32 %v13183_v53, %v13114_v57  ;;  %v3001_v53 = vcombine.high %v2999_v41, %v2999_v41  ;;  %v1173_v57 = vld [vmem:[%s20623_s22 + $0x1a20] sm:$0x3]  ;;  %v1175_v59 = vld [vmem:[%s20623_s22 + $0x1a30] sm:$0x3] }
 0x33f   : > { %v20109_v9 = vpack.c.bf16 %v1175_v59, %v731_v58 }
 0x340   : > { %16892 = vmatmul.mubr.f32.vlgmr.msra.gmra.mrb[188].mxu0 %v2941_v27  ;;  %v2983_v27 = vcombine.high %v2975_v11, %v2975_v11 }
 0x341   : > { %16962 = vmatmul.mubr.f32.vlgmr.msra.gmra.mrb[188].mxu1 %v2948_v32  ;;  %20082 = vmatpush1.bf16.xpose.msra.mxu0 %v20081_v63  ;;  %v725_v32 = vld [vmem:[%s20623_s22 + $0xc20] sm:$0xff]  ;;  %v734_v63 = vld [vmem:[%s20623_s22 + $0xc68] sm:$0xff] }
 0x342   : > { %20086 = vmatpush1.bf16.xpose.msra.mxu1 %v20085_v0  ;;  %17031 = vmatprep.mubr.f32.mxu0 %v2966_v2  ;;  %v20097_v48 = vpack.c.bf16 %v1169_v33, %v725_v32  ;;  %v1178_v0 = vld [vmem:[%s20623_s22 + $0x1a48] sm:$0x3]  ;;  %v326_v32 = vld [vmem:[%s20641_s29 + $0x320] sm:$0xff] }
 0x343   : > { %20088 = vmatprep.subr.bf16.mxu0 %v20087_v3  ;;  %v13253_v12 = vpop.f32.mrb[136].mxu0  ;;  %17101 = vmatprep.mubr.f32.mxu1 %v2967_v4  ;;  %v3036_v40 = vcombine.high %v326_v32, %v326_v32  ;;  %v3043_v45 = vrot.slane %v326_v32, %v20657_v25 }
 0x344   : > { %v13323_v13 = vpop.f32.mrb[136].mxu1  ;;  %20092 = vmatprep.subr.bf16.mxu1 %v20091_v5  ;;  %v13254_v17 = vadd.f32 %v13253_v12, %v13184_v1  ;;  %v13255_v18 = vpop.f32.mrb[137].mxu0  ;;  %v3016_v1 = vrot.slane %v3002_v55, %v20657_v25  ;;  %v736_v5 = vld [vmem:[%s20623_s22 + $0xc78] sm:$0xff]  ;;  %v20111_v12 = vpack.c.bf16 %v1178_v0, %v734_v63 }
 0x345   : > { %v13325_v19 = vpop.f32.mrb[137].mxu1  ;;  %v20115_v14 = vpack.c.bf16 %v1180_v6, %v736_v5  ;;  %v735_v18 = vld [vmem:[%s20623_s22 + $0xc70] sm:$0xff]  ;;  %v1188_v55 = vld [vmem:[%s20623_s22 + $0x1a98] sm:$0x3] }
 0x346   : > { %v13324_v26 = vadd.f32 %v13323_v13, %v13254_v17  ;;  %v3018_v13 = vcombine.high %v3016_v1, %v3016_v1  ;;  %v1177_v17 = vld [vmem:[%s20623_s22 + $0x1a40] sm:$0x3]  ;;  %v1179_v19 = vld [vmem:[%s20623_s22 + $0x1a50] sm:$0x3] }
 0x347   : > { %v20117_v34 = vpack.c.bf16 %v1179_v19, %v735_v18 }
 0x348   : > { %17032 = vmatmul.mubr.f32.vlgmr.msra.gmra.mrb[190].mxu0 %v2958_v51  ;;  %v3000_v51 = vcombine.high %v2992_v36, %v2992_v36 }
 0x349   : > { %17102 = vmatmul.mubr.f32.vlgmr.msra.gmra.mrb[190].mxu1 %v2965_v56  ;;  %20090 = vmatpush1.bf16.xpose.msra.mxu0 %v20089_v23  ;;  %v729_v56 = vld [vmem:[%s20623_s22 + $0xc40] sm:$0xff]  ;;  %v738_v23 = vld [vmem:[%s20623_s22 + $0xc88] sm:$0xff] }
 0x34a   : > { %20094 = vmatpush1.bf16.xpose.msra.mxu1 %v20093_v24  ;;  %17171 = vmatprep.mubr.f32.mxu0 %v2983_v27  ;;  %v20105_v8 = vpack.c.bf16 %v1173_v57, %v729_v56  ;;  %v1182_v24 = vld [vmem:[%s20623_s22 + $0x1a68] sm:$0x3] }
 0x34b   : > { %20096 = vmatprep.subr.bf16.mxu0 %v20095_v28  ;;  %v13393_v37 = vpop.f32.mrb[138].mxu0  ;;  %17241 = vmatprep.mubr.f32.mxu1 %v2984_v29  ;;  %v327_v56 = vld [vmem:[%s20641_s29 + $0x328] sm:$0xff] }
 0x34c   : > { %v13463_v38 = vpop.f32.mrb[138].mxu1  ;;  %20100 = vmatprep.subr.bf16.mxu1 %v20099_v30  ;;  %v13394_v42 = vadd.f32 %v13393_v37, %v13324_v26  ;;  %v13395_v43 = vpop.f32.mrb[139].mxu0  ;;  %v3033_v26 = vrot.slane %v3019_v15, %v20657_v25  ;;  %v740_v30 = vld [vmem:[%s20623_s22 + $0xc98] sm:$0xff]  ;;  %v20119_v37 = vpack.c.bf16 %v1182_v24, %v738_v23  ;;  %v3053_v0 = vcombine.high %v327_v56, %v327_v56 }
 0x34d   : > { %v13465_v44 = vpop.f32.mrb[139].mxu1  ;;  %v20123_v39 = vpack.c.bf16 %v1184_v31, %v740_v30  ;;  %v739_v43 = vld [vmem:[%s20623_s22 + $0xc90] sm:$0xff]  ;;  %v3060_v5 = vrot.slane %v327_v56, %v20657_v25  ;;  %v1192_v15 = vld [vmem:[%s20623_s22 + $0x1ab8] sm:$0x3] }
 0x34e   : > { %v13464_v50 = vadd.f32 %v13463_v38, %v13394_v42  ;;  %v3035_v38 = vcombine.high %v3033_v26, %v3033_v26  ;;  %v1181_v42 = vld [vmem:[%s20623_s22 + $0x1a60] sm:$0x3]  ;;  %v1183_v44 = vld [vmem:[%s20623_s22 + $0x1a70] sm:$0x3] }
 0x34f   : > { %v20125_v58 = vpack.c.bf16 %v1183_v44, %v739_v43 }
 0x350   : > { %17172 = vmatmul.mubr.f32.vlgmr.msra.gmra.mrb[192].mxu0 %v2975_v11  ;;  %v3017_v11 = vcombine.high %v3009_v60, %v3009_v60 }
 0x351   : > { %17242 = vmatmul.mubr.f32.vlgmr.msra.gmra.mrb[192].mxu1 %v2982_v16  ;;  %20098 = vmatpush1.bf16.xpose.msra.mxu0 %v20097_v48  ;;  %v733_v16 = vld [vmem:[%s20623_s22 + $0xc60] sm:$0xff]  ;;  %v742_v48 = vld [vmem:[%s20623_s22 + $0xca8] sm:$0xff] }
 0x352   : > { %20102 = vmatpush1.bf16.xpose.msra.mxu1 %v20101_v49  ;;  %17311 = vmatprep.mubr.f32.mxu0 %v3000_v51  ;;  %v20113_v33 = vpack.c.bf16 %v1177_v17, %v733_v16  ;;  %v1186_v49 = vld [vmem:[%s20623_s22 + $0x1a88] sm:$0x3]  ;;  %v328_v16 = vld [vmem:[%s20641_s29 + $0x330] sm:$0xff] }
 0x353   : > { %20104 = vmatprep.subr.bf16.mxu0 %v20103_v52  ;;  %v13533_v61 = vpop.f32.mrb[140].mxu0  ;;  %17381 = vmatprep.mubr.f32.mxu1 %v3001_v53  ;;  %v3070_v24 = vcombine.high %v328_v16, %v328_v16  ;;  %v3077_v30 = vrot.slane %v328_v16, %v20657_v25 }
 0x354   : > { %v13603_v62 = vpop.f32.mrb[140].mxu1  ;;  %20108 = vmatprep.subr.bf16.mxu1 %v20107_v54  ;;  %v13534_v2 = vadd.f32 %v13533_v61, %v13464_v50  ;;  %v13535_v3 = vpop.f32.mrb[141].mxu0  ;;  %v3050_v50 = vrot.slane %v3036_v40, %v20657_v25  ;;  %v744_v54 = vld [vmem:[%s20623_s22 + $0xcb8] sm:$0xff]  ;;  %v20127_v61 = vpack.c.bf16 %v1186_v49, %v742_v48 }
 0x355   : > { %v13605_v4 = vpop.f32.mrb[141].mxu1  ;;  %v20131_v63 = vpack.c.bf16 %v1188_v55, %v744_v54  ;;  %v743_v3 = vld [vmem:[%s20623_s22 + $0xcb0] sm:$0xff]  ;;  %v1196_v40 = vld [vmem:[%s20623_s22 + $0x1ad8] sm:$0x3] }
 0x356   : > { %v13604_v10 = vadd.f32 %v13603_v62, %v13534_v2  ;;  %v3052_v62 = vcombine.high %v3050_v50, %v3050_v50  ;;  %v1185_v2 = vld [vmem:[%s20623_s22 + $0x1a80] sm:$0x3]  ;;  %v1187_v4 = vld [vmem:[%s20623_s22 + $0x1a90] sm:$0x3] }
 0x357   : > { %v20133_v18 = vpack.c.bf16 %v1187_v4, %v743_v3 }
 0x358   : > { %17312 = vmatmul.mubr.f32.vlgmr.msra.gmra.mrb[194].mxu0 %v2992_v36  ;;  %v3034_v36 = vcombine.high %v3026_v20, %v3026_v20 }
 0x359   : > { %17382 = vmatmul.mubr.f32.vlgmr.msra.gmra.mrb[194].mxu1 %v2999_v41  ;;  %20106 = vmatpush1.bf16.xpose.msra.mxu0 %v20105_v8  ;;  %v737_v41 = vld [vmem:[%s20623_s22 + $0xc80] sm:$0xff]  ;;  %v746_v8 = vld [vmem:[%s20623_s22 + $0xcc8] sm:$0xff] }
 0x35a   : > { %20110 = vmatpush1.bf16.xpose.msra.mxu1 %v20109_v9  ;;  %17451 = vmatprep.mubr.f32.mxu0 %v3017_v11  ;;  %v20121_v57 = vpack.c.bf16 %v1181_v42, %v737_v41  ;;  %v1190_v9 = vld [vmem:[%s20623_s22 + $0x1aa8] sm:$0x3]  ;;  %v329_v41 = vld [vmem:[%s20641_s29 + $0x338] sm:$0xff] }
 0x35b   : > { %20112 = vmatprep.subr.bf16.mxu0 %v20111_v12  ;;  %v13673_v21 = vpop.f32.mrb[142].mxu0  ;;  %17521 = vmatprep.mubr.f32.mxu1 %v3018_v13  ;;  %v3087_v49 = vcombine.high %v329_v41, %v329_v41  ;;  %v3094_v54 = vrot.slane %v329_v41, %v20657_v25 }
 0x35c   : > { %v13743_v22 = vpop.f32.mrb[142].mxu1  ;;  %20116 = vmatprep.subr.bf16.mxu1 %v20115_v14  ;;  %v13674_v27 = vadd.f32 %v13673_v21, %v13604_v10  ;;  %v13675_v28 = vpop.f32.mrb[143].mxu0  ;;  %v3067_v10 = vrot.slane %v3053_v0, %v20657_v25  ;;  %v748_v14 = vld [vmem:[%s20623_s22 + $0xcd8] sm:$0xff]  ;;  %v20135_v21 = vpack.c.bf16 %v1190_v9, %v746_v8 }
 0x35d   : > { %v13745_v29 = vpop.f32.mrb[143].mxu1  ;;  %v20139_v23 = vpack.c.bf16 %v1192_v15, %v748_v14  ;;  %v747_v28 = vld [vmem:[%s20623_s22 + $0xcd0] sm:$0xff]  ;;  %v1200_v0 = vld [vmem:[%s20623_s22 + $0x1af8] sm:$0x3] }
 0x35e   : > { %v13744_v35 = vadd.f32 %v13743_v22, %v13674_v27  ;;  %v3069_v22 = vcombine.high %v3067_v10, %v3067_v10  ;;  %v1189_v27 = vld [vmem:[%s20623_s22 + $0x1aa0] sm:$0x3]  ;;  %v1191_v29 = vld [vmem:[%s20623_s22 + $0x1ab0] sm:$0x3] }
 0x35f   : > { %v20141_v43 = vpack.c.bf16 %v1191_v29, %v747_v28 }
 0x360   : > { %17452 = vmatmul.mubr.f32.vlgmr.msra.gmra.mrb[196].mxu0 %v3009_v60  ;;  %v3051_v60 = vcombine.high %v3043_v45, %v3043_v45 }
 0x361   : > { %17522 = vmatmul.mubr.f32.vlgmr.msra.gmra.mrb[196].mxu1 %v3016_v1  ;;  %20114 = vmatpush1.bf16.xpose.msra.mxu0 %v20113_v33  ;;  %v741_v1 = vld [vmem:[%s20623_s22 + $0xca0] sm:$0xff]  ;;  %v750_v33 = vld [vmem:[%s20623_s22 + $0xce8] sm:$0xff] }
 0x362   : > { %20118 = vmatpush1.bf16.xpose.msra.mxu1 %v20117_v34  ;;  %17591 = vmatprep.mubr.f32.mxu0 %v3034_v36  ;;  %v20129_v17 = vpack.c.bf16 %v1185_v2, %v741_v1  ;;  %v1194_v34 = vld [vmem:[%s20623_s22 + $0x1ac8] sm:$0x3]  ;;  %v330_v1 = vld [vmem:[%s20641_s29 + $0x340] sm:$0xff] }
 0x363   : > { %20120 = vmatprep.subr.bf16.mxu0 %v20119_v37  ;;  %v13813_v46 = vpop.f32.mrb[144].mxu0  ;;  %17661 = vmatprep.mubr.f32.mxu1 %v3035_v38  ;;  %v3104_v9 = vcombine.high %v330_v1, %v330_v1  ;;  %v3111_v14 = vrot.slane %v330_v1, %v20657_v25 }
 0x364   : > { %v13883_v47 = vpop.f32.mrb[144].mxu1  ;;  %20124 = vmatprep.subr.bf16.mxu1 %v20123_v39  ;;  %v13814_v51 = vadd.f32 %v13813_v46, %v13744_v35  ;;  %v13815_v52 = vpop.f32.mrb[145].mxu0  ;;  %v3084_v35 = vrot.slane %v3070_v24, %v20657_v25  ;;  %v752_v39 = vld [vmem:[%s20623_s22 + $0xcf8] sm:$0xff]  ;;  %v20143_v46 = vpack.c.bf16 %v1194_v34, %v750_v33 }
 0x365   : > { %v13885_v53 = vpop.f32.mrb[145].mxu1  ;;  %v20147_v48 = vpack.c.bf16 %v1196_v40, %v752_v39  ;;  %v751_v52 = vld [vmem:[%s20623_s22 + $0xcf0] sm:$0xff]  ;;  %v1204_v24 = vld [vmem:[%s20623_s22 + $0x1b18] sm:$0x3] }
 0x366   : > { %v13884_v59 = vadd.f32 %v13883_v47, %v13814_v51  ;;  %v3086_v47 = vcombine.high %v3084_v35, %v3084_v35  ;;  %v1193_v51 = vld [vmem:[%s20623_s22 + $0x1ac0] sm:$0x3]  ;;  %v1195_v53 = vld [vmem:[%s20623_s22 + $0x1ad0] sm:$0x3] }
 0x367   : > { %v20149_v3 = vpack.c.bf16 %v1195_v53, %v751_v52 }
 0x368   : > { %17592 = vmatmul.mubr.f32.vlgmr.msra.gmra.mrb[198].mxu0 %v3026_v20  ;;  %v3068_v20 = vcombine.high %v3060_v5, %v3060_v5 }
 0x369   : > { %17662 = vmatmul.mubr.f32.vlgmr.msra.gmra.mrb[198].mxu1 %v3033_v26  ;;  %20122 = vmatpush1.bf16.xpose.msra.mxu0 %v20121_v57  ;;  %v745_v26 = vld [vmem:[%s20623_s22 + $0xcc0] sm:$0xff]  ;;  %v754_v57 = vld [vmem:[%s20623_s22 + $0xd08] sm:$0xff] }
 0x36a   : > { %20126 = vmatpush1.bf16.xpose.msra.mxu1 %v20125_v58  ;;  %17731 = vmatprep.mubr.f32.mxu0 %v3051_v60  ;;  %v20137_v42 = vpack.c.bf16 %v1189_v27, %v745_v26  ;;  %v1198_v58 = vld [vmem:[%s20623_s22 + $0x1ae8] sm:$0x3] }
 0x36b   : > { %20128 = vmatprep.subr.bf16.mxu0 %v20127_v61  ;;  %v13953_v6 = vpop.f32.mrb[146].mxu0  ;;  %17801 = vmatprep.mubr.f32.mxu1 %v3052_v62  ;;  %v331_v26 = vld [vmem:[%s20641_s29 + $0x348] sm:$0xff] }
 0x36c   : > { %v14023_v7 = vpop.f32.mrb[146].mxu1  ;;  %20132 = vmatprep.subr.bf16.mxu1 %v20131_v63  ;;  %v13954_v11 = vadd.f32 %v13953_v6, %v13884_v59  ;;  %v13955_v12 = vpop.f32.mrb[147].mxu0  ;;  %v3101_v59 = vrot.slane %v3087_v49, %v20657_v25  ;;  %v756_v63 = vld [vmem:[%s20623_s22 + $0xd18] sm:$0xff]  ;;  %v20151_v6 = vpack.c.bf16 %v1198_v58, %v754_v57  ;;  %v3121_v34 = vcombine.high %v331_v26, %v331_v26 }
 0x36d   : > { %v14025_v13 = vpop.f32.mrb[147].mxu1  ;;  %v20155_v8 = vpack.c.bf16 %v1200_v0, %v756_v63  ;;  %v755_v12 = vld [vmem:[%s20623_s22 + $0xd10] sm:$0xff]  ;;  %v3128_v39 = vrot.slane %v331_v26, %v20657_v25  ;;  %v1208_v49 = vld [vmem:[%s20623_s22 + $0x1b38] sm:$0x3] }
 0x36e   : > { %v14024_v19 = vadd.f32 %v14023_v7, %v13954_v11  ;;  %v3103_v7 = vcombine.high %v3101_v59, %v3101_v59  ;;  %v1197_v11 = vld [vmem:[%s20623_s22 + $0x1ae0] sm:$0x3]  ;;  %v1199_v13 = vld [vmem:[%s20623_s22 + $0x1af0] sm:$0x3] }
 0x36f   : > { %v20157_v28 = vpack.c.bf16 %v1199_v13, %v755_v12 }
 0x370   : > { %17732 = vmatmul.mubr.f32.vlgmr.msra.gmra.mrb[200].mxu0 %v3043_v45  ;;  %v3085_v45 = vcombine.high %v3077_v30, %v3077_v30 }
 0x371   : > { %17802 = vmatmul.mubr.f32.vlgmr.msra.gmra.mrb[200].mxu1 %v3050_v50  ;;  %20130 = vmatpush1.bf16.xpose.msra.mxu0 %v20129_v17  ;;  %v749_v50 = vld [vmem:[%s20623_s22 + $0xce0] sm:$0xff]  ;;  %v758_v17 = vld [vmem:[%s20623_s22 + $0xd28] sm:$0xff] }
 0x372   : > { %20134 = vmatpush1.bf16.xpose.msra.mxu1 %v20133_v18  ;;  %17871 = vmatprep.mubr.f32.mxu0 %v3068_v20  ;;  %v20145_v2 = vpack.c.bf16 %v1193_v51, %v749_v50  ;;  %v1202_v18 = vld [vmem:[%s20623_s22 + $0x1b08] sm:$0x3]  ;;  %v332_v50 = vld [vmem:[%s20641_s29 + $0x350] sm:$0xff] }
 0x373   : > { %20136 = vmatprep.subr.bf16.mxu0 %v20135_v21  ;;  %v14093_v31 = vpop.f32.mrb[148].mxu0  ;;  %17941 = vmatprep.mubr.f32.mxu1 %v3069_v22  ;;  %v3138_v58 = vcombine.high %v332_v50, %v332_v50  ;;  %v3145_v63 = vrot.slane %v332_v50, %v20657_v25 }
 0x374   : > { %v14163_v32 = vpop.f32.mrb[148].mxu1  ;;  %20140 = vmatprep.subr.bf16.mxu1 %v20139_v23  ;;  %v14094_v36 = vadd.f32 %v14093_v31, %v14024_v19  ;;  %v14095_v37 = vpop.f32.mrb[149].mxu0  ;;  %v3118_v19 = vrot.slane %v3104_v9, %v20657_v25  ;;  %v760_v23 = vld [vmem:[%s20623_s22 + $0xd38] sm:$0xff]  ;;  %v20159_v31 = vpack.c.bf16 %v1202_v18, %v758_v17 }
 0x375   : > { %v14165_v38 = vpop.f32.mrb[149].mxu1  ;;  %v20163_v33 = vpack.c.bf16 %v1204_v24, %v760_v23  ;;  %v759_v37 = vld [vmem:[%s20623_s22 + $0xd30] sm:$0xff]  ;;  %v1212_v9 = vld [vmem:[%s20623_s22 + $0x1b58] sm:$0x3] }
 0x376   : > { %v14164_v44 = vadd.f32 %v14163_v32, %v14094_v36  ;;  %v3120_v32 = vcombine.high %v3118_v19, %v3118_v19  ;;  %v1201_v36 = vld [vmem:[%s20623_s22 + $0x1b00] sm:$0x3]  ;;  %v1203_v38 = vld [vmem:[%s20623_s22 + $0x1b10] sm:$0x3] }
 0x377   : > { %v20165_v52 = vpack.c.bf16 %v1203_v38, %v759_v37 }
 0x378   : > { %17872 = vmatmul.mubr.f32.vlgmr.msra.gmra.mrb[202].mxu0 %v3060_v5  ;;  %v3102_v5 = vcombine.high %v3094_v54, %v3094_v54 }
 0x379   : > { %17942 = vmatmul.mubr.f32.vlgmr.msra.gmra.mrb[202].mxu1 %v3067_v10  ;;  %20138 = vmatpush1.bf16.xpose.msra.mxu0 %v20137_v42  ;;  %v753_v10 = vld [vmem:[%s20623_s22 + $0xd00] sm:$0xff]  ;;  %v762_v42 = vld [vmem:[%s20623_s22 + $0xd48] sm:$0xff] }
 0x37a   : > { %20142 = vmatpush1.bf16.xpose.msra.mxu1 %v20141_v43  ;;  %18011 = vmatprep.mubr.f32.mxu0 %v3085_v45  ;;  %v20153_v27 = vpack.c.bf16 %v1197_v11, %v753_v10  ;;  %v1206_v43 = vld [vmem:[%s20623_s22 + $0x1b28] sm:$0x3]  ;;  %v333_v10 = vld [vmem:[%s20641_s29 + $0x358] sm:$0xff] }
 0x37b   : > { %20144 = vmatprep.subr.bf16.mxu0 %v20143_v46  ;;  %v14233_v55 = vpop.f32.mrb[150].mxu0  ;;  %18081 = vmatprep.mubr.f32.mxu1 %v3086_v47  ;;  %v3155_v18 = vcombine.high %v333_v10, %v333_v10  ;;  %v3162_v23 = vrot.slane %v333_v10, %v20657_v25 }
 0x37c   : > { %v14303_v56 = vpop.f32.mrb[150].mxu1  ;;  %20148 = vmatprep.subr.bf16.mxu1 %v20147_v48  ;;  %v14234_v60 = vadd.f32 %v14233_v55, %v14164_v44  ;;  %v14235_v61 = vpop.f32.mrb[151].mxu0  ;;  %v3135_v44 = vrot.slane %v3121_v34, %v20657_v25  ;;  %v764_v48 = vld [vmem:[%s20623_s22 + $0xd58] sm:$0xff]  ;;  %v20167_v55 = vpack.c.bf16 %v1206_v43, %v762_v42 }
 0x37d   : > { %v14305_v62 = vpop.f32.mrb[151].mxu1  ;;  %v20171_v57 = vpack.c.bf16 %v1208_v49, %v764_v48  ;;  %v763_v61 = vld [vmem:[%s20623_s22 + $0xd50] sm:$0xff]  ;;  %v1216_v34 = vld [vmem:[%s20623_s22 + $0x1b78] sm:$0x3] }
 0x37e   : > { %v14304_v4 = vadd.f32 %v14303_v56, %v14234_v60  ;;  %v3137_v56 = vcombine.high %v3135_v44, %v3135_v44  ;;  %v1205_v60 = vld [vmem:[%s20623_s22 + $0x1b20] sm:$0x3]  ;;  %v1207_v62 = vld [vmem:[%s20623_s22 + $0x1b30] sm:$0x3] }
 0x37f   : > { %v20173_v12 = vpack.c.bf16 %v1207_v62, %v763_v61 }
 0x380   : > { %18012 = vmatmul.mubr.f32.vlgmr.msra.gmra.mrb[204].mxu0 %v3077_v30  ;;  %v3119_v30 = vcombine.high %v3111_v14, %v3111_v14 }
 0x381   : > { %18082 = vmatmul.mubr.f32.vlgmr.msra.gmra.mrb[204].mxu1 %v3084_v35  ;;  %20146 = vmatpush1.bf16.xpose.msra.mxu0 %v20145_v2  ;;  %v757_v35 = vld [vmem:[%s20623_s22 + $0xd20] sm:$0xff]  ;;  %v766_v2 = vld [vmem:[%s20623_s22 + $0xd68] sm:$0xff] }
 0x382   : > { %20150 = vmatpush1.bf16.xpose.msra.mxu1 %v20149_v3  ;;  %18151 = vmatprep.mubr.f32.mxu0 %v3102_v5  ;;  %v20161_v51 = vpack.c.bf16 %v1201_v36, %v757_v35  ;;  %v1210_v3 = vld [vmem:[%s20623_s22 + $0x1b48] sm:$0x3]  ;;  %v334_v35 = vld [vmem:[%s20641_s29 + $0x360] sm:$0xff] }
 0x383   : > { %20152 = vmatprep.subr.bf16.mxu0 %v20151_v6  ;;  %v14373_v15 = vpop.f32.mrb[152].mxu0  ;;  %18221 = vmatprep.mubr.f32.mxu1 %v3103_v7  ;;  %v3172_v43 = vcombine.high %v334_v35, %v334_v35  ;;  %v3179_v48 = vrot.slane %v334_v35, %v20657_v25 }
 0x384   : > { %v14443_v16 = vpop.f32.mrb[152].mxu1  ;;  %20156 = vmatprep.subr.bf16.mxu1 %v20155_v8  ;;  %v14374_v20 = vadd.f32 %v14373_v15, %v14304_v4  ;;  %v14375_v21 = vpop.f32.mrb[153].mxu0  ;;  %v3152_v4 = vrot.slane %v3138_v58, %v20657_v25  ;;  %v768_v8 = vld [vmem:[%s20623_s22 + $0xd78] sm:$0xff]  ;;  %v20175_v15 = vpack.c.bf16 %v1210_v3, %v766_v2 }
 0x385   : > { %v14445_v22 = vpop.f32.mrb[153].mxu1  ;;  %v20179_v17 = vpack.c.bf16 %v1212_v9, %v768_v8  ;;  %v767_v21 = vld [vmem:[%s20623_s22 + $0xd70] sm:$0xff]  ;;  %v1220_v58 = vld [vmem:[%s20623_s22 + $0x1b98] sm:$0x3] }
 0x386   : > { %v14444_v29 = vadd.f32 %v14443_v16, %v14374_v20  ;;  %v3154_v16 = vcombine.high %v3152_v4, %v3152_v4  ;;  %v1209_v20 = vld [vmem:[%s20623_s22 + $0x1b40] sm:$0x3]  ;;  %v1211_v22 = vld [vmem:[%s20623_s22 + $0x1b50] sm:$0x3] }
 0x387   : > { %v20181_v37 = vpack.c.bf16 %v1211_v22, %v767_v21 }
 0x388   : > { %18152 = vmatmul.mubr.f32.vlgmr.msra.gmra.mrb[206].mxu0 %v3094_v54  ;;  %v3136_v54 = vcombine.high %v3128_v39, %v3128_v39 }
 0x389   : > { %18222 = vmatmul.mubr.f32.vlgmr.msra.gmra.mrb[206].mxu1 %v3101_v59  ;;  %20154 = vmatpush1.bf16.xpose.msra.mxu0 %v20153_v27  ;;  %v761_v59 = vld [vmem:[%s20623_s22 + $0xd40] sm:$0xff]  ;;  %v770_v27 = vld [vmem:[%s20623_s22 + $0xd88] sm:$0xff] }
 0x38a   : > { %20158 = vmatpush1.bf16.xpose.msra.mxu1 %v20157_v28  ;;  %18291 = vmatprep.mubr.f32.mxu0 %v3119_v30  ;;  %v20169_v11 = vpack.c.bf16 %v1205_v60, %v761_v59  ;;  %v1214_v28 = vld [vmem:[%s20623_s22 + $0x1b68] sm:$0x3] }
 0x38b   : > { %20160 = vmatprep.subr.bf16.mxu0 %v20159_v31  ;;  %v14513_v40 = vpop.f32.mrb[154].mxu0  ;;  %18361 = vmatprep.mubr.f32.mxu1 %v3120_v32  ;;  %v335_v59 = vld [vmem:[%s20641_s29 + $0x368] sm:$0xff] }
 0x38c   : > { %v14583_v41 = vpop.f32.mrb[154].mxu1  ;;  %20164 = vmatprep.subr.bf16.mxu1 %v20163_v33  ;;  %v14514_v45 = vadd.f32 %v14513_v40, %v14444_v29  ;;  %v14515_v46 = vpop.f32.mrb[155].mxu0  ;;  %v3169_v29 = vrot.slane %v3155_v18, %v20657_v25  ;;  %v772_v33 = vld [vmem:[%s20623_s22 + $0xd98] sm:$0xff]  ;;  %v20183_v40 = vpack.c.bf16 %v1214_v28, %v770_v27  ;;  %v3189_v3 = vcombine.high %v335_v59, %v335_v59 }
 0x38d   : > { %v14585_v47 = vpop.f32.mrb[155].mxu1  ;;  %v20187_v42 = vpack.c.bf16 %v1216_v34, %v772_v33  ;;  %v771_v46 = vld [vmem:[%s20623_s22 + $0xd90] sm:$0xff]  ;;  %v3196_v8 = vrot.slane %v335_v59, %v20657_v25  ;;  %v780_v18 = vld [vmem:[%s20623_s22 + $0xdd8] sm:$0xff] }
 0x38e   : > { %v14584_v53 = vadd.f32 %v14583_v41, %v14514_v45  ;;  %v3171_v41 = vcombine.high %v3169_v29, %v3169_v29  ;;  %v1213_v45 = vld [vmem:[%s20623_s22 + $0x1b60] sm:$0x3]  ;;  %v1215_v47 = vld [vmem:[%s20623_s22 + $0x1b70] sm:$0x3] }
 0x38f   : > { %v20189_v61 = vpack.c.bf16 %v1215_v47, %v771_v46 }
 0x390   : > { %18292 = vmatmul.mubr.f32.vlgmr.msra.gmra.mrb[208].mxu0 %v3111_v14  ;;  %v3153_v14 = vcombine.high %v3145_v63, %v3145_v63 }
 0x391   : > { %18362 = vmatmul.mubr.f32.vlgmr.msra.gmra.mrb[208].mxu1 %v3118_v19  ;;  %20162 = vmatpush1.bf16.xpose.msra.mxu0 %v20161_v51  ;;  %v765_v19 = vld [vmem:[%s20623_s22 + $0xd60] sm:$0xff]  ;;  %v774_v51 = vld [vmem:[%s20623_s22 + $0xda8] sm:$0xff] }
 0x392   : > { %20166 = vmatpush1.bf16.xpose.msra.mxu1 %v20165_v52  ;;  %18431 = vmatprep.mubr.f32.mxu0 %v3136_v54  ;;  %v20177_v36 = vpack.c.bf16 %v1209_v20, %v765_v19  ;;  %v1218_v52 = vld [vmem:[%s20623_s22 + $0x1b88] sm:$0x3]  ;;  %v1224_v19 = vld [vmem:[%s20623_s22 + $0x1bb8] sm:$0x3] }
 0x393   : > { %20168 = vmatprep.subr.bf16.mxu0 %v20167_v55  ;;  %v14653_v0 = vpop.f32.mrb[156].mxu0  ;;  %18501 = vmatprep.mubr.f32.mxu1 %v3137_v56  ;;  %v20203_v28 = vpack.c.bf16 %v1224_v19, %v780_v18 }
 0x394   : > { %v14723_v1 = vpop.f32.mrb[156].mxu1  ;;  %20172 = vmatprep.subr.bf16.mxu1 %v20171_v57  ;;  %v14654_v5 = vadd.f32 %v14653_v0, %v14584_v53  ;;  %v14655_v6 = vpop.f32.mrb[157].mxu0  ;;  %v3186_v53 = vrot.slane %v3172_v43, %v20657_v25  ;;  %v776_v57 = vld [vmem:[%s20623_s22 + $0xdb8] sm:$0xff]  ;;  %v20191_v0 = vpack.c.bf16 %v1218_v52, %v774_v51 }
 0x395   : > { %v14725_v7 = vpop.f32.mrb[157].mxu1  ;;  %v20195_v2 = vpack.c.bf16 %v1220_v58, %v776_v57  ;;  %v775_v6 = vld [vmem:[%s20623_s22 + $0xdb0] sm:$0xff] }
 0x396   : > { %v14724_v13 = vadd.f32 %v14723_v1, %v14654_v5  ;;  %v3188_v1 = vcombine.high %v3186_v53, %v3186_v53  ;;  %v1217_v5 = vld [vmem:[%s20623_s22 + $0x1b80] sm:$0x3]  ;;  %v1219_v7 = vld [vmem:[%s20623_s22 + $0x1b90] sm:$0x3] }
 0x397   : > { %v20197_v21 = vpack.c.bf16 %v1219_v7, %v775_v6 }
 0x398   : > { %18432 = vmatmul.mubr.f32.vlgmr.msra.gmra.mrb[210].mxu0 %v3128_v39  ;;  %v3170_v39 = vcombine.high %v3162_v23, %v3162_v23 }
 0x399   : > { %18502 = vmatmul.mubr.f32.vlgmr.msra.gmra.mrb[210].mxu1 %v3135_v44  ;;  %20170 = vmatpush1.bf16.xpose.msra.mxu0 %v20169_v11  ;;  %v769_v44 = vld [vmem:[%s20623_s22 + $0xd80] sm:$0xff]  ;;  %v778_v11 = vld [vmem:[%s20623_s22 + $0xdc8] sm:$0xff] }
 0x39a   : > { %20174 = vmatpush1.bf16.xpose.msra.mxu1 %v20173_v12  ;;  %18571 = vmatprep.mubr.f32.mxu0 %v3153_v14  ;;  %v20185_v60 = vpack.c.bf16 %v1213_v45, %v769_v44  ;;  %v1222_v12 = vld [vmem:[%s20623_s22 + $0x1ba8] sm:$0x3]  ;;  %v336_v14 = vld [vmem:[%s20641_s29 + $0x370] sm:$0xff] }
 0x39b   : > { %20176 = vmatprep.subr.bf16.mxu0 %v20175_v15  ;;  %v14793_v24 = vpop.f32.mrb[158].mxu0  ;;  %18641 = vmatprep.mubr.f32.mxu1 %v3154_v16  ;;  %v3213_v33 = vrot.slane %v336_v14, %v20657_v25 }
 0x39c   : > { %v14863_v26 = vpop.f32.mrb[158].mxu1  ;;  %20180 = vmatprep.subr.bf16.mxu1 %v20179_v17  ;;  %v14794_v30 = vadd.f32 %v14793_v24, %v14724_v13  ;;  %v14795_v31 = vpop.f32.mrb[159].mxu0  ;;  %v3203_v13 = vrot.slane %v3189_v3, %v20657_v25  ;;  %v20199_v24 = vpack.c.bf16 %v1222_v12, %v778_v11 }
 0x39d   : > { %v14865_v32 = vpop.f32.mrb[159].mxu1  ;;  %v779_v31 = vld [vmem:[%s20623_s22 + $0xdd0] sm:$0xff]  ;;  %v3221_v43 = vcombine.high %v3213_v33, %v3213_v33 }
 0x39e   : > { %v14864_v38 = vadd.f32 %v14863_v26, %v14794_v30  ;;  %v3206_v26 = vcombine.high %v336_v14, %v336_v14  ;;  %v3205_v27 = vcombine.high %v3203_v13, %v3203_v13  ;;  %v1221_v30 = vld [vmem:[%s20623_s22 + $0x1ba0] sm:$0x3]  ;;  %v1223_v32 = vld [vmem:[%s20623_s22 + $0x1bb0] sm:$0x3] }
 0x3a0   : > { %18572 = vmatmul.mubr.f32.vlgmr.msra.gmra.mrb[212].mxu0 %v3145_v63  ;;  %v3187_v63 = vcombine.high %v3179_v48, %v3179_v48  ;;  %v3220_v34 = vrot.slane %v3206_v26, %v20657_v25 }
 0x3a1   : > { %18642 = vmatmul.mubr.f32.vlgmr.msra.gmra.mrb[212].mxu1 %v3152_v4  ;;  %20178 = vmatpush1.bf16.xpose.msra.mxu0 %v20177_v36  ;;  %v773_v4 = vld [vmem:[%s20623_s22 + $0xda0] sm:$0xff] }
 0x3a2   : > { %20182 = vmatpush1.bf16.xpose.msra.mxu1 %v20181_v37  ;;  %18711 = vmatprep.mubr.f32.mxu0 %v3170_v39  ;;  %v20193_v20 = vpack.c.bf16 %v1217_v5, %v773_v4  ;;  %v3222_v44 = vcombine.high %v3220_v34, %v3220_v34 }
 0x3a3   : > { %20184 = vmatprep.subr.bf16.mxu0 %v20183_v40  ;;  %v14933_v49 = vpop.f32.mrb[160].mxu0  ;;  %18781 = vmatprep.mubr.f32.mxu1 %v3171_v41  ;;  %v20205_v41 = vpack.c.bf16 %v1223_v32, %v779_v31 }
 0x3a4   : > { %v15003_v50 = vpop.f32.mrb[160].mxu1  ;;  %20188 = vmatprep.subr.bf16.mxu1 %v20187_v42  ;;  %v14934_v54 = vadd.f32 %v14933_v49, %v14864_v38  ;;  %v14935_v55 = vpop.f32.mrb[161].mxu0 }
 0x3a5   : > { %v15005_v56 = vpop.f32.mrb[161].mxu1 }
 0x3a6   : > { %v15004_v62 = vadd.f32 %v15003_v50, %v14934_v54 }
 0x3a8   : > { %18712 = vmatmul.mubr.f32.vlgmr.msra.gmra.mrb[214].mxu0 %v3162_v23  ;;  %v3204_v23 = vcombine.high %v3196_v8, %v3196_v8 }
 0x3a9   : > { %18782 = vmatmul.mubr.f32.vlgmr.msra.gmra.mrb[214].mxu1 %v3169_v29  ;;  %20186 = vmatpush1.bf16.xpose.msra.mxu0 %v20185_v60  ;;  %v777_v29 = vld [vmem:[%s20623_s22 + $0xdc0] sm:$0xff] }
 0x3aa   : > { %20190 = vmatpush1.bf16.xpose.msra.mxu1 %v20189_v61  ;;  %18851 = vmatprep.mubr.f32.mxu0 %v3187_v63  ;;  %v20201_v40 = vpack.c.bf16 %v1221_v30, %v777_v29 }
 0x3ab   : > { %20192 = vmatprep.subr.bf16.mxu0 %v20191_v0  ;;  %v15073_v9 = vpop.f32.mrb[162].mxu0  ;;  %18921 = vmatprep.mubr.f32.mxu1 %v3188_v1 }
 0x3ac   : > { %v15143_v10 = vpop.f32.mrb[162].mxu1  ;;  %20196 = vmatprep.subr.bf16.mxu1 %v20195_v2  ;;  %v15074_v15 = vadd.f32 %v15073_v9, %v15004_v62  ;;  %v15075_v16 = vpop.f32.mrb[163].mxu0 }
 0x3ad   : > { %v15145_v17 = vpop.f32.mrb[163].mxu1 }
 0x3ae   : > { %v15144_v22 = vadd.f32 %v15143_v10, %v15074_v15 }
 0x3b0   : > { %18852 = vmatmul.mubr.f32.vlgmr.msra.gmra.mrb[216].mxu0 %v3179_v48 }
 0x3b1   : > { %18922 = vmatmul.mubr.f32.vlgmr.msra.gmra.mrb[216].mxu1 %v3186_v53  ;;  %20194 = vmatpush1.bf16.xpose.msra.mxu0 %v20193_v20 }
 0x3b2   : > { %20198 = vmatpush1.bf16.xpose.msra.mxu1 %v20197_v21  ;;  %18991 = vmatprep.mubr.f32.mxu0 %v3204_v23 }
 0x3b3   : > { %20200 = vmatprep.subr.bf16.mxu0 %v20199_v24  ;;  %v15213_v35 = vpop.f32.mrb[164].mxu0  ;;  %19061 = vmatprep.mubr.f32.mxu1 %v3205_v27 }
 0x3b4   : > { %v15283_v36 = vpop.f32.mrb[164].mxu1  ;;  %20204 = vmatprep.subr.bf16.mxu1 %v20203_v28  ;;  %v15214_v37 = vadd.f32 %v15213_v35, %v15144_v22  ;;  %v15215_v38 = vpop.f32.mrb[165].mxu0 }
 0x3b5   : > { %v15285_v39 = vpop.f32.mrb[165].mxu1 }
 0x3b6   : > { %v15284_v42 = vadd.f32 %v15283_v36, %v15214_v37 }
 0x3b8   : > { %18992 = vmatmul.mubr.f32.vlgmr.msra.gmra.mrb[218].mxu0 %v3196_v8 }
 0x3b9   : > { %19062 = vmatmul.mubr.f32.vlgmr.msra.gmra.mrb[218].mxu1 %v3203_v13  ;;  %20202 = vmatpush1.bf16.xpose.msra.mxu0 %v20201_v40 }
 0x3ba   : > { %20206 = vmatpush1.bf16.xpose.msra.mxu1 %v20205_v41  ;;  %19131 = vmatprep.mubr.f32.mxu0 %v3221_v43 }
 0x3bb   : > { %19201 = vmatprep.mubr.f32.mxu1 %v3222_v44  ;;  %v15353_v45 = vpop.f32.mrb[166].mxu0 }
 0x3bc   : > { %v15423_v25 = vpop.f32.mrb[166].mxu1  ;;  %v15354_v46 = vadd.f32 %v15353_v45, %v15284_v42  ;;  %v15355_v47 = vpop.f32.mrb[167].mxu0 }
 0x3bd   : > { %v15425_v48 = vpop.f32.mrb[167].mxu1 }
 0x3be   : > { %v15424_v49 = vadd.f32 %v15423_v25, %v15354_v46 }
 0x3c0   : > { %19132 = vmatmul.mubr.f32.vlgmr.msra.gmra.mrb[220].mxu0 %v3213_v33 }
 0x3c1   : > { %19202 = vmatmul.mubr.f32.vlgmr.msra.gmra.mrb[220].mxu1 %v3220_v34 }
 0x3c3   : > { %v15493_v50 = vpop.f32.mrb[168].mxu0 }
 0x3c4   : > { %v15563_v51 = vpop.f32.mrb[168].mxu1  ;;  %v15494_v52 = vadd.f32 %v15493_v50, %v15424_v49  ;;  %v15495_v53 = vpop.f32.mrb[169].mxu0 }
 0x3c5   : > { %v15565_v54 = vpop.f32.mrb[169].mxu1 }
 0x3c6   : > { %v15564_v55 = vadd.f32 %v15563_v51, %v15494_v52 }
 0x3cb   : > { %v15633_v56 = vpop.f32.mrb[170].mxu0 }
 0x3cc   : > { %v15703_v57 = vpop.f32.mrb[170].mxu1  ;;  %v15634_v58 = vadd.f32 %v15633_v56, %v15564_v55  ;;  %v15635_v59 = vpop.f32.mrb[171].mxu0 }
 0x3cd   : > { %v15705_v60 = vpop.f32.mrb[171].mxu1 }
 0x3ce   : > { %v15704_v61 = vadd.f32 %v15703_v57, %v15634_v58 }
 0x3d3   : > { %v15773_v62 = vpop.f32.mrb[172].mxu0 }
 0x3d4   : > { %v15843_v63 = vpop.f32.mrb[172].mxu1  ;;  %v15774_v0 = vadd.f32 %v15773_v62, %v15704_v61  ;;  %v15775_v1 = vpop.f32.mrb[173].mxu0 }
 0x3d5   : > { %v15845_v2 = vpop.f32.mrb[173].mxu1 }
 0x3d6   : > { %v15844_v3 = vadd.f32 %v15843_v63, %v15774_v0 }
 0x3db   : > { %v15913_v4 = vpop.f32.mrb[174].mxu0 }
 0x3dc   : > { %v15983_v5 = vpop.f32.mrb[174].mxu1  ;;  %v15914_v6 = vadd.f32 %v15913_v4, %v15844_v3  ;;  %v15915_v7 = vpop.f32.mrb[175].mxu0 }
 0x3dd   : > { %v15985_v8 = vpop.f32.mrb[175].mxu1 }
 0x3de   : > { %v15984_v9 = vadd.f32 %v15983_v5, %v15914_v6 }
 0x3e3   : > { %v16053_v10 = vpop.f32.mrb[176].mxu0 }
 0x3e4   : > { %v16123_v11 = vpop.f32.mrb[176].mxu1  ;;  %v16054_v12 = vadd.f32 %v16053_v10, %v15984_v9  ;;  %v16055_v13 = vpop.f32.mrb[177].mxu0 }
 0x3e5   : > { %v16125_v14 = vpop.f32.mrb[177].mxu1 }
 0x3e6   : > { %v16124_v15 = vadd.f32 %v16123_v11, %v16054_v12 }
 0x3eb   : > { %v16193_v16 = vpop.f32.mrb[178].mxu0 }
 0x3ec   : > { %v16263_v17 = vpop.f32.mrb[178].mxu1  ;;  %v16194_v18 = vadd.f32 %v16193_v16, %v16124_v15  ;;  %v16195_v19 = vpop.f32.mrb[179].mxu0 }
 0x3ed   : > { %v16265_v20 = vpop.f32.mrb[179].mxu1 }
 0x3ee   : > { %v16264_v21 = vadd.f32 %v16263_v17, %v16194_v18 }
 0x3f3   : > { %v16333_v22 = vpop.f32.mrb[180].mxu0 }
 0x3f4   : > { %v16403_v23 = vpop.f32.mrb[180].mxu1  ;;  %v16334_v24 = vadd.f32 %v16333_v22, %v16264_v21  ;;  %v16335_v26 = vpop.f32.mrb[181].mxu0 }
 0x3f5   : > { %v16405_v27 = vpop.f32.mrb[181].mxu1 }
 0x3f6   : > { %v16404_v28 = vadd.f32 %v16403_v23, %v16334_v24 }
 0x3fb   : > { %v16473_v29 = vpop.f32.mrb[182].mxu0 }
 0x3fc   : > { %v16543_v30 = vpop.f32.mrb[182].mxu1  ;;  %v16474_v31 = vadd.f32 %v16473_v29, %v16404_v28  ;;  %v16475_v32 = vpop.f32.mrb[183].mxu0 }
 0x3fd   : > { %v16545_v33 = vpop.f32.mrb[183].mxu1 }
 0x3fe   : > { %v16544_v34 = vadd.f32 %v16543_v30, %v16474_v31 }
 0x403   : > { %v16613_v35 = vpop.f32.mrb[184].mxu0 }
 0x404   : > { %v16683_v36 = vpop.f32.mrb[184].mxu1  ;;  %v16614_v37 = vadd.f32 %v16613_v35, %v16544_v34  ;;  %v16615_v38 = vpop.f32.mrb[185].mxu0 }
 0x405   : > { %v16685_v39 = vpop.f32.mrb[185].mxu1 }
 0x406   : > { %v16684_v40 = vadd.f32 %v16683_v36, %v16614_v37 }
 0x40b   : > { %v16753_v41 = vpop.f32.mrb[186].mxu0 }
 0x40c   : > { %v16823_v42 = vpop.f32.mrb[186].mxu1  ;;  %v16754_v43 = vadd.f32 %v16753_v41, %v16684_v40  ;;  %v16755_v44 = vpop.f32.mrb[187].mxu0 }
 0x40d   : > { %v16825_v45 = vpop.f32.mrb[187].mxu1 }
 0x40e   : > { %v16824_v25 = vadd.f32 %v16823_v42, %v16754_v43 }
 0x413   : > { %v16893_v46 = vpop.f32.mrb[188].mxu0 }
 0x414   : > { %v16963_v47 = vpop.f32.mrb[188].mxu1  ;;  %v16894_v48 = vadd.f32 %v16893_v46, %v16824_v25  ;;  %v16895_v49 = vpop.f32.mrb[189].mxu0 }
 0x415   : > { %v16965_v50 = vpop.f32.mrb[189].mxu1 }
 0x416   : > { %v16964_v51 = vadd.f32 %v16963_v47, %v16894_v48 }
 0x41b   : > { %v17033_v52 = vpop.f32.mrb[190].mxu0 }
 0x41c   : > { %v17103_v53 = vpop.f32.mrb[190].mxu1  ;;  %v17034_v54 = vadd.f32 %v17033_v52, %v16964_v51  ;;  %v17035_v55 = vpop.f32.mrb[191].mxu0 }
 0x41d   : > { %v17105_v56 = vpop.f32.mrb[191].mxu1 }
 0x41e   : > { %v17104_v57 = vadd.f32 %v17103_v53, %v17034_v54 }
 0x423   : > { %v17173_v58 = vpop.f32.mrb[192].mxu0 }
 0x424   : > { %v17243_v59 = vpop.f32.mrb[192].mxu1  ;;  %v17174_v60 = vadd.f32 %v17173_v58, %v17104_v57  ;;  %v17175_v61 = vpop.f32.mrb[193].mxu0 }
 0x425   : > { %v17245_v62 = vpop.f32.mrb[193].mxu1 }
 0x426   : > { %v17244_v63 = vadd.f32 %v17243_v59, %v17174_v60 }
 0x42b   : > { %v17313_v0 = vpop.f32.mrb[194].mxu0 }
 0x42c   : > { %v17383_v1 = vpop.f32.mrb[194].mxu1  ;;  %v17314_v2 = vadd.f32 %v17313_v0, %v17244_v63  ;;  %v17315_v3 = vpop.f32.mrb[195].mxu0 }
 0x42d   : > { %v17385_v4 = vpop.f32.mrb[195].mxu1 }
 0x42e   : > { %v17384_v5 = vadd.f32 %v17383_v1, %v17314_v2 }
 0x433   : > { %v17453_v6 = vpop.f32.mrb[196].mxu0 }
 0x434   : > { %v17523_v7 = vpop.f32.mrb[196].mxu1  ;;  %v17454_v8 = vadd.f32 %v17453_v6, %v17384_v5  ;;  %v17455_v9 = vpop.f32.mrb[197].mxu0 }
 0x435   : > { %v17525_v10 = vpop.f32.mrb[197].mxu1 }
 0x436   : > { %v17524_v11 = vadd.f32 %v17523_v7, %v17454_v8 }
 0x43b   : > { %v17593_v12 = vpop.f32.mrb[198].mxu0 }
 0x43c   : > { %v17663_v13 = vpop.f32.mrb[198].mxu1  ;;  %v17594_v14 = vadd.f32 %v17593_v12, %v17524_v11  ;;  %v17595_v15 = vpop.f32.mrb[199].mxu0 }
 0x43d   : > { %v17665_v16 = vpop.f32.mrb[199].mxu1 }
 0x43e   : > { %v17664_v17 = vadd.f32 %v17663_v13, %v17594_v14 }
 0x443   : > { %v17733_v18 = vpop.f32.mrb[200].mxu0 }
 0x444   : > { %v17803_v19 = vpop.f32.mrb[200].mxu1  ;;  %v17734_v20 = vadd.f32 %v17733_v18, %v17664_v17  ;;  %v17735_v21 = vpop.f32.mrb[201].mxu0 }
 0x445   : > { %v17805_v22 = vpop.f32.mrb[201].mxu1 }
 0x446   : > { %v17804_v23 = vadd.f32 %v17803_v19, %v17734_v20  ;;  %v225_v19 = vld [vmem:[#allocation2] sm:$0x3] }
 0x44b   : > { %v17873_v24 = vpop.f32.mrb[202].mxu0 }
 0x44c   : > { %v17943_v26 = vpop.f32.mrb[202].mxu1  ;;  %v17874_v27 = vadd.f32 %v17873_v24, %v17804_v23  ;;  %v17875_v28 = vpop.f32.mrb[203].mxu0 }
 0x44d   : > { %v17945_v29 = vpop.f32.mrb[203].mxu1 }
 0x44e   : > { %v17944_v30 = vadd.f32 %v17943_v26, %v17874_v27 }
 0x453   : > { %v18013_v31 = vpop.f32.mrb[204].mxu0 }
 0x454   : > { %v18083_v32 = vpop.f32.mrb[204].mxu1  ;;  %v18014_v33 = vadd.f32 %v18013_v31, %v17944_v30  ;;  %v18015_v34 = vpop.f32.mrb[205].mxu0 }
 0x455   : > { %v18085_v35 = vpop.f32.mrb[205].mxu1 }
 0x456   : > { %v18084_v36 = vadd.f32 %v18083_v32, %v18014_v33 }
 0x45b   : > { %v18153_v37 = vpop.f32.mrb[206].mxu0 }
 0x45c   : > { %v18223_v38 = vpop.f32.mrb[206].mxu1  ;;  %v18154_v39 = vadd.f32 %v18153_v37, %v18084_v36  ;;  %v18155_v40 = vpop.f32.mrb[207].mxu0 }
 0x45d   : > { %v18225_v41 = vpop.f32.mrb[207].mxu1 }
 0x45e   : > { %v18224_v42 = vadd.f32 %v18223_v38, %v18154_v39 }
 0x463   : > { %v18293_v43 = vpop.f32.mrb[208].mxu0 }
 0x464   : > { %v18363_v44 = vpop.f32.mrb[208].mxu1  ;;  %v18294_v45 = vadd.f32 %v18293_v43, %v18224_v42  ;;  %v18295_v25 = vpop.f32.mrb[209].mxu0 }
 0x465   : > { %v18365_v46 = vpop.f32.mrb[209].mxu1 }
 0x466   : > { %v18364_v47 = vadd.f32 %v18363_v44, %v18294_v45 }
 0x46b   : > { %v18433_v48 = vpop.f32.mrb[210].mxu0 }
 0x46c   : > { %v18503_v49 = vpop.f32.mrb[210].mxu1  ;;  %v18434_v50 = vadd.f32 %v18433_v48, %v18364_v47  ;;  %v18435_v51 = vpop.f32.mrb[211].mxu0 }
 0x46d   : > { %v18505_v52 = vpop.f32.mrb[211].mxu1 }
 0x46e   : > { %v18504_v53 = vadd.f32 %v18503_v49, %v18434_v50 }
 0x473   : > { %v18573_v54 = vpop.f32.mrb[212].mxu0 }
 0x474   : > { %v18643_v55 = vpop.f32.mrb[212].mxu1  ;;  %v18574_v56 = vadd.f32 %v18573_v54, %v18504_v53  ;;  %v18575_v57 = vpop.f32.mrb[213].mxu0 }
 0x475   : > { %v18645_v58 = vpop.f32.mrb[213].mxu1 }
 0x476   : > { %v18644_v59 = vadd.f32 %v18643_v55, %v18574_v56 }
 0x47b   : > { %v18713_v60 = vpop.f32.mrb[214].mxu0 }
 0x47c   : > { %v18783_v61 = vpop.f32.mrb[214].mxu1  ;;  %v18714_v62 = vadd.f32 %v18713_v60, %v18644_v59  ;;  %v18715_v63 = vpop.f32.mrb[215].mxu0 }
 0x47d   : > { %v18785_v0 = vpop.f32.mrb[215].mxu1 }
 0x47e   : > { %v18784_v1 = vadd.f32 %v18783_v61, %v18714_v62 }
 0x483   : > { %v18853_v2 = vpop.f32.mrb[216].mxu0 }
 0x484   : > { %v18923_v3 = vpop.f32.mrb[216].mxu1  ;;  %v18854_v4 = vadd.f32 %v18853_v2, %v18784_v1  ;;  %v18855_v5 = vpop.f32.mrb[217].mxu0 }
 0x485   : > { %v18925_v6 = vpop.f32.mrb[217].mxu1 }
 0x486   : > { %v18924_v7 = vadd.f32 %v18923_v3, %v18854_v4 }
 0x48b   : > { %v18993_v8 = vpop.f32.mrb[218].mxu0 }
 0x48c   : > { %v19063_v9 = vpop.f32.mrb[218].mxu1  ;;  %v18994_v10 = vadd.f32 %v18993_v8, %v18924_v7  ;;  %v18995_v11 = vpop.f32.mrb[219].mxu0 }
 0x48d   : > { %v19065_v12 = vpop.f32.mrb[219].mxu1 }
 0x48e   : > { %v19064_v13 = vadd.f32 %v19063_v9, %v18994_v10 }
 0x493   : > { %v19133_v14 = vpop.f32.mrb[220].mxu0 }
 0x494   : > { %v19203_v15 = vpop.f32.mrb[220].mxu1  ;;  %v19134_v16 = vadd.f32 %v19133_v14, %v19064_v13  ;;  %v19135_v17 = vpop.f32.mrb[221].mxu0  ;;  %19213 = sbr.rel (%p19315_p6) target bundleno = 1187 (0x4a3), region = 40 }
 0x495   : > { %v19205_v18 = vpop.f32.mrb[221].mxu1 }
 0x496   : > { %v19204_v20 = vadd.f32 %v19203_v15, %v19134_v16 }
 0x498   : > { %v19207_v21 = vadd.f32 %v19204_v20, %v225_v19 }
 0x49a   : > { %19209 = vst.msk [vmem:[#allocation2] sm:$0x3] %vm19208_vm1, %v19207_v21 }
 0x4a1   : > { %v19214_v22 = vld [vmem:[#allocation2] sm:$0x3] }
 0x4a2   : > { %19215 = vst.msk [vmem:[%s20636_s25] sm:$0x3] %vm19208_vm1, %v19214_v22 }
 0x4a3 PF: > { %s15_s16 = sadd.s32 1, %s20492_s16   ;;  %s21899_s9 = smov %s20468_s10 }
 0x4a4   : > { %p12_p8 = scmp.ge.s32.totalorder %s15_s16, 16   ;;  %s21900_s10 = smov %s20472_s11 }
 0x4a5   : > { %s21901_s11 = smov %s20581_s3  ;;  %s21902_s12 = smov %s20484_s14 }
 0x4a6   : > { %s21903_s13 = smov %s20488_s15  ;;  %s21904_s14 = smov %s21907_s18 }
 0x4a7   : > { %s21905_s15 = smov %s21911_s19  ;;  %14 = sbr.rel (!%p12_p8) target bundleno = 5 (0x5), region = 79 }
 0x4ae   :  { %19235 = vsyncpa [#allocation4], 1 }
 0x4af   :  { %19237 = vsyncpa [#allocation4 + $0x1], 1 }

</bundles_post_ra>
